<compile_context>
chip_gen: v5e
topology: v5e:2x2
jax: 0.10.0
libtpu: 0.0.40
codegen_flags: <defaults>
</compile_context>

<pallas_src>
import numpy as np
import jax
import jax.numpy as jnp
from jax.experimental import pallas as pl
from jax.experimental.pallas import tpu as pltpu

_SELU_ALPHA = 1.6732632423543772
_SELU_SCALE = 1.0507009873554805
_LEAKY_SLOPE = 0.2


def _leaky_relu(x):
    return jnp.where(x >= 0.0, x, _LEAKY_SLOPE * x)


def _selu(x):
    # Clamp the exp argument so the unselected branch cannot overflow.
    return _SELU_SCALE * jnp.where(
        x > 0.0, x, _SELU_ALPHA * (jnp.exp(jnp.minimum(x, 0.0)) - 1.0))


def _d_stage2_kernel(x1_ref, w1_ref, w2_ref, w3_ref, w4_ref, w5_ref,
                     out_ref, feats_ref, x2_ref, x3_ref, x4_ref):
    bb = x1_ref.shape[0]

    # One-time (per core) zero init of the persistent scratches.  Only the
    # conv zero-padding border and the unused over-read column groups rely on
    # these zeros; the interiors are fully overwritten every grid step.  The
    # batch-block axis (axis 1) is sequential per core, so program_id(1) == 0
    # fires exactly once per core before any of that core's work.
    @pl.when(pl.program_id(1) == 0)
    def _init():
        x2_ref[...] = jnp.zeros_like(x2_ref)
        x3_ref[...] = jnp.zeros_like(x3_ref)
        x4_ref[...] = jnp.zeros_like(x4_ref)

    def conv(x_ref, w_ref, s_out, act):
        """Stride-2 4x4 pad-1 conv on a column-grouped input, + activation.

        x_ref : (B, s_out+1, 9, 2*g*Cin) bf16 with
                x_ref[b, i, u, (rh*g + w)*Cin + c] = x_pad[b, 2i+rh, g*u+w, c]
        w_ref : (2, 2, 2*g*Cin, o*Cout) bf16 tap matrices (o = g // 2).
        Returns f32 (B, s_out, 8, o*Cout).  Column groups 4..7 are garbage
        produced by the zero over-read padding and are discarded by callers.
        """
        k = w_ref.shape[2]
        n = w_ref.shape[3]
        m = bb * s_out * 8
        acc = jnp.zeros((m, n), jnp.float32)
        for ph in (0, 1):
            for q in (0, 1):
                slab = x_ref[:, ph:ph + s_out, q:q + 8, :]    # dense slice
                acc = acc + jnp.dot(slab.reshape(m, k), w_ref[ph, q],
                                    preferred_element_type=jnp.float32)
        return act(acc).reshape(bb, s_out, 8, n)

    def repack(y, dst_ref, cout):
        """Store activation y as the next layer's column-grouped input.

        y       : (B, S, 8, g'*cout) f32 from `conv` (groups 0..3 valid,
                  covering all S = 4*g' output columns).
        dst_ref : (B, S//2+1, 9, 2*g'*cout) bf16 scratch with
                  dst[b,i,u,(rh*g'+w)*cout+c] = y_pad[b, 2i+rh, g'*u+w, c].
        Four bulk stores; the zero border/padding was written once at init.
        """
        s = y.shape[1]
        ncol = y.shape[3]
        gp = ncol // cout                               # g' of next layer
        h = s // 2
        lo = (gp - 1) * cout
        yv = y[:, :, 0:4, :].astype(dst_ref.dtype)      # (B, S, 4, gp*cout)
        yv = yv.reshape(bb * h, 2, 4, ncol)             # rows -> (pair, parity)
        for parity, rows in ((0, slice(0, h)), (1, slice(1, h + 1))):
            # parity 0 = even y rows -> rh'=1 channel blocks, dest rows 0..h-1
            # parity 1 = odd  y rows -> rh'=0 channel blocks, dest rows 1..h
            part = yv[:, parity]                        # (B*h, 4, gp*cout)
            main = part[:, :, 0:lo].reshape(bb, h, 4, lo)
            last = part[:, :, lo:ncol].reshape(bb, h, 4, cout)
            if parity == 0:
                dst_ref[:, rows, 0:4, (gp + 1) * cout:2 * gp * cout] = main
                dst_ref[:, rows, 1:5, gp * cout:(gp + 1) * cout] = last
            else:
                dst_ref[:, rows, 0:4, cout:gp * cout] = main
                dst_ref[:, rows, 1:5, 0:cout] = last

    c1 = w1_ref.shape[3] // 8                           # ndf

    # layer 1: Conv(nc -> ndf, 4, 2, 1) + LeakyReLU(0.2)          64 -> 32
    y1 = conv(x1_ref, w1_ref, 32, _leaky_relu)
    repack(y1, x2_ref, c1)
    # layer 2: Conv(ndf -> 2*ndf, 4, 2, 1) + SELU                  32 -> 16
    y2 = conv(x2_ref, w2_ref, 16, _selu)
    repack(y2, x3_ref, 2 * c1)
    # layer 3: Conv(2*ndf -> 4*ndf, 4, 2, 1) + SELU                16 -> 8
    y3 = conv(x3_ref, w3_ref, 8, _selu)
    repack(y3, x4_ref, 4 * c1)
    # layer 4: Conv(4*ndf -> 8*ndf, 4, 2, 1) + SELU -> feats        8 -> 4
    y4 = conv(x4_ref, w4_ref, 4, _selu)                 # (B, 4, 8, 8*ndf)
    feats_ref[...] = y4                                 # one dense store

    # layer 5: Conv(8*ndf -> 1, 4, 1, 0) folded in as multiply-reduce.
    # w5 is zero on the padded columns 4..7, so garbage columns contribute 0.
    prod = y4 * w5_ref[...]
    for b in range(bb):
        out_ref[b] = jnp.full((1, 128), jnp.sum(prod[b]), jnp.float32)


def _fused_forward_call(n_total, bb, nc, ndf):
    c4 = 8 * ndf
    blocks = n_total // bb
    if blocks % 2 == 0:
        grid = (2, blocks // 2)      # 2-way core-parallel, even split on v7x
    else:
        grid = (1, blocks)
    gh = grid[1]

    return pl.pallas_call(
        _d_stage2_kernel,
        grid=grid,
        in_specs=[
            pl.BlockSpec((bb, 33, 9, 32 * nc),
                         lambda c, j: (c * gh + j, 0, 0, 0)),
            pl.BlockSpec((2, 2, 32 * nc, c4), lambda c, j: (0, 0, 0, 0)),
            pl.BlockSpec((2, 2, 16 * ndf, c4), lambda c, j: (0, 0, 0, 0)),
            pl.BlockSpec((2, 2, 16 * ndf, c4), lambda c, j: (0, 0, 0, 0)),
            pl.BlockSpec((2, 2, 16 * ndf, c4), lambda c, j: (0, 0, 0, 0)),
            pl.BlockSpec((4, 8, c4), lambda c, j: (0, 0, 0)),
        ],
        out_specs=(
            pl.BlockSpec((bb, 1, 128), lambda c, j: (c * gh + j, 0, 0)),
            pl.BlockSpec((bb, 4, 8, c4), lambda c, j: (c * gh + j, 0, 0, 0)),
        ),
        out_shape=(
            jax.ShapeDtypeStruct((n_total, 1, 128), jnp.float32),
            jax.ShapeDtypeStruct((n_total, 4, 8, c4), jnp.float32),
        ),
        scratch_shapes=[
            pltpu.VMEM((bb, 17, 9, 16 * ndf), jnp.bfloat16),   # layer-2 input
            pltpu.VMEM((bb, 9, 9, 16 * ndf), jnp.bfloat16),    # layer-3 input
            pltpu.VMEM((bb, 5, 9, 16 * ndf), jnp.bfloat16),    # layer-4 input
        ],
        compiler_params=pltpu.CompilerParams(
            dimension_semantics=("parallel", "arbitrary"),
            vmem_limit_bytes=32 * 1024 * 1024,
        ),
    )


# ----------------------------- host-side packing -----------------------------
def _pack_conv_weight(w_oihw, g):
    """torch OIHW (Cout, Cin, 4, 4) -> (2, 2, 2*g*Cin, (g//2)*Cout) bf16.

    wp[ph, q, (rh*g + w)*Cin + c, v*Cout + co] = w[co, c, 2*ph + rh, kw]
    with kw = w + g*q - 2*v (zero where kw is outside 0..3).
    """
    w = np.asarray(w_oihw, dtype=np.float32)
    cout, cin = w.shape[0], w.shape[1]
    o = g // 2
    wp = np.zeros((2, 2, 2 * g * cin, o * cout), np.float32)
    for ph in range(2):
        for q in range(2):
            for rh in range(2):
                for wi in range(g):
                    kblk = (rh * g + wi) * cin
                    for v in range(o):
                        kw = wi + g * q - 2 * v
                        if 0 <= kw < 4:
                            wp[ph, q, kblk:kblk + cin,
                               v * cout:(v + 1) * cout] = \
                                w[:, :, 2 * ph + rh, kw].T
    return jnp.asarray(wp, dtype=jnp.bfloat16)


def _pack_final_weight(w5_oihw):
    """(1, 8*ndf, 4, 4) -> (4, 8, 8*ndf) f32, zero-padded on columns 4..7."""
    w = np.asarray(w5_oihw, dtype=np.float32)[0]       # (8*ndf, 4, 4)
    c4 = w.shape[0]
    wp = np.zeros((4, 8, c4), np.float32)
    wp[:, 0:4, :] = np.transpose(w, (1, 2, 0))         # [kh, kw, ci]
    return jnp.asarray(wp)


def pack_d_stage2_params(params):
    """Pack PyTorch-layout params (host numpy, call once outside jit)."""
    w1, w2, w3, w4, w5 = params
    return (_pack_conv_weight(w1, 16), _pack_conv_weight(w2, 8),
            _pack_conv_weight(w3, 4), _pack_conv_weight(w4, 2),
            _pack_final_weight(w5))


def init_d_stage2_params(key, nc=3, ndf=8):
    """Deterministic DCGAN-style init (normal * 0.02), PyTorch OIHW layout."""
    shapes = [
        (ndf, nc, 4, 4),
        (2 * ndf, ndf, 4, 4),
        (4 * ndf, 2 * ndf, 4, 4),
        (8 * ndf, 4 * ndf, 4, 4),
        (1, 8 * ndf, 4, 4),
    ]
    keys = jax.random.split(key, len(shapes))
    return [0.02 * jax.random.normal(k, s, dtype=jnp.float32)
            for k, s in zip(keys, shapes)]


# ------------------------------- forward wrapper ------------------------------
def _build_grouped_input(x_nchw, g=16):
    """NCHW -> column-grouped bf16 input X1[b,i,u,(rh*g+w)*nc+c]."""
    n, nc, h, w = x_nchw.shape
    x = jnp.transpose(x_nchw, (0, 2, 3, 1))                  # NHWC
    xp = jnp.pad(x, ((0, 0), (1, 1), (1, 1), (0, 0)))        # (n, h+2, w+2, nc)
    xp = jnp.pad(xp, ((0, 0), (0, 0), (0, 9 * g - (w + 2)), (0, 0)))
    xp = xp.reshape(n, (h + 2) // 2, 2, 9, g, nc)
    xp = jnp.transpose(xp, (0, 1, 3, 2, 4, 5))               # (n,33,9,2,g,nc)
    return xp.reshape(n, (h + 2) // 2, 9, 2 * g * nc).astype(jnp.bfloat16)


def _pick_batch_block(n):
    # Largest block whose count is even (keeps both v7x TCs busy).
    for bb in (8, 4, 2):
        if n % bb == 0 and (n // bb) % 2 == 0:
            return bb
    return 1


def d_stage2_forward(x_nchw, packed_params):
    """Matches D_Stage2.forward: returns (output.squeeze(), feats.squeeze())."""
    w1p, w2p, w3p, w4p, w5p = packed_params
    n, nc, h, w = x_nchw.shape
    c4 = w5p.shape[-1]
    ndf = c4 // 8
    assert h == 64 and w == 64, "D_Stage2 expects 64x64 inputs"
    assert w1p.shape == (2, 2, 32 * nc, c4)

    bb = _pick_batch_block(n)
    x1 = _build_grouped_input(x_nchw)

    out_raw, feats_raw = _fused_forward_call(n, bb, nc, ndf)(
        x1, w1p, w2p, w3p, w4p, w5p)

    feats = jnp.transpose(feats_raw[:, :, 0:4, :], (0, 3, 1, 2))  # NCHW
    output = out_raw[:, 0, 0]                                     # (N,)
    return jnp.squeeze(output), jnp.squeeze(feats)


if __name__ == "__main__":
    # Spatial 64 -> 32 -> 16 -> 8 -> 4 -> 1 (required by the final 4x4 conv).
    N, NC, H, W = 4, 3, 64, 64
    NDF = 8

    key = jax.random.PRNGKey(0)
    kx, kp = jax.random.split(key)
    x = jax.random.normal(kx, (N, NC, H, W), dtype=jnp.float32)
    params = init_d_stage2_params(kp, nc=NC, ndf=NDF)
    packed = pack_d_stage2_params(params)

    output, feats = jax.jit(d_stage2_forward)(x, packed)
    jax.block_until_ready((output, feats))

    assert output.shape == (N,), output.shape
    assert feats.shape == (N, 8 * NDF, 4, 4), feats.shape
    print("KERNEL_OK")
</pallas_src>

<mosaic_0001>
module attributes {stable_mosaic.version = 11 : i64} {
  func.func @_d_stage2_kernel(%arg0: i32, %arg1: i32, %arg2: memref<2x33x9x96xbf16, #tpu.memory_space<vmem>>, %arg3: memref<2x2x96x64xbf16, #tpu.memory_space<vmem>>, %arg4: memref<2x2x128x64xbf16, #tpu.memory_space<vmem>>, %arg5: memref<2x2x128x64xbf16, #tpu.memory_space<vmem>>, %arg6: memref<2x2x128x64xbf16, #tpu.memory_space<vmem>>, %arg7: memref<4x8x64xf32, #tpu.memory_space<vmem>>, %arg8: memref<2x1x128xf32, #tpu.memory_space<vmem>>, %arg9: memref<2x4x8x64xf32, #tpu.memory_space<vmem>>, %arg10: memref<2x17x9x128xbf16, #tpu.memory_space<vmem>>, %arg11: memref<2x9x9x128xbf16, #tpu.memory_space<vmem>>, %arg12: memref<2x5x9x128xbf16, #tpu.memory_space<vmem>>) attributes {dimension_semantics = [#tpu.dimension_semantics<parallel>, #tpu.dimension_semantics<arbitrary>], iteration_bounds = array<i64: 2, 1>, scalar_prefetch = 0 : i64, scratch_operands = 3 : i64, tpu.core_type = #tpu.core_type<tc>, window_params = [{transform_indices = @transform_0, window_bounds = array<i64: 2, 33, 9, 96>}, {pipeline_mode = #tpu.pipeline_mode<synchronous>, transform_indices = @transform_1, window_bounds = array<i64: 2, 2, 96, 64>}, {pipeline_mode = #tpu.pipeline_mode<synchronous>, transform_indices = @transform_2, window_bounds = array<i64: 2, 2, 128, 64>}, {pipeline_mode = #tpu.pipeline_mode<synchronous>, transform_indices = @transform_3, window_bounds = array<i64: 2, 2, 128, 64>}, {pipeline_mode = #tpu.pipeline_mode<synchronous>, transform_indices = @transform_4, window_bounds = array<i64: 2, 2, 128, 64>}, {pipeline_mode = #tpu.pipeline_mode<synchronous>, transform_indices = @transform_5, window_bounds = array<i64: 4, 8, 64>}, {transform_indices = @transform_6, window_bounds = array<i64: 2, 1, 128>}, {transform_indices = @transform_7, window_bounds = array<i64: 2, 4, 8, 64>}]} {
    %c0_i32 = arith.constant 0 : i32
    %0 = arith.cmpi eq, %arg1, %c0_i32 : i32
    %1 = arith.extui %0 : i1 to i32
    %c0_i32_0 = arith.constant 0 : i32
    %2 = arith.cmpi ne, %1, %c0_i32_0 : i32
    scf.if %2 {
      %cst_219 = arith.constant 0.000000e+00 : bf16
      %230 = vector.broadcast %cst_219 : bf16 to vector<2x17x9x128xbf16>
      %c0_220 = arith.constant 0 : index
      %c0_221 = arith.constant 0 : index
      %c0_222 = arith.constant 0 : index
      %c0_223 = arith.constant 0 : index
      %231 = vector.load %arg10[%c0_220, %c0_221, %c0_222, %c0_223] : memref<2x17x9x128xbf16, #tpu.memory_space<vmem>>, vector<2x17x9x128xbf16>
      tpu.vector_store %arg10[%c0_220, %c0_221, %c0_222, %c0_223], %230 {strides = array<i32>} : memref<2x17x9x128xbf16, #tpu.memory_space<vmem>>, vector<2x17x9x128xbf16>,
      %cst_224 = arith.constant 0.000000e+00 : bf16
      %232 = vector.broadcast %cst_224 : bf16 to vector<2x9x9x128xbf16>
      %c0_225 = arith.constant 0 : index
      %c0_226 = arith.constant 0 : index
      %c0_227 = arith.constant 0 : index
      %c0_228 = arith.constant 0 : index
      %233 = vector.load %arg11[%c0_225, %c0_226, %c0_227, %c0_228] : memref<2x9x9x128xbf16, #tpu.memory_space<vmem>>, vector<2x9x9x128xbf16>
      tpu.vector_store %arg11[%c0_225, %c0_226, %c0_227, %c0_228], %232 {strides = array<i32>} : memref<2x9x9x128xbf16, #tpu.memory_space<vmem>>, vector<2x9x9x128xbf16>,
      %cst_229 = arith.constant 0.000000e+00 : bf16
      %234 = vector.broadcast %cst_229 : bf16 to vector<2x5x9x128xbf16>
      %c0_230 = arith.constant 0 : index
      %c0_231 = arith.constant 0 : index
      %c0_232 = arith.constant 0 : index
      %c0_233 = arith.constant 0 : index
      %235 = vector.load %arg12[%c0_230, %c0_231, %c0_232, %c0_233] : memref<2x5x9x128xbf16, #tpu.memory_space<vmem>>, vector<2x5x9x128xbf16>
      tpu.vector_store %arg12[%c0_230, %c0_231, %c0_232, %c0_233], %234 {strides = array<i32>} : memref<2x5x9x128xbf16, #tpu.memory_space<vmem>>, vector<2x5x9x128xbf16>,
    } else {
    }
    %cst = arith.constant 0.000000e+00 : f32
    %3 = vector.broadcast %cst : f32 to vector<512x64xf32>
    %c0 = arith.constant 0 : index
    %c0_1 = arith.constant 0 : index
    %c0_2 = arith.constant 0 : index
    %c0_3 = arith.constant 0 : index
    %4 = vector.load %arg2[%c0, %c0_1, %c0_2, %c0_3] : memref<2x33x9x96xbf16, #tpu.memory_space<vmem>>, vector<2x32x8x96xbf16>
    %5 = vector.shape_cast %4 : vector<2x32x8x96xbf16> to vector<512x96xbf16>
    %c0_4 = arith.constant 0 : index
    %c0_5 = arith.constant 0 : index
    %c0_6 = arith.constant 0 : index
    %c0_7 = arith.constant 0 : index
    %6 = vector.load %arg3[%c0_4, %c0_5, %c0_6, %c0_7] : memref<2x2x96x64xbf16, #tpu.memory_space<vmem>>, vector<1x1x96x64xbf16>
    %7 = vector.shape_cast %6 : vector<1x1x96x64xbf16> to vector<96x64xbf16>
    %cst_8 = arith.constant dense<0.000000e+00> : vector<512x64xf32>
    %8 = tpu.matmul %5, %7, %cst_8 {dimension_numbers = #tpu.dot_dimension_numbers<[1], [0], [0], [1], [0, 0, 1, 1], [], []>} : vector<512x96xbf16>, vector<96x64xbf16>, vector<512x64xf32> -> vector<512x64xf32>
    %9 = arith.addf %3, %8 : vector<512x64xf32>
    %c0_9 = arith.constant 0 : index
    %c0_10 = arith.constant 0 : index
    %c1 = arith.constant 1 : index
    %c0_11 = arith.constant 0 : index
    %10 = vector.load %arg2[%c0_9, %c0_10, %c1, %c0_11] : memref<2x33x9x96xbf16, #tpu.memory_space<vmem>>, vector<2x32x8x96xbf16>
    %11 = vector.shape_cast %10 : vector<2x32x8x96xbf16> to vector<512x96xbf16>
    %c0_12 = arith.constant 0 : index
    %c1_13 = arith.constant 1 : index
    %c0_14 = arith.constant 0 : index
    %c0_15 = arith.constant 0 : index
    %12 = vector.load %arg3[%c0_12, %c1_13, %c0_14, %c0_15] : memref<2x2x96x64xbf16, #tpu.memory_space<vmem>>, vector<1x1x96x64xbf16>
    %13 = vector.shape_cast %12 : vector<1x1x96x64xbf16> to vector<96x64xbf16>
    %cst_16 = arith.constant dense<0.000000e+00> : vector<512x64xf32>
    %14 = tpu.matmul %11, %13, %cst_16 {dimension_numbers = #tpu.dot_dimension_numbers<[1], [0], [0], [1], [0, 0, 1, 1], [], []>} : vector<512x96xbf16>, vector<96x64xbf16>, vector<512x64xf32> -> vector<512x64xf32>
    %15 = arith.addf %9, %14 : vector<512x64xf32>
    %c0_17 = arith.constant 0 : index
    %c1_18 = arith.constant 1 : index
    %c0_19 = arith.constant 0 : index
    %c0_20 = arith.constant 0 : index
    %16 = vector.load %arg2[%c0_17, %c1_18, %c0_19, %c0_20] : memref<2x33x9x96xbf16, #tpu.memory_space<vmem>>, vector<2x32x8x96xbf16>
    %17 = vector.shape_cast %16 : vector<2x32x8x96xbf16> to vector<512x96xbf16>
    %c1_21 = arith.constant 1 : index
    %c0_22 = arith.constant 0 : index
    %c0_23 = arith.constant 0 : index
    %c0_24 = arith.constant 0 : index
    %18 = vector.load %arg3[%c1_21, %c0_22, %c0_23, %c0_24] : memref<2x2x96x64xbf16, #tpu.memory_space<vmem>>, vector<1x1x96x64xbf16>
    %19 = vector.shape_cast %18 : vector<1x1x96x64xbf16> to vector<96x64xbf16>
    %cst_25 = arith.constant dense<0.000000e+00> : vector<512x64xf32>
    %20 = tpu.matmul %17, %19, %cst_25 {dimension_numbers = #tpu.dot_dimension_numbers<[1], [0], [0], [1], [0, 0, 1, 1], [], []>} : vector<512x96xbf16>, vector<96x64xbf16>, vector<512x64xf32> -> vector<512x64xf32>
    %21 = arith.addf %15, %20 : vector<512x64xf32>
    %c0_26 = arith.constant 0 : index
    %c1_27 = arith.constant 1 : index
    %c1_28 = arith.constant 1 : index
    %c0_29 = arith.constant 0 : index
    %22 = vector.load %arg2[%c0_26, %c1_27, %c1_28, %c0_29] : memref<2x33x9x96xbf16, #tpu.memory_space<vmem>>, vector<2x32x8x96xbf16>
    %23 = vector.shape_cast %22 : vector<2x32x8x96xbf16> to vector<512x96xbf16>
    %c1_30 = arith.constant 1 : index
    %c1_31 = arith.constant 1 : index
    %c0_32 = arith.constant 0 : index
    %c0_33 = arith.constant 0 : index
    %24 = vector.load %arg3[%c1_30, %c1_31, %c0_32, %c0_33] : memref<2x2x96x64xbf16, #tpu.memory_space<vmem>>, vector<1x1x96x64xbf16>
    %25 = vector.shape_cast %24 : vector<1x1x96x64xbf16> to vector<96x64xbf16>
    %cst_34 = arith.constant dense<0.000000e+00> : vector<512x64xf32>
    %26 = tpu.matmul %23, %25, %cst_34 {dimension_numbers = #tpu.dot_dimension_numbers<[1], [0], [0], [1], [0, 0, 1, 1], [], []>} : vector<512x96xbf16>, vector<96x64xbf16>, vector<512x64xf32> -> vector<512x64xf32>
    %27 = arith.addf %21, %26 : vector<512x64xf32>
    %cst_35 = arith.constant 0.000000e+00 : f32
    %28 = vector.broadcast %cst_35 : f32 to vector<512x64xf32>
    %29 = arith.cmpf oge, %27, %28 : vector<512x64xf32>
    %cst_36 = arith.constant 2.000000e-01 : f32
    %30 = vector.broadcast %cst_36 : f32 to vector<512x64xf32>
    %31 = arith.mulf %30, %27 : vector<512x64xf32>
    %32 = arith.select %29, %27, %31 : vector<512x64xi1>, vector<512x64xf32>
    %33 = vector.shape_cast %32 : vector<512x64xf32> to vector<2x32x8x64xf32>
    %34 = vector.extract_strided_slice %33 {offsets = [0, 0, 0, 0], sizes = [2, 32, 4, 64], strides = [1, 1, 1, 1]} : vector<2x32x8x64xf32> to vector<2x32x4x64xf32>
    %35 = arith.truncf %34 : vector<2x32x4x64xf32> to vector<2x32x4x64xbf16>
    %36 = vector.shape_cast %35 : vector<2x32x4x64xbf16> to vector<32x2x4x64xbf16>
    %37 = vector.extract_strided_slice %36 {offsets = [0, 0, 0, 0], sizes = [32, 1, 4, 64], strides = [1, 1, 1, 1]} : vector<32x2x4x64xbf16> to vector<32x1x4x64xbf16>
    %38 = vector.shape_cast %37 : vector<32x1x4x64xbf16> to vector<32x4x64xbf16>
    %39 = vector.extract_strided_slice %38 {offsets = [0, 0, 0], sizes = [32, 4, 56], strides = [1, 1, 1]} : vector<32x4x64xbf16> to vector<32x4x56xbf16>
    %40 = vector.shape_cast %39 : vector<32x4x56xbf16> to vector<2x16x4x56xbf16>
    %41 = vector.extract_strided_slice %38 {offsets = [0, 0, 56], sizes = [32, 4, 8], strides = [1, 1, 1]} : vector<32x4x64xbf16> to vector<32x4x8xbf16>
    %42 = vector.shape_cast %41 : vector<32x4x8xbf16> to vector<2x16x4x8xbf16>
    %c0_37 = arith.constant 0 : index
    %c0_38 = arith.constant 0 : index
    %c0_39 = arith.constant 0 : index
    %c72 = arith.constant 72 : index
    %43 = vector.load %arg10[%c0_37, %c0_38, %c0_39, %c72] : memref<2x17x9x128xbf16, #tpu.memory_space<vmem>>, vector<2x16x4x56xbf16>
    tpu.vector_store %arg10[%c0_37, %c0_38, %c0_39, %c72], %40 {strides = array<i32>} : memref<2x17x9x128xbf16, #tpu.memory_space<vmem>>, vector<2x16x4x56xbf16>,
    %c0_40 = arith.constant 0 : index
    %c0_41 = arith.constant 0 : index
    %c1_42 = arith.constant 1 : index
    %c64 = arith.constant 64 : index
    %44 = vector.load %arg10[%c0_40, %c0_41, %c1_42, %c64] : memref<2x17x9x128xbf16, #tpu.memory_space<vmem>>, vector<2x16x4x8xbf16>
    tpu.vector_store %arg10[%c0_40, %c0_41, %c1_42, %c64], %42 {strides = array<i32>} : memref<2x17x9x128xbf16, #tpu.memory_space<vmem>>, vector<2x16x4x8xbf16>,
    %45 = vector.extract_strided_slice %36 {offsets = [0, 1, 0, 0], sizes = [32, 1, 4, 64], strides = [1, 1, 1, 1]} : vector<32x2x4x64xbf16> to vector<32x1x4x64xbf16>
    %46 = vector.shape_cast %45 : vector<32x1x4x64xbf16> to vector<32x4x64xbf16>
    %47 = vector.extract_strided_slice %46 {offsets = [0, 0, 0], sizes = [32, 4, 56], strides = [1, 1, 1]} : vector<32x4x64xbf16> to vector<32x4x56xbf16>
    %48 = vector.shape_cast %47 : vector<32x4x56xbf16> to vector<2x16x4x56xbf16>
    %49 = vector.extract_strided_slice %46 {offsets = [0, 0, 56], sizes = [32, 4, 8], strides = [1, 1, 1]} : vector<32x4x64xbf16> to vector<32x4x8xbf16>
    %50 = vector.shape_cast %49 : vector<32x4x8xbf16> to vector<2x16x4x8xbf16>
    %c0_43 = arith.constant 0 : index
    %c1_44 = arith.constant 1 : index
    %c0_45 = arith.constant 0 : index
    %c8 = arith.constant 8 : index
    %51 = vector.load %arg10[%c0_43, %c1_44, %c0_45, %c8] : memref<2x17x9x128xbf16, #tpu.memory_space<vmem>>, vector<2x16x4x56xbf16>
    tpu.vector_store %arg10[%c0_43, %c1_44, %c0_45, %c8], %48 {strides = array<i32>} : memref<2x17x9x128xbf16, #tpu.memory_space<vmem>>, vector<2x16x4x56xbf16>,
    %c0_46 = arith.constant 0 : index
    %c1_47 = arith.constant 1 : index
    %c1_48 = arith.constant 1 : index
    %c0_49 = arith.constant 0 : index
    %52 = vector.load %arg10[%c0_46, %c1_47, %c1_48, %c0_49] : memref<2x17x9x128xbf16, #tpu.memory_space<vmem>>, vector<2x16x4x8xbf16>
    tpu.vector_store %arg10[%c0_46, %c1_47, %c1_48, %c0_49], %50 {strides = array<i32>} : memref<2x17x9x128xbf16, #tpu.memory_space<vmem>>, vector<2x16x4x8xbf16>,
    %cst_50 = arith.constant 0.000000e+00 : f32
    %53 = vector.broadcast %cst_50 : f32 to vector<256x64xf32>
    %c0_51 = arith.constant 0 : index
    %c0_52 = arith.constant 0 : index
    %c0_53 = arith.constant 0 : index
    %c0_54 = arith.constant 0 : index
    %54 = vector.load %arg10[%c0_51, %c0_52, %c0_53, %c0_54] : memref<2x17x9x128xbf16, #tpu.memory_space<vmem>>, vector<2x16x8x128xbf16>
    %55 = vector.shape_cast %54 : vector<2x16x8x128xbf16> to vector<256x128xbf16>
    %c0_55 = arith.constant 0 : index
    %c0_56 = arith.constant 0 : index
    %c0_57 = arith.constant 0 : index
    %c0_58 = arith.constant 0 : index
    %56 = vector.load %arg4[%c0_55, %c0_56, %c0_57, %c0_58] : memref<2x2x128x64xbf16, #tpu.memory_space<vmem>>, vector<1x1x128x64xbf16>
    %57 = vector.shape_cast %56 : vector<1x1x128x64xbf16> to vector<128x64xbf16>
    %cst_59 = arith.constant dense<0.000000e+00> : vector<256x64xf32>
    %58 = tpu.matmul %55, %57, %cst_59 {dimension_numbers = #tpu.dot_dimension_numbers<[1], [0], [0], [1], [0, 0, 1, 1], [], []>} : vector<256x128xbf16>, vector<128x64xbf16>, vector<256x64xf32> -> vector<256x64xf32>
    %59 = arith.addf %53, %58 : vector<256x64xf32>
    %c0_60 = arith.constant 0 : index
    %c0_61 = arith.constant 0 : index
    %c1_62 = arith.constant 1 : index
    %c0_63 = arith.constant 0 : index
    %60 = vector.load %arg10[%c0_60, %c0_61, %c1_62, %c0_63] : memref<2x17x9x128xbf16, #tpu.memory_space<vmem>>, vector<2x16x8x128xbf16>
    %61 = vector.shape_cast %60 : vector<2x16x8x128xbf16> to vector<256x128xbf16>
    %c0_64 = arith.constant 0 : index
    %c1_65 = arith.constant 1 : index
    %c0_66 = arith.constant 0 : index
    %c0_67 = arith.constant 0 : index
    %62 = vector.load %arg4[%c0_64, %c1_65, %c0_66, %c0_67] : memref<2x2x128x64xbf16, #tpu.memory_space<vmem>>, vector<1x1x128x64xbf16>
    %63 = vector.shape_cast %62 : vector<1x1x128x64xbf16> to vector<128x64xbf16>
    %cst_68 = arith.constant dense<0.000000e+00> : vector<256x64xf32>
    %64 = tpu.matmul %61, %63, %cst_68 {dimension_numbers = #tpu.dot_dimension_numbers<[1], [0], [0], [1], [0, 0, 1, 1], [], []>} : vector<256x128xbf16>, vector<128x64xbf16>, vector<256x64xf32> -> vector<256x64xf32>
    %65 = arith.addf %59, %64 : vector<256x64xf32>
    %c0_69 = arith.constant 0 : index
    %c1_70 = arith.constant 1 : index
    %c0_71 = arith.constant 0 : index
    %c0_72 = arith.constant 0 : index
    %66 = vector.load %arg10[%c0_69, %c1_70, %c0_71, %c0_72] : memref<2x17x9x128xbf16, #tpu.memory_space<vmem>>, vector<2x16x8x128xbf16>
    %67 = vector.shape_cast %66 : vector<2x16x8x128xbf16> to vector<256x128xbf16>
    %c1_73 = arith.constant 1 : index
    %c0_74 = arith.constant 0 : index
    %c0_75 = arith.constant 0 : index
    %c0_76 = arith.constant 0 : index
    %68 = vector.load %arg4[%c1_73, %c0_74, %c0_75, %c0_76] : memref<2x2x128x64xbf16, #tpu.memory_space<vmem>>, vector<1x1x128x64xbf16>
    %69 = vector.shape_cast %68 : vector<1x1x128x64xbf16> to vector<128x64xbf16>
    %cst_77 = arith.constant dense<0.000000e+00> : vector<256x64xf32>
    %70 = tpu.matmul %67, %69, %cst_77 {dimension_numbers = #tpu.dot_dimension_numbers<[1], [0], [0], [1], [0, 0, 1, 1], [], []>} : vector<256x128xbf16>, vector<128x64xbf16>, vector<256x64xf32> -> vector<256x64xf32>
    %71 = arith.addf %65, %70 : vector<256x64xf32>
    %c0_78 = arith.constant 0 : index
    %c1_79 = arith.constant 1 : index
    %c1_80 = arith.constant 1 : index
    %c0_81 = arith.constant 0 : index
    %72 = vector.load %arg10[%c0_78, %c1_79, %c1_80, %c0_81] : memref<2x17x9x128xbf16, #tpu.memory_space<vmem>>, vector<2x16x8x128xbf16>
    %73 = vector.shape_cast %72 : vector<2x16x8x128xbf16> to vector<256x128xbf16>
    %c1_82 = arith.constant 1 : index
    %c1_83 = arith.constant 1 : index
    %c0_84 = arith.constant 0 : index
    %c0_85 = arith.constant 0 : index
    %74 = vector.load %arg4[%c1_82, %c1_83, %c0_84, %c0_85] : memref<2x2x128x64xbf16, #tpu.memory_space<vmem>>, vector<1x1x128x64xbf16>
    %75 = vector.shape_cast %74 : vector<1x1x128x64xbf16> to vector<128x64xbf16>
    %cst_86 = arith.constant dense<0.000000e+00> : vector<256x64xf32>
    %76 = tpu.matmul %73, %75, %cst_86 {dimension_numbers = #tpu.dot_dimension_numbers<[1], [0], [0], [1], [0, 0, 1, 1], [], []>} : vector<256x128xbf16>, vector<128x64xbf16>, vector<256x64xf32> -> vector<256x64xf32>
    %77 = arith.addf %71, %76 : vector<256x64xf32>
    %cst_87 = arith.constant 0.000000e+00 : f32
    %78 = vector.broadcast %cst_87 : f32 to vector<256x64xf32>
    %79 = arith.cmpf ogt, %77, %78 : vector<256x64xf32>
    %cst_88 = arith.constant 0.000000e+00 : f32
    %80 = vector.broadcast %cst_88 : f32 to vector<256x64xf32>
    %81 = arith.minimumf %77, %80 : vector<256x64xf32>
    %82 = math.exp %81 : vector<256x64xf32>
    %cst_89 = arith.constant 1.000000e+00 : f32
    %83 = vector.broadcast %cst_89 : f32 to vector<256x64xf32>
    %84 = arith.subf %82, %83 : vector<256x64xf32>
    %cst_90 = arith.constant 1.67326319 : f32
    %85 = vector.broadcast %cst_90 : f32 to vector<256x64xf32>
    %86 = arith.mulf %85, %84 : vector<256x64xf32>
    %87 = arith.select %79, %77, %86 : vector<256x64xi1>, vector<256x64xf32>
    %cst_91 = arith.constant 1.05070102 : f32
    %88 = vector.broadcast %cst_91 : f32 to vector<256x64xf32>
    %89 = arith.mulf %88, %87 : vector<256x64xf32>
    %90 = vector.shape_cast %89 : vector<256x64xf32> to vector<2x16x8x64xf32>
    %91 = vector.extract_strided_slice %90 {offsets = [0, 0, 0, 0], sizes = [2, 16, 4, 64], strides = [1, 1, 1, 1]} : vector<2x16x8x64xf32> to vector<2x16x4x64xf32>
    %92 = arith.truncf %91 : vector<2x16x4x64xf32> to vector<2x16x4x64xbf16>
    %93 = vector.shape_cast %92 : vector<2x16x4x64xbf16> to vector<16x2x4x64xbf16>
    %94 = vector.extract_strided_slice %93 {offsets = [0, 0, 0, 0], sizes = [16, 1, 4, 64], strides = [1, 1, 1, 1]} : vector<16x2x4x64xbf16> to vector<16x1x4x64xbf16>
    %95 = vector.shape_cast %94 : vector<16x1x4x64xbf16> to vector<16x4x64xbf16>
    %96 = vector.extract_strided_slice %95 {offsets = [0, 0, 0], sizes = [16, 4, 48], strides = [1, 1, 1]} : vector<16x4x64xbf16> to vector<16x4x48xbf16>
    %97 = vector.shape_cast %96 : vector<16x4x48xbf16> to vector<2x8x4x48xbf16>
    %98 = vector.extract_strided_slice %95 {offsets = [0, 0, 48], sizes = [16, 4, 16], strides = [1, 1, 1]} : vector<16x4x64xbf16> to vector<16x4x16xbf16>
    %99 = vector.shape_cast %98 : vector<16x4x16xbf16> to vector<2x8x4x16xbf16>
    %c0_92 = arith.constant 0 : index
    %c0_93 = arith.constant 0 : index
    %c0_94 = arith.constant 0 : index
    %c80 = arith.constant 80 : index
    %100 = vector.load %arg11[%c0_92, %c0_93, %c0_94, %c80] : memref<2x9x9x128xbf16, #tpu.memory_space<vmem>>, vector<2x8x4x48xbf16>
    tpu.vector_store %arg11[%c0_92, %c0_93, %c0_94, %c80], %97 {strides = array<i32>} : memref<2x9x9x128xbf16, #tpu.memory_space<vmem>>, vector<2x8x4x48xbf16>,
    %c0_95 = arith.constant 0 : index
    %c0_96 = arith.constant 0 : index
    %c1_97 = arith.constant 1 : index
    %c64_98 = arith.constant 64 : index
    %101 = vector.load %arg11[%c0_95, %c0_96, %c1_97, %c64_98] : memref<2x9x9x128xbf16, #tpu.memory_space<vmem>>, vector<2x8x4x16xbf16>
    tpu.vector_store %arg11[%c0_95, %c0_96, %c1_97, %c64_98], %99 {strides = array<i32>} : memref<2x9x9x128xbf16, #tpu.memory_space<vmem>>, vector<2x8x4x16xbf16>,
    %102 = vector.extract_strided_slice %93 {offsets = [0, 1, 0, 0], sizes = [16, 1, 4, 64], strides = [1, 1, 1, 1]} : vector<16x2x4x64xbf16> to vector<16x1x4x64xbf16>
    %103 = vector.shape_cast %102 : vector<16x1x4x64xbf16> to vector<16x4x64xbf16>
    %104 = vector.extract_strided_slice %103 {offsets = [0, 0, 0], sizes = [16, 4, 48], strides = [1, 1, 1]} : vector<16x4x64xbf16> to vector<16x4x48xbf16>
    %105 = vector.shape_cast %104 : vector<16x4x48xbf16> to vector<2x8x4x48xbf16>
    %106 = vector.extract_strided_slice %103 {offsets = [0, 0, 48], sizes = [16, 4, 16], strides = [1, 1, 1]} : vector<16x4x64xbf16> to vector<16x4x16xbf16>
    %107 = vector.shape_cast %106 : vector<16x4x16xbf16> to vector<2x8x4x16xbf16>
    %c0_99 = arith.constant 0 : index
    %c1_100 = arith.constant 1 : index
    %c0_101 = arith.constant 0 : index
    %c16 = arith.constant 16 : index
    %108 = vector.load %arg11[%c0_99, %c1_100, %c0_101, %c16] : memref<2x9x9x128xbf16, #tpu.memory_space<vmem>>, vector<2x8x4x48xbf16>
    tpu.vector_store %arg11[%c0_99, %c1_100, %c0_101, %c16], %105 {strides = array<i32>} : memref<2x9x9x128xbf16, #tpu.memory_space<vmem>>, vector<2x8x4x48xbf16>,
    %c0_102 = arith.constant 0 : index
    %c1_103 = arith.constant 1 : index
    %c1_104 = arith.constant 1 : index
    %c0_105 = arith.constant 0 : index
    %109 = vector.load %arg11[%c0_102, %c1_103, %c1_104, %c0_105] : memref<2x9x9x128xbf16, #tpu.memory_space<vmem>>, vector<2x8x4x16xbf16>
    tpu.vector_store %arg11[%c0_102, %c1_103, %c1_104, %c0_105], %107 {strides = array<i32>} : memref<2x9x9x128xbf16, #tpu.memory_space<vmem>>, vector<2x8x4x16xbf16>,
    %cst_106 = arith.constant 0.000000e+00 : f32
    %110 = vector.broadcast %cst_106 : f32 to vector<128x64xf32>
    %c0_107 = arith.constant 0 : index
    %c0_108 = arith.constant 0 : index
    %c0_109 = arith.constant 0 : index
    %c0_110 = arith.constant 0 : index
    %111 = vector.load %arg11[%c0_107, %c0_108, %c0_109, %c0_110] : memref<2x9x9x128xbf16, #tpu.memory_space<vmem>>, vector<2x8x8x128xbf16>
    %112 = vector.shape_cast %111 : vector<2x8x8x128xbf16> to vector<128x128xbf16>
    %c0_111 = arith.constant 0 : index
    %c0_112 = arith.constant 0 : index
    %c0_113 = arith.constant 0 : index
    %c0_114 = arith.constant 0 : index
    %113 = vector.load %arg5[%c0_111, %c0_112, %c0_113, %c0_114] : memref<2x2x128x64xbf16, #tpu.memory_space<vmem>>, vector<1x1x128x64xbf16>
    %114 = vector.shape_cast %113 : vector<1x1x128x64xbf16> to vector<128x64xbf16>
    %cst_115 = arith.constant dense<0.000000e+00> : vector<128x64xf32>
    %115 = tpu.matmul %112, %114, %cst_115 {dimension_numbers = #tpu.dot_dimension_numbers<[1], [0], [0], [1], [0, 0, 1, 1], [], []>} : vector<128x128xbf16>, vector<128x64xbf16>, vector<128x64xf32> -> vector<128x64xf32>
    %116 = arith.addf %110, %115 : vector<128x64xf32>
    %c0_116 = arith.constant 0 : index
    %c0_117 = arith.constant 0 : index
    %c1_118 = arith.constant 1 : index
    %c0_119 = arith.constant 0 : index
    %117 = vector.load %arg11[%c0_116, %c0_117, %c1_118, %c0_119] : memref<2x9x9x128xbf16, #tpu.memory_space<vmem>>, vector<2x8x8x128xbf16>
    %118 = vector.shape_cast %117 : vector<2x8x8x128xbf16> to vector<128x128xbf16>
    %c0_120 = arith.constant 0 : index
    %c1_121 = arith.constant 1 : index
    %c0_122 = arith.constant 0 : index
    %c0_123 = arith.constant 0 : index
    %119 = vector.load %arg5[%c0_120, %c1_121, %c0_122, %c0_123] : memref<2x2x128x64xbf16, #tpu.memory_space<vmem>>, vector<1x1x128x64xbf16>
    %120 = vector.shape_cast %119 : vector<1x1x128x64xbf16> to vector<128x64xbf16>
    %cst_124 = arith.constant dense<0.000000e+00> : vector<128x64xf32>
    %121 = tpu.matmul %118, %120, %cst_124 {dimension_numbers = #tpu.dot_dimension_numbers<[1], [0], [0], [1], [0, 0, 1, 1], [], []>} : vector<128x128xbf16>, vector<128x64xbf16>, vector<128x64xf32> -> vector<128x64xf32>
    %122 = arith.addf %116, %121 : vector<128x64xf32>
    %c0_125 = arith.constant 0 : index
    %c1_126 = arith.constant 1 : index
    %c0_127 = arith.constant 0 : index
    %c0_128 = arith.constant 0 : index
    %123 = vector.load %arg11[%c0_125, %c1_126, %c0_127, %c0_128] : memref<2x9x9x128xbf16, #tpu.memory_space<vmem>>, vector<2x8x8x128xbf16>
    %124 = vector.shape_cast %123 : vector<2x8x8x128xbf16> to vector<128x128xbf16>
    %c1_129 = arith.constant 1 : index
    %c0_130 = arith.constant 0 : index
    %c0_131 = arith.constant 0 : index
    %c0_132 = arith.constant 0 : index
    %125 = vector.load %arg5[%c1_129, %c0_130, %c0_131, %c0_132] : memref<2x2x128x64xbf16, #tpu.memory_space<vmem>>, vector<1x1x128x64xbf16>
    %126 = vector.shape_cast %125 : vector<1x1x128x64xbf16> to vector<128x64xbf16>
    %cst_133 = arith.constant dense<0.000000e+00> : vector<128x64xf32>
    %127 = tpu.matmul %124, %126, %cst_133 {dimension_numbers = #tpu.dot_dimension_numbers<[1], [0], [0], [1], [0, 0, 1, 1], [], []>} : vector<128x128xbf16>, vector<128x64xbf16>, vector<128x64xf32> -> vector<128x64xf32>
    %128 = arith.addf %122, %127 : vector<128x64xf32>
    %c0_134 = arith.constant 0 : index
    %c1_135 = arith.constant 1 : index
    %c1_136 = arith.constant 1 : index
    %c0_137 = arith.constant 0 : index
    %129 = vector.load %arg11[%c0_134, %c1_135, %c1_136, %c0_137] : memref<2x9x9x128xbf16, #tpu.memory_space<vmem>>, vector<2x8x8x128xbf16>
    %130 = vector.shape_cast %129 : vector<2x8x8x128xbf16> to vector<128x128xbf16>
    %c1_138 = arith.constant 1 : index
    %c1_139 = arith.constant 1 : index
    %c0_140 = arith.constant 0 : index
    %c0_141 = arith.constant 0 : index
    %131 = vector.load %arg5[%c1_138, %c1_139, %c0_140, %c0_141] : memref<2x2x128x64xbf16, #tpu.memory_space<vmem>>, vector<1x1x128x64xbf16>
    %132 = vector.shape_cast %131 : vector<1x1x128x64xbf16> to vector<128x64xbf16>
    %cst_142 = arith.constant dense<0.000000e+00> : vector<128x64xf32>
    %133 = tpu.matmul %130, %132, %cst_142 {dimension_numbers = #tpu.dot_dimension_numbers<[1], [0], [0], [1], [0, 0, 1, 1], [], []>} : vector<128x128xbf16>, vector<128x64xbf16>, vector<128x64xf32> -> vector<128x64xf32>
    %134 = arith.addf %128, %133 : vector<128x64xf32>
    %cst_143 = arith.constant 0.000000e+00 : f32
    %135 = vector.broadcast %cst_143 : f32 to vector<128x64xf32>
    %136 = arith.cmpf ogt, %134, %135 : vector<128x64xf32>
    %cst_144 = arith.constant 0.000000e+00 : f32
    %137 = vector.broadcast %cst_144 : f32 to vector<128x64xf32>
    %138 = arith.minimumf %134, %137 : vector<128x64xf32>
    %139 = math.exp %138 : vector<128x64xf32>
    %cst_145 = arith.constant 1.000000e+00 : f32
    %140 = vector.broadcast %cst_145 : f32 to vector<128x64xf32>
    %141 = arith.subf %139, %140 : vector<128x64xf32>
    %cst_146 = arith.constant 1.67326319 : f32
    %142 = vector.broadcast %cst_146 : f32 to vector<128x64xf32>
    %143 = arith.mulf %142, %141 : vector<128x64xf32>
    %144 = arith.select %136, %134, %143 : vector<128x64xi1>, vector<128x64xf32>
    %cst_147 = arith.constant 1.05070102 : f32
    %145 = vector.broadcast %cst_147 : f32 to vector<128x64xf32>
    %146 = arith.mulf %145, %144 : vector<128x64xf32>
    %147 = vector.shape_cast %146 : vector<128x64xf32> to vector<2x8x8x64xf32>
    %148 = vector.extract_strided_slice %147 {offsets = [0, 0, 0, 0], sizes = [2, 8, 4, 64], strides = [1, 1, 1, 1]} : vector<2x8x8x64xf32> to vector<2x8x4x64xf32>
    %149 = arith.truncf %148 : vector<2x8x4x64xf32> to vector<2x8x4x64xbf16>
    %150 = vector.shape_cast %149 : vector<2x8x4x64xbf16> to vector<8x2x4x64xbf16>
    %151 = vector.extract_strided_slice %150 {offsets = [0, 0, 0, 0], sizes = [8, 1, 4, 64], strides = [1, 1, 1, 1]} : vector<8x2x4x64xbf16> to vector<8x1x4x64xbf16>
    %152 = vector.shape_cast %151 : vector<8x1x4x64xbf16> to vector<8x4x64xbf16>
    %153 = vector.extract_strided_slice %152 {offsets = [0, 0, 0], sizes = [8, 4, 32], strides = [1, 1, 1]} : vector<8x4x64xbf16> to vector<8x4x32xbf16>
    %154 = vector.shape_cast %153 : vector<8x4x32xbf16> to vector<2x4x4x32xbf16>
    %155 = vector.extract_strided_slice %152 {offsets = [0, 0, 32], sizes = [8, 4, 32], strides = [1, 1, 1]} : vector<8x4x64xbf16> to vector<8x4x32xbf16>
    %156 = vector.shape_cast %155 : vector<8x4x32xbf16> to vector<2x4x4x32xbf16>
    %c0_148 = arith.constant 0 : index
    %c0_149 = arith.constant 0 : index
    %c0_150 = arith.constant 0 : index
    %c96 = arith.constant 96 : index
    %157 = vector.load %arg12[%c0_148, %c0_149, %c0_150, %c96] : memref<2x5x9x128xbf16, #tpu.memory_space<vmem>>, vector<2x4x4x32xbf16>
    tpu.vector_store %arg12[%c0_148, %c0_149, %c0_150, %c96], %154 {strides = array<i32>} : memref<2x5x9x128xbf16, #tpu.memory_space<vmem>>, vector<2x4x4x32xbf16>,
    %c0_151 = arith.constant 0 : index
    %c0_152 = arith.constant 0 : index
    %c1_153 = arith.constant 1 : index
    %c64_154 = arith.constant 64 : index
    %158 = vector.load %arg12[%c0_151, %c0_152, %c1_153, %c64_154] : memref<2x5x9x128xbf16, #tpu.memory_space<vmem>>, vector<2x4x4x32xbf16>
    tpu.vector_store %arg12[%c0_151, %c0_152, %c1_153, %c64_154], %156 {strides = array<i32>} : memref<2x5x9x128xbf16, #tpu.memory_space<vmem>>, vector<2x4x4x32xbf16>,
    %159 = vector.extract_strided_slice %150 {offsets = [0, 1, 0, 0], sizes = [8, 1, 4, 64], strides = [1, 1, 1, 1]} : vector<8x2x4x64xbf16> to vector<8x1x4x64xbf16>
    %160 = vector.shape_cast %159 : vector<8x1x4x64xbf16> to vector<8x4x64xbf16>
    %161 = vector.extract_strided_slice %160 {offsets = [0, 0, 0], sizes = [8, 4, 32], strides = [1, 1, 1]} : vector<8x4x64xbf16> to vector<8x4x32xbf16>
    %162 = vector.shape_cast %161 : vector<8x4x32xbf16> to vector<2x4x4x32xbf16>
    %163 = vector.extract_strided_slice %160 {offsets = [0, 0, 32], sizes = [8, 4, 32], strides = [1, 1, 1]} : vector<8x4x64xbf16> to vector<8x4x32xbf16>
    %164 = vector.shape_cast %163 : vector<8x4x32xbf16> to vector<2x4x4x32xbf16>
    %c0_155 = arith.constant 0 : index
    %c1_156 = arith.constant 1 : index
    %c0_157 = arith.constant 0 : index
    %c32 = arith.constant 32 : index
    %165 = vector.load %arg12[%c0_155, %c1_156, %c0_157, %c32] : memref<2x5x9x128xbf16, #tpu.memory_space<vmem>>, vector<2x4x4x32xbf16>
    tpu.vector_store %arg12[%c0_155, %c1_156, %c0_157, %c32], %162 {strides = array<i32>} : memref<2x5x9x128xbf16, #tpu.memory_space<vmem>>, vector<2x4x4x32xbf16>,
    %c0_158 = arith.constant 0 : index
    %c1_159 = arith.constant 1 : index
    %c1_160 = arith.constant 1 : index
    %c0_161 = arith.constant 0 : index
    %166 = vector.load %arg12[%c0_158, %c1_159, %c1_160, %c0_161] : memref<2x5x9x128xbf16, #tpu.memory_space<vmem>>, vector<2x4x4x32xbf16>
    tpu.vector_store %arg12[%c0_158, %c1_159, %c1_160, %c0_161], %164 {strides = array<i32>} : memref<2x5x9x128xbf16, #tpu.memory_space<vmem>>, vector<2x4x4x32xbf16>,
    %cst_162 = arith.constant 0.000000e+00 : f32
    %167 = vector.broadcast %cst_162 : f32 to vector<64x64xf32>
    %c0_163 = arith.constant 0 : index
    %c0_164 = arith.constant 0 : index
    %c0_165 = arith.constant 0 : index
    %c0_166 = arith.constant 0 : index
    %168 = vector.load %arg12[%c0_163, %c0_164, %c0_165, %c0_166] : memref<2x5x9x128xbf16, #tpu.memory_space<vmem>>, vector<2x4x8x128xbf16>
    %169 = vector.shape_cast %168 : vector<2x4x8x128xbf16> to vector<64x128xbf16>
    %c0_167 = arith.constant 0 : index
    %c0_168 = arith.constant 0 : index
    %c0_169 = arith.constant 0 : index
    %c0_170 = arith.constant 0 : index
    %170 = vector.load %arg6[%c0_167, %c0_168, %c0_169, %c0_170] : memref<2x2x128x64xbf16, #tpu.memory_space<vmem>>, vector<1x1x128x64xbf16>
    %171 = vector.shape_cast %170 : vector<1x1x128x64xbf16> to vector<128x64xbf16>
    %cst_171 = arith.constant dense<0.000000e+00> : vector<64x64xf32>
    %172 = tpu.matmul %169, %171, %cst_171 {dimension_numbers = #tpu.dot_dimension_numbers<[1], [0], [0], [1], [0, 0, 1, 1], [], []>} : vector<64x128xbf16>, vector<128x64xbf16>, vector<64x64xf32> -> vector<64x64xf32>
    %173 = arith.addf %167, %172 : vector<64x64xf32>
    %c0_172 = arith.constant 0 : index
    %c0_173 = arith.constant 0 : index
    %c1_174 = arith.constant 1 : index
    %c0_175 = arith.constant 0 : index
    %174 = vector.load %arg12[%c0_172, %c0_173, %c1_174, %c0_175] : memref<2x5x9x128xbf16, #tpu.memory_space<vmem>>, vector<2x4x8x128xbf16>
    %175 = vector.shape_cast %174 : vector<2x4x8x128xbf16> to vector<64x128xbf16>
    %c0_176 = arith.constant 0 : index
    %c1_177 = arith.constant 1 : index
    %c0_178 = arith.constant 0 : index
    %c0_179 = arith.constant 0 : index
    %176 = vector.load %arg6[%c0_176, %c1_177, %c0_178, %c0_179] : memref<2x2x128x64xbf16, #tpu.memory_space<vmem>>, vector<1x1x128x64xbf16>
    %177 = vector.shape_cast %176 : vector<1x1x128x64xbf16> to vector<128x64xbf16>
    %cst_180 = arith.constant dense<0.000000e+00> : vector<64x64xf32>
    %178 = tpu.matmul %175, %177, %cst_180 {dimension_numbers = #tpu.dot_dimension_numbers<[1], [0], [0], [1], [0, 0, 1, 1], [], []>} : vector<64x128xbf16>, vector<128x64xbf16>, vector<64x64xf32> -> vector<64x64xf32>
    %179 = arith.addf %173, %178 : vector<64x64xf32>
    %c0_181 = arith.constant 0 : index
    %c1_182 = arith.constant 1 : index
    %c0_183 = arith.constant 0 : index
    %c0_184 = arith.constant 0 : index
    %180 = vector.load %arg12[%c0_181, %c1_182, %c0_183, %c0_184] : memref<2x5x9x128xbf16, #tpu.memory_space<vmem>>, vector<2x4x8x128xbf16>
    %181 = vector.shape_cast %180 : vector<2x4x8x128xbf16> to vector<64x128xbf16>
    %c1_185 = arith.constant 1 : index
    %c0_186 = arith.constant 0 : index
    %c0_187 = arith.constant 0 : index
    %c0_188 = arith.constant 0 : index
    %182 = vector.load %arg6[%c1_185, %c0_186, %c0_187, %c0_188] : memref<2x2x128x64xbf16, #tpu.memory_space<vmem>>, vector<1x1x128x64xbf16>
    %183 = vector.shape_cast %182 : vector<1x1x128x64xbf16> to vector<128x64xbf16>
    %cst_189 = arith.constant dense<0.000000e+00> : vector<64x64xf32>
    %184 = tpu.matmul %181, %183, %cst_189 {dimension_numbers = #tpu.dot_dimension_numbers<[1], [0], [0], [1], [0, 0, 1, 1], [], []>} : vector<64x128xbf16>, vector<128x64xbf16>, vector<64x64xf32> -> vector<64x64xf32>
    %185 = arith.addf %179, %184 : vector<64x64xf32>
    %c0_190 = arith.constant 0 : index
    %c1_191 = arith.constant 1 : index
    %c1_192 = arith.constant 1 : index
    %c0_193 = arith.constant 0 : index
    %186 = vector.load %arg12[%c0_190, %c1_191, %c1_192, %c0_193] : memref<2x5x9x128xbf16, #tpu.memory_space<vmem>>, vector<2x4x8x128xbf16>
    %187 = vector.shape_cast %186 : vector<2x4x8x128xbf16> to vector<64x128xbf16>
    %c1_194 = arith.constant 1 : index
    %c1_195 = arith.constant 1 : index
    %c0_196 = arith.constant 0 : index
    %c0_197 = arith.constant 0 : index
    %188 = vector.load %arg6[%c1_194, %c1_195, %c0_196, %c0_197] : memref<2x2x128x64xbf16, #tpu.memory_space<vmem>>, vector<1x1x128x64xbf16>
    %189 = vector.shape_cast %188 : vector<1x1x128x64xbf16> to vector<128x64xbf16>
    %cst_198 = arith.constant dense<0.000000e+00> : vector<64x64xf32>
    %190 = tpu.matmul %187, %189, %cst_198 {dimension_numbers = #tpu.dot_dimension_numbers<[1], [0], [0], [1], [0, 0, 1, 1], [], []>} : vector<64x128xbf16>, vector<128x64xbf16>, vector<64x64xf32> -> vector<64x64xf32>
    %191 = arith.addf %185, %190 : vector<64x64xf32>
    %cst_199 = arith.constant 0.000000e+00 : f32
    %192 = vector.broadcast %cst_199 : f32 to vector<64x64xf32>
    %193 = arith.cmpf ogt, %191, %192 : vector<64x64xf32>
    %cst_200 = arith.constant 0.000000e+00 : f32
    %194 = vector.broadcast %cst_200 : f32 to vector<64x64xf32>
    %195 = arith.minimumf %191, %194 : vector<64x64xf32>
    %196 = math.exp %195 : vector<64x64xf32>
    %cst_201 = arith.constant 1.000000e+00 : f32
    %197 = vector.broadcast %cst_201 : f32 to vector<64x64xf32>
    %198 = arith.subf %196, %197 : vector<64x64xf32>
    %cst_202 = arith.constant 1.67326319 : f32
    %199 = vector.broadcast %cst_202 : f32 to vector<64x64xf32>
    %200 = arith.mulf %199, %198 : vector<64x64xf32>
    %201 = arith.select %193, %191, %200 : vector<64x64xi1>, vector<64x64xf32>
    %cst_203 = arith.constant 1.05070102 : f32
    %202 = vector.broadcast %cst_203 : f32 to vector<64x64xf32>
    %203 = arith.mulf %202, %201 : vector<64x64xf32>
    %204 = vector.shape_cast %203 : vector<64x64xf32> to vector<2x4x8x64xf32>
    %c0_204 = arith.constant 0 : index
    %c0_205 = arith.constant 0 : index
    %c0_206 = arith.constant 0 : index
    %c0_207 = arith.constant 0 : index
    %205 = vector.load %arg9[%c0_204, %c0_205, %c0_206, %c0_207] : memref<2x4x8x64xf32, #tpu.memory_space<vmem>>, vector<2x4x8x64xf32>
    tpu.vector_store %arg9[%c0_204, %c0_205, %c0_206, %c0_207], %204 {strides = array<i32>} : memref<2x4x8x64xf32, #tpu.memory_space<vmem>>, vector<2x4x8x64xf32>,
    %c0_208 = arith.constant 0 : index
    %c0_209 = arith.constant 0 : index
    %c0_210 = arith.constant 0 : index
    %206 = vector.load %arg7[%c0_208, %c0_209, %c0_210] : memref<4x8x64xf32, #tpu.memory_space<vmem>>, vector<4x8x64xf32>
    %207 = vector.shape_cast %206 : vector<4x8x64xf32> to vector<1x4x8x64xf32>
    %208 = vector.broadcast %207 : vector<1x4x8x64xf32> to vector<2x4x8x64xf32>
    %209 = arith.mulf %204, %208 : vector<2x4x8x64xf32>
    %210 = vector.extract_strided_slice %209 {offsets = [0, 0, 0, 0], sizes = [1, 4, 8, 64], strides = [1, 1, 1, 1]} : vector<2x4x8x64xf32> to vector<1x4x8x64xf32>
    %211 = vector.shape_cast %210 : vector<1x4x8x64xf32> to vector<4x8x64xf32>
    %212 = vector.shape_cast %211 : vector<4x8x64xf32> to vector<1x4x8x64xf32>
    %cst_211 = arith.constant dense<0.000000e+00> : vector<1xf32>
    %213 = vector.multi_reduction <add>, %212, %cst_211 [1, 2, 3] : vector<1x4x8x64xf32> to vector<1xf32>
    %214 = vector.shape_cast %213 : vector<1xf32> to vector<1x1x1x1xf32>
    %215 = vector.extract %214[0, 0, 0, 0] : f32 from vector<1x1x1x1xf32>
    %216 = vector.broadcast %215 : f32 to vector<1x128xf32>
    %c0_212 = arith.constant 0 : index
    %c0_213 = arith.constant 0 : index
    %c0_214 = arith.constant 0 : index
    %217 = vector.load %arg8[%c0_212, %c0_213, %c0_214] : memref<2x1x128xf32, #tpu.memory_space<vmem>>, vector<1x1x128xf32>
    %218 = vector.shape_cast %217 : vector<1x1x128xf32> to vector<1x128xf32>
    %219 = vector.shape_cast %216 : vector<1x128xf32> to vector<1x1x128xf32>
    tpu.vector_store %arg8[%c0_212, %c0_213, %c0_214], %219 {strides = array<i32>} : memref<2x1x128xf32, #tpu.memory_space<vmem>>, vector<1x1x128xf32>,
    %220 = vector.extract_strided_slice %209 {offsets = [1, 0, 0, 0], sizes = [1, 4, 8, 64], strides = [1, 1, 1, 1]} : vector<2x4x8x64xf32> to vector<1x4x8x64xf32>
    %221 = vector.shape_cast %220 : vector<1x4x8x64xf32> to vector<4x8x64xf32>
    %222 = vector.shape_cast %221 : vector<4x8x64xf32> to vector<1x4x8x64xf32>
    %cst_215 = arith.constant dense<0.000000e+00> : vector<1xf32>
    %223 = vector.multi_reduction <add>, %222, %cst_215 [1, 2, 3] : vector<1x4x8x64xf32> to vector<1xf32>
    %224 = vector.shape_cast %223 : vector<1xf32> to vector<1x1x1x1xf32>
    %225 = vector.extract %224[0, 0, 0, 0] : f32 from vector<1x1x1x1xf32>
    %226 = vector.broadcast %225 : f32 to vector<1x128xf32>
    %c1_216 = arith.constant 1 : index
    %c0_217 = arith.constant 0 : index
    %c0_218 = arith.constant 0 : index
    %227 = vector.load %arg8[%c1_216, %c0_217, %c0_218] : memref<2x1x128xf32, #tpu.memory_space<vmem>>, vector<1x1x128xf32>
    %228 = vector.shape_cast %227 : vector<1x1x128xf32> to vector<1x128xf32>
    %229 = vector.shape_cast %226 : vector<1x128xf32> to vector<1x1x128xf32>
    tpu.vector_store %arg8[%c1_216, %c0_217, %c0_218], %229 {strides = array<i32>} : memref<2x1x128xf32, #tpu.memory_space<vmem>>, vector<1x1x128xf32>,
    return
  }
  func.func @transform_0(%arg0: i32, %arg1: i32) -> (i32, i32, i32, i32) {
    %c1_i32 = arith.constant 1 : i32
    %0 = arith.muli %arg0, %c1_i32 : i32
    %1 = arith.addi %0, %arg1 : i32
    %c0_i32 = arith.constant 0 : i32
    %c0_i32_0 = arith.constant 0 : i32
    %c0_i32_1 = arith.constant 0 : i32
    %c0_i32_2 = arith.constant 0 : i32
    return %1, %c0_i32, %c0_i32_0, %c0_i32_1 : i32, i32, i32, i32
  }
  func.func @transform_1(%arg0: i32, %arg1: i32) -> (i32, i32, i32, i32) {
    %c0_i32 = arith.constant 0 : i32
    %c0_i32_0 = arith.constant 0 : i32
    %c0_i32_1 = arith.constant 0 : i32
    %c0_i32_2 = arith.constant 0 : i32
    %c0_i32_3 = arith.constant 0 : i32
    return %c0_i32, %c0_i32_0, %c0_i32_1, %c0_i32_2 : i32, i32, i32, i32
  }
  func.func @transform_2(%arg0: i32, %arg1: i32) -> (i32, i32, i32, i32) {
    %c0_i32 = arith.constant 0 : i32
    %c0_i32_0 = arith.constant 0 : i32
    %c0_i32_1 = arith.constant 0 : i32
    %c0_i32_2 = arith.constant 0 : i32
    %c0_i32_3 = arith.constant 0 : i32
    return %c0_i32, %c0_i32_0, %c0_i32_1, %c0_i32_2 : i32, i32, i32, i32
  }
  func.func @transform_3(%arg0: i32, %arg1: i32) -> (i32, i32, i32, i32) {
    %c0_i32 = arith.constant 0 : i32
    %c0_i32_0 = arith.constant 0 : i32
    %c0_i32_1 = arith.constant 0 : i32
    %c0_i32_2 = arith.constant 0 : i32
    %c0_i32_3 = arith.constant 0 : i32
    return %c0_i32, %c0_i32_0, %c0_i32_1, %c0_i32_2 : i32, i32, i32, i32
  }
  func.func @transform_4(%arg0: i32, %arg1: i32) -> (i32, i32, i32, i32) {
    %c0_i32 = arith.constant 0 : i32
    %c0_i32_0 = arith.constant 0 : i32
    %c0_i32_1 = arith.constant 0 : i32
    %c0_i32_2 = arith.constant 0 : i32
    %c0_i32_3 = arith.constant 0 : i32
    return %c0_i32, %c0_i32_0, %c0_i32_1, %c0_i32_2 : i32, i32, i32, i32
  }
  func.func @transform_5(%arg0: i32, %arg1: i32) -> (i32, i32, i32) {
    %c0_i32 = arith.constant 0 : i32
    %c0_i32_0 = arith.constant 0 : i32
    %c0_i32_1 = arith.constant 0 : i32
    %c0_i32_2 = arith.constant 0 : i32
    return %c0_i32, %c0_i32_0, %c0_i32_1 : i32, i32, i32
  }
  func.func @transform_6(%arg0: i32, %arg1: i32) -> (i32, i32, i32) {
    %c1_i32 = arith.constant 1 : i32
    %0 = arith.muli %arg0, %c1_i32 : i32
    %1 = arith.addi %0, %arg1 : i32
    %c0_i32 = arith.constant 0 : i32
    %c0_i32_0 = arith.constant 0 : i32
    %c0_i32_1 = arith.constant 0 : i32
    return %1, %c0_i32, %c0_i32_0 : i32, i32, i32
  }
  func.func @transform_7(%arg0: i32, %arg1: i32) -> (i32, i32, i32, i32) {
    %c1_i32 = arith.constant 1 : i32
    %0 = arith.muli %arg0, %c1_i32 : i32
    %1 = arith.addi %0, %arg1 : i32
    %c0_i32 = arith.constant 0 : i32
    %c0_i32_0 = arith.constant 0 : i32
    %c0_i32_1 = arith.constant 0 : i32
    %c0_i32_2 = arith.constant 0 : i32
    return %1, %c0_i32, %c0_i32_0, %c0_i32_1 : i32, i32, i32, i32
  }
}

</mosaic_0001>

<bundles_post_ra>
// kernel: d_stage2_forward.1
= control target key start
LH: loop header
LB: loop body
LE: loop exit
PB: predicated region body
PF: predicated region fallthrough
CT: control target
= control target key end

     0   :  { %s13500_s24 = smov 0   ;;  %s13502_s25 = smov 0   ;;  %s17202_s0 = inlined_call_operand.vmem [shape: bf16[4,33,9,96], index: 0, kind: input, shape index: {}]   ;;  %s17203_s1 = inlined_call_operand.vmem [shape: bf16[2,2,96,64], index: 1, kind: input, shape index: {}]   ;;  %s17204_s2 = inlined_call_operand.vmem [shape: bf16[2,2,128,64], index: 2, kind: input, shape index: {}]   ;;  %s17205_s3 = inlined_call_operand.vmem [shape: bf16[2,2,128,64], index: 3, kind: input, shape index: {}]   ;;  %s17206_s4 = inlined_call_operand.vmem [shape: bf16[2,2,128,64], index: 4, kind: input, shape index: {}]   ;;  %s17207_s5 = inlined_call_operand.vmem [shape: f32[4,8,64], index: 5, kind: input, shape index: {}]   ;;  %s17208_s6 = inlined_call_operand.vmem [shape: f32[4,1,128], index: 6, kind: output, shape index: {0}]   ;;  %s17209_s7 = inlined_call_operand.vmem [shape: f32[4,4,8,64], index: 7, kind: output, shape index: {1}]  }
   0x1   :  { %s13504_s26 = smov 0  }
   0x2 LB: > { %s30_s27 = sadd.s32 1, %s13447_s25  ;;  %p11514_p0 = scmp.ge.s32.totalorder %s13451_s26, 1  ;;  %s13451_s26 = sphi %s13504_s26, %s18_s26   ;;  %s13447_s25 = sphi %s13502_s25, %s17227_s25   ;;  %s13443_s24 = sphi %s13500_s24, %s17226_s24  }
   0x3   : > { %p32_p1 = scmp.ge.s32.totalorder %s30_s27, 2  ;;  %p262_p2 = scmp.lt.s32.totalorder %s13451_s26, 3 }
   0x5   : > { %s17229_s27 = smov (%p32_p1, %s30_s27), 0  ;;  %p263_p3 = pnand %p11514_p0, %p262_p2 }
   0x6   : > { %s11515_s11 = sshll.u32 (!%p263_p3), %s13443_s24, 1  ;;  %s13453_s30 = smov (!%p263_p3), 72  }
   0x7   : > { %266 = sbr.rel (%p263_p3) target bundleno = 1849 (0x739), region = 44  ;;  %p305_p4 = scmp.lt.s32.totalorder (!%p263_p3), %s11515_s11, 3 }
   0x8   : > { %s13454_s8 = smov (!%p263_p3), 8  }
   0xc   : > { %v13084_v0 = vld [vmem:[%s17203_s1 + $0x58] sm:$0xff]  ;;  %v13078_v1 = vld [vmem:[%s17203_s1 + $0x28] sm:$0xff]  ;;  %v13083_v4 = vld [vmem:[%s17203_s1 + $0x50] sm:$0xff]  ;;  %s17231_s11 = smov (!%p305_p4, %s11515_s11), 3  ;;  %vm724_vm0 = vsmask.f32 3328 }
   0xd   : > { %v13122_v2 = vld [vmem:[%s17203_s1 + $0x88] sm:$0xff]  ;;  %v13128_v3 = vld [vmem:[%s17203_s1 + $0xb8] sm:$0xff]  ;;  %1867 = vmatpush.bf16.msra.mxu0 %v13084_v0  ;;  %2328 = vmatpush.bf16.msra.mxu1 %v13078_v1  ;;  %v13077_v5 = vld [vmem:[%s17203_s1 + $0x20] sm:$0xff]  ;;  %s13281_s22 = smul.u32 264, %s17231_s11  ;;  %vm725_vm1 = vsmask.f32 7440 }
   0xe   : > { %2867 = vmatpush.bf16.msra.mxu2 %v13122_v2  ;;  %4365 = vmatpush.bf16.msra.mxu3 %v13128_v3  ;;  %v13121_v6 = vld [vmem:[%s17203_s1 + $0x80] sm:$0xff]  ;;  %v13127_v7 = vld [vmem:[%s17203_s1 + $0xb0] sm:$0xff]  ;;  %v13082_v8 = vld [vmem:[%s17203_s1 + $0x48] sm:$0xff]  ;;  %vm1768_vm3 = vcmask 785408  }
   0xf   : > { %v13076_v9 = vld [vmem:[%s17203_s1 + $0x18] sm:$0xff]  ;;  %v13126_v11 = vld [vmem:[%s17203_s1 + $0xa8] sm:$0xff]  ;;  %s13560_s14 = scalar_lea.vmem %s17202_s0, %s13281_s22  ;;  %v13081_v12 = vld [vmem:[%s17203_s1 + $0x40] sm:$0xff]  ;;  %s316_s22 = scalar_lea.vmem %s17208_s6, %s17231_s11 }
  0x10   : > { %v13120_v10 = vld [vmem:[%s17203_s1 + $0x78] sm:$0xff]  ;;  %v13075_v13 = vld [vmem:[%s17203_s1 + $0x10] sm:$0xff]  ;;  %v584_v14 = vld [vmem:[%s13560_s14] sm:$0xf] }
  0x11   : > { %1868 = vmatpush.bf16.msra.mxu0 %v13083_v4  ;;  %2329 = vmatpush.bf16.msra.mxu1 %v13077_v5  ;;  %v585_v15 = vld [vmem:[%s13560_s14 + $0x8] sm:$0xf]  ;;  %v660_v16 = vld [vmem:[%s13560_s14 + $0x4] sm:$0x1]  ;;  %v661_v17 = vld [vmem:[%s13560_s14 + $0xc] sm:$0x1] }
  0x12   : > { %2868 = vmatpush.bf16.msra.mxu2 %v13121_v6  ;;  %4366 = vmatpush.bf16.msra.mxu3 %v13127_v7  ;;  %v728_v18 = vshrl.u32 %v584_v14, 16  ;;  %v731_v19 = vshll.u32 %v584_v14, 16  ;;  %v737_v20 = vshll.u32 %v660_v16, 16  ;;  %v742_v21 = vshrl.u32 %v585_v15, 16  ;;  %v13573_v24 = vld [vmem:[%s13560_s14] sm:$0xf]  ;;  %vm13604_vm2 = vmor %vm724_vm0, %vm725_vm1 }
  0x13   : > { %v745_v22 = vshll.u32 %v585_v15, 16  ;;  %v751_v23 = vshll.u32 %v661_v17, 16  ;;  %v13576_v25 = vld [vmem:[%s13560_s14 + $0x4] sm:$0xf0]  ;;  %v13119_v26 = vld [vmem:[%s17203_s1 + $0x70] sm:$0xff]  ;;  %v13125_v27 = vld [vmem:[%s17203_s1 + $0xa0] sm:$0xff] }
  0x14   : > { %v730_v28 = vrot.slane %v728_v18, 4  ;;  %v733_v29 = vrot.slane %v731_v19, 5  ;;  %v744_v30 = vrot.slane %v742_v21, 4  ;;  %v13080_v31 = vld [vmem:[%s17203_s1 + $0x38] sm:$0xff]  ;;  %v13074_v32 = vld [vmem:[%s17203_s1 + $0x8] sm:$0xff]  ;;  %v739_v33 = vrot.slane %v737_v20, 5 }
  0x15   : > { %1869 = vmatpush.bf16.msra.mxu0 %v13082_v8  ;;  %2330 = vmatpush.bf16.msra.mxu1 %v13076_v9  ;;  %v747_v34 = vrot.slane %v745_v22, 5  ;;  %v753_v35 = vrot.slane %v751_v23, 5  ;;  %v12033_v36 = vld [vmem:[%s13560_s14 + $0x8] sm:$0xf]  ;;  %v11592_v38 = vor.u32 %v13576_v25, %v13573_v24  ;;  %v12034_v39 = vld [vmem:[%s13560_s14 + $0xc] sm:$0x1] }
  0x16   : > { %2869 = vmatpush.bf16.msra.mxu2 %v13120_v10  ;;  %4367 = vmatpush.bf16.msra.mxu3 %v13126_v11  ;;  %v734_v37 = vor.u32 %v733_v29, %v730_v28  ;;  %v12035_v40 = vld [vmem:[%s13560_s14 + $0x10] sm:$0xf]  ;;  %v12036_v41 = vld [vmem:[%s13560_s14 + $0x14] sm:$0x1]  ;;  %v13118_v42 = vld [vmem:[%s17203_s1 + $0x68] sm:$0xff]  ;;  %v3227_v46 = vshrl.u32 %v12033_v36, 16 }
  0x17   : > { %v13124_v43 = vld [vmem:[%s17203_s1 + $0x98] sm:$0xff]  ;;  %v748_v45 = vor.u32 %v747_v34, %v744_v30  ;;  %v3230_v47 = vshll.u32 %v12033_v36, 16  ;;  %v3236_v48 = vshll.u32 %v12034_v39, 16  ;;  %v3241_v50 = vshrl.u32 %v12035_v40, 16  ;;  %v586_v53 = vld [vmem:[%s13560_s14 + $0x10] sm:$0xf] }
  0x18   : > { %v735_v49 = vrot.slane %v734_v37, 4  ;;  %v3244_v51 = vshll.u32 %v12035_v40, 16  ;;  %v3250_v52 = vshll.u32 %v12036_v41, 16  ;;  %v3229_v55 = vrot.slane %v3227_v46, 4  ;;  %v662_v58 = vld [vmem:[%s13560_s14 + $0x14] sm:$0x1] }
  0x19   : > { %1870 = vmatpush.bf16.msra.mxu0 %v13081_v12  ;;  %2331 = vmatpush.bf16.msra.mxu1 %v13075_v13  ;;  %v749_v54 = vrot.slane %v748_v45, 4  ;;  %v3232_v56 = vrot.slane %v3230_v47, 5  ;;  %v3238_v57 = vrot.slane %v3236_v48, 5  ;;  %v13079_v59 = vld [vmem:[%s17203_s1 + $0x30] sm:$0xff]  ;;  %v3243_v61 = vrot.slane %v3241_v50, 4  ;;  %v13073_v1 = vld [vmem:[%s17203_s1] sm:$0xff] }
  0x1a   : > { %2870 = vmatpush.bf16.msra.mxu2 %v13119_v26  ;;  %4368 = vmatpush.bf16.msra.mxu3 %v13125_v27  ;;  %v740_v60 = vsel %vm13604_vm2, %v735_v49, %v739_v33  ;;  %v3246_v62 = vrot.slane %v3244_v51, 5  ;;  %v3252_v63 = vrot.slane %v3250_v52, 5  ;;  %v587_v0 = vld [vmem:[%s13560_s14 + $0x18] sm:$0xf]  ;;  %v11851_v4 = vld [vmem:[%s13560_s14 + $0x8] sm:$0xf] }
  0x1b   : > { %v754_v2 = vsel %vm13604_vm2, %v749_v54, %v753_v35  ;;  %v1636_v3 = vunpack.c.l.b16 %v740_v60  ;;  %v13085_v5 = vld [vmem:[%s13560_s14 + $0xc] sm:$0xf0]  ;;  %v3233_v6 = vor.u32 %v3232_v56, %v3229_v55  ;;  %v756_v7 = vshrl.u32 %v586_v53, 16  ;;  %v13117_v8 = vld [vmem:[%s17203_s1 + $0x60] sm:$0xff]  ;;  %v663_v12 = vld [vmem:[%s13560_s14 + $0x1c] sm:$0x1] }
  0x1c   : > { %v13123_v9 = vld [vmem:[%s17203_s1 + $0x90] sm:$0xff]  ;;  %v1637_v10 = vunpack.c.l.b16 %v754_v2  ;;  %v3247_v11 = vor.u32 %v3246_v62, %v3243_v61  ;;  %v759_v13 = vshll.u32 %v586_v53, 16  ;;  %v765_v14 = vshll.u32 %v662_v58, 16  ;;  %v12037_v23 = vld [vmem:[%s13560_s14 + $0x18] sm:$0xf] }
  0x1d   : > { %1871 = vmatpush.bf16.msra.mxu0 %v13080_v31  ;;  %2332 = vmatpush.bf16.msra.mxu1 %v13074_v32  ;;  %v3234_v15 = vrot.slane %v3233_v6, 4  ;;  %v758_v16 = vrot.slane %v756_v7, 4  ;;  %v770_v17 = vshrl.u32 %v587_v0, 16  ;;  %v773_v18 = vshll.u32 %v587_v0, 16  ;;  %v12038_v30 = vld [vmem:[%s13560_s14 + $0x1c] sm:$0x1] }
  0x1e   : > { %2871 = vmatpush.bf16.msra.mxu2 %v13118_v42  ;;  %4369 = vmatpush.bf16.msra.mxu3 %v13124_v43  ;;  %v1700_v19 = vpack.c.b16 %v1637_v10, %v1636_v3  ;;  %v11852_v20 = vor.u32 %v13085_v5, %v11851_v4  ;;  %v3248_v21 = vrot.slane %v3247_v11, 4  ;;  %v761_v22 = vrot.slane %v759_v13, 5  ;;  %v12039_v34 = vld [vmem:[%s13560_s14 + $0x20] sm:$0xf]  ;;  %v12040_v41 = vld [vmem:[%s13560_s14 + $0x24] sm:$0x1] }
  0x1f   : > { %v3239_v26 = vsel %vm13604_vm2, %v3234_v15, %v3238_v57  ;;  %v772_v27 = vrot.slane %v770_v17, 4  ;;  %v775_v28 = vrot.slane %v773_v18, 5  ;;  %v779_v29 = vshll.u32 %v663_v12, 16  ;;  %v588_v50 = vld [vmem:[%s13560_s14 + $0x20] sm:$0xf]  ;;  %v13184_v2 = vld [vmem:[%s17204_s2 + $0xb8] sm:$0xff] }
  0x20   : > { %v3253_v31 = vsel %vm13604_vm2, %v3248_v21, %v3252_v63  ;;  %v4135_v32 = vunpack.c.l.b16 %v3239_v26  ;;  %v762_v33 = vor.u32 %v761_v22, %v758_v16  ;;  %v767_v36 = vrot.slane %v765_v14, 5  ;;  %v589_v25 = vld [vmem:[%s13560_s14 + $0x28] sm:$0xf]  ;;  %v11595_v54 = vld [vmem:[%s13560_s14 + $0x10] sm:$0xf]  ;;  %v13192_v5 = vld [vmem:[%s17204_s2 + $0xf8] sm:$0xff] }
  0x21   : > { %1872 = vmatpush.bf16.msra.mxu0 %v13079_v59  ;;  %2333 = vmatpush.bf16.msra.mxu1 %v13073_v1  ;;  %v4136_v35 = vunpack.c.l.b16 %v3253_v31  ;;  %v776_v37 = vor.u32 %v775_v28, %v772_v27  ;;  %v781_v39 = vrot.slane %v779_v29, 5  ;;  %v3255_v42 = vshrl.u32 %v12037_v23, 16  ;;  %v13042_v55 = vld [vmem:[%s13560_s14 + $0x14] sm:$0xf0]  ;;  %v664_v59 = vld [vmem:[%s13560_s14 + $0x24] sm:$0x1] }
  0x22   : > { %2872 = vmatpush.bf16.msra.mxu2 %v13117_v8  ;;  %4370 = vmatpush.bf16.msra.mxu3 %v13123_v9  ;;  %v763_v40 = vrot.slane %v762_v33, 4  ;;  %v3258_v43 = vshll.u32 %v12037_v23, 16  ;;  %v3264_v45 = vshll.u32 %v12038_v30, 16  ;;  %v3269_v48 = vshrl.u32 %v12039_v34, 16  ;;  %v665_v63 = vld [vmem:[%s13560_s14 + $0x2c] sm:$0x1] }
  0x23   : > { %v4199_v46 = vpack.c.b16 %v4136_v35, %v4135_v32  ;;  %v777_v47 = vrot.slane %v776_v37, 4  ;;  %v3272_v49 = vshll.u32 %v12039_v34, 16  ;;  %v3257_v51 = vrot.slane %v3255_v42, 4  ;;  %v13160_v6 = vld [vmem:[%s17204_s2 + $0x78] sm:$0xff]  ;;  %v12041_v12 = vld [vmem:[%s13560_s14 + $0x28] sm:$0xf] }
  0x24   : > { %11557 = vmatmul.msk.bf16.vlgmr.msra.gmra.mxu0 %vm1768_vm3, %v1700_v19  ;;  %11741 = vmatmul.msk.bf16.vlgmr.msra.gmra.mxu1 %vm1768_vm3, %v11592_v38  ;;  %v3260_v24 = vrot.slane %v3258_v43, 5  ;;  %v768_v38 = vsel %vm13604_vm2, %v763_v40, %v767_v36  ;;  %v3271_v52 = vrot.slane %v3269_v48, 4  ;;  %v3266_v57 = vrot.slane %v3264_v45, 5  ;;  %v13152_v7 = vld [vmem:[%s17204_s2 + $0x38] sm:$0xff]  ;;  %v12043_v17 = vld [vmem:[%s13560_s14 + $0x30] sm:$0xf] }
  0x25   : > { %12001 = vmatmul.msk.bf16.vlgmr.msra.gmra.mxu2 %vm1768_vm3, %v11852_v20  ;;  %12197 = vmatmul.msk.bf16.vlgmr.msra.gmra.mxu3 %vm1768_vm3, %v4199_v46  ;;  %v3274_v53 = vrot.slane %v3272_v49, 5  ;;  %v3278_v58 = vshll.u32 %v12040_v41, 16  ;;  %v784_v60 = vshrl.u32 %v588_v50, 16  ;;  %v782_v61 = vsel %vm13604_vm2, %v777_v47, %v781_v39  ;;  %v11855_v19 = vld [vmem:[%s13560_s14 + $0x18] sm:$0xf] }
  0x26   : > { %v3261_v56 = vor.u32 %v3260_v24, %v3257_v51  ;;  %v787_v0 = vshll.u32 %v588_v50, 16  ;;  %v798_v1 = vshrl.u32 %v589_v25, 16  ;;  %v1638_v8 = vunpack.c.l.b16 %v768_v38  ;;  %7184 = vmatpush.bf16.msrb.mxu2 %v13184_v2  ;;  %7946 = vmatpush.bf16.msrb.mxu3 %v13192_v5  ;;  %v13086_v22 = vld [vmem:[%s13560_s14 + $0x1c] sm:$0xf0]  ;;  %v12042_v35 = vld [vmem:[%s13560_s14 + $0x2c] sm:$0x1] }
  0x27   : > { %v3275_v62 = vor.u32 %v3274_v53, %v3271_v52  ;;  %v3280_v4 = vrot.slane %v3278_v58, 5  ;;  %v786_v10 = vrot.slane %v784_v60, 4  ;;  %v1639_v13 = vunpack.c.l.b16 %v782_v61  ;;  %6669 = vmatpush.bf16.msrb.mxu0 %v13160_v6  ;;  %6902 = vmatpush.bf16.msrb.mxu1 %v13152_v7  ;;  %v12044_v40 = vld [vmem:[%s13560_s14 + $0x34] sm:$0x1]  ;;  %v590_v38 = vld [vmem:[%s13560_s14 + $0x30] sm:$0xf] }
  0x28   : > { %v3262_v3 = vrot.slane %v3261_v56, 4  ;;  %v789_v11 = vrot.slane %v787_v0, 5  ;;  %v800_v15 = vrot.slane %v798_v1, 4  ;;  %v801_v16 = vshll.u32 %v589_v25, 16  ;;  %v591_v52 = vld [vmem:[%s13560_s14 + $0x38] sm:$0xf] }
  0x29   : > { %v3276_v9 = vrot.slane %v3275_v62, 4  ;;  %v11596_v18 = vor.u32 %v13042_v55, %v11595_v54  ;;  %v793_v21 = vshll.u32 %v664_v59, 16  ;;  %v807_v27 = vshll.u32 %v665_v63, 16  ;;  %v12047_v0 = vld [vmem:[%s13560_s14 + $0x40] sm:$0xf] }
  0x2a   : > { %v3267_v14 = vsel %vm13604_vm2, %v3262_v3, %v3266_v57  ;;  %v803_v26 = vrot.slane %v801_v16, 5  ;;  %v3283_v28 = vshrl.u32 %v12041_v12, 16  ;;  %v790_v30 = vor.u32 %v789_v11, %v786_v10  ;;  %v12045_v57 = vld [vmem:[%s13560_s14 + $0x38] sm:$0xf]  ;;  %v11599_v7 = vld [vmem:[%s13560_s14 + $0x20] sm:$0xf] }
  0x2b   : > { %v3281_v20 = vsel %vm13604_vm2, %v3276_v9, %v3280_v4  ;;  %v4137_v23 = vunpack.c.l.b16 %v3267_v14  ;;  %v3286_v31 = vshll.u32 %v12041_v12, 16  ;;  %v3297_v32 = vshrl.u32 %v12043_v17, 16  ;;  %v666_v10 = vld [vmem:[%s13560_s14 + $0x34] sm:$0x1]  ;;  %v11859_v14 = vld [vmem:[%s13560_s14 + $0x28] sm:$0xf] }
  0x2c   : > { %v4138_v29 = vunpack.c.l.b16 %v3281_v20  ;;  %v1701_v33 = vpack.c.b16 %v1639_v13, %v1638_v8  ;;  %v804_v34 = vor.u32 %v803_v26, %v800_v15  ;;  %v3285_v36 = vrot.slane %v3283_v28, 4  ;;  %v13043_v13 = vld [vmem:[%s13560_s14 + $0x24] sm:$0xf0] }
  0x2d   : > { %v3300_v37 = vshll.u32 %v12043_v17, 16  ;;  %v11856_v39 = vor.u32 %v13086_v22, %v11855_v19  ;;  %v3288_v41 = vrot.slane %v3286_v31, 5  ;;  %v3299_v42 = vrot.slane %v3297_v32, 4  ;;  %v13087_v17 = vld [vmem:[%s13560_s14 + $0x2c] sm:$0xf0] }
  0x2e   : > { %v795_v43 = vrot.slane %v793_v21, 5  ;;  %v4200_v46 = vpack.c.b16 %v4138_v29, %v4137_v23  ;;  %v791_v47 = vrot.slane %v790_v30, 4  ;;  %v809_v48 = vrot.slane %v807_v27, 5  ;;  %v12046_v27 = vld [vmem:[%s13560_s14 + $0x3c] sm:$0x1] }
  0x2f   : > { %v3302_v45 = vrot.slane %v3300_v37, 5  ;;  %v3292_v49 = vshll.u32 %v12042_v35, 16  ;;  %v805_v50 = vrot.slane %v804_v34, 4  ;;  %v3289_v51 = vor.u32 %v3288_v41, %v3285_v36  ;;  %v12048_v35 = vld [vmem:[%s13560_s14 + $0x44] sm:$0x1] }
  0x30   : > { %v3306_v25 = vshll.u32 %v12044_v40, 16  ;;  %v796_v53 = vsel %vm13604_vm2, %v791_v47, %v795_v43  ;;  %v812_v55 = vshrl.u32 %v590_v38, 16  ;;  %v815_v56 = vshll.u32 %v590_v38, 16 }
  0x31   : > { %v3303_v24 = vor.u32 %v3302_v45, %v3299_v42  ;;  %v3294_v54 = vrot.slane %v3292_v49, 5  ;;  %v810_v58 = vsel %vm13604_vm2, %v805_v50, %v809_v48  ;;  %v3290_v59 = vrot.slane %v3289_v51, 4  ;;  %v592_v42 = vld [vmem:[%s13560_s14 + $0x40] sm:$0xf] }
  0x32   : > { %v3308_v61 = vrot.slane %v3306_v25, 5  ;;  %v826_v62 = vshrl.u32 %v591_v52, 16  ;;  %v829_v63 = vshll.u32 %v591_v52, 16  ;;  %v3311_v1 = vshrl.u32 %v12045_v57, 16 }
  0x33   : > { %v3304_v60 = vrot.slane %v3303_v24, 4  ;;  %v3314_v2 = vshll.u32 %v12045_v57, 16  ;;  %v1640_v3 = vunpack.c.l.b16 %v796_v53  ;;  %v1641_v4 = vunpack.c.l.b16 %v810_v58  ;;  %v12051_v57 = vld [vmem:[%s13560_s14 + $0x50] sm:$0xf] }
  0x34   : > { %11558 = vmatmul.msk.bf16.gmra.mxu0 %vm1768_vm3, %v1701_v33  ;;  %11742 = vmatmul.msk.bf16.gmra.mxu1 %vm1768_vm3, %v11596_v18  ;;  %v814_v5 = vrot.slane %v812_v55, 4  ;;  %v817_v6 = vrot.slane %v815_v56, 5  ;;  %v3295_v8 = vsel %vm13604_vm2, %v3290_v59, %v3294_v54  ;;  %v3325_v11 = vshrl.u32 %v12047_v0, 16  ;;  %v667_v18 = vld [vmem:[%s13560_s14 + $0x3c] sm:$0x1] }
  0x35   : > { %12002 = vmatmul.msk.bf16.gmra.mxu2 %vm1768_vm3, %v11856_v39  ;;  %12198 = vmatmul.msk.bf16.gmra.mxu3 %vm1768_vm3, %v4200_v46  ;;  %v3309_v9 = vsel %vm13604_vm2, %v3304_v60, %v3308_v61  ;;  %v3328_v12 = vshll.u32 %v12047_v0, 16  ;;  %v828_v15 = vrot.slane %v826_v62, 4  ;;  %v831_v16 = vrot.slane %v829_v63, 5  ;;  %v593_v46 = vld [vmem:[%s13560_s14 + $0x48] sm:$0xf] }
  0x36   : > { %v3313_v19 = vrot.slane %v3311_v1, 4  ;;  %v3316_v20 = vrot.slane %v3314_v2, 5  ;;  %v4139_v21 = vunpack.c.l.b16 %v3295_v8  ;;  %v4140_v22 = vunpack.c.l.b16 %v3309_v9  ;;  %v12049_v55 = vld [vmem:[%s13560_s14 + $0x48] sm:$0xf]  ;;  %v668_v60 = vld [vmem:[%s13560_s14 + $0x44] sm:$0x1] }
  0x37   : > { %v818_v23 = vor.u32 %v817_v6, %v814_v5  ;;  %v821_v26 = vshll.u32 %v666_v10, 16  ;;  %v1702_v28 = vpack.c.b16 %v1641_v4, %v1640_v3  ;;  %v11600_v29 = vor.u32 %v13043_v13, %v11599_v7  ;;  %v669_v63 = vld [vmem:[%s13560_s14 + $0x4c] sm:$0x1]  ;;  %v11603_v8 = vld [vmem:[%s13560_s14 + $0x30] sm:$0xf] }
  0x38   : > { %v3327_v30 = vrot.slane %v3325_v11, 4  ;;  %v3330_v31 = vrot.slane %v3328_v12, 5  ;;  %v11860_v32 = vor.u32 %v13087_v17, %v11859_v14  ;;  %v832_v33 = vor.u32 %v831_v16, %v828_v15  ;;  %v13044_v9 = vld [vmem:[%s13560_s14 + $0x34] sm:$0xf0]  ;;  %v13088_v11 = vld [vmem:[%s13560_s14 + $0x3c] sm:$0xf0] }
  0x39   : > { %v835_v34 = vshll.u32 %v667_v18, 16  ;;  %v3317_v36 = vor.u32 %v3316_v20, %v3313_v19  ;;  %v3320_v37 = vshll.u32 %v12046_v27, 16  ;;  %v4201_v39 = vpack.c.b16 %v4140_v22, %v4139_v21  ;;  %v11863_v10 = vld [vmem:[%s13560_s14 + $0x38] sm:$0xf]  ;;  %v12050_v18 = vld [vmem:[%s13560_s14 + $0x4c] sm:$0x1] }
  0x3a   : > { %v819_v40 = vrot.slane %v818_v23, 4  ;;  %v823_v41 = vrot.slane %v821_v26, 5  ;;  %v3331_v43 = vor.u32 %v3330_v31, %v3327_v30  ;;  %v3334_v45 = vshll.u32 %v12048_v35, 16 }
  0x3b   : > { %v833_v47 = vrot.slane %v832_v33, 4  ;;  %v837_v48 = vrot.slane %v835_v34, 5  ;;  %v3318_v49 = vrot.slane %v3317_v36, 4  ;;  %v3322_v50 = vrot.slane %v3320_v37, 5  ;;  %v594_v36 = vld [vmem:[%s13560_s14 + $0x50] sm:$0xf] }
  0x3c   : > { %v840_v51 = vshrl.u32 %v592_v42, 16  ;;  %v843_v24 = vshll.u32 %v592_v42, 16  ;;  %v824_v25 = vsel %vm13604_vm2, %v819_v40, %v823_v41  ;;  %v854_v38 = vshrl.u32 %v593_v46, 16  ;;  %v595_v40 = vld [vmem:[%s13560_s14 + $0x58] sm:$0xf] }
  0x3d   : > { %v857_v52 = vshll.u32 %v593_v46, 16  ;;  %v3332_v53 = vrot.slane %v3331_v43, 4  ;;  %v3336_v54 = vrot.slane %v3334_v45, 5  ;;  %v838_v56 = vsel %vm13604_vm2, %v833_v47, %v837_v48 }
  0x3e   : > { %v1642_v58 = vunpack.c.l.b16 %v824_v25  ;;  %v3323_v59 = vsel %vm13604_vm2, %v3318_v49, %v3322_v50  ;;  %v842_v61 = vrot.slane %v840_v51, 4  ;;  %v845_v62 = vrot.slane %v843_v24, 5  ;;  %v12053_v24 = vld [vmem:[%s13560_s14 + $0x58] sm:$0xf]  ;;  %v11607_v25 = vld [vmem:[%s13560_s14 + $0x40] sm:$0xf] }
  0x3f   : > { %v856_v0 = vrot.slane %v854_v38, 4  ;;  %v859_v1 = vrot.slane %v857_v52, 5  ;;  %v3339_v2 = vshrl.u32 %v12049_v55, 16  ;;  %v3342_v3 = vshll.u32 %v12049_v55, 16  ;;  %v12055_v38 = vld [vmem:[%s13560_s14 + $0x60] sm:$0xf] }
  0x40   : > { %v1643_v4 = vunpack.c.l.b16 %v838_v56  ;;  %v3337_v5 = vsel %vm13604_vm2, %v3332_v53, %v3336_v54  ;;  %v3353_v6 = vshrl.u32 %v12051_v57, 16  ;;  %v3356_v7 = vshll.u32 %v12051_v57, 16  ;;  %v13045_v54 = vld [vmem:[%s13560_s14 + $0x44] sm:$0xf0]  ;;  %v670_v55 = vld [vmem:[%s13560_s14 + $0x54] sm:$0x1] }
  0x41   : > { %v4141_v12 = vunpack.c.l.b16 %v3323_v59  ;;  %v846_v13 = vor.u32 %v845_v62, %v842_v61  ;;  %v849_v14 = vshll.u32 %v668_v60, 16  ;;  %v863_v15 = vshll.u32 %v669_v63, 16  ;;  %v671_v59 = vld [vmem:[%s13560_s14 + $0x5c] sm:$0x1] }
  0x42   : > { %v4142_v16 = vunpack.c.l.b16 %v3337_v5  ;;  %v860_v17 = vor.u32 %v859_v1, %v856_v0  ;;  %v3341_v19 = vrot.slane %v3339_v2, 4  ;;  %v3344_v20 = vrot.slane %v3342_v3, 5  ;;  %v11867_v5 = vld [vmem:[%s13560_s14 + $0x48] sm:$0xf] }
  0x43   : > { %v1703_v21 = vpack.c.b16 %v1643_v4, %v1642_v58  ;;  %v11604_v22 = vor.u32 %v13044_v9, %v11603_v8  ;;  %v3355_v23 = vrot.slane %v3353_v6, 4  ;;  %v3358_v26 = vrot.slane %v3356_v7, 5  ;;  %v13089_v6 = vld [vmem:[%s13560_s14 + $0x4c] sm:$0xf0] }
  0x44   : > { %11559 = vmatmul.msk.bf16.gmra.mxu0 %vm1768_vm3, %v1702_v28  ;;  %11743 = vmatmul.msk.bf16.gmra.mxu1 %vm1768_vm3, %v11600_v29  ;;  %v11864_v27 = vor.u32 %v13088_v11, %v11863_v10  ;;  %v12052_v28 = vld [vmem:[%s13560_s14 + $0x54] sm:$0x1]  ;;  %v847_v29 = vrot.slane %v846_v13, 4  ;;  %v851_v30 = vrot.slane %v849_v14, 5  ;;  %v3348_v31 = vshll.u32 %v12050_v18, 16 }
  0x45   : > { %12003 = vmatmul.msk.bf16.gmra.mxu2 %vm1768_vm3, %v11860_v32  ;;  %12199 = vmatmul.msk.bf16.gmra.mxu3 %vm1768_vm3, %v4201_v39  ;;  %v4202_v32 = vpack.c.b16 %v4142_v16, %v4141_v12  ;;  %v861_v33 = vrot.slane %v860_v17, 4  ;;  %v865_v34 = vrot.slane %v863_v15, 5  ;;  %v3345_v35 = vor.u32 %v3344_v20, %v3341_v19  ;;  %v12054_v13 = vld [vmem:[%s13560_s14 + $0x5c] sm:$0x1]  ;;  %v12056_v19 = vld [vmem:[%s13560_s14 + $0x64] sm:$0x1] }
  0x46   : > { %v3359_v37 = vor.u32 %v3358_v26, %v3355_v23  ;;  %v3362_v39 = vshll.u32 %v12052_v28, 16  ;;  %v852_v41 = vsel %vm13604_vm2, %v847_v29, %v851_v30  ;;  %v3350_v42 = vrot.slane %v3348_v31, 5  ;;  %v596_v31 = vld [vmem:[%s13560_s14 + $0x60] sm:$0xf] }
  0x47   : > { %v868_v43 = vshrl.u32 %v594_v36, 16  ;;  %v871_v45 = vshll.u32 %v594_v36, 16  ;;  %v866_v46 = vsel %vm13604_vm2, %v861_v33, %v865_v34  ;;  %v3346_v47 = vrot.slane %v3345_v35, 4  ;;  %v12057_v33 = vld [vmem:[%s13560_s14 + $0x68] sm:$0xf] }
  0x48   : > { %v882_v48 = vshrl.u32 %v595_v40, 16  ;;  %v885_v49 = vshll.u32 %v595_v40, 16  ;;  %v3360_v50 = vrot.slane %v3359_v37, 4  ;;  %v3364_v51 = vrot.slane %v3362_v39, 5  ;;  %v12059_v34 = vld [vmem:[%s13560_s14 + $0x70] sm:$0xf] }
  0x49   : > { %v1644_v52 = vunpack.c.l.b16 %v852_v41  ;;  %v1645_v53 = vunpack.c.l.b16 %v866_v46  ;;  %v870_v56 = vrot.slane %v868_v43, 4  ;;  %v873_v57 = vrot.slane %v871_v45, 5  ;;  %v13183_v37 = vld [vmem:[%s17204_s2 + $0xb0] sm:$0xff] }
  0x4a   : > { %v3351_v58 = vsel %vm13604_vm2, %v3346_v47, %v3350_v42  ;;  %v884_v60 = vrot.slane %v882_v48, 4  ;;  %v887_v61 = vrot.slane %v885_v49, 5  ;;  %v3367_v62 = vshrl.u32 %v12053_v24, 16  ;;  %v13191_v39 = vld [vmem:[%s17204_s2 + $0xf0] sm:$0xff]  ;;  %7185 = vmatpush.bf16.msrb.mxu2 %v13183_v37 }
  0x4b   : > { %v3365_v63 = vsel %vm13604_vm2, %v3360_v50, %v3364_v51  ;;  %v3370_v0 = vshll.u32 %v12053_v24, 16  ;;  %v3381_v1 = vshrl.u32 %v12055_v38, 16  ;;  %v3384_v2 = vshll.u32 %v12055_v38, 16  ;;  %v13159_v40 = vld [vmem:[%s17204_s2 + $0x70] sm:$0xff]  ;;  %7947 = vmatpush.bf16.msrb.mxu3 %v13191_v39 }
  0x4c   : > { %v1704_v3 = vpack.c.b16 %v1645_v53, %v1644_v52  ;;  %v11608_v4 = vor.u32 %v13045_v54, %v11607_v25  ;;  %v877_v7 = vshll.u32 %v670_v55, 16  ;;  %v891_v8 = vshll.u32 %v671_v59, 16  ;;  %v13151_v46 = vld [vmem:[%s17204_s2 + $0x30] sm:$0xff]  ;;  %6670 = vmatpush.bf16.msrb.mxu0 %v13159_v40  ;;  %v13046_v55 = vld [vmem:[%s13560_s14 + $0x54] sm:$0xf0] }
  0x4d   : > { %v4143_v9 = vunpack.c.l.b16 %v3351_v58  ;;  %v4144_v10 = vunpack.c.l.b16 %v3365_v63  ;;  %v874_v11 = vor.u32 %v873_v57, %v870_v56  ;;  %v888_v12 = vor.u32 %v887_v61, %v884_v60  ;;  %6903 = vmatpush.bf16.msrb.mxu1 %v13151_v46  ;;  %v11611_v52 = vld [vmem:[%s13560_s14 + $0x50] sm:$0xf]  ;;  %v11871_v56 = vld [vmem:[%s13560_s14 + $0x58] sm:$0xf]  ;;  %v13090_v57 = vld [vmem:[%s13560_s14 + $0x5c] sm:$0xf0] }
  0x4e   : > { %v3369_v14 = vrot.slane %v3367_v62, 4  ;;  %v3372_v15 = vrot.slane %v3370_v0, 5  ;;  %v3383_v16 = vrot.slane %v3381_v1, 4  ;;  %v3386_v17 = vrot.slane %v3384_v2, 5  ;;  %v672_v60 = vld [vmem:[%s13560_s14 + $0x64] sm:$0x1] }
  0x4f   : > { %v11868_v18 = vor.u32 %v13089_v6, %v11867_v5  ;;  %v879_v20 = vrot.slane %v877_v7, 5  ;;  %v893_v23 = vrot.slane %v891_v8, 5  ;;  %v3376_v26 = vshll.u32 %v12054_v13, 16  ;;  %v673_v1 = vld [vmem:[%s13560_s14 + $0x6c] sm:$0x1] }
  0x50   : > { %v3373_v28 = vor.u32 %v3372_v15, %v3369_v14  ;;  %v3387_v29 = vor.u32 %v3386_v17, %v3383_v16  ;;  %v3390_v30 = vshll.u32 %v12056_v19, 16  ;;  %v896_v47 = vshrl.u32 %v596_v31, 16  ;;  %v12058_v8 = vld [vmem:[%s13560_s14 + $0x6c] sm:$0x1]  ;;  %v598_v13 = vld [vmem:[%s13560_s14 + $0x70] sm:$0xf] }
  0x51   : > { %v3378_v36 = vrot.slane %v3376_v26, 5  ;;  %v899_v48 = vshll.u32 %v596_v31, 16  ;;  %v3395_v51 = vshrl.u32 %v12057_v33, 16  ;;  %v3398_v24 = vshll.u32 %v12057_v33, 16  ;;  %v12063_v46 = vld [vmem:[%s13560_s14 + $0x80] sm:$0xf] }
  0x52   : > { %v3374_v42 = vrot.slane %v3373_v28, 4  ;;  %v3388_v43 = vrot.slane %v3387_v29, 4  ;;  %v3392_v45 = vrot.slane %v3390_v30, 5  ;;  %v3409_v25 = vshrl.u32 %v12059_v34, 16 }
  0x53   : > { %v3412_v38 = vshll.u32 %v12059_v34, 16  ;;  %v898_v61 = vrot.slane %v896_v47, 4  ;;  %v901_v62 = vrot.slane %v899_v48, 5  ;;  %v3397_v2 = vrot.slane %v3395_v51, 4 }
  0x54   : > { %11560 = vmatmul.msk.bf16.gmra.mxu0 %vm1768_vm3, %v1703_v21  ;;  %11744 = vmatmul.msk.bf16.gmra.mxu1 %vm1768_vm3, %v11604_v22  ;;  %v4203_v21 = vpack.c.b16 %v4144_v10, %v4143_v9  ;;  %v875_v22 = vrot.slane %v874_v11, 4  ;;  %v3379_v58 = vsel %vm13604_vm2, %v3374_v42, %v3378_v36  ;;  %v3393_v59 = vsel %vm13604_vm2, %v3388_v43, %v3392_v45  ;;  %v12060_v9 = vld [vmem:[%s13560_s14 + $0x74] sm:$0x1] }
  0x55   : > { %12004 = vmatmul.msk.bf16.gmra.mxu2 %vm1768_vm3, %v11864_v27  ;;  %12200 = vmatmul.msk.bf16.gmra.mxu3 %vm1768_vm3, %v4202_v32  ;;  %v889_v27 = vrot.slane %v888_v12, 4  ;;  %v597_v32 = vld [vmem:[%s13560_s14 + $0x68] sm:$0xf]  ;;  %v3414_v5 = vrot.slane %v3412_v38, 5  ;;  %v4145_v6 = vunpack.c.l.b16 %v3379_v58  ;;  %v4146_v7 = vunpack.c.l.b16 %v3393_v59  ;;  %v674_v42 = vld [vmem:[%s13560_s14 + $0x74] sm:$0x1] }
  0x56   : > { %v880_v35 = vsel %vm13604_vm2, %v875_v22, %v879_v20  ;;  %v910_v49 = vshrl.u32 %v597_v32, 16  ;;  %v913_v50 = vshll.u32 %v597_v32, 16  ;;  %v11612_v11 = vor.u32 %v13046_v55, %v11611_v52  ;;  %v11615_v59 = vld [vmem:[%s13560_s14 + $0x60] sm:$0xf] }
  0x57   : > { %v894_v41 = vsel %vm13604_vm2, %v889_v27, %v893_v23  ;;  %v1646_v53 = vunpack.c.l.b16 %v880_v35  ;;  %v11872_v12 = vor.u32 %v13090_v57, %v11871_v56  ;;  %v902_v14 = vor.u32 %v901_v62, %v898_v61  ;;  %v11875_v61 = vld [vmem:[%s13560_s14 + $0x68] sm:$0xf]  ;;  %v13091_v62 = vld [vmem:[%s13560_s14 + $0x6c] sm:$0xf0] }
  0x58   : > { %v1647_v54 = vunpack.c.l.b16 %v894_v41  ;;  %v912_v63 = vrot.slane %v910_v49, 4  ;;  %v915_v0 = vrot.slane %v913_v50, 5  ;;  %v905_v15 = vshll.u32 %v672_v60, 16  ;;  %v12061_v41 = vld [vmem:[%s13560_s14 + $0x78] sm:$0xf] }
  0x59   : > { %v919_v17 = vshll.u32 %v673_v1, 16  ;;  %v3404_v20 = vshll.u32 %v12058_v8, 16  ;;  %v3418_v22 = vshll.u32 %v12060_v9, 16  ;;  %v4204_v23 = vpack.c.b16 %v4146_v7, %v4145_v6  ;;  %v675_v49 = vld [vmem:[%s13560_s14 + $0x7c] sm:$0x1] }
  0x5a   : > { %v1705_v10 = vpack.c.b16 %v1647_v54, %v1646_v53  ;;  %v916_v16 = vor.u32 %v915_v0, %v912_v63  ;;  %v924_v26 = vshrl.u32 %v598_v13, 16  ;;  %v927_v27 = vshll.u32 %v598_v13, 16  ;;  %v13047_v60 = vld [vmem:[%s13560_s14 + $0x64] sm:$0xf0]  ;;  %v12062_v1 = vld [vmem:[%s13560_s14 + $0x7c] sm:$0x1] }
  0x5b   : > { %v903_v30 = vrot.slane %v902_v14, 4  ;;  %v907_v31 = vrot.slane %v905_v15, 5  ;;  %v921_v33 = vrot.slane %v919_v17, 5  ;;  %v3406_v35 = vrot.slane %v3404_v20, 5  ;;  %v12064_v6 = vld [vmem:[%s13560_s14 + $0x84] sm:$0x1] }
  0x5c   : > { %v917_v32 = vrot.slane %v916_v16, 4  ;;  %v3420_v37 = vrot.slane %v3418_v22, 5  ;;  %v926_v39 = vrot.slane %v924_v26, 4  ;;  %v929_v40 = vrot.slane %v927_v27, 5  ;;  %v600_v14 = vld [vmem:[%s13560_s14 + $0x80] sm:$0xf] }
  0x5d   : > { %v908_v47 = vsel %vm13604_vm2, %v903_v30, %v907_v31  ;;  %v933_v52 = vshll.u32 %v674_v42, 16  ;;  %v3437_v53 = vshrl.u32 %v12063_v46, 16  ;;  %v3440_v54 = vshll.u32 %v12063_v46, 16  ;;  %v601_v22 = vld [vmem:[%s13560_s14 + $0x88] sm:$0xf] }
  0x5e   : > { %v922_v48 = vsel %vm13604_vm2, %v917_v32, %v921_v33  ;;  %v930_v38 = vor.u32 %v929_v40, %v926_v39  ;;  %v1648_v55 = vunpack.c.l.b16 %v908_v47  ;;  %v947_v58 = vshll.u32 %v675_v49, 16  ;;  %v12065_v27 = vld [vmem:[%s13560_s14 + $0x88] sm:$0xf]  ;;  %v12067_v32 = vld [vmem:[%s13560_s14 + $0x90] sm:$0xf] }
  0x5f   : > { %v1649_v56 = vunpack.c.l.b16 %v922_v48  ;;  %v3439_v7 = vrot.slane %v3437_v53, 4  ;;  %v3442_v8 = vrot.slane %v3440_v54, 5  ;;  %v11876_v13 = vor.u32 %v13091_v62, %v11875_v61  ;;  %v13048_v39 = vld [vmem:[%s13560_s14 + $0x74] sm:$0xf0]  ;;  %v13092_v48 = vld [vmem:[%s13560_s14 + $0x7c] sm:$0xf0] }
  0x60   : > { %v3432_v16 = vshll.u32 %v12062_v1, 16  ;;  %v3446_v17 = vshll.u32 %v12064_v6, 16  ;;  %v955_v26 = vshll.u32 %v600_v14, 16  ;;  %v3451_v42 = vshrl.u32 %v12065_v27, 16  ;;  %v11879_v47 = vld [vmem:[%s13560_s14 + $0x78] sm:$0xf] }
  0x61   : > { %v1706_v9 = vpack.c.b16 %v1649_v56, %v1648_v55  ;;  %v3443_v20 = vor.u32 %v3442_v8, %v3439_v7  ;;  %v3468_v46 = vshll.u32 %v12067_v32, 16  ;;  %v603_v53 = vld [vmem:[%s13560_s14 + $0x98] sm:$0xf]  ;;  %v677_v55 = vld [vmem:[%s13560_s14 + $0x8c] sm:$0x1]  ;;  %v11880_v6 = vor.u32 %v13092_v48, %v11879_v47 }
  0x62   : > { %v3434_v30 = vrot.slane %v3432_v16, 5  ;;  %v3448_v31 = vrot.slane %v3446_v17, 5 }
  0x63   : > { %v3470_v62 = vrot.slane %v3468_v46, 5 }
  0x64   : > { %11561 = vmatmul.msk.bf16.gmra.mxu0 %vm1768_vm3, %v1704_v3  ;;  %11745 = vmatmul.msk.bf16.gmra.mxu1 %vm1768_vm3, %v11608_v4  ;;  %v3400_v3 = vrot.slane %v3398_v24, 5  ;;  %v3411_v4 = vrot.slane %v3409_v25, 4  ;;  %v3423_v24 = vshrl.u32 %v12061_v41, 16  ;;  %v3426_v25 = vshll.u32 %v12061_v41, 16 }
  0x65   : > { %12005 = vmatmul.msk.bf16.gmra.mxu2 %vm1768_vm3, %v11868_v18  ;;  %12201 = vmatmul.msk.bf16.gmra.mxu3 %vm1768_vm3, %v4203_v21  ;;  %v599_v18 = vld [vmem:[%s13560_s14 + $0x78] sm:$0xf]  ;;  %v957_v41 = vrot.slane %v955_v26, 5  ;;  %v678_v26 = vld [vmem:[%s13560_s14 + $0x94] sm:$0x1] }
  0x66   : > { %v3401_v19 = vor.u32 %v3400_v3, %v3397_v2  ;;  %v3415_v21 = vor.u32 %v3414_v5, %v3411_v4  ;;  %v938_v28 = vshrl.u32 %v599_v18, 16  ;;  %v941_v29 = vshll.u32 %v599_v18, 16 }
  0x67   : > { %v3425_v2 = vrot.slane %v3423_v24, 4  ;;  %v3428_v3 = vrot.slane %v3426_v25, 5  ;;  %v931_v4 = vrot.slane %v930_v38, 4  ;;  %v935_v5 = vrot.slane %v933_v52, 5  ;;  %v676_v25 = vld [vmem:[%s13560_s14 + $0x84] sm:$0x1] }
  0x68   : > { %v3402_v34 = vrot.slane %v3401_v19, 4  ;;  %v3416_v36 = vrot.slane %v3415_v21, 4  ;;  %v940_v43 = vrot.slane %v938_v28, 4  ;;  %v943_v45 = vrot.slane %v941_v29, 5 }
  0x69   : > { %v3429_v15 = vor.u32 %v3428_v3, %v3425_v2  ;;  %v936_v19 = vsel %vm13604_vm2, %v931_v4, %v935_v5  ;;  %v961_v2 = vshll.u32 %v676_v25, 16  ;;  %v994_v3 = vshrl.u32 %v603_v53, 16  ;;  %v12069_v5 = vld [vmem:[%s13560_s14 + $0x98] sm:$0xf] }
  0x6a   : > { %v3407_v50 = vsel %vm13604_vm2, %v3402_v34, %v3406_v35  ;;  %v3421_v51 = vsel %vm13604_vm2, %v3416_v36, %v3420_v37  ;;  %v944_v57 = vor.u32 %v943_v45, %v940_v43  ;;  %v13819_v28 = vunpack.c.l.b16 %v936_v19  ;;  %v11619_v34 = vld [vmem:[%s13560_s14 + $0x70] sm:$0xf] }
  0x6b   : > { %v4147_v63 = vunpack.c.l.b16 %v3407_v50  ;;  %v4148_v0 = vunpack.c.l.b16 %v3421_v51  ;;  %v3430_v29 = vrot.slane %v3429_v15, 4  ;;  %v3444_v35 = vrot.slane %v3443_v20, 4  ;;  %v602_v50 = vld [vmem:[%s13560_s14 + $0x90] sm:$0xf] }
  0x6c   : > { %v966_v36 = vshrl.u32 %v601_v22, 16  ;;  %v969_v37 = vshll.u32 %v601_v22, 16  ;;  %v3454_v43 = vshll.u32 %v12065_v27, 16  ;;  %v3465_v45 = vshrl.u32 %v12067_v32, 16  ;;  %v679_v27 = vld [vmem:[%s13560_s14 + $0x9c] sm:$0x1] }
  0x6d   : > { %v4205_v18 = vpack.c.b16 %v4148_v0, %v4147_v63  ;;  %v3435_v49 = vsel %vm13604_vm2, %v3430_v29, %v3434_v30  ;;  %v11620_v24 = vor.u32 %v13048_v39, %v11619_v34  ;;  %v3449_v54 = vsel %vm13604_vm2, %v3444_v35, %v3448_v31 }
  0x6e   : > { %v968_v38 = vrot.slane %v966_v36, 4  ;;  %v971_v52 = vrot.slane %v969_v37, 5  ;;  %v3467_v61 = vrot.slane %v3465_v45, 4  ;;  %v980_v63 = vshrl.u32 %v602_v50, 16 }
  0x6f   : > { %v983_v0 = vshll.u32 %v602_v50, 16  ;;  %v4149_v1 = vunpack.c.l.b16 %v3435_v49  ;;  %v997_v4 = vshll.u32 %v603_v53, 16  ;;  %v4150_v7 = vunpack.c.l.b16 %v3449_v54  ;;  %v12072_v49 = vld [vmem:[%s13560_s14 + $0xa4] sm:$0x1] }
  0x70   : > { %v972_v8 = vor.u32 %v971_v52, %v968_v38  ;;  %v3471_v15 = vor.u32 %v3470_v62, %v3467_v61  ;;  %v982_v16 = vrot.slane %v980_v63, 4  ;;  %v963_v19 = vrot.slane %v961_v2, 5  ;;  %v13049_v61 = vld [vmem:[%s13560_s14 + $0x84] sm:$0xf0]  ;;  %v13093_v2 = vld [vmem:[%s13560_s14 + $0x8c] sm:$0xf0] }
  0x71   : > { %v985_v17 = vrot.slane %v983_v0, 5  ;;  %v996_v20 = vrot.slane %v994_v3, 4  ;;  %v3482_v22 = vshll.u32 %v12069_v5, 16  ;;  %v989_v39 = vshll.u32 %v678_v26, 16  ;;  %v605_v0 = vld [vmem:[%s13560_s14 + $0xa8] sm:$0xf] }
  0x72   : > { %v973_v30 = vrot.slane %v972_v8, 4  ;;  %v3472_v34 = vrot.slane %v3471_v15, 4  ;;  %v12073_v15 = vld [vmem:[%s13560_s14 + $0xa8] sm:$0xf]  ;;  %v13875_v26 = vld [vmem:[%s13560_s14 + $0x90] sm:$0xf] }
  0x73   : > { %v986_v36 = vor.u32 %v985_v17, %v982_v16  ;;  %v991_v38 = vrot.slane %v989_v39, 5 }
  0x74   : > { %11562 = vmatmul.msk.bf16.gmra.mxu0 %vm1768_vm3, %v1705_v10  ;;  %11746 = vmatmul.msk.bf16.gmra.mxu1 %vm1768_vm3, %v11612_v11  ;;  %v11616_v10 = vor.u32 %v13047_v60, %v11615_v59  ;;  %v945_v11 = vrot.slane %v944_v57, 4  ;;  %v12066_v57 = vld [vmem:[%s13560_s14 + $0x8c] sm:$0x1]  ;;  %v3456_v59 = vrot.slane %v3454_v43, 5  ;;  %v12068_v60 = vld [vmem:[%s13560_s14 + $0x94] sm:$0x1] }
  0x75   : > { %12006 = vmatmul.msk.bf16.gmra.mxu2 %vm1768_vm3, %v11872_v12  ;;  %12202 = vmatmul.msk.bf16.gmra.mxu3 %vm1768_vm3, %v4204_v23  ;;  %v949_v12 = vrot.slane %v947_v58, 5  ;;  %v952_v23 = vshrl.u32 %v600_v14, 16  ;;  %v3453_v58 = vrot.slane %v3451_v42, 4  ;;  %v12071_v14 = vld [vmem:[%s13560_s14 + $0xa0] sm:$0xf]  ;;  %v3484_v43 = vrot.slane %v3482_v22, 5 }
  0x76   : > { %v3496_v29 = vshll.u32 %v12071_v14, 16  ;;  %v12070_v42 = vld [vmem:[%s13560_s14 + $0x9c] sm:$0x1] }
  0x77   : > { %v950_v21 = vsel %vm13604_vm2, %v945_v11, %v949_v12  ;;  %v954_v40 = vrot.slane %v952_v23, 4  ;;  %v3457_v11 = vor.u32 %v3456_v59, %v3453_v58  ;;  %v3460_v12 = vshll.u32 %v12066_v57, 16  ;;  %v604_v59 = vld [vmem:[%s13560_s14 + $0xa0] sm:$0xf] }
  0x78   : > { %v1651_v33 = vunpack.c.l.b16 %v950_v21  ;;  %v999_v21 = vrot.slane %v997_v4, 5  ;;  %v4206_v23 = vpack.c.b16 %v4150_v7, %v4149_v1  ;;  %v3498_v46 = vrot.slane %v3496_v29, 5  ;;  %v11883_v1 = vld [vmem:[%s13560_s14 + $0x88] sm:$0xf] }
  0x79   : > { %v958_v56 = vor.u32 %v957_v41, %v954_v40  ;;  %v3458_v32 = vrot.slane %v3457_v11, 4  ;;  %v1003_v41 = vshll.u32 %v679_v27, 16  ;;  %v3488_v25 = vshll.u32 %v12070_v42, 16  ;;  %v13891_v42 = vld [vmem:[%s13560_s14 + $0x9c] sm:$0xf0] }
  0x7a   : > { %v1707_v51 = vpack.c.b16 %v1651_v33, %v13819_v28  ;;  %v3493_v28 = vshrl.u32 %v12071_v14, 16  ;;  %v3462_v33 = vrot.slane %v3460_v12, 5  ;;  %v1000_v40 = vor.u32 %v999_v21, %v996_v20 }
  0x7b   : > { %v1005_v53 = vrot.slane %v1003_v41, 5  ;;  %v1025_v14 = vshll.u32 %v605_v0, 16  ;;  %v13888_v41 = vld [vmem:[%s13560_s14 + $0x98] sm:$0xf] }
  0x7c   : > { %v3495_v45 = vrot.slane %v3493_v28, 4  ;;  %v3463_v50 = vsel %vm13604_vm2, %v3458_v32, %v3462_v33  ;;  %v1001_v52 = vrot.slane %v1000_v40, 4 }
  0x7d   : > { %v4151_v62 = vunpack.c.l.b16 %v3463_v50  ;;  %v1027_v33 = vrot.slane %v1025_v14, 5 }
  0x7e   : > { %v1006_v4 = vsel %vm13604_vm2, %v1001_v52, %v1005_v53  ;;  %v12076_v52 = vld [vmem:[%s13560_s14 + $0xb4] sm:$0x1] }
  0x7f   : > { %v13869_v21 = vunpack.c.l.b16 %v1006_v4 }
  0x84   : > { %11563 = vmatmul.msk.bf16.gmra.mxu0 %vm1768_vm3, %v1706_v9  ;;  %11747 = vmatmul.msk.bf16.gmra.mxu1 %vm1768_vm3, %v11616_v10  ;;  %v975_v9 = vshll.u32 %v677_v55, 16  ;;  %v959_v10 = vrot.slane %v958_v56, 4  ;;  %v3499_v55 = vor.u32 %v3498_v46, %v3495_v45  ;;  %v3502_v56 = vshll.u32 %v12072_v49, 16  ;;  %v12074_v49 = vld [vmem:[%s13560_s14 + $0xac] sm:$0x1] }
  0x85   : > { %12007 = vmatmul.msk.bf16.gmra.mxu2 %vm1768_vm3, %v11876_v13  ;;  %12203 = vmatmul.msk.bf16.gmra.mxu3 %vm1768_vm3, %v4205_v18  ;;  %v3474_v13 = vshll.u32 %v12068_v60, 16  ;;  %v3479_v18 = vshrl.u32 %v12069_v5, 16  ;;  %v11623_v60 = vld [vmem:[%s13560_s14 + $0x80] sm:$0xf] }
  0x86   : > { %v977_v31 = vrot.slane %v975_v9, 5  ;;  %v964_v47 = vsel %vm13604_vm2, %v959_v10, %v963_v19  ;;  %v3500_v7 = vrot.slane %v3499_v55, 4  ;;  %v3504_v8 = vrot.slane %v3502_v56, 5 }
  0x87   : > { %v3476_v35 = vrot.slane %v3474_v13, 5  ;;  %v3481_v37 = vrot.slane %v3479_v18, 4  ;;  %v1652_v57 = vunpack.c.l.b16 %v964_v47  ;;  %v1008_v9 = vshrl.u32 %v604_v59, 16 }
  0x88   : > { %v978_v48 = vsel %vm13604_vm2, %v973_v30, %v977_v31  ;;  %v1011_v10 = vshll.u32 %v604_v59, 16  ;;  %v11624_v12 = vor.u32 %v13049_v61, %v11623_v60  ;;  %v1022_v13 = vshrl.u32 %v605_v0, 16  ;;  %v13882_v31 = vld [vmem:[%s13560_s14 + $0x94] sm:$0xf0]  ;;  %v606_v60 = vld [vmem:[%s13560_s14 + $0xb0] sm:$0xf] }
  0x89   : > { %v3485_v54 = vor.u32 %v3484_v43, %v3481_v37  ;;  %v1653_v58 = vunpack.c.l.b16 %v978_v48  ;;  %v11884_v18 = vor.u32 %v13093_v2, %v11883_v1  ;;  %v3505_v27 = vsel %vm13604_vm2, %v3500_v7, %v3504_v8  ;;  %v681_v37 = vld [vmem:[%s13560_s14 + $0xac] sm:$0x1]  ;;  %v607_v61 = vld [vmem:[%s13560_s14 + $0xb8] sm:$0xf] }
  0x8a   : > { %v1010_v28 = vrot.slane %v1008_v9, 4  ;;  %v1013_v29 = vrot.slane %v1011_v10, 5  ;;  %v3507_v30 = vshrl.u32 %v12073_v15, 16  ;;  %v1024_v32 = vrot.slane %v1022_v13, 4  ;;  %v12077_v7 = vld [vmem:[%s13560_s14 + $0xb8] sm:$0xf] }
  0x8b   : > { %v3486_v5 = vrot.slane %v3485_v54, 4  ;;  %v1708_v11 = vpack.c.b16 %v1653_v58, %v1652_v57  ;;  %v13895_v45 = vunpack.c.l.b16 %v3505_v27  ;;  %v11628_v47 = vor.u32 %v13882_v31, %v13875_v26  ;;  %v13950_v31 = vld [vmem:[%s13560_s14 + $0xa0] sm:$0xf] }
  0x8c   : > { %v1014_v48 = vor.u32 %v1013_v29, %v1010_v28  ;;  %v3509_v50 = vrot.slane %v3507_v30, 4  ;;  %v11888_v57 = vor.u32 %v13891_v42, %v13888_v41  ;;  %v3516_v0 = vshll.u32 %v12074_v49, 16  ;;  %v682_v30 = vld [vmem:[%s13560_s14 + $0xb4] sm:$0x1] }
  0x8d   : > { %v1036_v1 = vshrl.u32 %v606_v60, 16  ;;  %v1039_v2 = vshll.u32 %v606_v60, 16  ;;  %v3538_v27 = vshll.u32 %v12077_v7, 16 }
  0x8e   : > { %v1015_v4 = vrot.slane %v1014_v48, 4 }
  0x8f   : > { %v3540_v60 = vrot.slane %v3538_v27, 5  ;;  %v13095_v27 = vld [vmem:[%s13560_s14 + $0xac] sm:$0xf0] }
  0x94   : > { %11564 = vmatmul.msk.bf16.gmra.mxu0 %vm1768_vm3, %v1707_v51  ;;  %11748 = vmatmul.msk.bf16.gmra.mxu1 %vm1768_vm3, %v11620_v24  ;;  %v3477_v51 = vsel %vm13604_vm2, %v3472_v34, %v3476_v35  ;;  %v987_v24 = vrot.slane %v986_v36, 4  ;;  %v3510_v34 = vshll.u32 %v12073_v15, 16  ;;  %v680_v36 = vld [vmem:[%s13560_s14 + $0xa4] sm:$0x1]  ;;  %v13182_v15 = vld [vmem:[%s17204_s2 + $0xa8] sm:$0xff] }
  0x95   : > { %12008 = vmatmul.msk.bf16.gmra.mxu2 %vm1768_vm3, %v11880_v6  ;;  %12204 = vmatmul.msk.bf16.gmra.mxu3 %vm1768_vm3, %v4206_v23  ;;  %v4152_v63 = vunpack.c.l.b16 %v3477_v51  ;;  %v3490_v6 = vrot.slane %v3488_v25, 5  ;;  %v12075_v23 = vld [vmem:[%s13560_s14 + $0xb0] sm:$0xf]  ;;  %v1028_v25 = vor.u32 %v1027_v33, %v1024_v32  ;;  %v683_v32 = vld [vmem:[%s13560_s14 + $0xbc] sm:$0x1] }
  0x96   : > { %v992_v3 = vsel %vm13604_vm2, %v987_v24, %v991_v38  ;;  %v3521_v39 = vshrl.u32 %v12075_v23, 16  ;;  %v3524_v40 = vshll.u32 %v12075_v23, 16  ;;  %v1017_v24 = vshll.u32 %v680_v36, 16  ;;  %7186 = vmatpush.bf16.msrb.mxu2 %v13182_v15 }
  0x97   : > { %v4207_v19 = vpack.c.b16 %v4152_v63, %v4151_v62  ;;  %v13867_v20 = vunpack.c.l.b16 %v992_v3  ;;  %v3491_v22 = vsel %vm13604_vm2, %v3486_v5, %v3490_v6  ;;  %v1031_v38 = vshll.u32 %v681_v37, 16 }
  0x98   : > { %v13893_v43 = vunpack.c.l.b16 %v3491_v22  ;;  %v3512_v53 = vrot.slane %v3510_v34, 5  ;;  %v3523_v58 = vrot.slane %v3521_v39, 4  ;;  %v3526_v59 = vrot.slane %v3524_v40, 5 }
  0x99   : > { %v1709_v46 = vpack.c.b16 %v13869_v21, %v13867_v20  ;;  %v1050_v5 = vshrl.u32 %v607_v61, 16  ;;  %v1053_v6 = vshll.u32 %v607_v61, 16  ;;  %v1019_v8 = vrot.slane %v1017_v24, 5  ;;  %v12079_v21 = vld [vmem:[%s13560_s14 + $0xc0] sm:$0xf] }
  0x9a   : > { %v4208_v63 = vpack.c.b16 %v13895_v45, %v13893_v43  ;;  %v1029_v9 = vrot.slane %v1028_v25, 4  ;;  %v1033_v10 = vrot.slane %v1031_v38, 5  ;;  %v3513_v13 = vor.u32 %v3512_v53, %v3509_v50 }
  0x9b   : > { %v3527_v14 = vor.u32 %v3526_v59, %v3523_v58  ;;  %v1041_v22 = vrot.slane %v1039_v2, 5  ;;  %v3535_v23 = vshrl.u32 %v12077_v7, 16  ;;  %v1052_v33 = vrot.slane %v1050_v5, 4 }
  0x9c   : > { %v1055_v34 = vrot.slane %v1053_v6, 5  ;;  %v1020_v37 = vsel %vm13604_vm2, %v1015_v4, %v1019_v8  ;;  %v1034_v39 = vsel %vm13604_vm2, %v1029_v9, %v1033_v10  ;;  %v3518_v40 = vrot.slane %v3516_v0, 5  ;;  %v12078_v6 = vld [vmem:[%s13560_s14 + $0xbc] sm:$0x1] }
  0x9d   : > { %v3528_v24 = vrot.slane %v3527_v14, 4  ;;  %v3537_v59 = vrot.slane %v3535_v23, 4  ;;  %v13938_v0 = vunpack.c.l.b16 %v1020_v37  ;;  %v3549_v10 = vshrl.u32 %v12079_v21, 16 }
  0x9e   : > { %v1056_v58 = vor.u32 %v1055_v34, %v1052_v33 }
  0x9f   : > { %v3541_v7 = vor.u32 %v3540_v60, %v3537_v59  ;;  %v12081_v60 = vld [vmem:[%s13560_s14 + $0xc8] sm:$0xf] }
  0xa0   : > { %v1057_v42 = vrot.slane %v1056_v58, 4 }
  0xa1   : > { %v1874_v16 = vpop.f32.mrf.mxu0  ;;  %v2335_v17 = vpop.f32.mrf.mxu1 }
  0xa2   : > { %v2336_v35 = vadd.f32 %v2335_v17, %v1874_v16  ;;  %v13190_v16 = vld [vmem:[%s17204_s2 + $0xe8] sm:$0xff] }
  0xa3   : > { %v13158_v17 = vld [vmem:[%s17204_s2 + $0x68] sm:$0xff]  ;;  %7948 = vmatpush.bf16.msrb.mxu3 %v13190_v16 }
  0xa4   : > { %11565 = vmatmul.msk.bf16.gmra.mxu0 %vm1768_vm3, %v1708_v11  ;;  %11749 = vmatmul.msk.bf16.gmra.mxu1 %vm1768_vm3, %v11624_v12  ;;  %v3530_v11 = vshll.u32 %v12076_v52, 16  ;;  %v13968_v16 = vld [vmem:[%s13560_s14 + $0xa8] sm:$0xf] }
  0xa5   : > { %12009 = vmatmul.msk.bf16.gmra.mxu2 %vm1768_vm3, %v11884_v18  ;;  %12205 = vmatmul.msk.bf16.gmra.mxu3 %vm1768_vm3, %v4207_v19  ;;  %v13150_v18 = vld [vmem:[%s17204_s2 + $0x28] sm:$0xff]  ;;  %v1038_v19 = vrot.slane %v1036_v1, 4  ;;  %v13940_v1 = vunpack.c.l.b16 %v1034_v39 }
  0xa6   : > { %6671 = vmatpush.bf16.msrb.mxu0 %v13158_v17  ;;  %6904 = vmatpush.bf16.msrb.mxu1 %v13150_v18  ;;  %v3532_v25 = vrot.slane %v3530_v11, 5  ;;  %v3552_v11 = vshll.u32 %v12079_v21, 16 }
  0xa7   : > { %v1042_v53 = vor.u32 %v1041_v22, %v1038_v19  ;;  %v1710_v45 = vpack.c.b16 %v13940_v1, %v13938_v0  ;;  %v3544_v19 = vshll.u32 %v12078_v6, 16  ;;  %v608_v22 = vld [vmem:[%s13560_s14 + $0xc0] sm:$0xf]  ;;  %v3563_v6 = vshrl.u32 %v12081_v60, 16 }
  0xa8   : > { %v2874_v51 = vpop.f32.mrf.mxu2  ;;  %v4372_v62 = vpop.f32.mrf.mxu3  ;;  %v3554_v37 = vrot.slane %v3552_v11, 5 }
  0xa9   : > { %v3034_v54 = vadd.f32 %v2874_v51, %v2336_v35  ;;  %v1876_v55 = vpop.f32.mrf.mxu0  ;;  %v2337_v56 = vpop.f32.mrf.mxu1  ;;  %v3514_v51 = vrot.slane %v3513_v13, 4  ;;  %v1043_v4 = vrot.slane %v1042_v53, 4 }
  0xaa   : > { %v2338_v28 = vadd.f32 %v2337_v56, %v1876_v55  ;;  %v1059_v55 = vshll.u32 %v683_v32, 16  ;;  %v609_v32 = vld [vmem:[%s13560_s14 + $0xc8] sm:$0xf] }
  0xab   : > { %v4532_v3 = vadd.f32 %v4372_v62, %v3034_v54  ;;  %v1045_v54 = vshll.u32 %v682_v30, 16  ;;  %v3519_v20 = vsel %vm13604_vm2, %v3514_v51, %v3518_v40  ;;  %v13980_v30 = vrot.slane %v3541_v7, 4 }
  0xac   : > { %v13970_v17 = vunpack.c.l.b16 %v3519_v20  ;;  %v1064_v40 = vshrl.u32 %v608_v22, 16  ;;  %v1078_v51 = vshrl.u32 %v609_v32, 16  ;;  %v3566_v7 = vshll.u32 %v12081_v60, 16 }
  0xad   : > { %vm4596_vm4 = vcmp.ge.f32.partialorder %v4532_v3, 0.0  ;;  %v4660_v12 = vmul.f32 0.2, %v4532_v3  ;;  %v1047_v5 = vrot.slane %v1045_v54, 5 }
  0xae   : > { %v1066_v20 = vrot.slane %v1064_v40, 4  ;;  %v610_v40 = vld [vmem:[%s13560_s14 + $0xd0] sm:$0xf] }
  0xaf   : > { %v4724_v29 = vsel %vm4596_vm4, %v4532_v3, %v4660_v12  ;;  %v1095_v60 = vshll.u32 %v610_v40, 16  ;;  %vm4980_vm4 = vcmask 1041984  }
  0xb0   : > { %v2876_v35 = vpop.f32.mrf.mxu2  ;;  %v4788_v36 = vpack.c.bf16 %v4724_v29, %v4724_v29  ;;  %v4374_v38 = vpop.f32.mrf.mxu3 }
  0xb1   : > { %v3035_v48 = vadd.f32 %v2876_v35, %v2338_v28  ;;  %v2340_v49 = vpop.f32.mrf.mxu1  ;;  %v1879_v50 = vpop.f32.mrf.mxu0  ;;  %v1048_v28 = vsel %vm13604_vm2, %v1043_v4, %v1047_v5  ;;  %v12080_v35 = vld [vmem:[%s13560_s14 + $0xc4] sm:$0x1]  ;;  %v1080_v4 = vrot.slane %v1078_v51, 4 }
  0xb2   : > { %4884 = vrot.lane.b32.xlu0 %v4788_v36, %s13453_s30  ;;  %v5014_v52 = vshrl.u32 %v4788_v36, 16  ;;  %v5017_v62 = vshll.u32 %v4788_v36, 16  ;;  %v2341_v3 = vadd.f32 %v2340_v49, %v1879_v50  ;;  %v3551_v36 = vrot.slane %v3549_v10, 4 }
  0xb3   : > { %v4533_v56 = vadd.f32 %v4374_v38, %v3035_v48  ;;  %v1067_v48 = vshll.u32 %v608_v22, 16  ;;  %v3546_v50 = vrot.slane %v3544_v19, 5  ;;  %v11892_v38 = vor.u32 %v13095_v27, %v13968_v16 }
  0xb4   : > { %11566 = vmatmul.msk.bf16.gmra.mxu0 %vm1768_vm3, %v1709_v46  ;;  %11750 = vmatmul.msk.bf16.gmra.mxu1 %vm1768_vm3, %v11628_v47  ;;  %v5016_v61 = vrot.slane %v5014_v52, 7  ;;  %v13953_v46 = vld [vmem:[%s13560_s14 + $0xa4] sm:$0xf0]  ;;  %v3533_v47 = vsel %vm13604_vm2, %v3528_v24, %v3532_v25  ;;  %v1081_v24 = vshll.u32 %v609_v32, 16  ;;  %v3558_v53 = vshll.u32 %v12080_v35, 16 }
  0xb5   : > { %vm4597_vm5 = vcmp.ge.f32.partialorder %v4533_v56, 0.0  ;;  %v4661_v2 = vmul.f32 0.2, %v4533_v56  ;;  %12010 = vmatmul.msk.bf16.gmra.mxu2 %vm1768_vm3, %v11888_v57  ;;  %12206 = vmatmul.msk.bf16.gmra.mxu3 %vm1768_vm3, %v4208_v63  ;;  %v1061_v57 = vrot.slane %v1059_v55, 5  ;;  %v11632_v63 = vor.u32 %v13953_v46, %v13950_v31  ;;  %v13999_v46 = vld [vmem:[%s13560_s14 + $0xb4] sm:$0xf0] }
  0xb6   : > { %v5019_v26 = vor.u32 %v5017_v62, %v5016_v61  ;;  %v13972_v18 = vunpack.c.l.b16 %v3533_v47  ;;  %v13989_v58 = vunpack.c.l.b16 %v1048_v28  ;;  %v3555_v59 = vor.u32 %v3554_v37, %v3551_v36 }
  0xb7   : > { %v4725_v41 = vsel %vm4597_vm5, %v4533_v56, %v4661_v2  ;;  %v1062_v29 = vsel %vm13604_vm2, %v1057_v42, %v1061_v57  ;;  %v13995_v2 = vld [vmem:[%s13560_s14 + $0xb0] sm:$0xf]  ;;  %v1069_v21 = vrot.slane %v1067_v48, 5  ;;  %v3547_v47 = vsel %vm13604_vm2, %v13980_v30, %v3546_v50  ;;  %v685_v57 = vld [vmem:[%s13560_s14 + $0xcc] sm:$0x1] }
  0xb8   : > { %v2879_v8 = vpop.f32.mrf.mxu2  ;;  %5237 = vrot.lane.b32.xlu2 %v5019_v26, %s13454_s8  ;;  %v4789_v9 = vpack.c.bf16 %v4725_v41, %v4725_v41  ;;  %v4377_v14 = vpop.f32.mrf.mxu3  ;;  %v4209_v55 = vpack.c.b16 %v13972_v18, %v13970_v17  ;;  %v13992_v1 = vunpack.c.l.b16 %v1062_v29  ;;  %v1083_v5 = vrot.slane %v1081_v24, 5  ;;  %v12082_v29 = vld [vmem:[%s13560_s14 + $0xcc] sm:$0x1] }
  0xb9   : > { %v3036_v12 = vadd.f32 %v2879_v8, %v2341_v3  ;;  %v1881_v13 = vpop.f32.mrf.mxu0  ;;  %v2342_v43 = vpop.f32.mrf.mxu1  ;;  %v684_v3 = vld [vmem:[%s13560_s14 + $0xc4] sm:$0x1]  ;;  %v3560_v42 = vrot.slane %v3558_v53, 5  ;;  %v3556_v10 = vrot.slane %v3555_v59, 4  ;;  %v11636_v16 = vor.u32 %v13999_v46, %v13995_v2  ;;  %v14063_v2 = vld [vmem:[%s13560_s14 + $0xcc] sm:$0xf0] }
  0xba   : > { %v5595_v15 = vshrl.u32 %v4789_v9, 16  ;;  %v5598_v34 = vshll.u32 %v4789_v9, 16  ;;  %v2343_v25 = vadd.f32 %v2342_v43, %v1881_v13  ;;  %v1073_v11 = vshll.u32 %v684_v3, 16  ;;  %v611_v3 = vld [vmem:[%s13560_s14 + $0xd8] sm:$0xf] }
  0xbb   : > { %v4534_v23 = vadd.f32 %v4377_v14, %v3036_v12  ;;  %v1070_v43 = vor.u32 %v1069_v21, %v1066_v20  ;;  %v12083_v14 = vld [vmem:[%s13560_s14 + $0xd0] sm:$0xf]  ;;  %v1084_v17 = vor.u32 %v1083_v5, %v1080_v4  ;;  %v1711_v18 = vpack.c.b16 %v13992_v1, %v13989_v58  ;;  %v11895_v21 = vld [vmem:[%s13560_s14 + $0xb8] sm:$0xf]  ;;  %v12087_v1 = vld [vmem:[%s13560_s14 + $0xe0] sm:$0xf] }
  0xbc   : > { %v5597_v33 = vrot.slane %v5595_v15, 7  ;;  %v3565_v19 = vrot.slane %v3563_v6, 4  ;;  %v3568_v22 = vrot.slane %v3566_v7, 5  ;;  %v14016_v28 = vunpack.c.l.b16 %v3547_v47 }
  0xbd   : > { %vm4598_vm6 = vcmp.ge.f32.partialorder %v4534_v23, 0.0  ;;  %v4662_v39 = vmul.f32 0.2, %v4534_v23  ;;  %v3577_v30 = vshrl.u32 %v12083_v14, 16  ;;  %v3580_v32 = vshll.u32 %v12083_v14, 16 }
  0xbe   : > { %v5600_v49 = vor.u32 %v5598_v34, %v5597_v33  ;;  %v3561_v36 = vsel %vm13604_vm2, %v3556_v10, %v3560_v42  ;;  %v1071_v37 = vrot.slane %v1070_v43, 4  ;;  %v1085_v50 = vrot.slane %v1084_v17, 4  ;;  %v686_v42 = vld [vmem:[%s13560_s14 + $0xd4] sm:$0x1] }
  0xbf   : > { %v4726_v52 = vsel %vm4598_vm6, %v4534_v23, %v4662_v39  ;;  %v1075_v39 = vrot.slane %v1073_v11, 5  ;;  %v3579_v24 = vrot.slane %v3577_v30, 4  ;;  %v3572_v53 = vshll.u32 %v12082_v29, 16 }
  0xc0   : > { %v2881_v54 = vpop.f32.mrf.mxu2  ;;  %5464 = vrot.lane.b32.xlu2 %v4789_v9, %s13454_s8  ;;  %5818 = vrot.lane.b32.xlu0 %v5600_v49, %s13453_s30  ;;  %v4790_v56 = vpack.c.bf16 %v4726_v52, %v4726_v52  ;;  %v4379_v26 = vpop.f32.mrf.mxu3  ;;  %v3569_v52 = vor.u32 %v3568_v22, %v3565_v19  ;;  %v1092_v59 = vshrl.u32 %v610_v40, 16  ;;  %v1097_v6 = vrot.slane %v1095_v60, 5  ;;  %v12085_v40 = vld [vmem:[%s13560_s14 + $0xd8] sm:$0xf] }
  0xc1   : > { %v3037_v61 = vadd.f32 %v2881_v54, %v2343_v25  ;;  %v1884_v62 = vpop.f32.mrf.mxu0  ;;  %v2345_v0 = vpop.f32.mrf.mxu1  ;;  %v3582_v54 = vrot.slane %v3580_v32, 5  ;;  %v3574_v10 = vrot.slane %v3572_v53, 5  ;;  %v1106_v11 = vshrl.u32 %v611_v3, 16  ;;  %v14040_v32 = vld [vmem:[%s13560_s14 + $0xc0] sm:$0xf] }
  0xc2   : > { %v5021_v31 = vshrl.u32 %v4790_v56, 16  ;;  %v5024_v9 = vshll.u32 %v4790_v56, 16  ;;  %v2346_v13 = vadd.f32 %v2345_v0, %v1884_v62  ;;  %v4158_v62 = vunpack.c.l.b16 %v3561_v36 }
  0xc3   : > { %v4535_v41 = vadd.f32 %v4379_v26, %v3037_v61  ;;  %v1076_v0 = vsel %vm13604_vm2, %v1071_v37, %v1075_v39  ;;  %v13096_v26 = vld [vmem:[%s13560_s14 + $0xbc] sm:$0xf0]  ;;  %v3583_v47 = vor.u32 %v3582_v54, %v3579_v24  ;;  %v1109_v17 = vshll.u32 %v611_v3, 16 }
  0xc4   : > { %11567 = vmatmul.msk.bf16.gmra.mxu0 %vm1768_vm3, %v1710_v45  ;;  %11751 = vmatmul.msk.bf16.gmra.mxu1 %vm1768_vm3, %v11632_v63  ;;  %v5023_v8 = vrot.slane %v5021_v31, 7  ;;  %v1087_v45 = vshll.u32 %v685_v57, 16  ;;  %v1094_v57 = vrot.slane %v1092_v59, 4  ;;  %v11896_v14 = vor.u32 %v13096_v26, %v11895_v21 }
  0xc5   : > { %vm4599_vm7 = vcmp.ge.f32.partialorder %v4535_v41, 0.0  ;;  %v4663_v12 = vmul.f32 0.2, %v4535_v41  ;;  %12011 = vmatmul.msk.bf16.gmra.mxu2 %vm1768_vm3, %v11892_v38  ;;  %12207 = vmatmul.msk.bf16.gmra.mxu3 %vm1768_vm3, %v4209_v55  ;;  %v12084_v38 = vld [vmem:[%s13560_s14 + $0xd4] sm:$0x1]  ;;  %v3584_v19 = vrot.slane %v3583_v47, 4  ;;  %v14035_v29 = vunpack.c.l.b16 %v1076_v0 }
  0xc6   : > { %v5026_v15 = vor.u32 %v5024_v9, %v5023_v8  ;;  %v1089_v51 = vrot.slane %v1087_v45, 5  ;;  %v3586_v4 = vshll.u32 %v12084_v38, 16  ;;  %v3570_v9 = vrot.slane %v3569_v52, 4 }
  0xc7   : > { %v4727_v63 = vsel %vm4599_vm7, %v4535_v41, %v4663_v12  ;;  %v1108_v39 = vrot.slane %v1106_v11, 4  ;;  %v1111_v58 = vrot.slane %v1109_v17, 5  ;;  %v3591_v38 = vshrl.u32 %v12085_v40, 16 }
  0xc8   : > { %v2884_v23 = vpop.f32.mrf.mxu2  ;;  %4886 = vrot.lane.b32.xlu0 %v4790_v56, %s13453_s30  ;;  %5239 = vrot.lane.b32.xlu1 %v5026_v15, %s13454_s8  ;;  %v4791_v27 = vpack.c.bf16 %v4727_v63, %v4727_v63  ;;  %v4382_v48 = vpop.f32.mrf.mxu3  ;;  %v1090_v31 = vsel %vm13604_vm2, %v1085_v50, %v1089_v51  ;;  %v4210_v15 = vpack.c.b16 %v4158_v62, %v14016_v28  ;;  %v3588_v22 = vrot.slane %v3586_v4, 5  ;;  %v687_v28 = vld [vmem:[%s13560_s14 + $0xdc] sm:$0x1]  ;;  %v14060_v50 = vld [vmem:[%s13560_s14 + $0xc8] sm:$0xf] }
  0xc9   : > { %v3038_v33 = vadd.f32 %v2884_v23, %v2346_v13  ;;  %v2347_v34 = vpop.f32.mrf.mxu1  ;;  %v1886_v35 = vpop.f32.mrf.mxu0  ;;  %v1101_v23 = vshll.u32 %v686_v42, 16  ;;  %v14037_v30 = vunpack.c.l.b16 %v1090_v31  ;;  %v3575_v37 = vsel %vm13604_vm2, %v3570_v9, %v3574_v10 }
  0xca   : > { %5466 = vrot.lane.b32.xlu2 %v4791_v27, %s13454_s8  ;;  %v5602_v49 = vshrl.u32 %v4791_v27, 16  ;;  %v5605_v56 = vshll.u32 %v4791_v27, 16  ;;  %v2348_v5 = vadd.f32 %v2347_v34, %v1886_v35  ;;  %v1098_v34 = vor.u32 %v1097_v6, %v1094_v57  ;;  %v12086_v57 = vld [vmem:[%s13560_s14 + $0xdc] sm:$0x1]  ;;  %v12088_v6 = vld [vmem:[%s13560_s14 + $0xe4] sm:$0x1] }
  0xcb   : > { %v4536_v25 = vadd.f32 %v4382_v48, %v3038_v33  ;;  %v14043_v33 = vld [vmem:[%s13560_s14 + $0xc4] sm:$0xf0]  ;;  %v3589_v46 = vsel %vm13604_vm2, %v3584_v19, %v3588_v22  ;;  %v1115_v51 = vshll.u32 %v687_v28, 16  ;;  %v3594_v52 = vshll.u32 %v12085_v40, 16 }
  0xcc   : > { %v5604_v55 = vrot.slane %v5602_v49, 7  ;;  %v3608_v59 = vshll.u32 %v12087_v1, 16  ;;  %v1712_v0 = vpack.c.b16 %v14037_v30, %v14035_v29  ;;  %v11900_v3 = vor.u32 %v14063_v2, %v14060_v50 }
  0xcd   : > { %vm4600_vm8 = vcmp.ge.f32.partialorder %v4536_v25, 0.0  ;;  %v4664_v61 = vmul.f32 0.2, %v4536_v25  ;;  %v14076_v31 = vunpack.c.l.b16 %v3575_v37  ;;  %v14078_v47 = vunpack.c.l.b16 %v3589_v46 }
  0xce   : > { %v5607_v20 = vor.u32 %v5605_v56, %v5604_v55  ;;  %v11640_v55 = vor.u32 %v14043_v33, %v14040_v32  ;;  %v3605_v56 = vshrl.u32 %v12087_v1, 16  ;;  %v14080_v4 = vrot.slane %v1115_v51, 5  ;;  %v14099_v51 = vld [vmem:[%s13560_s14 + $0xd0] sm:$0xf] }
  0xcf   : > { %v4728_v41 = vsel %vm4600_vm8, %v4536_v25, %v4664_v61  ;;  %v1099_v25 = vrot.slane %v1098_v34, 4  ;;  %v4211_v34 = vpack.c.b16 %v14078_v47, %v14076_v31  ;;  %v12091_v33 = vld [vmem:[%s13560_s14 + $0xf0] sm:$0xf]  ;;  %vm5333_vm6 = vcmask 584192  }
  0xd0   : > { %v2886_v7 = vpop.f32.mrf.mxu2  ;;  %5820 = vrot.lane.b32.xlu1 %v5607_v20, %s13453_s30  ;;  %v4792_v8 = vpack.c.bf16 %v4728_v41, %v4728_v41  ;;  %v4384_v45 = vpop.f32.mrf.mxu3  ;;  %v1112_v20 = vor.u32 %v1111_v58, %v1108_v39  ;;  %v3607_v11 = vrot.slane %v3605_v56, 4  ;;  %v689_v56 = vld [vmem:[%s13560_s14 + $0xec] sm:$0x1]  ;;  %vm5334_vm7 = vsmask.f32 2306 }
  0xd1   : > { %v3039_v12 = vadd.f32 %v2886_v7, %v2348_v5  ;;  %v2350_v13 = vpop.f32.mrf.mxu1  ;;  %v1889_v43 = vpop.f32.mrf.mxu0  ;;  %v612_v5 = vld [vmem:[%s13560_s14 + $0xe0] sm:$0xf]  ;;  %v3593_v7 = vrot.slane %v3591_v38, 4  ;;  %v12089_v38 = vld [vmem:[%s13560_s14 + $0xe8] sm:$0xf]  ;;  %v1143_v32 = vshll.u32 %v689_v56, 16 }
  0xd2   : > { %4888 = vrot.lane.b32.xlu0 %v4792_v8, %s13453_s30  ;;  %v5028_v63 = vshrl.u32 %v4792_v8, 16  ;;  %v5031_v36 = vshll.u32 %v4792_v8, 16  ;;  %v2351_v49 = vadd.f32 %v2350_v13, %v1889_v43  ;;  %v3596_v8 = vrot.slane %v3594_v52, 5  ;;  %v613_v13 = vld [vmem:[%s13560_s14 + $0xe8] sm:$0xf] }
  0xd3   : > { %v4537_v27 = vadd.f32 %v4384_v45, %v3039_v12  ;;  %v3610_v12 = vrot.slane %v3608_v59, 5  ;;  %v3600_v45 = vshll.u32 %v12086_v57, 16  ;;  %v1123_v19 = vshll.u32 %v612_v5, 16 }
  0xd4   : > { %11568 = vmatmul.msk.bf16.gmra.mxu0 %vm1768_vm3, %v1711_v18  ;;  %11752 = vmatmul.msk.bf16.gmra.mxu1 %vm1768_vm3, %v11636_v16  ;;  %v5030_v35 = vrot.slane %v5028_v63, 7  ;;  %v1103_v16 = vrot.slane %v1101_v23, 5  ;;  %v3614_v63 = vshll.u32 %v12088_v6, 16  ;;  %v1134_v29 = vshrl.u32 %v613_v13, 16 }
  0xd5   : > { %vm4601_vm9 = vcmp.ge.f32.partialorder %v4537_v27, 0.0  ;;  %v4665_v48 = vmul.f32 0.2, %v4537_v27  ;;  %12012 = vmatmul.msk.bf16.gmra.mxu2 %vm1768_vm3, %v11896_v14  ;;  %12208 = vmatmul.msk.bf16.gmra.mxu3 %vm1768_vm3, %v4210_v15  ;;  %v1113_v14 = vrot.slane %v1112_v20, 4  ;;  %v1120_v15 = vshrl.u32 %v612_v5, 16 }
  0xd6   : > { %v5033_v18 = vor.u32 %v5031_v36, %v5030_v35  ;;  %v1104_v42 = vsel %vm13604_vm2, %v1099_v25, %v1103_v16  ;;  %v3611_v36 = vor.u32 %v3610_v12, %v3607_v11  ;;  %v1125_v58 = vrot.slane %v1123_v19, 5  ;;  %v12090_v12 = vld [vmem:[%s13560_s14 + $0xec] sm:$0x1] }
  0xd7   : > { %v4729_v24 = vsel %vm4601_vm9, %v4537_v27, %v4665_v48  ;;  %v3597_v27 = vor.u32 %v3596_v8, %v3593_v7  ;;  %v14091_v35 = vunpack.c.l.b16 %v1104_v42  ;;  %v688_v48 = vld [vmem:[%s13560_s14 + $0xe4] sm:$0x1]  ;;  %v1137_v1 = vshll.u32 %v613_v13, 16  ;;  %vm14430_vm9 = vmand %vm5333_vm6, %vm5334_vm7 }
  0xd8   : > { %v2889_v53 = vpop.f32.mrf.mxu2  ;;  %5241 = vrot.lane.b32.xlu1 %v5033_v18, %s13454_s8  ;;  %v4793_v54 = vpack.c.bf16 %v4729_v24, %v4729_v24  ;;  %v4387_v21 = vpop.f32.mrf.mxu3  ;;  %v1118_v16 = vsel %vm13604_vm2, %v1113_v14, %v14080_v4  ;;  %v3602_v24 = vrot.slane %v3600_v45, 5  ;;  %v1136_v25 = vrot.slane %v1134_v29, 4  ;;  %v12092_v29 = vld [vmem:[%s13560_s14 + $0xf4] sm:$0x1] }
  0xd9   : > { %v3040_v60 = vadd.f32 %v2889_v53, %v2351_v49  ;;  %v2352_v61 = vpop.f32.mrf.mxu1  ;;  %v1891_v62 = vpop.f32.mrf.mxu0  ;;  %v1122_v49 = vrot.slane %v1120_v15, 4  ;;  %v3598_v53 = vrot.slane %v3597_v27, 4  ;;  %v1139_v59 = vrot.slane %v1137_v1, 5  ;;  %v13181_v1 = vld [vmem:[%s17204_s2 + $0xa0] sm:$0xff] }
  0xda   : > { %5468 = vrot.lane.b32.xlu2 %v4793_v54, %s13454_s8  ;;  %v5609_v26 = vshrl.u32 %v4793_v54, 16  ;;  %v5612_v10 = vshll.u32 %v4793_v54, 16  ;;  %v2353_v22 = vadd.f32 %v2352_v61, %v1891_v62  ;;  %v3616_v54 = vrot.slane %v3614_v63, 5  ;;  %v14109_v62 = vld [vmem:[%s13560_s14 + $0xd4] sm:$0xf0]  ;;  %7187 = vmatpush.bf16.msrb.mxu2 %v13181_v1 }
  0xdb   : > { %v4538_v41 = vadd.f32 %v4387_v21, %v3040_v60  ;;  %v3612_v20 = vrot.slane %v3611_v36, 4  ;;  %v1129_v21 = vshll.u32 %v688_v48, 16  ;;  %v1140_v4 = vor.u32 %v1139_v59, %v1136_v25  ;;  %v615_v59 = vld [vmem:[%s13560_s14 + $0xf8] sm:$0xf] }
  0xdc   : > { %v5611_v9 = vrot.slane %v5609_v26, 7  ;;  %v11644_v42 = vor.u32 %v14109_v62, %v14099_v51  ;;  %v3603_v50 = vsel %vm13604_vm2, %v3598_v53, %v3602_v24  ;;  %v3622_v7 = vshll.u32 %v12089_v38, 16  ;;  %v691_v62 = vld [vmem:[%s13560_s14 + $0xfc] sm:$0x1] }
  0xdd   : > { %vm4602_vm10 = vcmp.ge.f32.partialorder %v4538_v41, 0.0  ;;  %v4666_v43 = vmul.f32 0.2, %v4538_v41  ;;  %v3617_v57 = vsel %vm13604_vm2, %v3612_v20, %v3616_v54  ;;  %v1131_v6 = vrot.slane %v1129_v21, 5 }
  0xde   : > { %v5614_v17 = vor.u32 %v5612_v10, %v5611_v9  ;;  %v3633_v13 = vshrl.u32 %v12091_v33, 16  ;;  %v1145_v45 = vrot.slane %v1143_v32, 5  ;;  %v14133_v27 = vunpack.c.l.b16 %v3603_v50  ;;  %v14173_v50 = vld [vmem:[%s13560_s14 + $0xe4] sm:$0xf0] }
  0xdf   : > { %v4730_v23 = vsel %vm4602_vm10, %v4538_v41, %v4666_v43  ;;  %v14117_v41 = vunpack.c.l.b16 %v1118_v16  ;;  %v3636_v43 = vshll.u32 %v12091_v33, 16  ;;  %v3642_v56 = vshll.u32 %v12092_v29, 16 }
  0xe0   : > { %v2891_v30 = vpop.f32.mrf.mxu2  ;;  %5822 = vrot.lane.b32.xlu0 %v5614_v17, %s13453_s30  ;;  %v4794_v28 = vpack.c.bf16 %v4730_v23, %v4730_v23  ;;  %v4389_v18 = vpop.f32.mrf.mxu3  ;;  %v1141_v17 = vrot.slane %v1140_v4, 4  ;;  %v14131_v23 = vld [vmem:[%s13560_s14 + $0xdc] sm:$0xf0] }
  0xe1   : > { %v3041_v37 = vadd.f32 %v2891_v30, %v2353_v22  ;;  %v2355_v39 = vpop.f32.mrf.mxu1  ;;  %v1894_v40 = vpop.f32.mrf.mxu0  ;;  %v14128_v22 = vld [vmem:[%s13560_s14 + $0xd8] sm:$0xf]  ;;  %v3624_v30 = vrot.slane %v3622_v7, 5  ;;  %v1713_v21 = vpack.c.b16 %v14117_v41, %v14091_v35  ;;  %v14170_v41 = vld [vmem:[%s13560_s14 + $0xe0] sm:$0xf] }
  0xe2   : > { %4890 = vrot.lane.b32.xlu1 %v4794_v28, %s13453_s30  ;;  %v5035_v46 = vshrl.u32 %v4794_v28, 16  ;;  %v5038_v61 = vshll.u32 %v4794_v28, 16  ;;  %v2356_v31 = vadd.f32 %v2355_v39, %v1894_v40  ;;  %v3635_v28 = vrot.slane %v3633_v13, 4  ;;  %v614_v40 = vld [vmem:[%s13560_s14 + $0xf0] sm:$0xf] }
  0xe3   : > { %v4539_v52 = vadd.f32 %v4389_v18, %v3041_v37  ;;  %v3628_v37 = vshll.u32 %v12090_v12, 16  ;;  %v3638_v39 = vrot.slane %v3636_v43, 5  ;;  %v13189_v18 = vld [vmem:[%s17204_s2 + $0xe0] sm:$0xff]  ;;  %v1146_v25 = vsel %vm13604_vm2, %v1141_v17, %v1145_v45 }
  0xe4   : > { %11569 = vmatmul.msk.bf16.gmra.mxu0 %vm1768_vm3, %v1712_v0  ;;  %11753 = vmatmul.msk.bf16.gmra.mxu1 %vm1768_vm3, %v11640_v55  ;;  %v5037_v60 = vrot.slane %v5035_v46, 7  ;;  %v1126_v0 = vor.u32 %v1125_v58, %v1122_v49  ;;  %v3619_v55 = vshrl.u32 %v12089_v38, 16  ;;  %v14137_v49 = vunpack.c.l.b16 %v3617_v57  ;;  %v13157_v46 = vld [vmem:[%s17204_s2 + $0x60] sm:$0xff]  ;;  %v690_v57 = vld [vmem:[%s13560_s14 + $0xf4] sm:$0x1] }
  0xe5   : > { %vm4603_vm11 = vcmp.ge.f32.partialorder %v4539_v52, 0.0  ;;  %v4667_v26 = vmul.f32 0.2, %v4539_v52  ;;  %12013 = vmatmul.msk.bf16.gmra.mxu2 %vm1768_vm3, %v11900_v3  ;;  %12209 = vmatmul.msk.bf16.gmra.mxu3 %vm1768_vm3, %v4211_v34  ;;  %v3639_v54 = vor.u32 %v3638_v39, %v3635_v28  ;;  %v11648_v29 = vor.u32 %v14173_v50, %v14170_v41 }
  0xe6   : > { %v5040_v47 = vor.u32 %v5038_v61, %v5037_v60  ;;  %v1127_v11 = vrot.slane %v1126_v0, 4  ;;  %v3621_v63 = vrot.slane %v3619_v55, 4  ;;  %7949 = vmatpush.bf16.msrb.mxu3 %v13189_v18  ;;  %v1148_v60 = vshrl.u32 %v614_v40, 16  ;;  %6672 = vmatpush.bf16.msrb.mxu0 %v13157_v46 }
  0xe7   : > { %v4731_v5 = vsel %vm4603_vm11, %v4539_v52, %v4667_v26  ;;  %v13149_v52 = vld [vmem:[%s17204_s2 + $0x20] sm:$0xff]  ;;  %v11904_v26 = vor.u32 %v14131_v23, %v14128_v22  ;;  %v4212_v32 = vpack.c.b16 %v14137_v49, %v14133_v27  ;;  %v14166_v55 = vunpack.c.l.b16 %v1146_v25 }
  0xe8   : > { %v2894_v2 = vpop.f32.mrf.mxu2  ;;  %5243 = vrot.lane.b32.xlu0 %v5040_v47, %s13454_s8  ;;  %v4795_v3 = vpack.c.bf16 %v4731_v5, %v4731_v5  ;;  %v4392_v14 = vpop.f32.mrf.mxu3  ;;  %v1132_v58 = vsel %vm13604_vm2, %v1127_v11, %v1131_v6  ;;  %v3625_v38 = vor.u32 %v3624_v30, %v3621_v63  ;;  %6905 = vmatpush.bf16.msrb.mxu1 %v13149_v52  ;;  %v1162_v6 = vshrl.u32 %v615_v59, 16  ;;  %v14187_v63 = vld [vmem:[%s13560_s14 + $0xec] sm:$0xf0] }
  0xe9   : > { %v3042_v8 = vadd.f32 %v2894_v2, %v2356_v31  ;;  %v1896_v9 = vpop.f32.mrf.mxu0  ;;  %v2357_v10 = vpop.f32.mrf.mxu1  ;;  %v1151_v31 = vshll.u32 %v614_v40, 16  ;;  %v14164_v33 = vunpack.c.l.b16 %v1132_v58  ;;  %v1150_v11 = vrot.slane %v1148_v60, 4  ;;  %v14214_v60 = vld [vmem:[%s13560_s14 + $0xf4] sm:$0xf0] }
  0xea   : > { %v5616_v15 = vshrl.u32 %v4795_v3, 16  ;;  %v5619_v36 = vshll.u32 %v4795_v3, 16  ;;  %v2358_v16 = vadd.f32 %v2357_v10, %v1896_v9  ;;  %v3626_v2 = vrot.slane %v3625_v38, 4 }
  0xeb   : > { %v4540_v19 = vadd.f32 %v4392_v14, %v3042_v8  ;;  %v14177_v8 = vld [vmem:[%s13560_s14 + $0xe8] sm:$0xf]  ;;  %v3640_v9 = vrot.slane %v3639_v54, 4  ;;  %v3644_v10 = vrot.slane %v3642_v56, 5  ;;  %v1153_v43 = vrot.slane %v1151_v31, 5 }
  0xec   : > { %v5618_v34 = vrot.slane %v5616_v15, 7  ;;  %v1165_v14 = vshll.u32 %v615_v59, 16  ;;  %v12093_v15 = vld [vmem:[%s13560_s14 + $0xf8] sm:$0xf]  ;;  %v11908_v39 = vor.u32 %v14187_v63, %v14177_v8  ;;  %v1171_v46 = vshll.u32 %v691_v62, 16 }
  0xed   : > { %vm4604_vm12 = vcmp.ge.f32.partialorder %v4540_v19, 0.0  ;;  %v4668_v48 = vmul.f32 0.2, %v4540_v19  ;;  %v3645_v30 = vsel %vm13604_vm2, %v3640_v9, %v3644_v10  ;;  %v3647_v28 = vshrl.u32 %v12093_v15, 16  ;;  %v12094_v54 = vld [vmem:[%s13560_s14 + $0xfc] sm:$0x1] }
  0xee   : > { %v5621_v24 = vor.u32 %v5619_v36, %v5618_v34  ;;  %v1167_v23 = vrot.slane %v1165_v14, 5  ;;  %v1154_v40 = vor.u32 %v1153_v43, %v1150_v11  ;;  %v14205_v38 = vunpack.c.l.b16 %v3645_v30  ;;  %v14211_v59 = vld [vmem:[%s13560_s14 + $0xf0] sm:$0xf]  ;;  %v12096_v11 = vld [vmem:[%s13560_s14 + $0x104] sm:$0x1] }
  0xef   : > { %v4732_v53 = vsel %vm4604_vm12, %v4540_v19, %v4668_v48  ;;  %v1157_v19 = vshll.u32 %v690_v57, 16  ;;  %v12095_v48 = vld [vmem:[%s13560_s14 + $0x100] sm:$0xf] }
  0xf0   : > { %v2896_v61 = vpop.f32.mrf.mxu2  ;;  %5470 = vrot.lane.b32.xlu0 %v4795_v3, %s13454_s8  ;;  %5824 = vrot.lane.b32.xlu1 %v5621_v24, %s13453_s30  ;;  %v4796_v20 = vpack.c.bf16 %v4732_v53, %v4732_v53  ;;  %v4394_v5 = vpop.f32.mrf.mxu3  ;;  %v3630_v3 = vrot.slane %v3628_v37, 5  ;;  %v1714_v37 = vpack.c.b16 %v14166_v55, %v14164_v33 }
  0xf1   : > { %v3043_v0 = vadd.f32 %v2896_v61, %v2358_v16  ;;  %v2360_v47 = vpop.f32.mrf.mxu1  ;;  %v1899_v4 = vpop.f32.mrf.mxu0  ;;  %v3650_v16 = vshll.u32 %v12093_v15, 16  ;;  %v14207_v52 = vrot.slane %v1157_v19, 5  ;;  %v3649_v61 = vrot.slane %v3647_v28, 4 }
  0xf2   : > { %4892 = vrot.lane.b32.xlu2 %v4796_v20, %s13453_s30  ;;  %v5042_v35 = vshrl.u32 %v4796_v20, 16  ;;  %v5045_v13 = vshll.u32 %v4796_v20, 16  ;;  %v2361_v45 = vadd.f32 %v2360_v47, %v1899_v4  ;;  %v3631_v51 = vsel %vm13604_vm2, %v3626_v2, %v3630_v3  ;;  %v616_v4 = vld [vmem:[%s13560_s14 + $0x108] sm:$0xf] }
  0xf3   : > { %v4541_v7 = vadd.f32 %v4394_v5, %v3043_v0  ;;  %v14203_v18 = vunpack.c.l.b16 %v3631_v51  ;;  %v3652_v20 = vrot.slane %v3650_v16, 5  ;;  %v14216_v0 = vrot.slane %v1154_v40, 4  ;;  %v14251_v16 = vld [vmem:[%s13560_s14 + $0x110] sm:$0xf] }
  0xf4   : > { %11570 = vmatmul.msk.bf16.gmra.mxu0 %vm1768_vm3, %v1713_v21  ;;  %11754 = vmatmul.msk.bf16.gmra.mxu1 %vm1768_vm3, %v11644_v42  ;;  %v5044_v12 = vrot.slane %v5042_v35, 7  ;;  %v1164_v42 = vrot.slane %v1162_v6, 4  ;;  %v3661_v21 = vshrl.u32 %v12095_v48, 16  ;;  %v3664_v47 = vshll.u32 %v12095_v48, 16 }
  0xf5   : > { %vm4605_vm13 = vcmp.ge.f32.partialorder %v4541_v7, 0.0  ;;  %v4669_v17 = vmul.f32 0.2, %v4541_v7  ;;  %12014 = vmatmul.msk.bf16.gmra.mxu2 %vm1768_vm3, %v11904_v26  ;;  %12210 = vmatmul.msk.bf16.gmra.mxu3 %vm1768_vm3, %v4212_v32  ;;  %v14219_v5 = vrot.slane %v1171_v46, 5  ;;  %v3656_v35 = vshll.u32 %v12094_v54, 16 }
  0xf6   : > { %v5047_v22 = vor.u32 %v5045_v13, %v5044_v12  ;;  %v1168_v53 = vor.u32 %v1167_v23, %v1164_v42  ;;  %v3663_v57 = vrot.slane %v3661_v21, 4  ;;  %v3666_v6 = vrot.slane %v3664_v47, 5 }
  0xf7   : > { %v4733_v27 = vsel %vm4605_vm13, %v4541_v7, %v4669_v17  ;;  %v617_v7 = vld [vmem:[%s13560_s14 + $0x110] sm:$0xf]  ;;  %v3653_v12 = vor.u32 %v3652_v20, %v3649_v61  ;;  %v1176_v13 = vshrl.u32 %v616_v4, 16  ;;  %v4213_v14 = vpack.c.b16 %v14205_v38, %v14203_v18 }
  0xf8   : > { %v2899_v34 = vpop.f32.mrf.mxu2  ;;  %5245 = vrot.lane.b32.xlu1 %v5047_v22, %s13454_s8  ;;  %v4797_v36 = vpack.c.bf16 %v4733_v27, %v4733_v27  ;;  %v4397_v24 = vpop.f32.mrf.mxu3  ;;  %v14221_v3 = vrot.slane %v1168_v53, 4  ;;  %v11652_v17 = vor.u32 %v14214_v60, %v14211_v59  ;;  %v1160_v62 = vsel %vm13604_vm2, %v14216_v0, %v14207_v52  ;;  %v693_v52 = vld [vmem:[%s13560_s14 + $0x114] sm:$0x1]  ;;  %v14334_v59 = vld [vmem:[%s13560_s14 + $0x110] sm:$0xf] }
  0xf9   : > { %v3044_v49 = vadd.f32 %v2899_v34, %v2361_v45  ;;  %v1901_v58 = vpop.f32.mrf.mxu0  ;;  %v2362_v1 = vpop.f32.mrf.mxu1  ;;  %v1179_v45 = vshll.u32 %v616_v4, 16  ;;  %v14235_v42 = vrot.slane %v3656_v35, 5  ;;  %v1190_v23 = vshrl.u32 %v617_v7, 16  ;;  %v14242_v34 = vld [vmem:[%s13560_s14 + $0xf8] sm:$0xf] }
  0xfa   : > { %v5623_v25 = vshrl.u32 %v4797_v36, 16  ;;  %v5626_v31 = vshll.u32 %v4797_v36, 16  ;;  %v2363_v9 = vadd.f32 %v2362_v1, %v1901_v58  ;;  %v1174_v28 = vsel %vm13604_vm2, %v14221_v3, %v14219_v5  ;;  %v692_v1 = vld [vmem:[%s13560_s14 + $0x10c] sm:$0x1]  ;;  %v12099_v3 = vld [vmem:[%s13560_s14 + $0x118] sm:$0xf] }
  0xfb   : > { %v4542_v56 = vadd.f32 %v4397_v24, %v3044_v49  ;;  %v3667_v40 = vor.u32 %v3666_v6, %v3663_v57  ;;  %v3670_v48 = vshll.u32 %v12096_v11, 16  ;;  %v14247_v58 = vrot.slane %v3653_v12, 4  ;;  %v14337_v60 = vld [vmem:[%s13560_s14 + $0x114] sm:$0xf0] }
  0xfc   : > { %v5625_v26 = vrot.slane %v5623_v25, 7  ;;  %v1178_v18 = vrot.slane %v1176_v13, 4  ;;  %v1181_v46 = vrot.slane %v1179_v45, 5  ;;  %v1193_v53 = vshll.u32 %v617_v7, 16 }
  0xfd   : > { %vm4606_vm14 = vcmp.ge.f32.partialorder %v4542_v56, 0.0  ;;  %v4670_v32 = vmul.f32 0.2, %v4542_v56  ;;  %v3668_v55 = vrot.slane %v3667_v40, 4  ;;  %v13455_v61 = vmov 0  }
  0xfe   : > { %v5628_v2 = vor.u32 %v5626_v31, %v5625_v26  ;;  %333 = vst [vmem:[#allocation2] sm:$0xf] %v13455_v61  ;;  %v1185_v41 = vshll.u32 %v692_v1, 16  ;;  %v1182_v20 = vor.u32 %v1181_v46, %v1178_v18  ;;  %v1195_v8 = vrot.slane %v1193_v53, 5  ;;  %v618_v1 = vld [vmem:[%s13560_s14 + $0x118] sm:$0xf] }
  0xff   : > { %v4734_v10 = vsel %vm4606_vm14, %v4542_v56, %v4670_v32  ;;  %v1192_v56 = vrot.slane %v1190_v23, 4  ;;  %340 = vst [vmem:[#allocation2 + $0x8] sm:$0xf] %v13455_v61  ;;  %v14273_v21 = vunpack.c.l.b16 %v1160_v62  ;;  %v1199_v26 = vshll.u32 %v693_v52, 16 }
 0x100   : > { %v2901_v43 = vpop.f32.mrf.mxu2  ;;  %5472 = vrot.lane.b32.xlu1 %v4797_v36, %s13454_s8  ;;  %5826 = vrot.lane.b32.xlu2 %v5628_v2, %s13453_s30  ;;  %v4798_v15 = vpack.c.bf16 %v4734_v10, %v4734_v10  ;;  %v4399_v27 = vpop.f32.mrf.mxu3  ;;  %v14245_v36 = vld [vmem:[%s13560_s14 + $0xfc] sm:$0xf0]  ;;  %344 = vst [vmem:[#allocation2 + $0x10] sm:$0xf] %v13455_v61  ;;  %v3675_v31 = vshrl.u32 %v14251_v16, 16  ;;  %v14277_v32 = vunpack.c.l.b16 %v1174_v28  ;;  %v3659_v5 = vsel %vm13604_vm2, %v14247_v58, %v14235_v42 }
 0x101   : > { %v3045_v19 = vadd.f32 %v2901_v43, %v2363_v9  ;;  %v1904_v22 = vpop.f32.mrf.mxu0  ;;  %v2365_v51 = vpop.f32.mrf.mxu1  ;;  %348 = vst [vmem:[#allocation2 + $0x18] sm:$0xf] %v13455_v61  ;;  %v1196_v35 = vor.u32 %v1195_v8, %v1192_v56  ;;  %v12098_v2 = vld [vmem:[%s13560_s14 + $0x114] sm:$0x1]  ;;  %v1183_v9 = vrot.slane %v1182_v20, 4  ;;  %v1187_v10 = vrot.slane %v1185_v41, 5 }
 0x102   : > { %v5049_v30 = vshrl.u32 %v4798_v15, 16  ;;  %v2366_v24 = vadd.f32 %v2365_v51, %v1904_v22  ;;  %v5052_v38 = vshll.u32 %v4798_v15, 16  ;;  %352 = vst [vmem:[#allocation2 + $0x20] sm:$0xf] %v13455_v61  ;;  %v1201_v43 = vrot.slane %v1199_v26, 5 }
 0x103   : > { %v4543_v49 = vadd.f32 %v4399_v27, %v3045_v19  ;;  %356 = vst [vmem:[#allocation2 + $0x28] sm:$0xf] %v13455_v61  ;;  %v1197_v13 = vrot.slane %v1196_v35, 4  ;;  %v3678_v45 = vshll.u32 %v14251_v16, 16  ;;  %v3684_v19 = vshll.u32 %v12098_v2, 16 }
 0x104   : > { %11571 = vmatmul.msk.bf16.gmra.mxu0 %vm1768_vm3, %v1714_v37  ;;  %11755 = vmatmul.msk.bf16.gmra.mxu1 %vm1768_vm3, %v11648_v29  ;;  %v5051_v25 = vrot.slane %v5049_v30, 7  ;;  %v3672_v37 = vrot.slane %v3670_v48, 5  ;;  %v11912_v29 = vor.u32 %v14245_v36, %v14242_v34  ;;  %360 = vst [vmem:[#allocation2 + $0x30] sm:$0xf] %v13455_v61  ;;  %v1715_v51 = vpack.c.b16 %v14277_v32, %v14273_v21  ;;  %v12100_v30 = vld [vmem:[%s13560_s14 + $0x11c] sm:$0x1] }
 0x105   : > { %vm4607_vm15 = vcmp.ge.f32.partialorder %v4543_v49, 0.0  ;;  %v4671_v54 = vmul.f32 0.2, %v4543_v49  ;;  %12015 = vmatmul.msk.bf16.gmra.mxu2 %vm1768_vm3, %v11908_v39  ;;  %12211 = vmatmul.msk.bf16.gmra.mxu3 %vm1768_vm3, %v4213_v14  ;;  %364 = vst [vmem:[#allocation2 + $0x38] sm:$0xf] %v13455_v61  ;;  %v3689_v62 = vshrl.u32 %v12099_v3, 16  ;;  %v4165_v23 = vunpack.c.l.b16 %v3659_v5 }
 0x106   : > { %v5054_v33 = vor.u32 %v5052_v38, %v5051_v25  ;;  %v3673_v7 = vsel %vm13604_vm2, %v3668_v55, %v3672_v37  ;;  %368 = vst [vmem:[#allocation2 + $0x40] sm:$0xf] %v13455_v61  ;;  %v3680_v28 = vrot.slane %v3678_v45, 5  ;;  %v3692_v58 = vshll.u32 %v12099_v3, 16  ;;  %v14326_v32 = vld [vmem:[%s13560_s14 + $0x10c] sm:$0xf0] }
 0x107   : > { %v4735_v50 = vsel %vm4607_vm15, %v4543_v49, %v4671_v54  ;;  %v4166_v27 = vunpack.c.l.b16 %v3673_v7  ;;  %372 = vst [vmem:[#allocation2 + $0x48] sm:$0xf] %v13455_v61  ;;  %v3691_v49 = vrot.slane %v3689_v62, 4  ;;  %v1188_v16 = vsel %vm13604_vm2, %v1183_v9, %v1187_v10  ;;  %v694_v34 = vld [vmem:[%s13560_s14 + $0x11c] sm:$0x1] }
 0x108   : > { %v2904_v63 = vpop.f32.mrf.mxu2  ;;  %4894 = vrot.lane.b32.xlu1 %v4798_v15, %s13453_s30  ;;  %5247 = vrot.lane.b32.xlu2 %v5054_v33, %s13454_s8  ;;  %v4799_v39 = vpack.c.bf16 %v4735_v50, %v4735_v50  ;;  %v4402_v57 = vpop.f32.mrf.mxu3  ;;  %v3677_v15 = vrot.slane %v3675_v31, 4  ;;  %376 = vst [vmem:[#allocation2 + $0x50] sm:$0xf] %v13455_v61  ;;  %v1202_v53 = vsel %vm13604_vm2, %v1197_v13, %v1201_v43  ;;  %v14307_v54 = vrot.slane %v3684_v19, 5  ;;  %v619_v33 = vld [vmem:[%s13560_s14 + $0x120] sm:$0xf] }
 0x109   : > { %v3046_v0 = vadd.f32 %v2904_v63, %v2366_v24  ;;  %v1906_v47 = vpop.f32.mrf.mxu0  ;;  %v2367_v4 = vpop.f32.mrf.mxu1  ;;  %380 = vst [vmem:[#allocation2 + $0x58] sm:$0xf] %v13455_v61  ;;  %v3694_v56 = vrot.slane %v3692_v58, 5  ;;  %v3698_v50 = vshll.u32 %v12100_v30, 16  ;;  %v1204_v20 = vshrl.u32 %v618_v1, 16 }
 0x10a   : > { %v5630_v6 = vshrl.u32 %v4799_v39, 16  ;;  %v5633_v12 = vshll.u32 %v4799_v39, 16  ;;  %v2368_v40 = vadd.f32 %v2367_v4, %v1906_v47  ;;  %v3681_v24 = vor.u32 %v3680_v28, %v3677_v15  ;;  %384 = vst [vmem:[#allocation2 + $0x60] sm:$0xf] %v13455_v61  ;;  %v695_v13 = vld [vmem:[%s13560_s14 + $0x124] sm:$0x1] }
 0x10b   : > { %v4544_v11 = vadd.f32 %v4402_v57, %v3046_v0  ;;  %v4214_v63 = vpack.c.b16 %v4166_v27, %v4165_v23  ;;  %388 = vst [vmem:[#allocation2 + $0x68] sm:$0xf] %v13455_v61  ;;  %v3695_v21 = vor.u32 %v3694_v56, %v3691_v49  ;;  %v1207_v26 = vshll.u32 %v618_v1, 16  ;;  %v12101_v43 = vld [vmem:[%s13560_s14 + $0x120] sm:$0xf] }
 0x10c   : > { %v5632_v14 = vrot.slane %v5630_v6, 7  ;;  %v3682_v41 = vrot.slane %v3681_v24, 4  ;;  %392 = vst [vmem:[#allocation2 + $0x70] sm:$0xf] %v13455_v61  ;;  %v14321_v47 = vunpack.c.l.b16 %v1188_v16  ;;  %v14323_v4 = vunpack.c.l.b16 %v1202_v53  ;;  %v12102_v28 = vld [vmem:[%s13560_s14 + $0x124] sm:$0x1] }
 0x10d   : > { %vm4608_vm0 = vcmp.ge.f32.partialorder %v4544_v11, 0.0  ;;  %v4672_v22 = vmul.f32 0.2, %v4544_v11  ;;  %396 = vst [vmem:[#allocation2 + $0x78] sm:$0xf] %v13455_v61  ;;  %v3700_v57 = vrot.slane %v3698_v50, 5  ;;  %v11916_v27 = vor.u32 %v14337_v60, %v14334_v59 }
 0x10e   : > { %v5635_v42 = vor.u32 %v5633_v12, %v5632_v14  ;;  %400 = vst [vmem:[#allocation2 + $0x80] sm:$0xf] %v13455_v61  ;;  %v3687_v3 = vsel %vm13604_vm2, %v3682_v41, %v14307_v54  ;;  %v14344_v36 = vrot.slane %v1204_v20, 4  ;;  %v3696_v6 = vrot.slane %v3695_v21, 4  ;;  %v12103_v1 = vld [vmem:[%s13560_s14 + $0x128] sm:$0xf] }
 0x10f   : > { %v4736_v48 = vsel %vm4608_vm0, %v4544_v11, %v4672_v22  ;;  %404 = vst [vmem:[#allocation2 + $0x88] sm:$0xf] %v13455_v61  ;;  %v1209_v7 = vrot.slane %v1207_v26, 5  ;;  %v1221_v9 = vshll.u32 %v619_v33, 16  ;;  %v1213_v19 = vshll.u32 %v694_v34, 16 }
 0x110   : > { %v2906_v18 = vpop.f32.mrf.mxu2  ;;  %5474 = vrot.lane.b32.xlu2 %v4799_v39, %s13454_s8  ;;  %5828 = vrot.lane.b32.xlu0 %v5635_v42, %s13453_s30  ;;  %v4800_v46 = vpack.c.bf16 %v4736_v48, %v4736_v48  ;;  %v4404_v55 = vpop.f32.mrf.mxu3  ;;  %v14313_v39 = vld [vmem:[%s13560_s14 + $0x108] sm:$0xf]  ;;  %408 = vst [vmem:[#allocation2 + $0x90] sm:$0xf] %v13455_v61  ;;  %v1716_v23 = vpack.c.b16 %v14323_v4, %v14321_v47  ;;  %v14361_v30 = vunpack.c.l.b16 %v3687_v3  ;;  %v1227_v58 = vshll.u32 %v695_v13, 16 }
 0x111   : > { %v3047_v25 = vadd.f32 %v2906_v18, %v2368_v40  ;;  %v2370_v38 = vpop.f32.mrf.mxu1  ;;  %v1909_v52 = vpop.f32.mrf.mxu0  ;;  %v11656_v12 = vor.u32 %v14326_v32, %v14313_v39  ;;  %412 = vst [vmem:[#allocation2 + $0x98] sm:$0xf] %v13455_v61  ;;  %v3701_v48 = vsel %vm13604_vm2, %v3696_v6, %v3700_v57  ;;  %v1210_v49 = vor.u32 %v1209_v7, %v14344_v36  ;;  %v12104_v41 = vld [vmem:[%s13560_s14 + $0x12c] sm:$0x1]  ;;  %v620_v36 = vld [vmem:[%s13560_s14 + $0x128] sm:$0xf] }
 0x112   : > { %v5056_v37 = vshrl.u32 %v4800_v46, 16  ;;  %v5059_v0 = vshll.u32 %v4800_v46, 16  ;;  %v2371_v35 = vadd.f32 %v2370_v38, %v1909_v52  ;;  %416 = vst [vmem:[#allocation2 + $0xa0] sm:$0xf] %v13455_v61  ;;  %v3703_v16 = vshrl.u32 %v12101_v43, 16 }
 0x113   : > { %v4545_v8 = vadd.f32 %v4404_v55, %v3047_v25  ;;  %420 = vst [vmem:[#allocation2 + $0xa8] sm:$0xf] %v13455_v61  ;;  %v3706_v24 = vshll.u32 %v12101_v43, 16  ;;  %v14371_v38 = vrot.slane %v1213_v19, 5  ;;  %v4168_v54 = vunpack.c.l.b16 %v3701_v48  ;;  %v621_v43 = vld [vmem:[%s13560_s14 + $0x130] sm:$0xf] }
 0x114   : > { %11572 = vmatmul.msk.bf16.gmra.mxu0 %vm1768_vm3, %v1715_v51  ;;  %11756 = vmatmul.msk.bf16.gmra.mxu1 %vm1768_vm3, %v11652_v17  ;;  %v5058_v31 = vrot.slane %v5056_v37, 7  ;;  %v1218_v17 = vshrl.u32 %v619_v33, 16  ;;  %v1223_v51 = vrot.slane %v1221_v9, 5  ;;  %424 = vst [vmem:[#allocation2 + $0xb0] sm:$0xf] %v13455_v61  ;;  %v3705_v56 = vrot.slane %v3703_v16, 4 }
 0x115   : > { %vm4609_vm1 = vcmp.ge.f32.partialorder %v4545_v8, 0.0  ;;  %v4673_v5 = vmul.f32 0.2, %v4545_v8  ;;  %12016 = vmatmul.msk.bf16.gmra.mxu2 %vm1768_vm3, %v11912_v29  ;;  %12212 = vmatmul.msk.bf16.gmra.mxu3 %vm1768_vm3, %v4214_v63  ;;  %428 = vst [vmem:[#allocation2 + $0xb8] sm:$0xf] %v13455_v61  ;;  %v3708_v33 = vrot.slane %v3706_v24, 5  ;;  %v4215_v3 = vpack.c.b16 %v4168_v54, %v14361_v30 }
 0x116   : > { %v5061_v2 = vor.u32 %v5059_v0, %v5058_v31  ;;  %v1220_v22 = vrot.slane %v1218_v17, 4  ;;  %432 = vst [vmem:[#allocation2 + $0xc0] sm:$0xf] %v13455_v61  ;;  %v3712_v50 = vshll.u32 %v12102_v28, 16  ;;  %v3717_v20 = vshrl.u32 %v12103_v1, 16 }
 0x117   : > { %v4737_v29 = vsel %vm4609_vm1, %v4545_v8, %v4673_v5  ;;  %436 = vst [vmem:[#allocation2 + $0xc8] sm:$0xf] %v13455_v61  ;;  %v1211_v21 = vrot.slane %v1210_v49, 4  ;;  %v14379_v26 = vrot.slane %v1227_v58, 5  ;;  %v3720_v31 = vshll.u32 %v12103_v1, 16 }
 0x118   : > { %v2909_v10 = vpop.f32.mrf.mxu2  ;;  %4896 = vrot.lane.b32.xlu2 %v4800_v46, %s13453_s30  ;;  %5249 = vrot.lane.b32.xlu0 %v5061_v2, %s13454_s8  ;;  %v4801_v11 = vpack.c.bf16 %v4737_v29, %v4737_v29  ;;  %v4407_v62 = vpop.f32.mrf.mxu3  ;;  %v1224_v52 = vor.u32 %v1223_v51, %v1220_v22  ;;  %440 = vst [vmem:[#allocation2 + $0xd0] sm:$0xf] %v13455_v61  ;;  %v3719_v17 = vrot.slane %v3717_v20, 4  ;;  %v3726_v34 = vshll.u32 %v12104_v41, 16  ;;  %v696_v51 = vld [vmem:[%s13560_s14 + $0x12c] sm:$0x1] }
 0x119   : > { %v3048_v14 = vadd.f32 %v2909_v10, %v2371_v35  ;;  %v2372_v15 = vpop.f32.mrf.mxu1  ;;  %v1911_v45 = vpop.f32.mrf.mxu0  ;;  %444 = vst [vmem:[#allocation2 + $0xd8] sm:$0xf] %v13455_v61  ;;  %v3709_v35 = vor.u32 %v3708_v33, %v3705_v56  ;;  %v14388_v7 = vrot.slane %v3712_v50, 5  ;;  %v3722_v9 = vrot.slane %v3720_v31, 5  ;;  %v14414_v60 = vld [vmem:[%s13560_s14 + $0x118] sm:$0xf] }
 0x11a   : > { %v5637_v42 = vshrl.u32 %v4801_v11, 16  ;;  %v5640_v46 = vshll.u32 %v4801_v11, 16  ;;  %v2373_v55 = vadd.f32 %v2372_v15, %v1911_v45  ;;  %v14382_v5 = vrot.slane %v1224_v52, 4  ;;  %448 = vst [vmem:[#allocation2 + $0xe0] sm:$0xf] %v13455_v61 }
 0x11b   : > { %v4546_v40 = vadd.f32 %v4407_v62, %v3048_v14  ;;  %452 = vst [vmem:[#allocation2 + $0xe8] sm:$0xf] %v13455_v61  ;;  %v1232_v14 = vshrl.u32 %v620_v36, 16  ;;  %v3710_v45 = vrot.slane %v3709_v35, 4  ;;  %v3723_v19 = vor.u32 %v3722_v9, %v3719_v17  ;;  %v14446_v31 = vld [vmem:[%s13560_s14 + $0x120] sm:$0xf] }
 0x11c   : > { %v5639_v18 = vrot.slane %v5637_v42, 7  ;;  %456 = vst [vmem:[#allocation2 + $0xf0] sm:$0xf] %v13455_v61  ;;  %v1216_v32 = vsel %vm13604_vm2, %v1211_v21, %v14371_v38  ;;  %v3728_v22 = vrot.slane %v3726_v34, 5  ;;  %v1241_v28 = vshll.u32 %v696_v51, 16 }
 0x11d   : > { %vm4610_vm5 = vcmp.ge.f32.partialorder %v4546_v40, 0.0  ;;  %v4674_v25 = vmul.f32 0.2, %v4546_v40  ;;  %460 = vst [vmem:[#allocation2 + $0xf8] sm:$0xf] %v13455_v61  ;;  %v3724_v62 = vrot.slane %v3723_v19, 4  ;;  %v3715_v16 = vsel %vm13604_vm2, %v3710_v45, %v14388_v7 }
 0x11e   : > { %v5642_v53 = vor.u32 %v5640_v46, %v5639_v18  ;;  %464 = vst [vmem:[#allocation2 + $0x100] sm:$0xf] %v13455_v61  ;;  %v1234_v42 = vrot.slane %v1232_v14, 4  ;;  %v1249_v48 = vshll.u32 %v621_v43, 16  ;;  %v14420_v18 = vunpack.c.l.b16 %v1216_v32  ;;  %v14423_v46 = vld [vmem:[%s13560_s14 + $0x11c] sm:$0xf0] }
 0x11f   : > { %v4738_v37 = vsel %vm4610_vm5, %v4546_v40, %v4674_v25  ;;  %468 = vst [vmem:[#allocation2 + $0x108] sm:$0xf] %v13455_v61  ;;  %v1246_v40 = vshrl.u32 %v621_v43, 16  ;;  %v5238_v25 = vpop.permute.xlu2 %5237  ;;  %v3729_v33 = vsel %vm13604_vm2, %v3724_v62, %v3728_v22  ;;  %v1243_v50 = vrot.slane %v1241_v28, 5  ;;  %v14458_v7 = vld [vmem:[%s13560_s14 + $0x128] sm:$0xf] }
 0x120   : > { %v2911_v8 = vpop.f32.mrf.mxu2  ;;  %5476 = vrot.lane.b32.xlu0 %v4801_v11, %s13454_s8  ;;  %5830 = vrot.lane.b32.xlu1 %v5642_v53, %s13453_s30  ;;  %v4802_v63 = vpack.c.bf16 %v4738_v37, %v4738_v37  ;;  %v4409_v2 = vpop.f32.mrf.mxu3  ;;  %472 = vst [vmem:[#allocation3] sm:$0xf] %v13455_v61  ;;  %v12106_v9 = vld [vmem:[%s13560_s14 + $0x134] sm:$0x1]  ;;  %v14467_v14 = vld [vmem:[%s13560_s14 + $0x12c] sm:$0xf0] }
 0x121   : > { %v3049_v0 = vadd.f32 %v2911_v8, %v2373_v55  ;;  %v1914_v47 = vpop.f32.mrf.mxu0  ;;  %v2375_v4 = vpop.f32.mrf.mxu1  ;;  %476 = vst [vmem:[#allocation3 + $0x8] sm:$0xf] %v13455_v61  ;;  %v697_v55 = vld [vmem:[%s13560_s14 + $0x134] sm:$0x1]  ;;  %v1248_v20 = vrot.slane %v1246_v40, 4  ;;  %v11664_v40 = vor.u32 %v14467_v14, %v14458_v7  ;;  %vm5561_vm13 = vcmask 517184  }
 0x122   : > { %v5063_v57 = vshrl.u32 %v4802_v63, 16  ;;  %v5066_v6 = vshll.u32 %v4802_v63, 16  ;;  %v2376_v10 = vadd.f32 %v2375_v4, %v1914_v47  ;;  %480 = vst [vmem:[#allocation3 + $0x10] sm:$0xf] %v13455_v61  ;;  %v12105_v8 = vld [vmem:[%s13560_s14 + $0x130] sm:$0xf] }
 0x123   : > { %v4547_v29 = vadd.f32 %v4409_v2, %v3049_v0  ;;  %484 = vst [vmem:[#allocation3 + $0x18] sm:$0xf] %v13455_v61  ;;  %v14448_v0 = vunpack.c.l.b16 %v3715_v16  ;;  %v1251_v47 = vrot.slane %v1249_v48, 5  ;;  %v1255_v35 = vshll.u32 %v697_v55, 16  ;;  %v13102_v2 = vld [vmem:[%s13560_s14 + $0x124] sm:$0xf0] }
 0x124   : > { %v4885_v11 = vpop.permute.xlu0 %4884  ;;  %11573 = vmatmul.msk.bf16.gmra.mxu0 %vm1768_vm3, %v1716_v23  ;;  %11757 = vmatmul.msk.bf16.gmra.mxu1 %vm1768_vm3, %v11656_v12  ;;  %v5065_v13 = vrot.slane %v5063_v57, 7  ;;  %v1230_v12 = vsel %vm13604_vm2, %v14382_v5, %v14379_v26  ;;  %v1235_v23 = vshll.u32 %v620_v36, 16  ;;  %v11660_v26 = vor.u32 %v14423_v46, %v14414_v60  ;;  %488 = vst [vmem:[#allocation3 + $0x20] sm:$0xf] %v13455_v61  ;;  %v12107_v22 = vld [vmem:[%s13560_s14 + $0x138] sm:$0xf] }
 0x125   : > { %vm4611_vm8 = vcmp.ge.f32.partialorder %v4547_v29, 0.0  ;;  %v4675_v15 = vmul.f32 0.2, %v4547_v29  ;;  %4981 = vst.msk [vmem:[#allocation2] sm:$0x3] %vm4980_vm4, %v4885_v11  ;;  %12017 = vmatmul.msk.bf16.gmra.mxu2 %vm1768_vm3, %v11916_v27  ;;  %12213 = vmatmul.msk.bf16.gmra.mxu3 %vm1768_vm3, %v4215_v3  ;;  %v14435_v56 = vunpack.c.l.b16 %v1230_v12  ;;  %v4170_v3 = vunpack.c.l.b16 %v3729_v33 }
 0x126   : > { %v5068_v39 = vor.u32 %v5066_v6, %v5065_v13  ;;  %v1237_v24 = vrot.slane %v1235_v23, 5  ;;  %v1252_v34 = vor.u32 %v1251_v47, %v1248_v20  ;;  %492 = vst [vmem:[#allocation3 + $0x28] sm:$0xf] %v13455_v61  ;;  %v11920_v32 = vor.u32 %v13102_v2, %v14446_v31  ;;  %v14505_v20 = vld [vmem:[%s13560_s14 + $0x134] sm:$0xf0] }
 0x127   : > { %v4739_v59 = vsel %vm4611_vm8, %v4547_v29, %v4675_v15  ;;  %v1717_v29 = vpack.c.b16 %v14435_v56, %v14420_v18  ;;  %496 = vst [vmem:[#allocation3 + $0x30] sm:$0xf] %v13455_v61  ;;  %v3734_v15 = vshll.u32 %v12105_v8, 16  ;;  %v14471_v12 = vrot.slane %v1255_v35, 5 }
 0x128   : > { %v2914_v27 = vpop.f32.mrf.mxu2  ;;  %4898 = vrot.lane.b32.xlu0 %v4802_v63, %s13453_s30  ;;  %5251 = vrot.lane.b32.xlu1 %v5068_v39, %s13454_s8  ;;  %v4803_v30 = vpack.c.bf16 %v4739_v59, %v4739_v59  ;;  %v4412_v52 = vpop.f32.mrf.mxu3  ;;  %v1238_v41 = vor.u32 %v1237_v24, %v1234_v42  ;;  %500 = vst [vmem:[#allocation3 + $0x38] sm:$0xf] %v13455_v61  ;;  %v1253_v42 = vrot.slane %v1252_v34, 4  ;;  %v3740_v46 = vshll.u32 %v12106_v9, 16 }
 0x129   : > { %v3050_v49 = vadd.f32 %v2914_v27, %v2376_v10  ;;  %v1916_v58 = vpop.f32.mrf.mxu0  ;;  %v2377_v1 = vpop.f32.mrf.mxu1  ;;  %v3731_v10 = vshrl.u32 %v12105_v8, 16  ;;  %504 = vst [vmem:[#allocation3 + $0x40] sm:$0xf] %v13455_v61  ;;  %v4216_v60 = vpack.c.b16 %v4170_v3, %v14448_v0  ;;  %v12108_v27 = vld [vmem:[%s13560_s14 + $0x13c] sm:$0x1]  ;;  %v3736_v18 = vrot.slane %v3734_v15, 5 }
 0x12a   : > { %v5644_v53 = vshrl.u32 %v4803_v30, 16  ;;  %v5647_v54 = vshll.u32 %v4803_v30, 16  ;;  %v1239_v57 = vrot.slane %v1238_v41, 4  ;;  %v2378_v36 = vadd.f32 %v2377_v1, %v1916_v58  ;;  %508 = vst [vmem:[#allocation3 + $0x48] sm:$0xf] %v13455_v61  ;;  %v14487_v58 = vpop.permute.xlu2 %5464 }
 0x12b   : > { %v4548_v37 = vadd.f32 %v4412_v52, %v3050_v49  ;;  %v3733_v48 = vrot.slane %v3731_v10, 4  ;;  %v14485_v49 = vld [vmem:[%s13560_s14 + $0x138] sm:$0xf]  ;;  %512 = vst [vmem:[#allocation3 + $0x50] sm:$0xf] %v13455_v61  ;;  %v3745_v16 = vshrl.u32 %v12107_v22, 16 }
 0x12c   : > { %v5336_v63 = vld [vmem:[#allocation2] sm:$0x7]  ;;  %v5646_v21 = vrot.slane %v5644_v53, 7  ;;  %v1244_v43 = vsel %vm13604_vm2, %v1239_v57, %v1243_v50  ;;  %516 = vst [vmem:[#allocation3 + $0x58] sm:$0xf] %v13455_v61  ;;  %v3748_v52 = vshll.u32 %v12107_v22, 16  ;;  %v1258_v50 = vsel %vm13604_vm2, %v1253_v42, %v14471_v12 }
 0x12d   : > { %v5337_v4 = vsel %vm14430_vm9, %v5238_v25, %v5336_v63  ;;  %vm4612_vm10 = vcmp.ge.f32.partialorder %v4548_v37, 0.0  ;;  %v4676_v5 = vmul.f32 0.2, %v4548_v37  ;;  %v14478_v23 = vunpack.c.l.b16 %v1244_v43  ;;  %520 = vst [vmem:[#allocation3 + $0x60] sm:$0xf] %v13455_v61  ;;  %v13180_v57 = vld [vmem:[%s17204_s2 + $0x98] sm:$0xff] }
 0x12e   : > { %5338 = vst [vmem:[#allocation2] sm:$0x7] %v5337_v4  ;;  %v5649_v17 = vor.u32 %v5647_v54, %v5646_v21  ;;  %v14496_v54 = vld [vmem:[%s13560_s14 + $0x130] sm:$0xf]  ;;  %v3737_v56 = vor.u32 %v3736_v18, %v3733_v48  ;;  %v3742_v33 = vrot.slane %v3740_v46, 5  ;;  %v3747_v55 = vrot.slane %v3745_v16, 4  ;;  %7188 = vmatpush.bf16.msrb.mxu2 %v13180_v57 }
 0x12f   : > { %v4740_v6 = vsel %vm4612_vm10, %v4548_v37, %v4676_v5  ;;  %v698_v37 = vld [vmem:[%s13560_s14 + $0x13c] sm:$0x1]  ;;  %524 = vst [vmem:[#allocation3 + $0x68] sm:$0xf] %v13455_v61  ;;  %v3750_v8 = vrot.slane %v3748_v52, 5  ;;  %v3754_v63 = vshll.u32 %v12108_v27, 16  ;;  %v14520_v9 = vunpack.c.l.b16 %v1258_v50 }
 0x130   : > { %v2916_v11 = vpop.f32.mrf.mxu2  ;;  %5478 = vrot.lane.b32.xlu1 %v4803_v30, %s13454_s8  ;;  %5832 = vrot.lane.b32.xlu2 %v5649_v17, %s13453_s30  ;;  %v4804_v13 = vpack.c.bf16 %v4740_v6, %v4740_v6  ;;  %v4414_v51 = vpop.f32.mrf.mxu3  ;;  %528 = vst [vmem:[#allocation3 + $0x70] sm:$0xf] %v13455_v61  ;;  %v3738_v31 = vrot.slane %v3737_v56, 4  ;;  %v14511_v0 = vld [vmem:[%s13560_s14 + $0x140] sm:$0xf]  ;;  %v1260_v47 = vshrl.u32 %v14485_v49, 16  ;;  %v11924_v15 = vor.u32 %v14505_v20, %v14496_v54 }
 0x131   : > { %v3051_v45 = vadd.f32 %v2916_v11, %v2378_v36  ;;  %v2380_v19 = vpop.f32.mrf.mxu1  ;;  %v1919_v39 = vpop.f32.mrf.mxu0  ;;  %v1263_v4 = vshll.u32 %v14485_v49, 16  ;;  %532 = vst [vmem:[#allocation3 + $0x78] sm:$0xf] %v13455_v61  ;;  %v3751_v2 = vor.u32 %v3750_v8, %v3747_v55  ;;  %v3756_v3 = vrot.slane %v3754_v63, 5  ;;  %v699_v11 = vld [vmem:[%s13560_s14 + $0x144] sm:$0x1] }
 0x132   : > { %v14475_v59 = vpop.permute.xlu0 %5818  ;;  %v5070_v62 = vshrl.u32 %v4804_v13, 16  ;;  %v5073_v28 = vshll.u32 %v4804_v13, 16  ;;  %v2381_v25 = vadd.f32 %v2380_v19, %v1919_v39  ;;  %v1269_v34 = vshll.u32 %v698_v37, 16  ;;  %536 = vst [vmem:[#allocation3 + $0x80] sm:$0xf] %v13455_v61  ;;  %v13188_v39 = vld [vmem:[%s17204_s2 + $0xd8] sm:$0xff]  ;;  %v14542_v22 = vpop.permute.xlu2 %5466 }
 0x133   : > { %v4549_v30 = vadd.f32 %v4414_v51, %v3051_v45  ;;  %v3743_v10 = vsel %vm13604_vm2, %v3738_v31, %v3742_v33  ;;  %540 = vst [vmem:[#allocation3 + $0x88] sm:$0xf] %v13455_v61  ;;  %v3752_v45 = vrot.slane %v3751_v2, 4  ;;  %v13148_v12 = vld [vmem:[%s17204_s2 + $0x18] sm:$0xff]  ;;  %v1265_v42 = vrot.slane %v1263_v4, 5  ;;  %7950 = vmatpush.bf16.msrb.mxu3 %v13188_v39 }
 0x134   : > { %11574 = vmatmul.msk.bf16.gmra.mxu0 %vm1768_vm3, %v1717_v29  ;;  %11758 = vmatmul.msk.bf16.gmra.mxu1 %vm1768_vm3, %v11660_v26  ;;  %v5072_v1 = vrot.slane %v5070_v62, 7  ;;  %v14530_v19 = vunpack.c.l.b16 %v3743_v10  ;;  %544 = vst [vmem:[#allocation4] sm:$0xf] %v13455_v61  ;;  %v1262_v62 = vrot.slane %v1260_v47, 4  ;;  %v1271_v27 = vrot.slane %v1269_v34, 5 }
 0x135   : > { %vm4613_vm11 = vcmp.ge.f32.partialorder %v4549_v30, 0.0  ;;  %v4677_v24 = vmul.f32 0.2, %v4549_v30  ;;  %12018 = vmatmul.msk.bf16.gmra.mxu2 %vm1768_vm3, %v11920_v32  ;;  %12214 = vmatmul.msk.bf16.gmra.mxu3 %vm1768_vm3, %v4216_v60  ;;  %v13156_v32 = vld [vmem:[%s17204_s2 + $0x58] sm:$0xff]  ;;  %548 = vst [vmem:[#allocation4 + $0x8] sm:$0xf] %v13455_v61  ;;  %v3757_v48 = vsel %vm13604_vm2, %v3752_v45, %v3756_v3  ;;  %v1718_v37 = vpack.c.b16 %v14520_v9, %v14478_v23 }
 0x136   : > { %v5075_v53 = vor.u32 %v5073_v28, %v5072_v1  ;;  %6673 = vmatpush.bf16.msrb.mxu0 %v13156_v32  ;;  %v1274_v49 = vshrl.u32 %v14511_v0, 16  ;;  %552 = vst [vmem:[#allocation4 + $0x10] sm:$0xf] %v13455_v61  ;;  %v14554_v18 = vunpack.c.l.b16 %v3757_v48  ;;  %6906 = vmatpush.bf16.msrb.mxu1 %v13148_v12  ;;  %v1266_v46 = vor.u32 %v1265_v42, %v1262_v62  ;;  %v14562_v33 = vld [vmem:[%s13560_s14 + $0x13c] sm:$0xf0] }
 0x137   : > { %v4741_v41 = vsel %vm4613_vm11, %v4549_v30, %v4677_v24  ;;  %v14547_v30 = vld [vmem:[%s13560_s14 + $0x140] sm:$0xf]  ;;  %v1277_v16 = vshll.u32 %v14511_v0, 16  ;;  %v14558_v24 = vld [vmem:[%s13560_s14 + $0x138] sm:$0xf]  ;;  %v1283_v56 = vshll.u32 %v699_v11, 16 }
 0x138   : > { %v2919_v21 = vpop.f32.mrf.mxu2  ;;  %4900 = vrot.lane.b32.xlu1 %v4804_v13, %s13453_s30  ;;  %5253 = vrot.lane.b32.xlu2 %v5075_v53, %s13454_s8  ;;  %v4805_v26 = vpack.c.bf16 %v4741_v41, %v4741_v41  ;;  %v4417_v36 = vpop.f32.mrf.mxu3  ;;  %556 = vst [vmem:[#allocation4 + $0x18] sm:$0xf] %v13455_v61  ;;  %v1276_v53 = vrot.slane %v1274_v49, 4  ;;  %v1267_v50 = vrot.slane %v1266_v46, 4  ;;  %v14570_v63 = vld [vmem:[%s13560_s14 + $0x140] sm:$0xf]  ;;  %v4217_v47 = vpack.c.b16 %v14554_v18, %v14530_v19 }
 0x139   : > { %v3052_v5 = vadd.f32 %v2919_v21, %v2381_v25  ;;  %v2382_v35 = vpop.f32.mrf.mxu1  ;;  %v1921_v17 = vpop.f32.mrf.mxu0  ;;  %560 = vst [vmem:[#allocation4 + $0x20] sm:$0xf] %v13455_v61  ;;  %v1279_v8 = vrot.slane %v1277_v16, 5  ;;  %v14576_v4 = vld [vmem:[%s13560_s14 + $0x144] sm:$0xf0]  ;;  %v3759_v23 = vshrl.u32 %v14547_v30, 16  ;;  %v11668_v3 = vor.u32 %v14562_v33, %v14558_v24 }
 0x13a   : > { %v5651_v29 = vshrl.u32 %v4805_v26, 16  ;;  %v5654_v6 = vshll.u32 %v4805_v26, 16  ;;  %v14526_v43 = vpop.permute.xlu1 %5239  ;;  %v14544_v51 = vpop.permute.xlu0 %4886  ;;  %v2383_v25 = vadd.f32 %v2382_v35, %v1921_v17  ;;  %564 = vst [vmem:[#allocation4 + $0x28] sm:$0xf] %v13455_v61  ;;  %v1272_v2 = vsel %vm13604_vm2, %v1267_v50, %v1271_v27  ;;  %v12110_v57 = vld [vmem:[%s13560_s14 + $0x144] sm:$0x1] }
 0x13b   : > { %v4550_v13 = vadd.f32 %v4417_v36, %v3052_v5  ;;  %568 = vst [vmem:[#allocation4 + $0x30] sm:$0xf] %v13455_v61  ;;  %v14588_v9 = vunpack.c.l.b16 %v1272_v2  ;;  %v12111_v10 = vld [vmem:[%s13560_s14 + $0x148] sm:$0xf]  ;;  %v12112_v11 = vld [vmem:[%s13560_s14 + $0x14c] sm:$0x1]  ;;  %v11928_v7 = vor.u32 %v14576_v4, %v14570_v63 }
 0x13c   : > { %v5653_v60 = vrot.slane %v5651_v29, 7  ;;  %572 = vst [vmem:[#allocation4 + $0x38] sm:$0xf] %v13455_v61  ;;  %v3761_v39 = vrot.slane %v3759_v23, 4  ;;  %v3762_v32 = vshll.u32 %v14547_v30, 16  ;;  %v3768_v12 = vshll.u32 %v12110_v57, 16 }
 0x13d   : > { %vm4614_vm12 = vcmp.ge.f32.partialorder %v4550_v13, 0.0  ;;  %v4678_v28 = vmul.f32 0.2, %v4550_v13  ;;  %576 = vst [vmem:[#allocation4 + $0x40] sm:$0xf] %v13455_v61  ;;  %v3776_v20 = vshll.u32 %v12111_v10, 16 }
 0x13e   : > { %v5656_v1 = vor.u32 %v5654_v6, %v5653_v60  ;;  %v1280_v6 = vor.u32 %v1279_v8, %v1276_v53  ;;  %580 = vst [vmem:[#allocation4 + $0x48] sm:$0xf] %v13455_v61  ;;  %v3770_v42 = vrot.slane %v3768_v12, 5  ;;  %v3773_v61 = vshrl.u32 %v12111_v10, 16  ;;  %v624_v30 = vld [vmem:[%s13560_s14 + $0x148] sm:$0xf] }
 0x13f   : > { %v4742_v52 = vsel %vm4614_vm12, %v4550_v13, %v4678_v28  ;;  %v14593_v13 = vpop.permute.xlu2 %5468  ;;  %4982 = vst.msk [vmem:[#allocation2 + $0x8] sm:$0x3] %vm4980_vm4, %v14544_v51  ;;  %v14620_v18 = vld [vmem:[%s13560_s14 + $0x150] sm:$0xf]  ;;  %vm5914_vm15 = vcmask 59392   ;;  %v1291_v2 = vshll.u32 %v624_v30, 16 }
 0x140   : > { %v2921_v55 = vpop.f32.mrf.mxu2  ;;  %5480 = vrot.lane.b32.xlu2 %v4805_v26, %s13454_s8  ;;  %5834 = vrot.lane.b32.xlu0 %v5656_v1, %s13453_s30  ;;  %v4806_v41 = vpack.c.bf16 %v4742_v52, %v4742_v52  ;;  %v1285_v26 = vrot.slane %v1283_v56, 5  ;;  %v4419_v5 = vpop.f32.mrf.mxu3  ;;  %v1281_v62 = vrot.slane %v1280_v6, 4  ;;  %v3775_v1 = vrot.slane %v3773_v61, 4  ;;  %v700_v56 = vld [vmem:[%s13560_s14 + $0x14c] sm:$0x1]  ;;  %vm14672_vm1 = vmand %vm5914_vm15, %vm5334_vm7 }
 0x141   : > { %v3053_v21 = vadd.f32 %v2921_v55, %v2383_v25  ;;  %v2385_v31 = vpop.f32.mrf.mxu1  ;;  %v1924_v0 = vpop.f32.mrf.mxu0  ;;  %v3778_v52 = vrot.slane %v3776_v20, 5  ;;  %v1288_v55 = vshrl.u32 %v624_v30, 16  ;;  %v1297_v57 = vshll.u32 %v700_v56, 16  ;;  %v14631_v6 = vld [vmem:[%s13560_s14 + $0x14c] sm:$0xf0] }
 0x142   : > { %v5077_v35 = vshrl.u32 %v4806_v41, 16  ;;  %v5080_v17 = vshll.u32 %v4806_v41, 16  ;;  %v14586_v36 = vpop.permute.xlu1 %5820  ;;  %v2386_v29 = vadd.f32 %v2385_v31, %v1924_v0  ;;  %v1286_v54 = vsel %vm13604_vm2, %v1281_v62, %v1285_v26  ;;  %v14644_v61 = vld [vmem:[%s13560_s14 + $0x150] sm:$0xf]  ;;  %v14651_v30 = vld [vmem:[%s13560_s14 + $0x154] sm:$0xf0] }
 0x143   : > { %v4551_v34 = vadd.f32 %v4419_v5, %v3053_v21  ;;  %v14617_v48 = vunpack.c.l.b16 %v1286_v54  ;;  %v1290_v26 = vrot.slane %v1288_v55, 4 }
 0x144   : > { %v4889_v45 = vpop.permute.xlu0 %4888  ;;  %11575 = vmatmul.msk.bf16.gmra.mxu0 %vm1768_vm3, %v1718_v37  ;;  %11759 = vmatmul.msk.bf16.gmra.mxu1 %vm1768_vm3, %v11664_v40  ;;  %v5079_v19 = vrot.slane %v5077_v35, 7  ;;  %v3764_v40 = vrot.slane %v3762_v32, 5 }
 0x145   : > { %vm4615_vm14 = vcmp.ge.f32.partialorder %v4551_v34, 0.0  ;;  %v4679_v60 = vmul.f32 0.2, %v4551_v34  ;;  %12019 = vmatmul.msk.bf16.gmra.mxu2 %vm1768_vm3, %v11924_v15  ;;  %4983 = vst.msk [vmem:[#allocation2 + $0x10] sm:$0x3] %vm4980_vm4, %v4889_v45  ;;  %12215 = vmatmul.msk.bf16.gmra.mxu3 %vm1768_vm3, %v4217_v47  ;;  %v3782_v15 = vshll.u32 %v12112_v11, 16  ;;  %v1719_v21 = vpack.c.b16 %v14617_v48, %v14588_v9 }
 0x146   : > { %v5082_v14 = vor.u32 %v5080_v17, %v5079_v19  ;;  %v3765_v49 = vor.u32 %v3764_v40, %v3761_v39  ;;  %v3779_v47 = vor.u32 %v3778_v52, %v3775_v1  ;;  %v701_v17 = vld [vmem:[%s13560_s14 + $0x154] sm:$0x1]  ;;  %v5339_v10 = vld [vmem:[#allocation2 + $0x8] sm:$0x7]  ;;  %v1305_v1 = vshll.u32 %v14620_v18, 16 }
 0x147   : > { %v4743_v27 = vsel %vm4615_vm14, %v4551_v34, %v4679_v60  ;;  %v3784_v53 = vrot.slane %v3782_v15, 5  ;;  %v1302_v34 = vshrl.u32 %v14620_v18, 16  ;;  %v5340_v19 = vsel %vm14430_vm9, %v14526_v43, %v5339_v10 }
 0x148   : > { %v2924_v28 = vpop.f32.mrf.mxu2  ;;  %4902 = vrot.lane.b32.xlu2 %v4806_v41, %s13453_s30  ;;  %5255 = vrot.lane.b32.xlu0 %v5082_v14, %s13454_s8  ;;  %v4807_v51 = vpack.c.bf16 %v4743_v27, %v4743_v27  ;;  %v4422_v37 = vpop.f32.mrf.mxu3  ;;  %v3766_v0 = vrot.slane %v3765_v49, 4  ;;  %v3780_v45 = vrot.slane %v3779_v47, 4  ;;  %v1293_v60 = vrot.slane %v1291_v2, 5  ;;  %5341 = vst [vmem:[#allocation2 + $0x8] sm:$0x7] %v5340_v19 }
 0x149   : > { %v3054_v46 = vadd.f32 %v2924_v28, %v2386_v29  ;;  %v2387_v16 = vpop.f32.mrf.mxu1  ;;  %v1926_v25 = vpop.f32.mrf.mxu0  ;;  %v14628_v29 = vld [vmem:[%s13560_s14 + $0x148] sm:$0xf]  ;;  %5562 = vst.msk [vmem:[#allocation2 + $0x8] sm:$0x3] %vm5561_vm13, %v14487_v58  ;;  %v1304_v15 = vrot.slane %v1302_v34, 4  ;;  %v1311_v58 = vshll.u32 %v701_v17, 16 }
 0x14a   : > { %v2388_v41 = vadd.f32 %v2387_v16, %v1926_v25  ;;  %v5658_v50 = vshrl.u32 %v4807_v51, 16  ;;  %v5661_v8 = vshll.u32 %v4807_v51, 16  ;;  %v5242_v23 = vpop.permute.xlu1 %5241  ;;  %v3771_v11 = vsel %vm13604_vm2, %v3766_v0, %v3770_v42  ;;  %v12115_v47 = vld [vmem:[%s13560_s14 + $0x158] sm:$0xf] }
 0x14b   : > { %v4552_v31 = vadd.f32 %v4422_v37, %v3054_v46  ;;  %v4173_v12 = vunpack.c.l.b16 %v3771_v11  ;;  %v3785_v14 = vsel %vm13604_vm2, %v3780_v45, %v3784_v53  ;;  %v1299_v42 = vrot.slane %v1297_v57, 5  ;;  %v12116_v45 = vld [vmem:[%s13560_s14 + $0x15c] sm:$0x1] }
 0x14c   : > { %v4893_v5 = vpop.permute.xlu2 %4892  ;;  %v5660_v35 = vrot.slane %v5658_v50, 7  ;;  %v5342_v39 = vld [vmem:[#allocation2 + $0x10] sm:$0x7]  ;;  %v4174_v27 = vunpack.c.l.b16 %v3785_v14  ;;  %v1294_v20 = vor.u32 %v1293_v60, %v1290_v26  ;;  %v11672_v46 = vor.u32 %v14631_v6, %v14628_v29  ;;  %v12118_v6 = vld [vmem:[%s13560_s14 + $0x164] sm:$0x1] }
 0x14d   : > { %vm4616_vm0 = vcmp.ge.f32.partialorder %v4552_v31, 0.0  ;;  %v4680_v9 = vmul.f32 0.2, %v4552_v31  ;;  %4985 = vst.msk [vmem:[#allocation2 + $0x20] sm:$0x3] %vm4980_vm4, %v4893_v5  ;;  %v5343_v62 = vsel %vm14430_vm9, %v5242_v23, %v5342_v39  ;;  %v1307_v50 = vrot.slane %v1305_v1, 5 }
 0x14e   : > { %v5663_v32 = vor.u32 %v5661_v8, %v5660_v35  ;;  %5344 = vst [vmem:[#allocation2 + $0x10] sm:$0x7] %v5343_v62  ;;  %v4218_v53 = vpack.c.b16 %v4174_v27, %v4173_v12  ;;  %v1313_v18 = vrot.slane %v1311_v58, 5  ;;  %v12114_v8 = vld [vmem:[%s13560_s14 + $0x154] sm:$0x1]  ;;  %v11932_v0 = vor.u32 %v14651_v30, %v14644_v61 }
 0x14f   : > { %v4744_v40 = vsel %vm4616_vm0, %v4552_v31, %v4680_v9  ;;  %5563 = vst.msk [vmem:[#allocation2 + $0x10] sm:$0x3] %vm5561_vm13, %v14542_v22  ;;  %v1308_v33 = vor.u32 %v1307_v50, %v1304_v15  ;;  %v3796_v9 = vshll.u32 %v12114_v8, 16  ;;  %v3801_v63 = vshrl.u32 %v12115_v47, 16 }
 0x150   : > { %v2926_v43 = vpop.f32.mrf.mxu2  ;;  %5482 = vrot.lane.b32.xlu0 %v4807_v51, %s13454_s8  ;;  %5836 = vrot.lane.b32.xlu1 %v5663_v32, %s13453_s30  ;;  %v4808_v54 = vpack.c.bf16 %v4744_v40, %v4744_v40  ;;  %v12113_v51 = vld [vmem:[%s13560_s14 + $0x150] sm:$0xf]  ;;  %v4424_v16 = vpop.f32.mrf.mxu3  ;;  %v5916_v57 = vld [vmem:[#allocation2 + $0x8] sm:$0x7]  ;;  %v3804_v39 = vshll.u32 %v12115_v47, 16 }
 0x151   : > { %v3055_v28 = vadd.f32 %v2926_v43, %v2388_v41  ;;  %v2390_v48 = vpop.f32.mrf.mxu1  ;;  %v1929_v49 = vpop.f32.mrf.mxu0  ;;  %v1295_v41 = vrot.slane %v1294_v20, 4  ;;  %v3787_v26 = vshrl.u32 %v12113_v51, 16  ;;  %v3790_v23 = vshll.u32 %v12113_v51, 16  ;;  %v626_v32 = vld [vmem:[%s13560_s14 + $0x158] sm:$0xf] }
 0x152   : > { %v14659_v25 = vpop.permute.xlu0 %5822  ;;  %v2391_v52 = vadd.f32 %v2390_v48, %v1929_v49  ;;  %v5084_v56 = vshrl.u32 %v4808_v54, 16  ;;  %v5087_v55 = vshll.u32 %v4808_v54, 16  ;;  %v1309_v10 = vrot.slane %v1308_v33, 4  ;;  %v627_v51 = vld [vmem:[%s13560_s14 + $0x160] sm:$0xf] }
 0x153   : > { %v4553_v37 = vadd.f32 %v4424_v16, %v3055_v28  ;;  %v1300_v24 = vsel %vm13604_vm2, %v1295_v41, %v1299_v42  ;;  %v3789_v17 = vrot.slane %v3787_v26, 4  ;;  %v3792_v2 = vrot.slane %v3790_v23, 5  ;;  %v703_v26 = vld [vmem:[%s13560_s14 + $0x164] sm:$0x1] }
 0x154   : > { %v4891_v31 = vpop.permute.xlu1 %4890  ;;  %11576 = vmatmul.msk.bf16.gmra.mxu0 %vm1768_vm3, %v1719_v21  ;;  %11760 = vmatmul.msk.bf16.gmra.mxu1 %vm1768_vm3, %v11668_v3  ;;  %v5086_v22 = vrot.slane %v5084_v56, 7  ;;  %v14683_v35 = vunpack.c.l.b16 %v1300_v24  ;;  %v5917_v4 = vsel %vm14672_vm1, %v14475_v59, %v5916_v57  ;;  %v1314_v40 = vsel %vm13604_vm2, %v1309_v10, %v1313_v18  ;;  %v702_v18 = vld [vmem:[%s13560_s14 + $0x15c] sm:$0x1] }
 0x155   : > { %vm4617_vm5 = vcmp.ge.f32.partialorder %v4553_v37, 0.0  ;;  %v4681_v21 = vmul.f32 0.2, %v4553_v37  ;;  %4984 = vst.msk [vmem:[#allocation2 + $0x18] sm:$0x3] %vm4980_vm4, %v4891_v31  ;;  %12020 = vmatmul.msk.bf16.gmra.mxu2 %vm1768_vm3, %v11928_v7  ;;  %12216 = vmatmul.msk.bf16.gmra.mxu3 %vm1768_vm3, %v4218_v53  ;;  %v3793_v19 = vor.u32 %v3792_v2, %v3789_v17  ;;  %v3798_v59 = vrot.slane %v3796_v9, 5 }
 0x156   : > { %v5089_v3 = vor.u32 %v5087_v55, %v5086_v22  ;;  %5918 = vst [vmem:[#allocation2 + $0x8] sm:$0x7] %v5917_v4  ;;  %v5919_v12 = vld [vmem:[#allocation2 + $0x10] sm:$0x7]  ;;  %v3803_v42 = vrot.slane %v3801_v63, 4  ;;  %v1677_v49 = vunpack.c.l.b16 %v1314_v40  ;;  %v3806_v58 = vrot.slane %v3804_v39, 5 }
 0x157   : > { %v4745_v34 = vsel %vm4617_vm5, %v4553_v37, %v4681_v21  ;;  %v5920_v43 = vsel %vm14672_vm1, %v14586_v36, %v5919_v12  ;;  %v3794_v1 = vrot.slane %v3793_v19, 4  ;;  %v3810_v56 = vshll.u32 %v12116_v45, 16  ;;  %v12117_v12 = vld [vmem:[%s13560_s14 + $0x160] sm:$0xf] }
 0x158   : > { %v2929_v7 = vpop.f32.mrf.mxu2  ;;  %4904 = vrot.lane.b32.xlu0 %v4808_v54, %s13453_s30  ;;  %5257 = vrot.lane.b32.xlu1 %v5089_v3, %s13454_s8  ;;  %v4809_v11 = vpack.c.bf16 %v4745_v34, %v4745_v34  ;;  %v4427_v27 = vpop.f32.mrf.mxu3  ;;  %5921 = vst [vmem:[#allocation2 + $0x10] sm:$0x7] %v5920_v43  ;;  %v1316_v55 = vshrl.u32 %v626_v32, 16  ;;  %v1319_v36 = vshll.u32 %v626_v32, 16  ;;  %v1720_v50 = vpack.c.b16 %v1677_v49, %v14683_v35  ;;  %v14715_v32 = vld [vmem:[%s13560_s14 + $0x158] sm:$0xf] }
 0x159   : > { %v3056_v60 = vadd.f32 %v2929_v7, %v2391_v52  ;;  %v2392_v62 = vpop.f32.mrf.mxu1  ;;  %v1931_v14 = vpop.f32.mrf.mxu0  ;;  %v3799_v31 = vsel %vm13604_vm2, %v3794_v1, %v3798_v59  ;;  %v3807_v22 = vor.u32 %v3806_v58, %v3803_v42  ;;  %v3812_v47 = vrot.slane %v3810_v56, 5  ;;  %v14723_v43 = vld [vmem:[%s13560_s14 + $0x15c] sm:$0xf0]  ;;  %v14734_v49 = vld [vmem:[%s13560_s14 + $0x164] sm:$0xf0] }
 0x15a   : > { %v2393_v54 = vadd.f32 %v2392_v62, %v1931_v14  ;;  %v5665_v20 = vshrl.u32 %v4809_v11, 16  ;;  %v5668_v15 = vshll.u32 %v4809_v11, 16  ;;  %v14698_v48 = vpop.permute.xlu2 %5826  ;;  %v5244_v52 = vpop.permute.xlu0 %5243  ;;  %v4175_v23 = vunpack.c.l.b16 %v3799_v31  ;;  %v12119_v56 = vld [vmem:[%s13560_s14 + $0x168] sm:$0xf] }
 0x15b   : > { %v4554_v28 = vadd.f32 %v4427_v27, %v3056_v60  ;;  %v1318_v24 = vrot.slane %v1316_v55, 4  ;;  %v1321_v33 = vrot.slane %v1319_v36, 5  ;;  %v3808_v35 = vrot.slane %v3807_v22, 4  ;;  %v14726_v27 = vld [vmem:[%s13560_s14 + $0x160] sm:$0xf] }
 0x15c   : > { %v5345_v16 = vld [vmem:[#allocation2 + $0x18] sm:$0x7]  ;;  %v5667_v53 = vrot.slane %v5665_v20, 7  ;;  %v1325_v2 = vshll.u32 %v702_v18, 16  ;;  %v1330_v57 = vshrl.u32 %v627_v51, 16  ;;  %v1339_v4 = vshll.u32 %v703_v26, 16 }
 0x15d   : > { %vm4618_vm6 = vcmp.ge.f32.partialorder %v4554_v28, 0.0  ;;  %v4682_v37 = vmul.f32 0.2, %v4554_v28  ;;  %v5346_v41 = vsel %vm14430_vm9, %v5244_v52, %v5345_v16  ;;  %v1322_v63 = vor.u32 %v1321_v33, %v1318_v24 }
 0x15e   : > { %5347 = vst [vmem:[#allocation2 + $0x18] sm:$0x7] %v5346_v41  ;;  %v5670_v8 = vor.u32 %v5668_v15, %v5667_v53  ;;  %v1327_v42 = vrot.slane %v1325_v2, 5  ;;  %v1332_v20 = vrot.slane %v1330_v57, 4  ;;  %v11676_v53 = vor.u32 %v14723_v43, %v14715_v32 }
 0x15f   : > { %5564 = vst.msk [vmem:[#allocation2 + $0x18] sm:$0x3] %vm5561_vm13, %v14593_v13  ;;  %v4746_v21 = vsel %vm4618_vm6, %v4554_v28, %v4682_v37  ;;  %v1333_v13 = vshll.u32 %v627_v51, 16  ;;  %v1323_v59 = vrot.slane %v1322_v63, 4  ;;  %v1341_v28 = vrot.slane %v1339_v4, 5 }
 0x160   : > { %v2931_v3 = vpop.f32.mrf.mxu2  ;;  %5484 = vrot.lane.b32.xlu1 %v4809_v11, %s13454_s8  ;;  %5838 = vrot.lane.b32.xlu2 %v5670_v8, %s13453_s30  ;;  %v4810_v17 = vpack.c.bf16 %v4746_v21, %v4746_v21  ;;  %v4429_v7 = vpop.f32.mrf.mxu3  ;;  %v3813_v11 = vsel %vm13604_vm2, %v3808_v35, %v3812_v47  ;;  %v3815_v55 = vshrl.u32 %v12117_v12, 16  ;;  %v3824_v18 = vshll.u32 %v12118_v6, 16  ;;  %v5348_v21 = vld [vmem:[#allocation2 + $0x20] sm:$0x7] }
 0x161   : > { %v3057_v34 = vadd.f32 %v2931_v3, %v2393_v54  ;;  %v2395_v10 = vpop.f32.mrf.mxu1  ;;  %v1934_v9 = vpop.f32.mrf.mxu0  ;;  %v4176_v40 = vunpack.c.l.b16 %v3813_v11  ;;  %v1335_v15 = vrot.slane %v1333_v13, 5  ;;  %v1328_v29 = vsel %vm13604_vm2, %v1323_v59, %v1327_v42  ;;  %v628_v13 = vld [vmem:[%s13560_s14 + $0x168] sm:$0xf] }
 0x162   : > { %v2396_v45 = vadd.f32 %v2395_v10, %v1934_v9  ;;  %v5091_v19 = vshrl.u32 %v4810_v17, 16  ;;  %v5094_v39 = vshll.u32 %v4810_v17, 16  ;;  %v14718_v62 = vpop.permute.xlu1 %5824  ;;  %v14720_v14 = vpop.permute.xlu2 %5247  ;;  %v14743_v52 = vunpack.c.l.b16 %v1328_v29  ;;  %v12120_v10 = vld [vmem:[%s13560_s14 + $0x16c] sm:$0x1] }
 0x163   : > { %v4555_v60 = vadd.f32 %v4429_v7, %v3057_v34  ;;  %v4219_v58 = vpack.c.b16 %v4176_v40, %v4175_v23  ;;  %v1336_v16 = vor.u32 %v1335_v15, %v1332_v20  ;;  %v3817_v22 = vrot.slane %v3815_v55, 4 }
 0x164   : > { %11577 = vmatmul.msk.bf16.gmra.mxu0 %vm1768_vm3, %v1720_v50  ;;  %11761 = vmatmul.msk.bf16.gmra.mxu1 %vm1768_vm3, %v11672_v46  ;;  %v5093_v54 = vrot.slane %v5091_v19, 7  ;;  %v3818_v50 = vshll.u32 %v12117_v12, 16  ;;  %v3829_v47 = vshrl.u32 %v12119_v56, 16  ;;  %v3832_v26 = vshll.u32 %v12119_v56, 16  ;;  %v704_v19 = vld [vmem:[%s13560_s14 + $0x16c] sm:$0x1] }
 0x165   : > { %vm4619_vm8 = vcmp.ge.f32.partialorder %v4555_v60, 0.0  ;;  %v4683_v1 = vmul.f32 0.2, %v4555_v60  ;;  %12021 = vmatmul.msk.bf16.gmra.mxu2 %vm1768_vm3, %v11932_v0  ;;  %12217 = vmatmul.msk.bf16.gmra.mxu3 %vm1768_vm3, %v4219_v58  ;;  %v11936_v0 = vor.u32 %v14734_v49, %v14726_v27  ;;  %v1337_v41 = vrot.slane %v1336_v16, 4 }
 0x166   : > { %v5922_v46 = vld [vmem:[#allocation2 + $0x18] sm:$0x7]  ;;  %v5096_v51 = vor.u32 %v5094_v39, %v5093_v54  ;;  %v3820_v9 = vrot.slane %v3818_v50, 5  ;;  %v3826_v63 = vrot.slane %v3824_v18, 5  ;;  %v3834_v11 = vrot.slane %v3832_v26, 5  ;;  %v5471_v39 = vpop.permute.xlu0 %5470 }
 0x167   : > { %v5923_v61 = vsel %vm14672_vm1, %v14659_v25, %v5922_v46  ;;  %v4747_v30 = vsel %vm4619_vm8, %v4555_v60, %v4683_v1  ;;  %v1342_v35 = vsel %vm13604_vm2, %v1337_v41, %v1341_v28  ;;  %v3838_v54 = vshll.u32 %v12120_v10, 16  ;;  %v14782_v26 = vld [vmem:[%s13560_s14 + $0x16c] sm:$0xf0] }
 0x168   : > { %5924 = vst [vmem:[#allocation2 + $0x18] sm:$0x7] %v5923_v61  ;;  %v2934_v36 = vpop.f32.mrf.mxu2  ;;  %4906 = vrot.lane.b32.xlu1 %v4810_v17, %s13453_s30  ;;  %5259 = vrot.lane.b32.xlu2 %v5096_v51, %s13454_s8  ;;  %v4811_v37 = vpack.c.bf16 %v4747_v30, %v4747_v30  ;;  %v4432_v23 = vpop.f32.mrf.mxu3  ;;  %v1679_v34 = vunpack.c.l.b16 %v1342_v35  ;;  %v3821_v40 = vor.u32 %v3820_v9, %v3817_v22  ;;  %v1344_v20 = vshrl.u32 %v628_v13, 16 }
 0x169   : > { %v3058_v8 = vadd.f32 %v2934_v36, %v2396_v45  ;;  %v2397_v25 = vpop.f32.mrf.mxu1  ;;  %v1936_v31 = vpop.f32.mrf.mxu0  ;;  %v3831_v45 = vrot.slane %v3829_v47, 4  ;;  %v1347_v1 = vshll.u32 %v628_v13, 16  ;;  %v1353_v58 = vshll.u32 %v704_v19, 16  ;;  %v629_v36 = vld [vmem:[%s13560_s14 + $0x170] sm:$0xf] }
 0x16a   : > { %v2398_v24 = vadd.f32 %v2397_v25, %v1936_v31  ;;  %v5672_v33 = vshrl.u32 %v4811_v37, 16  ;;  %v5675_v3 = vshll.u32 %v4811_v37, 16  ;;  %v5246_v2 = vpop.permute.xlu1 %5245  ;;  %v14758_v57 = vpop.permute.xlu2 %5474  ;;  %v1721_v60 = vpack.c.b16 %v1679_v34, %v14743_v52  ;;  %v13179_v52 = vld [vmem:[%s17204_s2 + $0x90] sm:$0xff]  ;;  %v14779_v47 = vld [vmem:[%s13560_s14 + $0x168] sm:$0xf] }
 0x16b   : > { %v4556_v17 = vadd.f32 %v4432_v23, %v3058_v8  ;;  %v5349_v4 = vsel %vm14430_vm9, %v5246_v2, %v5348_v21  ;;  %v3835_v42 = vor.u32 %v3834_v11, %v3831_v45  ;;  %v3822_v15 = vrot.slane %v3821_v40, 4  ;;  %7189 = vmatpush.bf16.msrb.mxu2 %v13179_v52  ;;  %v14790_v2 = vld [vmem:[%s13560_s14 + $0x174] sm:$0xf0]  ;;  %v12121_v13 = vld [vmem:[%s13560_s14 + $0x170] sm:$0xf] }
 0x16c   : > { %v5674_v7 = vrot.slane %v5672_v33, 7  ;;  %5350 = vst [vmem:[#allocation2 + $0x20] sm:$0x7] %v5349_v4  ;;  %v3840_v46 = vrot.slane %v3838_v54, 5  ;;  %v1346_v16 = vrot.slane %v1344_v20, 4  ;;  %v1349_v41 = vrot.slane %v1347_v1, 5 }
 0x16d   : > { %vm4620_vm10 = vcmp.ge.f32.partialorder %v4556_v17, 0.0  ;;  %v4684_v12 = vmul.f32 0.2, %v4556_v17  ;;  %5565 = vst.msk [vmem:[#allocation2 + $0x20] sm:$0x3] %vm5561_vm13, %v5471_v39  ;;  %v3836_v6 = vrot.slane %v3835_v42, 4  ;;  %v3827_v55 = vsel %vm13604_vm2, %v3822_v15, %v3826_v63 }
 0x16e   : > { %v5677_v59 = vor.u32 %v5675_v3, %v5674_v7  ;;  %v1355_v50 = vrot.slane %v1353_v58, 5  ;;  %v4177_v31 = vunpack.c.l.b16 %v3827_v55  ;;  %v1350_v35 = vor.u32 %v1349_v41, %v1346_v16  ;;  %v12122_v39 = vld [vmem:[%s13560_s14 + $0x174] sm:$0x1] }
 0x16f   : > { %v4748_v28 = vsel %vm4620_vm10, %v4556_v17, %v4684_v12  ;;  %v3841_v25 = vsel %vm13604_vm2, %v3836_v6, %v3840_v46  ;;  %v14787_v17 = vld [vmem:[%s13560_s14 + $0x170] sm:$0xf]  ;;  %v1358_v10 = vshrl.u32 %v629_v36, 16  ;;  %v1361_v9 = vshll.u32 %v629_v36, 16  ;;  %v12123_v12 = vld [vmem:[%s13560_s14 + $0x178] sm:$0xf] }
 0x170   : > { %v2936_v29 = vpop.f32.mrf.mxu2  ;;  %5486 = vrot.lane.b32.xlu2 %v4811_v37, %s13454_s8  ;;  %5840 = vrot.lane.b32.xlu0 %v5677_v59, %s13453_s30  ;;  %v4812_v51 = vpack.c.bf16 %v4748_v28, %v4748_v28  ;;  %v705_v37 = vld [vmem:[%s13560_s14 + $0x174] sm:$0x1]  ;;  %v4434_v18 = vpop.f32.mrf.mxu3  ;;  %v4178_v33 = vunpack.c.l.b16 %v3841_v25  ;;  %v1351_v11 = vrot.slane %v1350_v35, 4  ;;  %v11940_v28 = vor.u32 %v14790_v2, %v14787_v17  ;;  %v12124_v6 = vld [vmem:[%s13560_s14 + $0x17c] sm:$0x1] }
 0x171   : > { %v3059_v56 = vadd.f32 %v2936_v29, %v2398_v24  ;;  %v2400_v61 = vpop.f32.mrf.mxu1  ;;  %v1939_v30 = vpop.f32.mrf.mxu0  ;;  %v1367_v63 = vshll.u32 %v705_v37, 16  ;;  %v1363_v19 = vrot.slane %v1361_v9, 5  ;;  %v13155_v40 = vld [vmem:[%s17204_s2 + $0x50] sm:$0xff]  ;;  %v3843_v46 = vshrl.u32 %v12121_v13, 16 }
 0x172   : > { %v2401_v8 = vadd.f32 %v2400_v61, %v1939_v30  ;;  %v5098_v22 = vshrl.u32 %v4812_v51, 16  ;;  %v14784_v21 = vpop.permute.xlu1 %5472  ;;  %v4897_v24 = vpop.permute.xlu2 %4896  ;;  %v5101_v3 = vshll.u32 %v4812_v51, 16  ;;  %v4220_v45 = vpack.c.b16 %v4178_v33, %v4177_v31  ;;  %v13147_v59 = vld [vmem:[%s17204_s2 + $0x10] sm:$0xff]  ;;  %6674 = vmatpush.bf16.msrb.mxu0 %v13155_v40 }
 0x173   : > { %v4557_v23 = vadd.f32 %v4434_v18, %v3059_v56  ;;  %4987 = vst.msk [vmem:[#allocation2 + $0x30] sm:$0x3] %vm4980_vm4, %v4897_v24  ;;  %v1356_v27 = vsel %vm13604_vm2, %v1351_v11, %v1355_v50  ;;  %v1369_v49 = vrot.slane %v1367_v63, 5  ;;  %v3846_v16 = vshll.u32 %v12121_v13, 16  ;;  %6907 = vmatpush.bf16.msrb.mxu1 %v13147_v59  ;;  %v706_v63 = vld [vmem:[%s13560_s14 + $0x17c] sm:$0x1] }
 0x174   : > { %11578 = vmatmul.msk.bf16.gmra.mxu0 %vm1768_vm3, %v1721_v60  ;;  %11762 = vmatmul.msk.bf16.gmra.mxu1 %vm1768_vm3, %v11676_v53  ;;  %v5100_v34 = vrot.slane %v5098_v22, 7  ;;  %v5925_v4 = vld [vmem:[#allocation2 + $0x20] sm:$0x7]  ;;  %v1360_v53 = vrot.slane %v1358_v10, 4  ;;  %v14824_v15 = vunpack.c.l.b16 %v1356_v27  ;;  %v3852_v52 = vshll.u32 %v12122_v39, 16 }
 0x175   : > { %vm4621_vm11 = vcmp.ge.f32.partialorder %v4557_v23, 0.0  ;;  %v4685_v7 = vmul.f32 0.2, %v4557_v23  ;;  %12022 = vmatmul.msk.bf16.gmra.mxu2 %vm1768_vm3, %v11936_v0  ;;  %v5926_v32 = vsel %vm14672_vm1, %v14718_v62, %v5925_v4  ;;  %12218 = vmatmul.msk.bf16.gmra.mxu3 %vm1768_vm3, %v4220_v45  ;;  %v11680_v0 = vor.u32 %v14782_v26, %v14779_v47  ;;  %v13187_v62 = vld [vmem:[%s17204_s2 + $0xd0] sm:$0xff] }
 0x176   : > { %v5103_v43 = vor.u32 %v5101_v3, %v5100_v34  ;;  %5927 = vst [vmem:[#allocation2 + $0x20] sm:$0x7] %v5926_v32  ;;  %v1364_v20 = vor.u32 %v1363_v19, %v1360_v53  ;;  %7951 = vmatpush.bf16.msrb.mxu3 %v13187_v62  ;;  %v3857_v30 = vshrl.u32 %v12123_v12, 16  ;;  %v3860_v55 = vshll.u32 %v12123_v12, 16 }
 0x177   : > { %v4749_v60 = vsel %vm4621_vm11, %v4557_v23, %v4685_v7  ;;  %v3845_v41 = vrot.slane %v3843_v46, 4  ;;  %v3848_v50 = vrot.slane %v3846_v16, 5  ;;  %v3854_v18 = vrot.slane %v3852_v52, 5 }
 0x178   : > { %v2939_v42 = vpop.f32.mrf.mxu2  ;;  %4908 = vrot.lane.b32.xlu2 %v4812_v51, %s13453_s30  ;;  %5261 = vrot.lane.b32.xlu0 %v5103_v43, %s13454_s8  ;;  %v4813_v54 = vpack.c.bf16 %v4749_v60, %v4749_v60  ;;  %v4437_v51 = vpop.f32.mrf.mxu3  ;;  %v1365_v61 = vrot.slane %v1364_v20, 4  ;;  %v3859_v31 = vrot.slane %v3857_v30, 4  ;;  %v3862_v22 = vrot.slane %v3860_v55, 5 }
 0x179   : > { %v3060_v1 = vadd.f32 %v2939_v42, %v2401_v8  ;;  %v2402_v58 = vpop.f32.mrf.mxu1  ;;  %v1941_v29 = vpop.f32.mrf.mxu0  ;;  %v630_v8 = vld [vmem:[%s13560_s14 + $0x178] sm:$0xf]  ;;  %v3866_v23 = vshll.u32 %v12124_v6, 16  ;;  %v3849_v3 = vor.u32 %v3848_v50, %v3845_v41  ;;  %v1381_v40 = vshll.u32 %v706_v63, 16  ;;  %v12126_v41 = vld [vmem:[%s13560_s14 + $0x184] sm:$0x1] }
 0x17a   : > { %v2403_v56 = vadd.f32 %v2402_v58, %v1941_v29  ;;  %v4895_v37 = vpop.permute.xlu1 %4894  ;;  %v1370_v25 = vsel %vm13604_vm2, %v1365_v61, %v1369_v49  ;;  %v3863_v35 = vor.u32 %v3862_v22, %v3859_v31  ;;  %v5679_v10 = vshrl.u32 %v4813_v54, 16  ;;  %v631_v49 = vld [vmem:[%s13560_s14 + $0x180] sm:$0xf]  ;;  %v707_v58 = vld [vmem:[%s13560_s14 + $0x184] sm:$0x1] }
 0x17b   : > { %v4558_v36 = vadd.f32 %v4437_v51, %v3060_v1  ;;  %4986 = vst.msk [vmem:[#allocation2 + $0x28] sm:$0x3] %vm4980_vm4, %v4895_v37  ;;  %v1681_v33 = vunpack.c.l.b16 %v1370_v25  ;;  %v3868_v34 = vrot.slane %v3866_v23, 5  ;;  %v5682_v9 = vshll.u32 %v4813_v54, 16  ;;  %v14849_v51 = vld [vmem:[%s13560_s14 + $0x178] sm:$0xf] }
 0x17c   : > { %v3850_v7 = vrot.slane %v3849_v3, 4  ;;  %v1372_v45 = vshrl.u32 %v630_v8, 16  ;;  %v3864_v43 = vrot.slane %v3863_v35, 4  ;;  %v5681_v53 = vrot.slane %v5679_v10, 7  ;;  %v12125_v37 = vld [vmem:[%s13560_s14 + $0x180] sm:$0xf] }
 0x17d   : > { %vm4622_vm12 = vcmp.ge.f32.partialorder %v4558_v36, 0.0  ;;  %v4686_v24 = vmul.f32 0.2, %v4558_v36  ;;  %v1722_v4 = vpack.c.b16 %v1681_v33, %v14824_v15  ;;  %v1375_v19 = vshll.u32 %v630_v8, 16  ;;  %v12127_v22 = vld [vmem:[%s13560_s14 + $0x188] sm:$0xf] }
 0x17e   : > { %v3855_v27 = vsel %vm13604_vm2, %v3850_v7, %v3854_v18  ;;  %v1374_v62 = vrot.slane %v1372_v45, 4  ;;  %v5684_v1 = vor.u32 %v5682_v9, %v5681_v53  ;;  %v1383_v55 = vrot.slane %v1381_v40, 5  ;;  %v5354_v63 = vld [vmem:[#allocation2 + $0x30] sm:$0x7] }
 0x17f   : > { %v4750_v13 = vsel %vm4622_vm12, %v4558_v36, %v4686_v24  ;;  %v4179_v15 = vunpack.c.l.b16 %v3855_v27  ;;  %v1377_v30 = vrot.slane %v1375_v19, 5  ;;  %v1386_v36 = vshrl.u32 %v631_v49, 16  ;;  %v12128_v27 = vld [vmem:[%s13560_s14 + $0x18c] sm:$0x1] }
 0x180   : > { %v14835_v11 = vpack.c.bf16 %v4750_v13, %v4750_v13  ;;  %v2941_v32 = vpop.f32.mrf.mxu2  ;;  %5488 = vrot.lane.b32.xlu0 %v4813_v54, %s13454_s8  ;;  %v4439_v59 = vpop.f32.mrf.mxu3  ;;  %v3869_v54 = vsel %vm13604_vm2, %v3864_v43, %v3868_v34  ;;  %v1395_v8 = vshll.u32 %v707_v58, 16  ;;  %v3871_v35 = vshrl.u32 %v12125_v37, 16 }
 0x181   : > { %v3061_v39 = vadd.f32 %v2941_v32, %v2403_v56  ;;  %v2405_v12 = vpop.f32.mrf.mxu1  ;;  %v1944_v60 = vpop.f32.mrf.mxu0  ;;  %v4180_v46 = vunpack.c.l.b16 %v3869_v54  ;;  %v14852_v56 = vld [vmem:[%s13560_s14 + $0x17c] sm:$0xf0]  ;;  %v1378_v47 = vor.u32 %v1377_v30, %v1374_v62  ;;  %v1388_v26 = vrot.slane %v1386_v36, 4 }
 0x182   : > { %v14841_v42 = vpop.permute.xlu0 %5828  ;;  %v2406_v20 = vadd.f32 %v2405_v12, %v1944_v60  ;;  %v5351_v29 = vld [vmem:[#allocation2 + $0x28] sm:$0x7]  ;;  %v5105_v16 = vshrl.u32 %v14835_v11, 16  ;;  %v5108_v52 = vshll.u32 %v14835_v11, 16  ;;  %v11684_v24 = vor.u32 %v14852_v56, %v14849_v51  ;;  %v14885_v12 = vld [vmem:[%s13560_s14 + $0x180] sm:$0xf] }
 0x183   : > { %v4559_v6 = vadd.f32 %v4439_v59, %v3061_v39  ;;  %v5352_v61 = vsel %vm14430_vm9, %v14720_v14, %v5351_v29  ;;  %v4221_v14 = vpack.c.b16 %v4180_v46, %v4179_v15  ;;  %v1379_v2 = vrot.slane %v1378_v47, 4  ;;  %v13108_v60 = vld [vmem:[%s13560_s14 + $0x184] sm:$0xf0] }
 0x184   : > { %11579 = vmatmul.msk.bf16.gmra.mxu0 %vm1768_vm3, %v1722_v4  ;;  %11763 = vmatmul.msk.bf16.gmra.mxu1 %vm1768_vm3, %v11680_v0  ;;  %5353 = vst [vmem:[#allocation2 + $0x28] sm:$0x7] %v5352_v61  ;;  %v5107_v18 = vrot.slane %v5105_v16, 7  ;;  %v1389_v0 = vshll.u32 %v631_v49, 16  ;;  %v3874_v34 = vshll.u32 %v12125_v37, 16  ;;  %v3880_v10 = vshll.u32 %v12126_v41, 16 }
 0x185   : > { %vm4623_vm14 = vcmp.ge.f32.partialorder %v4559_v6, 0.0  ;;  %v4687_v50 = vmul.f32 0.2, %v4559_v6  ;;  %12023 = vmatmul.msk.bf16.gmra.mxu2 %vm1768_vm3, %v11940_v28  ;;  %5566 = vst.msk [vmem:[#allocation2 + $0x28] sm:$0x3] %vm5561_vm13, %v14784_v21  ;;  %12219 = vmatmul.msk.bf16.gmra.mxu3 %vm1768_vm3, %v4221_v14  ;;  %v1384_v4 = vsel %vm13604_vm2, %v1379_v2, %v1383_v55  ;;  %v1397_v45 = vrot.slane %v1395_v8, 5 }
 0x186   : > { %v5110_v25 = vor.u32 %v5108_v52, %v5107_v18  ;;  %v1391_v28 = vrot.slane %v1389_v0, 5  ;;  %v3885_v32 = vshrl.u32 %v12127_v22, 16  ;;  %v3873_v49 = vrot.slane %v3871_v35, 4  ;;  %v632_v8 = vld [vmem:[%s13560_s14 + $0x188] sm:$0xf] }
 0x187   : > { %v4751_v31 = vsel %vm4623_vm14, %v4559_v6, %v4687_v50  ;;  %v3876_v40 = vrot.slane %v3874_v34, 5  ;;  %v3882_v59 = vrot.slane %v3880_v10, 5  ;;  %v3888_v58 = vshll.u32 %v12127_v22, 16 }
 0x188   : > { %v2944_v23 = vpop.f32.mrf.mxu2  ;;  %5842 = vrot.lane.b32.xlu0 %v5684_v1, %s13453_s30  ;;  %v14873_v17 = vpack.c.bf16 %v4751_v31, %v4751_v31  ;;  %5263 = vrot.lane.b32.xlu1 %v5110_v25, %s13454_s8  ;;  %v4442_v9 = vpop.f32.mrf.mxu3  ;;  %v1392_v7 = vor.u32 %v1391_v28, %v1388_v26  ;;  %v1682_v1 = vunpack.c.l.b16 %v1384_v4  ;;  %v3894_v16 = vshll.u32 %v12128_v27, 16  ;;  %v708_v25 = vld [vmem:[%s13560_s14 + $0x18c] sm:$0x1] }
 0x189   : > { %v3062_v21 = vadd.f32 %v2944_v23, %v2406_v20  ;;  %v2407_v33 = vpop.f32.mrf.mxu1  ;;  %v1946_v3 = vpop.f32.mrf.mxu0  ;;  %v3887_v20 = vrot.slane %v3885_v32, 4  ;;  %v3877_v46 = vor.u32 %v3876_v40, %v3873_v49  ;;  %v3890_v30 = vrot.slane %v3888_v58, 5  ;;  %v12130_v58 = vld [vmem:[%s13560_s14 + $0x194] sm:$0x1] }
 0x18a   : > { %v5250_v13 = vpop.permute.xlu0 %5249  ;;  %v14882_v19 = vpop.permute.xlu2 %5832  ;;  %v2408_v39 = vadd.f32 %v2407_v33, %v1946_v3  ;;  %v1393_v62 = vrot.slane %v1392_v7, 4  ;;  %v5686_v55 = vshrl.u32 %v14873_v17, 16  ;;  %v3896_v41 = vrot.slane %v3894_v16, 5 }
 0x18b   : > { %v4560_v43 = vadd.f32 %v4442_v9, %v3062_v21  ;;  %v5355_v53 = vsel %vm14430_vm9, %v5250_v13, %v5354_v63  ;;  %v3891_v26 = vor.u32 %v3890_v30, %v3887_v20  ;;  %v5689_v0 = vshll.u32 %v14873_v17, 16  ;;  %v633_v21 = vld [vmem:[%s13560_s14 + $0x190] sm:$0xf]  ;;  %v709_v63 = vld [vmem:[%s13560_s14 + $0x194] sm:$0x1] }
 0x18c   : > { %5356 = vst [vmem:[#allocation2 + $0x30] sm:$0x7] %v5355_v53  ;;  %v5928_v54 = vld [vmem:[#allocation2 + $0x28] sm:$0x7]  ;;  %v1398_v6 = vsel %vm13604_vm2, %v1393_v62, %v1397_v45  ;;  %v5688_v2 = vrot.slane %v5686_v55, 7  ;;  %v1400_v13 = vshrl.u32 %v632_v8, 16 }
 0x18d   : > { %vm4624_vm15 = vcmp.ge.f32.partialorder %v4560_v43, 0.0  ;;  %v4688_v15 = vmul.f32 0.2, %v4560_v43  ;;  %v5929_v29 = vsel %vm14672_vm1, %v14698_v48, %v5928_v54  ;;  %5567 = vst.msk [vmem:[#allocation2 + $0x30] sm:$0x3] %vm5561_vm13, %v14758_v57  ;;  %v1683_v61 = vunpack.c.l.b16 %v1398_v6 }
 0x18e   : > { %5930 = vst [vmem:[#allocation2 + $0x28] sm:$0x7] %v5929_v29  ;;  %v11944_v48 = vor.u32 %v13108_v60, %v14885_v12  ;;  %v3878_v57 = vrot.slane %v3877_v46, 4  ;;  %v1403_v4 = vshll.u32 %v632_v8, 16  ;;  %v1409_v7 = vshll.u32 %v708_v25, 16 }
 0x18f   : > { %v4752_v52 = vsel %vm4624_vm15, %v4560_v43, %v4688_v15  ;;  %v1723_v47 = vpack.c.b16 %v1683_v61, %v1682_v1  ;;  %v1414_v53 = vshrl.u32 %v633_v21, 16  ;;  %v14931_v12 = vld [vmem:[%s13560_s14 + $0x188] sm:$0xf]  ;;  %v14934_v60 = vld [vmem:[%s13560_s14 + $0x18c] sm:$0xf0]  ;;  %v5691_v27 = vor.u32 %v5689_v0, %v5688_v2 }
 0x190   : > { %v14897_v36 = vpack.c.bf16 %v4752_v52, %v4752_v52  ;;  %v2946_v37 = vpop.f32.mrf.mxu2  ;;  %4910 = vrot.lane.b32.xlu0 %v14835_v11, %s13453_s30  ;;  %5490 = vrot.lane.b32.xlu1 %v14873_v17, %s13454_s8  ;;  %v4444_v31 = vpop.f32.mrf.mxu3  ;;  %v3883_v23 = vsel %vm13604_vm2, %v3878_v57, %v3882_v59  ;;  %v3892_v17 = vrot.slane %v3891_v26, 4  ;;  %v1405_v62 = vrot.slane %v1403_v4, 5  ;;  %v12129_v59 = vld [vmem:[%s13560_s14 + $0x190] sm:$0xf]  ;;  %v12131_v30 = vld [vmem:[%s13560_s14 + $0x198] sm:$0xf] }
 0x191   : > { %v3063_v50 = vadd.f32 %v2946_v37, %v2408_v39  ;;  %v2410_v14 = vpop.f32.mrf.mxu1  ;;  %v1949_v18 = vpop.f32.mrf.mxu0  ;;  %v4181_v34 = vunpack.c.l.b16 %v3883_v23  ;;  %v1402_v39 = vrot.slane %v1400_v13, 4  ;;  %v1416_v40 = vrot.slane %v1414_v53, 4 }
 0x192   : > { %v14907_v11 = vpop.permute.xlu0 %5476  ;;  %v2411_v22 = vadd.f32 %v2410_v14, %v1949_v18  ;;  %v5112_v28 = vshrl.u32 %v14897_v36, 16  ;;  %v14913_v3 = vpop.permute.xlu1 %5830  ;;  %v5115_v10 = vshll.u32 %v14897_v36, 16  ;;  %v3897_v43 = vsel %vm13604_vm2, %v3892_v17, %v3896_v41  ;;  %v13109_v17 = vld [vmem:[%s13560_s14 + $0x194] sm:$0xf0] }
 0x193   : > { %v4561_v33 = vadd.f32 %v4444_v31, %v3063_v50  ;;  %v14915_v35 = vpop.permute.xlu2 %5253  ;;  %v4182_v56 = vunpack.c.l.b16 %v3897_v43  ;;  %v1417_v15 = vshll.u32 %v633_v21, 16  ;;  %v1423_v1 = vshll.u32 %v709_v63, 16  ;;  %v12132_v50 = vld [vmem:[%s13560_s14 + $0x19c] sm:$0x1] }
 0x194   : > { %11580 = vmatmul.msk.bf16.gmra.mxu0 %vm1768_vm3, %v1723_v47  ;;  %11764 = vmatmul.msk.bf16.gmra.mxu1 %vm1768_vm3, %v11684_v24  ;;  %v5114_v9 = vrot.slane %v5112_v28, 7  ;;  %v5931_v45 = vld [vmem:[#allocation2 + $0x30] sm:$0x7]  ;;  %v1406_v16 = vor.u32 %v1405_v62, %v1402_v39  ;;  %v1411_v52 = vrot.slane %v1409_v7, 5  ;;  %v11688_v61 = vor.u32 %v14934_v60, %v14931_v12 }
 0x195   : > { %vm4625_vm0 = vcmp.ge.f32.partialorder %v4561_v33, 0.0  ;;  %v4689_v32 = vmul.f32 0.2, %v4561_v33  ;;  %12024 = vmatmul.msk.bf16.gmra.mxu2 %vm1768_vm3, %v11944_v48  ;;  %v5932_v51 = vsel %vm14672_vm1, %v14841_v42, %v5931_v45  ;;  %v4222_v20 = vpack.c.b16 %v4182_v56, %v4181_v34 }
 0x196   : > { %v5117_v24 = vor.u32 %v5115_v10, %v5114_v9  ;;  %5933 = vst [vmem:[#allocation2 + $0x30] sm:$0x7] %v5932_v51  ;;  %v1419_v57 = vrot.slane %v1417_v15, 5  ;;  %v1425_v41 = vrot.slane %v1423_v1, 5  ;;  %v3899_v14 = vshrl.u32 %v12129_v59, 16 }
 0x197   : > { %v4753_v49 = vsel %vm4625_vm0, %v4561_v33, %v4689_v32  ;;  %12220 = vmatmul.msk.bf16.gmra.mxu3 %vm1768_vm3, %v4222_v20  ;;  %v1407_v0 = vrot.slane %v1406_v16, 4  ;;  %v3902_v8 = vshll.u32 %v12129_v59, 16  ;;  %v3908_v25 = vshll.u32 %v12130_v58, 16 }
 0x198   : > { %v2949_v54 = vpop.f32.mrf.mxu2  ;;  %5265 = vrot.lane.b32.xlu2 %v5117_v24, %s13454_s8  ;;  %v14938_v42 = vpack.c.bf16 %v4753_v49, %v4753_v49  ;;  %5844 = vrot.lane.b32.xlu1 %v5691_v27, %s13453_s30  ;;  %v4447_v55 = vpop.f32.mrf.mxu3  ;;  %v1420_v31 = vor.u32 %v1419_v57, %v1416_v40  ;;  %v3901_v23 = vrot.slane %v3899_v14, 4  ;;  %v3913_v2 = vshrl.u32 %v12131_v30, 16 }
 0x199   : > { %v3064_v29 = vadd.f32 %v2949_v54, %v2411_v22  ;;  %v2412_v6 = vpop.f32.mrf.mxu1  ;;  %v1951_v46 = vpop.f32.mrf.mxu0  ;;  %v11947_v22 = vld [vmem:[%s13560_s14 + $0x190] sm:$0xf]  ;;  %v3916_v28 = vshll.u32 %v12131_v30, 16  ;;  %v1412_v33 = vsel %vm13604_vm2, %v1407_v0, %v1411_v52  ;;  %v3904_v34 = vrot.slane %v3902_v8, 5  ;;  %v634_v30 = vld [vmem:[%s13560_s14 + $0x198] sm:$0xf] }
 0x19a   : > { %v4899_v37 = vpop.permute.xlu0 %4898  ;;  %5492 = vrot.lane.b32.xlu0 %v14938_v42, %s13454_s8  ;;  %v2413_v48 = vadd.f32 %v2412_v6, %v1951_v46  ;;  %v5252_v47 = vpop.permute.xlu1 %5251  ;;  %v1421_v10 = vrot.slane %v1420_v31, 4  ;;  %v1684_v9 = vunpack.c.l.b16 %v1412_v33  ;;  %v3910_v63 = vrot.slane %v3908_v25, 5  ;;  %v14984_v31 = vld [vmem:[%s13560_s14 + $0x198] sm:$0xf] }
 0x19b   : > { %v4562_v18 = vadd.f32 %v4447_v55, %v3064_v29  ;;  %4988 = vst.msk [vmem:[#allocation2 + $0x38] sm:$0x3] %vm4980_vm4, %v4899_v37  ;;  %v14950_v26 = vpop.permute.xlu2 %5480  ;;  %v3915_v13 = vrot.slane %v3913_v2, 4  ;;  %v3905_v7 = vor.u32 %v3904_v34, %v3901_v23  ;;  %v3918_v45 = vrot.slane %v3916_v28, 5  ;;  %v635_v55 = vld [vmem:[%s13560_s14 + $0x1a0] sm:$0xf] }
 0x19c   : > { %v3922_v32 = vshll.u32 %v12132_v50, 16  ;;  %v1426_v51 = vsel %vm13604_vm2, %v1421_v10, %v1425_v41  ;;  %v11948_v56 = vor.u32 %v13109_v17, %v11947_v22  ;;  %v5693_v24 = vshrl.u32 %v14938_v42, 16  ;;  %v710_v37 = vld [vmem:[%s13560_s14 + $0x19c] sm:$0x1]  ;;  %v14987_v22 = vld [vmem:[%s13560_s14 + $0x19c] sm:$0xf0] }
 0x19d   : > { %vm4626_vm5 = vcmp.ge.f32.partialorder %v4562_v18, 0.0  ;;  %v4690_v21 = vmul.f32 0.2, %v4562_v18  ;;  %v1685_v62 = vunpack.c.l.b16 %v1426_v51  ;;  %v3906_v40 = vrot.slane %v3905_v7, 4  ;;  %v14992_v7 = vld [vmem:[%s13560_s14 + $0x1a0] sm:$0xf] }
 0x19e   : > { %v3919_v59 = vor.u32 %v3918_v45, %v3915_v13  ;;  %v3924_v15 = vrot.slane %v3922_v32, 5  ;;  %v5695_v1 = vrot.slane %v5693_v24, 7  ;;  %v5696_v41 = vshll.u32 %v14938_v42, 16  ;;  %v14995_v45 = vld [vmem:[%s13560_s14 + $0x1a4] sm:$0xf0] }
 0x19f   : > { %v4754_v4 = vsel %vm4626_vm5, %v4562_v18, %v4690_v21  ;;  %v1724_v16 = vpack.c.b16 %v1685_v62, %v1684_v9  ;;  %v3911_v52 = vsel %vm13604_vm2, %v3906_v40, %v3910_v63  ;;  %v1428_v42 = vshrl.u32 %v634_v30, 16  ;;  %v711_v21 = vld [vmem:[%s13560_s14 + $0x1a4] sm:$0x1]  ;;  %v12133_v24 = vld [vmem:[%s13560_s14 + $0x1a0] sm:$0xf] }
 0x1a0   : > { %v2951_v43 = vpop.f32.mrf.mxu2  ;;  %v4818_v53 = vpack.c.bf16 %v4754_v4, %v4754_v4  ;;  %4912 = vrot.lane.b32.xlu1 %v14897_v36, %s13453_s30  ;;  %v4449_v54 = vpop.f32.mrf.mxu3  ;;  %v3920_v57 = vrot.slane %v3919_v59, 4  ;;  %v4183_v18 = vunpack.c.l.b16 %v3911_v52  ;;  %v5698_v0 = vor.u32 %v5696_v41, %v5695_v1  ;;  %v15017_v41 = vld [vmem:[%s13560_s14 + $0x1ac] sm:$0xf0] }
 0x1a1   : > { %v3065_v39 = vadd.f32 %v2951_v43, %v2413_v48  ;;  %v2415_v27 = vpop.f32.mrf.mxu1  ;;  %v1954_v49 = vpop.f32.mrf.mxu0  ;;  %v1442_v25 = vshrl.u32 %v635_v55, 16  ;;  %v1430_v33 = vrot.slane %v1428_v42, 4  ;;  %v1445_v4 = vshll.u32 %v635_v55, 16 }
 0x1a2   : > { %v5357_v20 = vld [vmem:[#allocation2 + $0x38] sm:$0x7]  ;;  %4914 = vrot.lane.b32.xlu2 %v4818_v53, %s13453_s30  ;;  %v5119_v58 = vshrl.u32 %v4818_v53, 16  ;;  %v14964_v36 = vpop.permute.xlu1 %5478  ;;  %v2416_v48 = vadd.f32 %v2415_v27, %v1954_v49  ;;  %v5122_v12 = vshll.u32 %v4818_v53, 16  ;;  %v3925_v60 = vsel %vm13604_vm2, %v3920_v57, %v3924_v15 }
 0x1a3   : > { %v5358_v29 = vsel %vm14430_vm9, %v5252_v47, %v5357_v20  ;;  %v4563_v6 = vadd.f32 %v4449_v54, %v3065_v39  ;;  %v4903_v46 = vpop.permute.xlu2 %4902  ;;  %v1437_v47 = vshll.u32 %v710_v37, 16  ;;  %v1444_v13 = vrot.slane %v1442_v25, 4  ;;  %v12134_v39 = vld [vmem:[%s13560_s14 + $0x1a4] sm:$0x1]  ;;  %v12135_v20 = vld [vmem:[%s13560_s14 + $0x1a8] sm:$0xf] }
 0x1a4   : > { %5359 = vst [vmem:[#allocation2 + $0x38] sm:$0x7] %v5358_v29  ;;  %11765 = vmatmul.msk.bf16.gmra.mxu1 %vm1768_vm3, %v11688_v61  ;;  %v5121_v50 = vrot.slane %v5119_v58, 7  ;;  %11581 = vmatmul.msk.bf16.gmra.mxu0 %vm1768_vm3, %v1724_v16  ;;  %v1431_v61 = vshll.u32 %v634_v30, 16  ;;  %v1447_v40 = vrot.slane %v1445_v4, 5  ;;  %v1451_v59 = vshll.u32 %v711_v21, 16 }
 0x1a5   : > { %5568 = vst.msk [vmem:[#allocation2 + $0x38] sm:$0x3] %vm5561_vm13, %v14907_v11  ;;  %vm4627_vm6 = vcmp.ge.f32.partialorder %v4563_v6, 0.0  ;;  %v4691_v14 = vmul.f32 0.2, %v4563_v6  ;;  %12025 = vmatmul.msk.bf16.gmra.mxu2 %vm1768_vm3, %v11948_v56  ;;  %v4184_v11 = vunpack.c.l.b16 %v3925_v60  ;;  %v1439_v51 = vrot.slane %v1437_v47, 5 }
 0x1a6   : > { %4990 = vst.msk [vmem:[#allocation2 + $0x48] sm:$0x3] %vm4980_vm4, %v4903_v46  ;;  %v5124_v2 = vor.u32 %v5122_v12, %v5121_v50  ;;  %v1433_v17 = vrot.slane %v1431_v61, 5  ;;  %v11692_v56 = vor.u32 %v14987_v22, %v14984_v31  ;;  %v12136_v54 = vld [vmem:[%s13560_s14 + $0x1ac] sm:$0x1]  ;;  %v1448_v52 = vor.u32 %v1447_v40, %v1444_v13 }
 0x1a7   : > { %v4755_v8 = vsel %vm4627_vm6, %v4563_v6, %v4691_v14  ;;  %v4223_v34 = vpack.c.b16 %v4184_v11, %v4183_v18  ;;  %v11952_v6 = vor.u32 %v14995_v45, %v14992_v7  ;;  %v15012_v30 = vld [vmem:[%s13560_s14 + $0x1a8] sm:$0xf]  ;;  %v3927_v57 = vshrl.u32 %v12133_v24, 16 }
 0x1a8   : > { %v2954_v23 = vpop.f32.mrf.mxu2  ;;  %v4819_v28 = vpack.c.bf16 %v4755_v8, %v4755_v8  ;;  %5846 = vrot.lane.b32.xlu1 %v5698_v0, %s13453_s30  ;;  %v4452_v32 = vpop.f32.mrf.mxu3  ;;  %v1434_v53 = vor.u32 %v1433_v17, %v1430_v33  ;;  %v1449_v50 = vrot.slane %v1448_v52, 4  ;;  %v3930_v18 = vshll.u32 %v12133_v24, 16  ;;  %v13178_v11 = vld [vmem:[%s17204_s2 + $0x88] sm:$0xff] }
 0x1a9   : > { %v3066_v10 = vadd.f32 %v2954_v23, %v2416_v48  ;;  %v2417_v9 = vpop.f32.mrf.mxu1  ;;  %v1956_v63 = vpop.f32.mrf.mxu0  ;;  %12221 = vmatmul.msk.bf16.gmra.mxu3 %vm1768_vm3, %v4223_v34  ;;  %v1453_v48 = vrot.slane %v1451_v59, 5  ;;  %v3936_v12 = vshll.u32 %v12134_v39, 16  ;;  %v3941_v42 = vshrl.u32 %v12135_v20, 16  ;;  %7190 = vmatpush.bf16.msrb.mxu2 %v13178_v11  ;;  %v636_v7 = vld [vmem:[%s13560_s14 + $0x1a8] sm:$0xf] }
 0x1aa   : > { %5267 = vrot.lane.b32.xlu2 %v5124_v2, %s13454_s8  ;;  %v5700_v43 = vshrl.u32 %v4819_v28, 16  ;;  %v4901_v49 = vpop.permute.xlu1 %4900  ;;  %v5703_v62 = vshll.u32 %v4819_v28, 16  ;;  %v2418_v1 = vadd.f32 %v2417_v9, %v1956_v63  ;;  %v1435_v29 = vrot.slane %v1434_v53, 4 }
 0x1ab   : > { %v4564_v27 = vadd.f32 %v4452_v32, %v3066_v10  ;;  %4989 = vst.msk [vmem:[#allocation2 + $0x40] sm:$0x3] %vm4980_vm4, %v4901_v49  ;;  %v3944_v61 = vshll.u32 %v12135_v20, 16  ;;  %v3950_v47 = vshll.u32 %v12136_v54, 16  ;;  %v1454_v31 = vsel %vm13604_vm2, %v1449_v50, %v1453_v48  ;;  %v637_v48 = vld [vmem:[%s13560_s14 + $0x1b0] sm:$0xf] }
 0x1ac   : > { %v5934_v15 = vld [vmem:[#allocation2 + $0x38] sm:$0x7]  ;;  %v5702_v58 = vrot.slane %v5700_v43, 7  ;;  %v1440_v37 = vsel %vm13604_vm2, %v1435_v29, %v1439_v51  ;;  %v3932_v22 = vrot.slane %v3930_v18, 5  ;;  %v11696_v23 = vor.u32 %v15017_v41, %v15012_v30  ;;  %v712_v51 = vld [vmem:[%s13560_s14 + $0x1ac] sm:$0x1] }
 0x1ad   : > { %v5935_v46 = vsel %vm14672_vm1, %v14913_v3, %v5934_v15  ;;  %vm4628_vm8 = vcmp.ge.f32.partialorder %v4564_v27, 0.0  ;;  %v4692_v16 = vmul.f32 0.2, %v4564_v27  ;;  %v1686_v14 = vunpack.c.l.b16 %v1440_v37  ;;  %v15044_v15 = vld [vmem:[%s13560_s14 + $0x1b0] sm:$0xf] }
 0x1ae   : > { %5936 = vst [vmem:[#allocation2 + $0x38] sm:$0x7] %v5935_v46  ;;  %v5705_v55 = vor.u32 %v5703_v62, %v5702_v58  ;;  %v3929_v3 = vrot.slane %v3927_v57, 4  ;;  %v1687_v33 = vunpack.c.l.b16 %v1454_v31  ;;  %v3938_v17 = vrot.slane %v3936_v12, 5  ;;  %v5363_v12 = vld [vmem:[#allocation2 + $0x48] sm:$0x7] }
 0x1af   : > { %v3943_v34 = vrot.slane %v3941_v42, 4  ;;  %v3952_v13 = vrot.slane %v3950_v47, 5  ;;  %v4756_v4 = vsel %vm4628_vm8, %v4564_v27, %v4692_v16  ;;  %v1456_v62 = vshrl.u32 %v636_v7, 16 }
 0x1b0   : > { %v2956_v60 = vpop.f32.mrf.mxu2  ;;  %5494 = vrot.lane.b32.xlu1 %v4819_v28, %s13454_s8  ;;  %v4454_v2 = vpop.f32.mrf.mxu3  ;;  %v3946_v28 = vrot.slane %v3944_v61, 5  ;;  %v3933_v63 = vor.u32 %v3932_v22, %v3929_v3  ;;  %v1725_v32 = vpack.c.b16 %v1687_v33, %v1686_v14  ;;  %v4820_v53 = vpack.c.bf16 %v4756_v4, %v4756_v4  ;;  %v12137_v22 = vld [vmem:[%s13560_s14 + $0x1b0] sm:$0xf]  ;;  %v12139_v4 = vld [vmem:[%s13560_s14 + $0x1b8] sm:$0xf] }
 0x1b1   : > { %v3067_v0 = vadd.f32 %v2956_v60, %v2418_v1  ;;  %v2420_v8 = vpop.f32.mrf.mxu1  ;;  %v1959_v25 = vpop.f32.mrf.mxu0  ;;  %v1459_v20 = vshll.u32 %v636_v7, 16  ;;  %v1465_v54 = vshll.u32 %v712_v51, 16  ;;  %v15047_v1 = vld [vmem:[%s13560_s14 + $0x1b4] sm:$0xf0]  ;;  %v1458_v57 = vrot.slane %v1456_v62, 4  ;;  %v13154_v51 = vld [vmem:[%s17204_s2 + $0x48] sm:$0xff] }
 0x1b2   : > { %v15027_v21 = vpop.permute.xlu0 %5834  ;;  %5848 = vrot.lane.b32.xlu2 %v5705_v55, %s13453_s30  ;;  %v5360_v10 = vld [vmem:[#allocation2 + $0x40] sm:$0x7]  ;;  %v3947_v43 = vor.u32 %v3946_v28, %v3943_v34  ;;  %v2421_v39 = vadd.f32 %v2420_v8, %v1959_v25  ;;  %v3934_v27 = vrot.slane %v3933_v63, 4  ;;  %v5126_v49 = vshrl.u32 %v4820_v53, 16  ;;  %v713_v25 = vld [vmem:[%s13560_s14 + $0x1b4] sm:$0x1]  ;;  %6675 = vmatpush.bf16.msrb.mxu0 %v13154_v51 }
 0x1b3   : > { %v4565_v9 = vadd.f32 %v4454_v2, %v3067_v0  ;;  %v5361_v45 = vsel %vm14430_vm9, %v14915_v35, %v5360_v10  ;;  %v1461_v50 = vrot.slane %v1459_v20, 5  ;;  %v11956_v61 = vor.u32 %v15047_v1, %v15044_v15  ;;  %v12138_v28 = vld [vmem:[%s13560_s14 + $0x1b4] sm:$0x1] }
 0x1b4   : > { %11766 = vmatmul.msk.bf16.gmra.mxu1 %vm1768_vm3, %v11692_v56  ;;  %5362 = vst [vmem:[#allocation2 + $0x40] sm:$0x7] %v5361_v45  ;;  %11582 = vmatmul.msk.bf16.gmra.mxu0 %vm1768_vm3, %v1725_v32  ;;  %v3948_v35 = vrot.slane %v3947_v43, 4  ;;  %v5129_v56 = vshll.u32 %v4820_v53, 16  ;;  %v3939_v40 = vsel %vm13604_vm2, %v3934_v27, %v3938_v17  ;;  %v1467_v33 = vrot.slane %v1465_v54, 5 }
 0x1b5   : > { %vm4629_vm10 = vcmp.ge.f32.partialorder %v4565_v9, 0.0  ;;  %v4693_v24 = vmul.f32 0.2, %v4565_v9  ;;  %12026 = vmatmul.msk.bf16.gmra.mxu2 %vm1768_vm3, %v11952_v6  ;;  %5569 = vst.msk [vmem:[#allocation2 + $0x40] sm:$0x3] %vm5561_vm13, %v14964_v36  ;;  %v4185_v58 = vunpack.c.l.b16 %v3939_v40  ;;  %v5128_v6 = vrot.slane %v5126_v49, 7 }
 0x1b6   : > { %v3953_v36 = vsel %vm13604_vm2, %v3948_v35, %v3952_v13  ;;  %v1462_v31 = vor.u32 %v1461_v50, %v1458_v57  ;;  %v1470_v17 = vshrl.u32 %v637_v48, 16  ;;  %v1473_v34 = vshll.u32 %v637_v48, 16  ;;  %v12140_v40 = vld [vmem:[%s13560_s14 + $0x1bc] sm:$0x1] }
 0x1b7   : > { %v4757_v59 = vsel %vm4629_vm10, %v4565_v9, %v4693_v24  ;;  %v4186_v16 = vunpack.c.l.b16 %v3953_v36  ;;  %v5131_v18 = vor.u32 %v5129_v56, %v5128_v6  ;;  %v3955_v27 = vshrl.u32 %v12137_v22, 16 }
 0x1b8   : > { %v2959_v29 = vpop.f32.mrf.mxu2  ;;  %v4821_v46 = vpack.c.bf16 %v4757_v59, %v4757_v59  ;;  %4916 = vrot.lane.b32.xlu1 %v4820_v53, %s13453_s30  ;;  %v4457_v14 = vpop.f32.mrf.mxu3  ;;  %v1463_v13 = vrot.slane %v1462_v31, 4  ;;  %v1472_v32 = vrot.slane %v1470_v17, 4  ;;  %v1475_v43 = vrot.slane %v1473_v34, 5  ;;  %v13186_v53 = vld [vmem:[%s17204_s2 + $0xc8] sm:$0xff] }
 0x1b9   : > { %v3068_v52 = vadd.f32 %v2959_v29, %v2421_v39  ;;  %v2422_v55 = vpop.f32.mrf.mxu1  ;;  %v1961_v37 = vpop.f32.mrf.mxu0  ;;  %v4224_v47 = vpack.c.b16 %v4186_v16, %v4185_v58  ;;  %5269 = vrot.lane.b32.xlu0 %v5131_v18, %s13454_s8  ;;  %v1479_v39 = vshll.u32 %v713_v25, 16  ;;  %v3958_v59 = vshll.u32 %v12137_v22, 16  ;;  %7952 = vmatpush.bf16.msrb.mxu3 %v13186_v53  ;;  %v639_v53 = vld [vmem:[%s13560_s14 + $0x1c0] sm:$0xf] }
 0x1ba   : > { %v5256_v60 = vpop.permute.xlu0 %5255  ;;  %5496 = vrot.lane.b32.xlu2 %v4821_v46, %s13454_s8  ;;  %v5707_v3 = vshrl.u32 %v4821_v46, 16  ;;  %v5710_v42 = vshll.u32 %v4821_v46, 16  ;;  %v15058_v8 = vpop.permute.xlu2 %5838  ;;  %v2423_v63 = vadd.f32 %v2422_v55, %v1961_v37  ;;  %v1476_v56 = vor.u32 %v1475_v43, %v1472_v32 }
 0x1bb   : > { %v4566_v11 = vadd.f32 %v4457_v14, %v3068_v52  ;;  %v5364_v0 = vsel %vm14430_vm9, %v5256_v60, %v5363_v12  ;;  %12222 = vmatmul.msk.bf16.gmra.mxu3 %vm1768_vm3, %v4224_v47  ;;  %v1481_v58 = vrot.slane %v1479_v39, 5  ;;  %v3957_v29 = vrot.slane %v3955_v27, 4 }
 0x1bc   : > { %5365 = vst [vmem:[#allocation2 + $0x48] sm:$0x7] %v5364_v0  ;;  %v5709_v2 = vrot.slane %v5707_v3, 7  ;;  %v5937_v10 = vld [vmem:[#allocation2 + $0x40] sm:$0x7]  ;;  %v3964_v6 = vshll.u32 %v12138_v28, 16 }
 0x1bd   : > { %vm4630_vm11 = vcmp.ge.f32.partialorder %v4566_v11, 0.0  ;;  %v4694_v9 = vmul.f32 0.2, %v4566_v11  ;;  %v5938_v7 = vsel %vm14672_vm1, %v14882_v19, %v5937_v10  ;;  %5570 = vst.msk [vmem:[#allocation2 + $0x48] sm:$0x3] %vm5561_vm13, %v14950_v26  ;;  %v1468_v19 = vsel %vm13604_vm2, %v1463_v13, %v1467_v33  ;;  %v13146_v26 = vld [vmem:[%s17204_s2 + $0x8] sm:$0xff] }
 0x1be   : > { %v5712_v45 = vor.u32 %v5710_v42, %v5709_v2  ;;  %5939 = vst [vmem:[#allocation2 + $0x40] sm:$0x7] %v5938_v7  ;;  %v1688_v62 = vunpack.c.l.b16 %v1468_v19  ;;  %6908 = vmatpush.bf16.msrb.mxu1 %v13146_v26  ;;  %v1477_v55 = vrot.slane %v1476_v56, 4  ;;  %v3960_v37 = vrot.slane %v3958_v59, 5  ;;  %v638_v0 = vld [vmem:[%s13560_s14 + $0x1b8] sm:$0xf] }
 0x1bf   : > { %v4758_v24 = vsel %vm4630_vm11, %v4566_v11, %v4694_v9  ;;  %v3969_v48 = vshrl.u32 %v12139_v4, 16  ;;  %v3966_v18 = vrot.slane %v3964_v6, 5  ;;  %v3972_v12 = vshll.u32 %v12139_v4, 16  ;;  %v715_v26 = vld [vmem:[%s13560_s14 + $0x1c4] sm:$0x1] }
 0x1c0   : > { %v2961_v35 = vpop.f32.mrf.mxu2  ;;  %v4822_v49 = vpack.c.bf16 %v4758_v24, %v4758_v24  ;;  %5850 = vrot.lane.b32.xlu1 %v5712_v45, %s13453_s30  ;;  %v4459_v46 = vpop.f32.mrf.mxu3  ;;  %v3978_v60 = vshll.u32 %v12140_v40, 16  ;;  %v1482_v3 = vsel %vm13604_vm2, %v1477_v55, %v1481_v58  ;;  %v3961_v42 = vor.u32 %v3960_v37, %v3957_v29  ;;  %v13068_v56 = vld [vmem:[%s13560_s14 + $0x1bc] sm:$0xf0]  ;;  %v13112_v37 = vld [vmem:[%s13560_s14 + $0x1c4] sm:$0xf0] }
 0x1c1   : > { %v3069_v20 = vadd.f32 %v2961_v35, %v2423_v63  ;;  %v2425_v54 = vpop.f32.mrf.mxu1  ;;  %v1964_v36 = vpop.f32.mrf.mxu0  ;;  %v3971_v47 = vrot.slane %v3969_v48, 4  ;;  %v1689_v22 = vunpack.c.l.b16 %v1482_v3  ;;  %v3974_v2 = vrot.slane %v3972_v12, 5  ;;  %v11959_v58 = vld [vmem:[%s13560_s14 + $0x1c0] sm:$0xf]  ;;  %v12142_v12 = vld [vmem:[%s13560_s14 + $0x1c4] sm:$0x1] }
 0x1c2   : > { %v15084_v16 = vpop.permute.xlu0 %5482  ;;  %4918 = vrot.lane.b32.xlu2 %v4822_v49, %s13453_s30  ;;  %v2426_v52 = vadd.f32 %v2425_v54, %v1964_v36  ;;  %v15087_v50 = vpop.permute.xlu1 %5836  ;;  %v5133_v11 = vshrl.u32 %v4822_v49, 16  ;;  %v3962_v41 = vrot.slane %v3961_v42, 4  ;;  %v5136_v28 = vshll.u32 %v4822_v49, 16  ;;  %v11699_v49 = vld [vmem:[%s13560_s14 + $0x1b8] sm:$0xf] }
 0x1c3   : > { %v4567_v57 = vadd.f32 %v4459_v46, %v3069_v20  ;;  %v15089_v14 = vpop.permute.xlu2 %5259  ;;  %v1726_v17 = vpack.c.b16 %v1689_v22, %v1688_v62  ;;  %v3975_v34 = vor.u32 %v3974_v2, %v3971_v47  ;;  %v1484_v63 = vshrl.u32 %v638_v0, 16  ;;  %v12141_v29 = vld [vmem:[%s13560_s14 + $0x1c0] sm:$0xf] }
 0x1c4   : > { %11767 = vmatmul.msk.bf16.gmra.mxu1 %vm1768_vm3, %v11696_v23  ;;  %v5940_v25 = vld [vmem:[#allocation2 + $0x48] sm:$0x7]  ;;  %v3980_v23 = vrot.slane %v3978_v60, 5  ;;  %v5135_v33 = vrot.slane %v5133_v11, 7  ;;  %v3967_v9 = vsel %vm13604_vm2, %v3962_v41, %v3966_v18  ;;  %v1487_v13 = vshll.u32 %v638_v0, 16 }
 0x1c5   : > { %vm4631_vm12 = vcmp.ge.f32.partialorder %v4567_v57, 0.0  ;;  %v4695_v31 = vmul.f32 0.2, %v4567_v57  ;;  %12027 = vmatmul.msk.bf16.gmra.mxu2 %vm1768_vm3, %v11956_v61  ;;  %v5941_v30 = vsel %vm14672_vm1, %v15027_v21, %v5940_v25  ;;  %v714_v61 = vld [vmem:[%s13560_s14 + $0x1bc] sm:$0x1]  ;;  %11583 = vmatmul.msk.bf16.gmra.mxu0 %vm1768_vm3, %v1726_v17  ;;  %v3976_v21 = vrot.slane %v3975_v34, 4 }
 0x1c6   : > { %5942 = vst [vmem:[#allocation2 + $0x48] sm:$0x7] %v5941_v30  ;;  %v4187_v4 = vunpack.c.l.b16 %v3967_v9  ;;  %v5138_v45 = vor.u32 %v5136_v28, %v5135_v33  ;;  %v1486_v35 = vrot.slane %v1484_v63, 4  ;;  %v1489_v54 = vrot.slane %v1487_v13, 5  ;;  %v12143_v11 = vld [vmem:[%s13560_s14 + $0x1c8] sm:$0xf] }
 0x1c7   : > { %v4759_v10 = vsel %vm4631_vm12, %v4567_v57, %v4695_v31  ;;  %v3981_v62 = vsel %vm13604_vm2, %v3976_v21, %v3980_v23  ;;  %v1493_v36 = vshll.u32 %v714_v61, 16  ;;  %v1501_v55 = vshll.u32 %v639_v53, 16 }
 0x1c8   : > { %v2964_v15 = vpop.f32.mrf.mxu2  ;;  %v15107_v1 = vpack.c.bf16 %v4759_v10, %v4759_v10  ;;  %v4462_v51 = vpop.f32.mrf.mxu3  ;;  %5271 = vrot.lane.b32.xlu0 %v5138_v45, %s13454_s8  ;;  %v4188_v6 = vunpack.c.l.b16 %v3981_v62  ;;  %v1490_v57 = vor.u32 %v1489_v54, %v1486_v35  ;;  %v1507_v25 = vshll.u32 %v715_v26, 16 }
 0x1c9   : > { %v3070_v7 = vadd.f32 %v2964_v15, %v2426_v52  ;;  %v2427_v32 = vpop.f32.mrf.mxu1  ;;  %v1966_v43 = vpop.f32.mrf.mxu0  ;;  %v1498_v52 = vshrl.u32 %v639_v53, 16  ;;  %v1495_v18 = vrot.slane %v1493_v36, 5  ;;  %v1503_v47 = vrot.slane %v1501_v55, 5  ;;  %v12144_v15 = vld [vmem:[%s13560_s14 + $0x1cc] sm:$0x1] }
 0x1ca   : > { %v4905_v24 = vpop.permute.xlu0 %4904  ;;  %v2428_v19 = vadd.f32 %v2427_v32, %v1966_v43  ;;  %v5714_v39 = vshrl.u32 %v15107_v1, 16  ;;  %v5717_v27 = vshll.u32 %v15107_v1, 16  ;;  %v5258_v59 = vpop.permute.xlu1 %5257  ;;  %v4225_v60 = vpack.c.b16 %v4188_v6, %v4187_v4 }
 0x1cb   : > { %v15119_v40 = vadd.f32 %v4462_v51, %v3070_v7  ;;  %4991 = vst.msk [vmem:[#allocation2 + $0x50] sm:$0x3] %vm4980_vm4, %v4905_v24  ;;  %v15123_v20 = vpop.permute.xlu2 %5486  ;;  %v1500_v42 = vrot.slane %v1498_v52, 4  ;;  %v1491_v0 = vrot.slane %v1490_v57, 4  ;;  %v11700_v31 = vor.u32 %v13068_v56, %v11699_v49  ;;  %v716_v57 = vld [vmem:[%s13560_s14 + $0x1cc] sm:$0x1] }
 0x1cc   : > { %v5716_v46 = vrot.slane %v5714_v39, 7  ;;  %v11960_v22 = vor.u32 %v13112_v37, %v11959_v58  ;;  %12223 = vmatmul.msk.bf16.gmra.mxu3 %vm1768_vm3, %v4225_v60  ;;  %v3983_v41 = vshrl.u32 %v12141_v29, 16  ;;  %v3986_v23 = vshll.u32 %v12141_v29, 16  ;;  %v640_v39 = vld [vmem:[%s13560_s14 + $0x1c8] sm:$0xf] }
 0x1cd   : > { %vm4632_vm14 = vcmp.ge.f32.partialorder %v15119_v40, 0.0  ;;  %v4696_v48 = vmul.f32 0.2, %v15119_v40  ;;  %v1504_v30 = vor.u32 %v1503_v47, %v1500_v42  ;;  %v3992_v33 = vshll.u32 %v12142_v12, 16 }
 0x1ce   : > { %v5719_v3 = vor.u32 %v5717_v27, %v5716_v46  ;;  %v1496_v10 = vsel %vm13604_vm2, %v1491_v0, %v1495_v18  ;;  %v1509_v9 = vrot.slane %v1507_v25, 5  ;;  %v3997_v61 = vshrl.u32 %v12143_v11, 16  ;;  %v15164_v0 = vld [vmem:[%s13560_s14 + $0x1cc] sm:$0xf0] }
 0x1cf   : > { %v1505_v4 = vrot.slane %v1504_v30, 4  ;;  %v1690_v7 = vunpack.c.l.b16 %v1496_v10  ;;  %v3985_v45 = vrot.slane %v3983_v41, 4  ;;  %v3988_v24 = vrot.slane %v3986_v23, 5  ;;  %v641_v41 = vld [vmem:[%s13560_s14 + $0x1d0] sm:$0xf] }
 0x1d0   : > { %v2966_v2 = vpop.f32.mrf.mxu2  ;;  %5852 = vrot.lane.b32.xlu2 %v5719_v3, %s13453_s30  ;;  %v4464_v13 = vpop.f32.mrf.mxu3  ;;  %5498 = vrot.lane.b32.xlu0 %v15107_v1, %s13454_s8  ;;  %v3999_v26 = vrot.slane %v3997_v61, 4  ;;  %v4000_v35 = vshll.u32 %v12143_v11, 16  ;;  %v4006_v49 = vshll.u32 %v12144_v15, 16  ;;  %v4760_v36 = vsel %vm4632_vm14, %v15119_v40, %v4696_v48  ;;  %v15161_v11 = vld [vmem:[%s13560_s14 + $0x1c8] sm:$0xf] }
 0x1d1   : > { %v3071_v17 = vadd.f32 %v2966_v2, %v2428_v19  ;;  %v2430_v34 = vpop.f32.mrf.mxu1  ;;  %v1969_v28 = vpop.f32.mrf.mxu0  ;;  %v3994_v19 = vrot.slane %v3992_v33, 5  ;;  %v1510_v27 = vsel %vm13604_vm2, %v1505_v4, %v1509_v9  ;;  %v3989_v62 = vor.u32 %v3988_v24, %v3985_v45  ;;  %v15172_v9 = vld [vmem:[%s13560_s14 + $0x1d0] sm:$0xf] }
 0x1d2   : > { %v5366_v63 = vld [vmem:[#allocation2 + $0x50] sm:$0x7]  ;;  %v2431_v21 = vadd.f32 %v2430_v34, %v1969_v28  ;;  %v15141_v53 = vpop.permute.xlu1 %5484  ;;  %v1691_v56 = vunpack.c.l.b16 %v1510_v27  ;;  %v4008_v54 = vrot.slane %v4006_v49, 5  ;;  %v1512_v58 = vshrl.u32 %v640_v39, 16  ;;  %v717_v28 = vld [vmem:[%s13560_s14 + $0x1d4] sm:$0x1] }
 0x1d3   : > { %v5367_v32 = vsel %vm14430_vm9, %v5258_v59, %v5366_v63  ;;  %v4569_v43 = vadd.f32 %v4464_v13, %v3071_v17  ;;  %v4909_v51 = vpop.permute.xlu2 %4908  ;;  %v4002_v59 = vrot.slane %v4000_v35, 5  ;;  %v3990_v6 = vrot.slane %v3989_v62, 4 }
 0x1d4   : > { %5368 = vst [vmem:[#allocation2 + $0x50] sm:$0x7] %v5367_v32  ;;  %11768 = vmatmul.msk.bf16.gmra.mxu1 %vm1768_vm3, %v11700_v31  ;;  %v1727_v29 = vpack.c.b16 %v1691_v56, %v1690_v7  ;;  %v1514_v18 = vrot.slane %v1512_v58, 4  ;;  %v1515_v12 = vshll.u32 %v640_v39, 16  ;;  %v1521_v13 = vshll.u32 %v716_v57, 16 }
 0x1d5   : > { %5571 = vst.msk [vmem:[#allocation2 + $0x50] sm:$0x3] %vm5561_vm13, %v15084_v16  ;;  %vm4633_vm15 = vcmp.ge.f32.partialorder %v4569_v43, 0.0  ;;  %v4697_v1 = vmul.f32 0.2, %v4569_v43  ;;  %12028 = vmatmul.msk.bf16.gmra.mxu2 %vm1768_vm3, %v11960_v22  ;;  %v4824_v16 = vpack.c.bf16 %v4760_v36, %v4760_v36  ;;  %v4003_v52 = vor.u32 %v4002_v59, %v3999_v26 }
 0x1d6   : > { %4993 = vst.msk [vmem:[#allocation2 + $0x60] sm:$0x3] %vm4980_vm4, %v4909_v51  ;;  %11584 = vmatmul.msk.bf16.gmra.mxu0 %vm1768_vm3, %v1727_v29  ;;  %v3995_v40 = vsel %vm13604_vm2, %v3990_v6, %v3994_v19  ;;  %v1517_v10 = vrot.slane %v1515_v12, 5  ;;  %v13113_v32 = vld [vmem:[%s13560_s14 + $0x1d4] sm:$0xf0]  ;;  %v1523_v19 = vrot.slane %v1521_v13, 5 }
 0x1d7   : > { %v4761_v46 = vsel %vm4633_vm15, %v4569_v43, %v4697_v1  ;;  %v5140_v60 = vshrl.u32 %v4824_v16, 16  ;;  %v5143_v3 = vshll.u32 %v4824_v16, 16  ;;  %v4004_v25 = vrot.slane %v4003_v52, 4  ;;  %v12145_v39 = vld [vmem:[%s13560_s14 + $0x1d0] sm:$0xf] }
 0x1d8   : > { %v2969_v55 = vpop.f32.mrf.mxu2  ;;  %v15154_v37 = vpack.c.bf16 %v4761_v46, %v4761_v46  ;;  %v4189_v31 = vunpack.c.l.b16 %v3995_v40  ;;  %v4467_v22 = vpop.f32.mrf.mxu3  ;;  %4920 = vrot.lane.b32.xlu0 %v4824_v16, %s13453_s30  ;;  %v1518_v24 = vor.u32 %v1517_v10, %v1514_v18  ;;  %v1526_v35 = vshrl.u32 %v641_v41, 16  ;;  %v12146_v46 = vld [vmem:[%s13560_s14 + $0x1d4] sm:$0x1] }
 0x1d9   : > { %v3072_v48 = vadd.f32 %v2969_v55, %v2431_v21  ;;  %v2432_v42 = vpop.f32.mrf.mxu1  ;;  %v1971_v47 = vpop.f32.mrf.mxu0  ;;  %v5142_v33 = vrot.slane %v5140_v60, 7  ;;  %v4009_v61 = vsel %vm13604_vm2, %v4004_v25, %v4008_v54  ;;  %v11704_v21 = vor.u32 %v15164_v0, %v15161_v11  ;;  %v12147_v54 = vld [vmem:[%s13560_s14 + $0x1d8] sm:$0xf] }
 0x1da   : > { %v2433_v2 = vadd.f32 %v2432_v42, %v1971_v47  ;;  %v5721_v30 = vshrl.u32 %v15154_v37, 16  ;;  %v4907_v17 = vpop.permute.xlu1 %4906  ;;  %v5724_v34 = vshll.u32 %v15154_v37, 16  ;;  %v4190_v7 = vunpack.c.l.b16 %v4009_v61  ;;  %v15198_v60 = vld [vmem:[%s13560_s14 + $0x1d8] sm:$0xf] }
 0x1db   : > { %v4570_v23 = vadd.f32 %v4467_v22, %v3072_v48  ;;  %4992 = vst.msk [vmem:[#allocation2 + $0x58] sm:$0x3] %vm4980_vm4, %v4907_v17  ;;  %v5145_v43 = vor.u32 %v5143_v3, %v5142_v33  ;;  %v1529_v49 = vshll.u32 %v641_v41, 16  ;;  %v1519_v56 = vrot.slane %v1518_v24, 4  ;;  %v15201_v3 = vld [vmem:[%s13560_s14 + $0x1dc] sm:$0xf0] }
 0x1dc   : > { %v5943_v15 = vld [vmem:[#allocation2 + $0x50] sm:$0x7]  ;;  %v5723_v63 = vrot.slane %v5721_v30, 7  ;;  %v4226_v27 = vpack.c.b16 %v4190_v7, %v4189_v31  ;;  %v1535_v62 = vshll.u32 %v717_v28, 16  ;;  %v11964_v59 = vor.u32 %v13113_v32, %v15172_v9  ;;  %v12148_v22 = vld [vmem:[%s13560_s14 + $0x1dc] sm:$0x1] }
 0x1dd   : > { %v5944_v4 = vsel %vm14672_vm1, %v15087_v50, %v5943_v15  ;;  %vm4634_vm0 = vcmp.ge.f32.partialorder %v4570_v23, 0.0  ;;  %v4698_v45 = vmul.f32 0.2, %v4570_v23  ;;  %5273 = vrot.lane.b32.xlu1 %v5145_v43, %s13454_s8  ;;  %v1528_v6 = vrot.slane %v1526_v35, 4 }
 0x1de   : > { %5945 = vst [vmem:[#allocation2 + $0x50] sm:$0x7] %v5944_v4  ;;  %v5726_v51 = vor.u32 %v5724_v34, %v5723_v63  ;;  %12224 = vmatmul.msk.bf16.gmra.mxu3 %vm1768_vm3, %v4226_v27  ;;  %v1531_v16 = vrot.slane %v1529_v49, 5  ;;  %v4011_v52 = vshrl.u32 %v12145_v39, 16  ;;  %v1524_v12 = vsel %vm13604_vm2, %v1519_v56, %v1523_v19  ;;  %v5372_v49 = vld [vmem:[#allocation2 + $0x60] sm:$0x7] }
 0x1df   : > { %v4762_v26 = vsel %vm4634_vm0, %v4570_v23, %v4698_v45  ;;  %v1537_v40 = vrot.slane %v1535_v62, 5  ;;  %v4014_v48 = vshll.u32 %v12145_v39, 16  ;;  %v1692_v0 = vunpack.c.l.b16 %v1524_v12  ;;  %v642_v39 = vld [vmem:[%s13560_s14 + $0x1d8] sm:$0xf]  ;;  %v15227_v56 = vld [vmem:[%s13560_s14 + $0x1e0] sm:$0xf] }
 0x1e0   : > { %v2971_v1 = vpop.f32.mrf.mxu2  ;;  %v15185_v50 = vpack.c.bf16 %v4762_v26, %v4762_v26  ;;  %v4469_v55 = vpop.f32.mrf.mxu3  ;;  %5500 = vrot.lane.b32.xlu0 %v15154_v37, %s13454_s8  ;;  %v1532_v11 = vor.u32 %v1531_v16, %v1528_v6  ;;  %v4013_v25 = vrot.slane %v4011_v52, 4  ;;  %v4020_v30 = vshll.u32 %v12146_v46, 16  ;;  %v15230_v62 = vld [vmem:[%s13560_s14 + $0x1e4] sm:$0xf0]  ;;  %v718_v6 = vld [vmem:[%s13560_s14 + $0x1dc] sm:$0x1] }
 0x1e1   : > { %v3073_v36 = vadd.f32 %v2971_v1, %v2433_v2  ;;  %v2435_v58 = vpop.f32.mrf.mxu1  ;;  %v1974_v29 = vpop.f32.mrf.mxu0  ;;  %v4016_v2 = vrot.slane %v4014_v48, 5  ;;  %v4025_v41 = vshrl.u32 %v12147_v54, 16  ;;  %v11708_v37 = vor.u32 %v15201_v3, %v15198_v60 }
 0x1e2   : > { %v15191_v57 = vpop.permute.xlu0 %5840  ;;  %4922 = vrot.lane.b32.xlu2 %v15185_v50, %s13453_s30  ;;  %v2436_v18 = vadd.f32 %v2435_v58, %v1974_v29  ;;  %v5369_v42 = vld [vmem:[#allocation2 + $0x58] sm:$0x7]  ;;  %v1533_v33 = vrot.slane %v1532_v11, 4  ;;  %v4028_v28 = vshll.u32 %v12147_v54, 16  ;;  %v4034_v9 = vshll.u32 %v12148_v22, 16 }
 0x1e3   : > { %v4571_v47 = vadd.f32 %v4469_v55, %v3073_v36  ;;  %v5370_v31 = vsel %vm14430_vm9, %v15089_v14, %v5369_v42  ;;  %v4017_v17 = vor.u32 %v4016_v2, %v4013_v25  ;;  %v4022_v14 = vrot.slane %v4020_v30, 5  ;;  %v643_v29 = vld [vmem:[%s13560_s14 + $0x1e0] sm:$0xf]  ;;  %v719_v22 = vld [vmem:[%s13560_s14 + $0x1e4] sm:$0x1] }
 0x1e4   : > { %11769 = vmatmul.msk.bf16.gmra.mxu1 %vm1768_vm3, %v11704_v21  ;;  %5371 = vst [vmem:[#allocation2 + $0x58] sm:$0x7] %v5370_v31  ;;  %v4027_v34 = vrot.slane %v4025_v41, 4  ;;  %v1538_v10 = vsel %vm13604_vm2, %v1533_v33, %v1537_v40  ;;  %v5147_v15 = vshrl.u32 %v15185_v50, 16  ;;  %v5150_v61 = vshll.u32 %v15185_v50, 16 }
 0x1e5   : > { %vm4635_vm5 = vcmp.ge.f32.partialorder %v4571_v47, 0.0  ;;  %v4699_v23 = vmul.f32 0.2, %v4571_v47  ;;  %12029 = vmatmul.msk.bf16.gmra.mxu2 %vm1768_vm3, %v11964_v59  ;;  %5572 = vst.msk [vmem:[#allocation2 + $0x58] sm:$0x3] %vm5561_vm13, %v15141_v53  ;;  %5854 = vrot.lane.b32.xlu1 %v5726_v51, %s13453_s30  ;;  %v1693_v63 = vunpack.c.l.b16 %v1538_v10  ;;  %v4018_v13 = vrot.slane %v4017_v17, 4 }
 0x1e6   : > { %v4030_v21 = vrot.slane %v4028_v28, 5  ;;  %v4036_v7 = vrot.slane %v4034_v9, 5  ;;  %v5149_v32 = vrot.slane %v5147_v15, 7  ;;  %v1540_v55 = vshrl.u32 %v642_v39, 16 }
 0x1e7   : > { %v4763_v53 = vsel %vm4635_vm5, %v4571_v47, %v4699_v23  ;;  %v1728_v27 = vpack.c.b16 %v1693_v63, %v1692_v0  ;;  %v4023_v51 = vsel %vm13604_vm2, %v4018_v13, %v4022_v14  ;;  %v1543_v40 = vshll.u32 %v642_v39, 16  ;;  %v12149_v14 = vld [vmem:[%s13560_s14 + $0x1e0] sm:$0xf]  ;;  %v12151_v63 = vld [vmem:[%s13560_s14 + $0x1e8] sm:$0xf] }
 0x1e8   : > { %v2974_v4 = vpop.f32.mrf.mxu2  ;;  %v15221_v19 = vpack.c.bf16 %v4763_v53, %v4763_v53  ;;  %v4031_v26 = vor.u32 %v4030_v21, %v4027_v34  ;;  %v4472_v35 = vpop.f32.mrf.mxu3  ;;  %v4191_v59 = vunpack.c.l.b16 %v4023_v51  ;;  %v5152_v36 = vor.u32 %v5150_v61, %v5149_v32  ;;  %v12150_v61 = vld [vmem:[%s13560_s14 + $0x1e4] sm:$0x1] }
 0x1e9   : > { %v3074_v45 = vadd.f32 %v2974_v4, %v2436_v18  ;;  %v2437_v43 = vpop.f32.mrf.mxu1  ;;  %v1976_v24 = vpop.f32.mrf.mxu0  ;;  %11585 = vmatmul.msk.bf16.gmra.mxu0 %vm1768_vm3, %v1728_v27  ;;  %v11968_v48 = vor.u32 %v15230_v62, %v15227_v56  ;;  %v1542_v0 = vrot.slane %v1540_v55, 4  ;;  %v1545_v2 = vrot.slane %v1543_v40, 5 }
 0x1ea   : > { %v5262_v1 = vpop.permute.xlu0 %5261  ;;  %v2438_v50 = vadd.f32 %v2437_v43, %v1976_v24  ;;  %v4032_v16 = vrot.slane %v4031_v26, 4  ;;  %v5728_v46 = vshrl.u32 %v15221_v19, 16  ;;  %v5731_v52 = vshll.u32 %v15221_v19, 16 }
 0x1eb   : > { %v4572_v54 = vadd.f32 %v4472_v35, %v3074_v45  ;;  %v5373_v58 = vsel %vm14430_vm9, %v5262_v1, %v5372_v49  ;;  %v1549_v30 = vshll.u32 %v718_v6, 16  ;;  %v1554_v33 = vshrl.u32 %v643_v29, 16  ;;  %v12152_v35 = vld [vmem:[%s13560_s14 + $0x1ec] sm:$0x1] }
 0x1ec   : > { %5374 = vst [vmem:[#allocation2 + $0x60] sm:$0x7] %v5373_v58  ;;  %v5946_v18 = vld [vmem:[#allocation2 + $0x58] sm:$0x7]  ;;  %v4037_v47 = vsel %vm13604_vm2, %v4032_v16, %v4036_v7  ;;  %v5730_v11 = vrot.slane %v5728_v46, 7  ;;  %v1557_v17 = vshll.u32 %v643_v29, 16  ;;  %v1546_v9 = vor.u32 %v1545_v2, %v1542_v0 }
 0x1ed   : > { %vm4636_vm6 = vcmp.ge.f32.partialorder %v4572_v54, 0.0  ;;  %v4700_v12 = vmul.f32 0.2, %v4572_v54  ;;  %v5947_v42 = vsel %vm14672_vm1, %v15058_v8, %v5946_v18  ;;  %5573 = vst.msk [vmem:[#allocation2 + $0x60] sm:$0x3] %vm5561_vm13, %v15123_v20  ;;  %v4192_v25 = vunpack.c.l.b16 %v4037_v47  ;;  %5275 = vrot.lane.b32.xlu1 %v5152_v36, %s13454_s8  ;;  %v13185_v58 = vld [vmem:[%s17204_s2 + $0xc0] sm:$0xff] }
 0x1ee   : > { %5948 = vst [vmem:[#allocation2 + $0x58] sm:$0x7] %v5947_v42  ;;  %v5733_v41 = vor.u32 %v5731_v52, %v5730_v11  ;;  %v1551_v15 = vrot.slane %v1549_v30, 5  ;;  %v1556_v53 = vrot.slane %v1554_v33, 4  ;;  %v1559_v7 = vrot.slane %v1557_v17, 5  ;;  %v13153_v29 = vld [vmem:[%s17204_s2 + $0x40] sm:$0xff]  ;;  %7953 = vmatpush.bf16.msrb.mxu3 %v13185_v58 }
 0x1ef   : > { %v4764_v31 = vsel %vm4636_vm6, %v4572_v54, %v4700_v12  ;;  %v4227_v20 = vpack.c.b16 %v4192_v25, %v4191_v59  ;;  %v1563_v45 = vshll.u32 %v719_v22, 16  ;;  %v1547_v43 = vrot.slane %v1546_v9, 4  ;;  %6676 = vmatpush.bf16.msrb.mxu0 %v13153_v29 }
 0x1f0   : > { %v2976_v8 = vpop.f32.mrf.mxu2  ;;  %v15250_v23 = vpack.c.bf16 %v4764_v31, %v4764_v31  ;;  %v4474_v13 = vpop.f32.mrf.mxu3  ;;  %5856 = vrot.lane.b32.xlu2 %v5733_v41, %s13453_s30  ;;  %v4039_v24 = vshrl.u32 %v12149_v14, 16  ;;  %v4042_v39 = vshll.u32 %v12149_v14, 16  ;;  %v1560_v51 = vor.u32 %v1559_v7, %v1556_v53  ;;  %v644_v31 = vld [vmem:[%s13560_s14 + $0x1e8] sm:$0xf] }
 0x1f1   : > { %v3075_v34 = vadd.f32 %v2976_v8, %v2438_v50  ;;  %v2440_v28 = vpop.f32.mrf.mxu1  ;;  %v1979_v10 = vpop.f32.mrf.mxu0  ;;  %12225 = vmatmul.msk.bf16.gmra.mxu3 %vm1768_vm3, %v4227_v20  ;;  %v1565_v26 = vrot.slane %v1563_v45, 5  ;;  %v4048_v49 = vshll.u32 %v12150_v61, 16  ;;  %v4053_v1 = vshrl.u32 %v12151_v63, 16  ;;  %v720_v61 = vld [vmem:[%s13560_s14 + $0x1ec] sm:$0x1] }
 0x1f2   : > { %v15256_v21 = vpop.permute.xlu0 %5488  ;;  %4924 = vrot.lane.b32.xlu0 %v15250_v23, %s13453_s30  ;;  %v2441_v4 = vadd.f32 %v2440_v28, %v1979_v10  ;;  %v15261_v27 = vpop.permute.xlu2 %5265  ;;  %v1552_v62 = vsel %vm13604_vm2, %v1547_v43, %v1551_v15  ;;  %v4041_v59 = vrot.slane %v4039_v24, 4  ;;  %v1561_v36 = vrot.slane %v1560_v51, 4  ;;  %v645_v28 = vld [vmem:[%s13560_s14 + $0x1f0] sm:$0xf] }
 0x1f3   : > { %v4573_v32 = vadd.f32 %v4474_v13, %v3075_v34  ;;  %v1694_v60 = vunpack.c.l.b16 %v1552_v62  ;;  %v4044_v3 = vrot.slane %v4042_v39, 5  ;;  %v4050_v6 = vrot.slane %v4048_v49, 5 }
 0x1f4   : > { %11770 = vmatmul.msk.bf16.gmra.mxu1 %vm1768_vm3, %v11708_v37  ;;  %v5949_v50 = vld [vmem:[#allocation2 + $0x60] sm:$0x7]  ;;  %v4055_v16 = vrot.slane %v4053_v1, 4  ;;  %v4056_v46 = vshll.u32 %v12151_v63, 16  ;;  %v1566_v52 = vsel %vm13604_vm2, %v1561_v36, %v1565_v26  ;;  %v5154_v12 = vshrl.u32 %v15250_v23, 16 }
 0x1f5   : > { %vm4637_vm8 = vcmp.ge.f32.partialorder %v4573_v32, 0.0  ;;  %v4701_v56 = vmul.f32 0.2, %v4573_v32  ;;  %12030 = vmatmul.msk.bf16.gmra.mxu2 %vm1768_vm3, %v11968_v48  ;;  %v5950_v54 = vsel %vm14672_vm1, %v15191_v57, %v5949_v50  ;;  %v13177_v37 = vld [vmem:[%s17204_s2 + $0x80] sm:$0xff]  ;;  %v4062_v57 = vshll.u32 %v12152_v35, 16  ;;  %5502 = vrot.lane.b32.xlu1 %v15221_v19, %s13454_s8 }
 0x1f6   : > { %5951 = vst [vmem:[#allocation2 + $0x60] sm:$0x7] %v5950_v54  ;;  %v4045_v55 = vor.u32 %v4044_v3, %v4041_v59  ;;  %v5157_v40 = vshll.u32 %v15250_v23, 16  ;;  %7191 = vmatpush.bf16.msrb.mxu2 %v13177_v37  ;;  %v13145_v48 = vld [vmem:[%s17204_s2] sm:$0xff]  ;;  %v1695_v42 = vunpack.c.l.b16 %v1566_v52  ;;  %v4058_v47 = vrot.slane %v4056_v46, 5 }
 0x1f7   : > { %v4064_v11 = vrot.slane %v4062_v57, 5  ;;  %v5156_v30 = vrot.slane %v5154_v12, 7  ;;  %v4765_v23 = vsel %vm4637_vm8, %v4573_v32, %v4701_v56  ;;  %6909 = vmatpush.bf16.msrb.mxu1 %v13145_v48  ;;  %v721_v63 = vld [vmem:[%s13560_s14 + $0x1f4] sm:$0x1]  ;;  %v1568_v13 = vshrl.u32 %v644_v31, 16 }
 0x1f8   : > { %v2979_v18 = vpop.f32.mrf.mxu2  ;;  %v4046_v22 = vrot.slane %v4045_v55, 4  ;;  %v4477_v2 = vpop.f32.mrf.mxu3  ;;  %v1729_v33 = vpack.c.b16 %v1695_v42, %v1694_v60  ;;  %v4059_v17 = vor.u32 %v4058_v47, %v4055_v16  ;;  %v15300_v34 = vpack.c.bf16 %v4765_v23, %v4765_v23  ;;  %v11711_v1 = vld [vmem:[%s13560_s14 + $0x1e8] sm:$0xf]  ;;  %v12153_v50 = vld [vmem:[%s13560_s14 + $0x1f0] sm:$0xf] }
 0x1f9   : > { %v3076_v0 = vadd.f32 %v2979_v18, %v2441_v4  ;;  %v2442_v25 = vpop.f32.mrf.mxu1  ;;  %v1981_v19 = vpop.f32.mrf.mxu0  ;;  %v5159_v9 = vor.u32 %v5157_v40, %v5156_v30  ;;  %v1571_v4 = vshll.u32 %v644_v31, 16  ;;  %v1570_v24 = vrot.slane %v1568_v13, 4  ;;  %v13071_v60 = vld [vmem:[%s13560_s14 + $0x1ec] sm:$0xf0]  ;;  %v13115_v57 = vld [vmem:[%s13560_s14 + $0x1f4] sm:$0xf0] }
 0x1fa   : > { %v15293_v8 = vpop.permute.xlu0 %5842  ;;  %v2443_v41 = vadd.f32 %v2442_v25, %v1981_v19  ;;  %v15298_v20 = vpop.permute.xlu1 %5263  ;;  %v4051_v10 = vsel %vm13604_vm2, %v4046_v22, %v4050_v6  ;;  %11586 = vmatmul.msk.bf16.gmra.mxu0 %vm1768_vm3, %v1729_v33  ;;  %v4060_v53 = vrot.slane %v4059_v17, 4  ;;  %v5735_v32 = vshrl.u32 %v15300_v34, 16  ;;  %v11971_v3 = vld [vmem:[%s13560_s14 + $0x1f0] sm:$0xf]  ;;  %v12155_v42 = vld [vmem:[%s13560_s14 + $0x1f8] sm:$0xf] }
 0x1fb   : > { %v15296_v14 = vadd.f32 %v4477_v2, %v3076_v0  ;;  %v4193_v7 = vunpack.c.l.b16 %v4051_v10  ;;  %5277 = vrot.lane.b32.xlu2 %v5159_v9, %s13454_s8  ;;  %v5738_v43 = vshll.u32 %v15300_v34, 16  ;;  %v1573_v39 = vrot.slane %v1571_v4, 5  ;;  %v12154_v31 = vld [vmem:[%s13560_s14 + $0x1f4] sm:$0x1]  ;;  %v12156_v23 = vld [vmem:[%s13560_s14 + $0x1fc] sm:$0x1] }
 0x1fc   : > { %v4915_v15 = vpop.permute.xlu2 %4914  ;;  %v4065_v51 = vsel %vm13604_vm2, %v4060_v53, %v4064_v11  ;;  %v1577_v26 = vshll.u32 %v720_v61, 16  ;;  %v1582_v35 = vshrl.u32 %v645_v28, 16  ;;  %v1585_v49 = vshll.u32 %v645_v28, 16 }
 0x1fd   : > { %vm4638_vm10 = vcmp.ge.f32.partialorder %v15296_v14, 0.0  ;;  %v15310_v45 = vmul.f32 0.2, %v15296_v14  ;;  %4996 = vst.msk [vmem:[#allocation2 + $0x78] sm:$0x3] %vm4980_vm4, %v4915_v15  ;;  %v4194_v56 = vunpack.c.l.b16 %v4065_v51  ;;  %v5737_v59 = vrot.slane %v5735_v32, 7 }
 0x1fe   : > { %v1574_v54 = vor.u32 %v1573_v39, %v1570_v24  ;;  %v1591_v36 = vshll.u32 %v721_v63, 16  ;;  %v1579_v6 = vrot.slane %v1577_v26, 5  ;;  %v1584_v16 = vrot.slane %v1582_v35, 4 }
 0x1ff   : > { %v1587_v46 = vrot.slane %v1585_v49, 5  ;;  %v4228_v52 = vpack.c.b16 %v4194_v56, %v4193_v7  ;;  %v5740_v18 = vor.u32 %v5738_v43, %v5737_v59  ;;  %v11712_v19 = vor.u32 %v13071_v60, %v11711_v1 }
 0x200   : > { %v2981_v62 = vpop.f32.mrf.mxu2  ;;  %v4479_v55 = vpop.f32.mrf.mxu3  ;;  %v1575_v48 = vrot.slane %v1574_v54, 4  ;;  %v1593_v25 = vrot.slane %v1591_v36, 5  ;;  %v4067_v33 = vshrl.u32 %v12153_v50, 16  ;;  %v4070_v17 = vshll.u32 %v12153_v50, 16 }
 0x201   : > { %v3077_v37 = vadd.f32 %v2981_v62, %v2443_v41  ;;  %v2445_v58 = vpop.f32.mrf.mxu1  ;;  %v1984_v29 = vpop.f32.mrf.mxu0  ;;  %v1588_v0 = vor.u32 %v1587_v46, %v1584_v16  ;;  %12226 = vmatmul.msk.bf16.gmra.mxu3 %vm1768_vm3, %v4228_v52  ;;  %5858 = vrot.lane.b32.xlu0 %v5740_v18, %s13453_s30  ;;  %v11972_v41 = vor.u32 %v13115_v57, %v11971_v3  ;;  %v4076_v13 = vshll.u32 %v12154_v31, 16  ;;  %v722_v18 = vld [vmem:[%s13560_s14 + $0x1fc] sm:$0x1] }
 0x202   : > { %v4911_v12 = vpop.permute.xlu0 %4910  ;;  %v2446_v40 = vadd.f32 %v2445_v58, %v1984_v29  ;;  %v15325_v11 = vpop.permute.xlu1 %5490  ;;  %v1580_v30 = vsel %vm13604_vm2, %v1575_v48, %v1579_v6  ;;  %v4069_v61 = vrot.slane %v4067_v33, 4  ;;  %v4072_v63 = vrot.slane %v4070_v17, 5  ;;  %v646_v29 = vld [vmem:[%s13560_s14 + $0x1f8] sm:$0xf]  ;;  %v647_v6 = vld [vmem:[%s13560_s14 + $0x200] sm:$0xf] }
 0x203   : > { %v4575_v47 = vadd.f32 %v4479_v55, %v3077_v37  ;;  %4994 = vst.msk [vmem:[#allocation2 + $0x68] sm:$0x3] %vm4980_vm4, %v4911_v12  ;;  %v1589_v9 = vrot.slane %v1588_v0, 4  ;;  %5504 = vrot.lane.b32.xlu2 %v15300_v34, %s13454_s8  ;;  %v1696_v15 = vunpack.c.l.b16 %v1580_v30  ;;  %v4081_v53 = vshrl.u32 %v12155_v42, 16  ;;  %v723_v0 = vld [vmem:[%s13560_s14 + $0x204] sm:$0x1] }
 0x204   : > { %v5381_v22 = vld [vmem:[#allocation2 + $0x78] sm:$0x7]  ;;  %v5268_v2 = vpop.permute.xlu2 %5267  ;;  %11771 = vmatmul.msk.bf16.gmra.mxu1 %vm1768_vm3, %v11712_v19  ;;  %v4084_v7 = vshll.u32 %v12155_v42, 16  ;;  %v4090_v32 = vshll.u32 %v12156_v23, 16  ;;  %v4073_v24 = vor.u32 %v4072_v63, %v4069_v61  ;;  %v4078_v39 = vrot.slane %v4076_v13, 5 }
 0x205   : > { %vm4639_vm11 = vcmp.ge.f32.partialorder %v4575_v47, 0.0  ;;  %v4703_v28 = vmul.f32 0.2, %v4575_v47  ;;  %v5382_v10 = vsel %vm14430_vm9, %v5268_v2, %v5381_v22  ;;  %12031 = vmatmul.msk.bf16.gmra.mxu2 %vm1768_vm3, %v11972_v41  ;;  %v1594_v4 = vsel %vm13604_vm2, %v1589_v9, %v1593_v25  ;;  %v11715_v30 = vld [vmem:[%s13560_s14 + $0x1f8] sm:$0xf] }
 0x206   : > { %5383 = vst [vmem:[#allocation2 + $0x78] sm:$0x7] %v5382_v10  ;;  %v1697_v43 = vunpack.c.l.b16 %v1594_v4  ;;  %v4766_v34 = vsel %vm4638_vm10, %v15296_v14, %v15310_v45  ;;  %v4083_v26 = vrot.slane %v4081_v53, 4  ;;  %v4086_v35 = vrot.slane %v4084_v7, 5  ;;  %v12157_v41 = vld [vmem:[%s13560_s14 + $0x200] sm:$0xf] }
 0x207   : > { %v4074_v59 = vrot.slane %v4073_v24, 4  ;;  %v4092_v54 = vrot.slane %v4090_v32, 5  ;;  %v4830_v60 = vpack.c.bf16 %v4766_v34, %v4766_v34  ;;  %v4767_v58 = vsel %vm4639_vm11, %v4575_v47, %v4703_v28  ;;  %v13072_v9 = vld [vmem:[%s13560_s14 + $0x1fc] sm:$0xf0]  ;;  %v13116_v32 = vld [vmem:[%s13560_s14 + $0x204] sm:$0xf0] }
 0x208   : > { %v2984_v51 = vpop.f32.mrf.mxu2  ;;  %v1730_v62 = vpack.c.b16 %v1697_v43, %v1696_v15  ;;  %v4482_v36 = vpop.f32.mrf.mxu3  ;;  %v4087_v37 = vor.u32 %v4086_v35, %v4083_v26  ;;  %v1596_v25 = vshrl.u32 %v646_v29, 16  ;;  %v1599_v31 = vshll.u32 %v646_v29, 16  ;;  %v11975_v15 = vld [vmem:[%s13560_s14 + $0x200] sm:$0xf] }
 0x209   : > { %v3078_v49 = vadd.f32 %v2984_v51, %v2446_v40  ;;  %v2447_v1 = vpop.f32.mrf.mxu1  ;;  %v1986_v50 = vpop.f32.mrf.mxu0  ;;  %v4079_v16 = vsel %vm13604_vm2, %v4074_v59, %v4078_v39  ;;  %v5161_v46 = vshrl.u32 %v4830_v60, 16  ;;  %v5164_v48 = vshll.u32 %v4830_v60, 16 }
 0x20a   : > { %v5375_v56 = vld [vmem:[#allocation2 + $0x68] sm:$0x7]  ;;  %v15350_v45 = vpop.permute.xlu1 %5844  ;;  %v2448_v57 = vadd.f32 %v2447_v1, %v1986_v50  ;;  %11587 = vmatmul.msk.bf16.gmra.mxu0 %vm1768_vm3, %v1730_v62  ;;  %v4088_v12 = vrot.slane %v4087_v37, 4  ;;  %v4195_v40 = vunpack.c.l.b16 %v4079_v16  ;;  %v1605_v22 = vshll.u32 %v722_v18, 16 }
 0x20b   : > { %v5376_v3 = vsel %vm14430_vm9, %v15298_v20, %v5375_v56  ;;  %v15348_v14 = vadd.f32 %v4482_v36, %v3078_v49  ;;  %v15359_v20 = vpack.c.bf16 %v4767_v58, %v4767_v58  ;;  %4926 = vrot.lane.b32.xlu2 %v4830_v60, %s13453_s30  ;;  %v5163_v42 = vrot.slane %v5161_v46, 7  ;;  %v12158_v56 = vld [vmem:[%s13560_s14 + $0x204] sm:$0x1]  ;;  %v12159_v62 = vld [vmem:[%s13560_s14 + $0x208] sm:$0xf] }
 0x20c   : > { %5377 = vst [vmem:[#allocation2 + $0x68] sm:$0x7] %v5376_v3  ;;  %v5493_v52 = vpop.permute.xlu0 %5492  ;;  %v15357_v55 = vpop.permute.xlu2 %5848  ;;  %v4093_v19 = vsel %vm13604_vm2, %v4088_v12, %v4092_v54  ;;  %v1610_v2 = vshrl.u32 %v647_v6, 16  ;;  %v1598_v10 = vrot.slane %v1596_v25, 4  ;;  %v1601_v53 = vrot.slane %v1599_v31, 5 }
 0x20d   : > { %5574 = vst.msk [vmem:[#allocation2 + $0x68] sm:$0x3] %vm5561_vm13, %v15256_v21  ;;  %vm4640_vm12 = vcmp.ge.f32.partialorder %v15348_v14, 0.0  ;;  %v5742_v47 = vshrl.u32 %v15359_v20, 16  ;;  %v5745_v21 = vshll.u32 %v15359_v20, 16  ;;  %v4196_v23 = vunpack.c.l.b16 %v4093_v19 }
 0x20e   : > { %5576 = vst.msk [vmem:[#allocation2 + $0x78] sm:$0x3] %vm5561_vm13, %v5493_v52  ;;  %v5166_v33 = vor.u32 %v5164_v48, %v5163_v42  ;;  %v4704_v61 = vmul.f32 0.2, %v15348_v14  ;;  %v1607_v7 = vrot.slane %v1605_v22, 5  ;;  %v1612_v51 = vrot.slane %v1610_v2, 4 }
 0x20f   : > { %v5744_v28 = vrot.slane %v5742_v47, 7  ;;  %v4229_v43 = vpack.c.b16 %v4196_v23, %v4195_v40  ;;  %v1613_v34 = vshll.u32 %v647_v6, 16  ;;  %v1602_v49 = vor.u32 %v1601_v53, %v1598_v10  ;;  %v12160_v6 = vld [vmem:[%s13560_s14 + $0x20c] sm:$0x1]  ;;  %s13456_s14 = smov 80  }
 0x210   : > { %v2986_v17 = vpop.f32.mrf.mxu2  ;;  %5279 = vrot.lane.b32.xlu0 %v5166_v33, %s13454_s8  ;;  %v4484_v24 = vpop.f32.mrf.mxu3  ;;  %v1619_v1 = vshll.u32 %v723_v0, 16  ;;  %v11716_v50 = vor.u32 %v13072_v9, %v11715_v30  ;;  %v11976_v3 = vor.u32 %v13116_v32, %v11975_v15  ;;  %v4095_v37 = vshrl.u32 %v12157_v41, 16 }
 0x211   : > { %v3079_v63 = vadd.f32 %v2986_v17, %v2448_v57  ;;  %v2450_v13 = vpop.f32.mrf.mxu1  ;;  %v1989_v4 = vpop.f32.mrf.mxu0  ;;  %v5747_v39 = vor.u32 %v5745_v21, %v5744_v28  ;;  %12227 = vmatmul.msk.bf16.gmra.mxu3 %vm1768_vm3, %v4229_v43  ;;  %v1615_v60 = vrot.slane %v1613_v34, 5  ;;  %vm334_vm14 = vcmask 1040384   ;;  %v337_v43 = vld [vmem:[#allocation2 + $0x4] sm:$0x1] }
 0x212   : > { %v4913_v35 = vpop.permute.xlu1 %4912  ;;  %v2451_v54 = vadd.f32 %v2450_v13, %v1989_v4  ;;  %v1603_v29 = vrot.slane %v1602_v49, 4  ;;  %v4768_v16 = vsel %vm4640_vm12, %v15348_v14, %v4704_v61  ;;  %v1621_v57 = vrot.slane %v1619_v1, 5  ;;  %v6012_v13 = vld [vmem:[#allocation2] sm:$0xf] }
 0x213   : > { %v4577_v26 = vadd.f32 %v4484_v24, %v3079_v63  ;;  %5860 = vrot.lane.b32.xlu1 %v5747_v39, %s13453_s30  ;;  %4995 = vst.msk [vmem:[#allocation2 + $0x70] sm:$0x3] %vm4980_vm4, %v4913_v35  ;;  %v1616_v46 = vor.u32 %v1615_v60, %v1612_v51  ;;  %v4097_v52 = vrot.slane %v4095_v37, 4  ;;  %v4098_v18 = vshll.u32 %v12157_v41, 16  ;;  %v341_v24 = vld [vmem:[#allocation2 + $0xc] sm:$0x1] }
 0x214   : > { %v5952_v59 = vld [vmem:[#allocation2 + $0x68] sm:$0x7]  ;;  %v15385_v36 = vpop.permute.xlu2 %5496  ;;  %11772 = vmatmul.msk.bf16.gmra.mxu1 %vm1768_vm3, %v11716_v50  ;;  %v1608_v12 = vsel %vm13604_vm2, %v1603_v29, %v1607_v7  ;;  %v4109_v40 = vshrl.u32 %v12159_v62, 16  ;;  %v4112_v48 = vshll.u32 %v12159_v62, 16  ;;  %v4118_v0 = vshll.u32 %v12160_v6, 16 }
 0x215   : > { %v5953_v58 = vsel %vm14672_vm1, %v15293_v8, %v5952_v59  ;;  %vm4641_vm15 = vcmp.ge.f32.partialorder %v4577_v26, 0.0  ;;  %12032 = vmatmul.msk.bf16.gmra.mxu2 %vm1768_vm3, %v11976_v3  ;;  %v4104_v8 = vshll.u32 %v12158_v56, 16  ;;  %v4705_v42 = vmul.f32 0.2, %v4577_v26  ;;  %v6013_v50 = vld [vmem:[#allocation2 + $0x8] sm:$0xf] }
 0x216   : > { %5954 = vst [vmem:[#allocation2 + $0x68] sm:$0x7] %v5953_v58  ;;  %v1617_v47 = vrot.slane %v1616_v46, 4  ;;  %v4100_v21 = vrot.slane %v4098_v18, 5  ;;  %v1698_v19 = vunpack.c.l.b16 %v1608_v12  ;;  %v4111_v31 = vrot.slane %v4109_v40, 4 }
 0x217   : > { %v4106_v14 = vrot.slane %v4104_v8, 5  ;;  %v4114_v22 = vrot.slane %v4112_v48, 5  ;;  %v4832_v17 = vpack.c.bf16 %v4768_v16, %v4768_v16  ;;  %v4120_v15 = vrot.slane %v4118_v0, 5  ;;  %v13129_v62 = vld [vmem:[#allocation2 + $0x4] sm:$0xf0] }
 0x218   : > { %v2989_v25 = vpop.f32.mrf.mxu2  ;;  %5506 = vrot.lane.b32.xlu0 %v15359_v20, %s13454_s8  ;;  %v1622_v41 = vsel %vm13604_vm2, %v1617_v47, %v1621_v57  ;;  %v4101_v23 = vor.u32 %v4100_v21, %v4097_v52  ;;  %v5958_v20 = vld [vmem:[#allocation2 + $0x78] sm:$0x7]  ;;  %v4769_v32 = vsel %vm4641_vm15, %v4577_v26, %v4705_v42  ;;  %vm335_vm0 = vsmask.f32 256  ;;  %v13161_v59 = vld [vmem:[#allocation2 + $0xc] sm:$0xf0] }
 0x219   : > { %v2452_v2 = vpop.f32.mrf.mxu1  ;;  %v1991_v30 = vpop.f32.mrf.mxu0  ;;  %v3080_v33 = vadd.f32 %v2989_v25, %v2451_v54  ;;  %v1699_v10 = vunpack.c.l.b16 %v1622_v41  ;;  %v4115_v9 = vor.u32 %v4114_v22, %v4111_v31  ;;  %v5168_v7 = vshrl.u32 %v4832_v17, 16  ;;  %v345_v54 = vld [vmem:[#allocation2 + $0x14] sm:$0x1]  ;;  %vm15416_vm5 = vmand %vm334_vm14, %vm335_vm0  ;;  %v7305_v29 = vld [vmem:[#allocation2 + $0x8] sm:$0xf] }
 0x21a   : > { %v5378_v28 = vld [vmem:[#allocation2 + $0x70] sm:$0x7]  ;;  %v5847_v61 = vpop.permute.xlu1 %5846  ;;  %v2453_v63 = vadd.f32 %v2452_v2, %v1991_v30  ;;  %v4102_v53 = vrot.slane %v4101_v23, 4  ;;  %v4487_v34 = vpop.f32.mrf.mxu3  ;;  %v5171_v35 = vshll.u32 %v4832_v17, 16  ;;  %v6096_v58 = vshll.u32 %v6012_v13, 16 }
 0x21b   : > { %v5379_v4 = vsel %vm14430_vm9, %v15261_v27, %v5378_v28  ;;  %v1731_v39 = vpack.c.b16 %v1699_v10, %v1698_v19  ;;  %v4116_v51 = vrot.slane %v4115_v9, 4  ;;  %v5959_v49 = vsel %vm14672_vm1, %v5847_v61, %v5958_v20  ;;  %v12279_v52 = vld [vmem:[#allocation2] sm:$0xf]  ;;  %v12391_v18 = vld [vmem:[#allocation2 + $0x8] sm:$0xf] }
 0x21c   : > { %5380 = vst [vmem:[#allocation2 + $0x70] sm:$0x7] %v5379_v4  ;;  %v4919_v1 = vpop.permute.xlu2 %4918  ;;  %v4107_v27 = vsel %vm13604_vm2, %v4102_v53, %v4106_v14  ;;  %v4578_v56 = vadd.f32 %v4487_v34, %v3080_v33  ;;  %v5170_v26 = vrot.slane %v5168_v7, 7  ;;  %v338_v40 = vsel %vm15416_vm5, 0, %v337_v43  ;;  %v7307_v47 = vld [vmem:[#allocation2 + $0x10] sm:$0xf] }
 0x21d   : > { %5575 = vst.msk [vmem:[#allocation2 + $0x70] sm:$0x3] %vm5561_vm13, %v15325_v11  ;;  %11588 = vmatmul.msk.bf16.gmra.mxu0 %vm1768_vm3, %v1731_v39  ;;  %v4121_v60 = vsel %vm13604_vm2, %v4116_v51, %v4120_v15  ;;  %v4197_v3 = vunpack.c.l.b16 %v4107_v27  ;;  %v6093_v11 = vshrl.u32 %v6012_v13, 16  ;;  %v342_v48 = vsel %vm15416_vm5, 0, %v341_v24  ;;  %v15437_v43 = vld [vmem:[#allocation2 + $0x14] sm:$0xf0] }
 0x21e   : > { %5960 = vst [vmem:[#allocation2 + $0x78] sm:$0x7] %v5959_v49  ;;  %v4198_v6 = vunpack.c.l.b16 %v4121_v60  ;;  %vm4642_vm6 = vcmp.ge.f32.partialorder %v4578_v56, 0.0  ;;  %v4706_v16 = vmul.f32 0.2, %v4578_v56  ;;  %v5173_v46 = vor.u32 %v5171_v35, %v5170_v26 }
 0x21f   : > { %4998 = vst.msk [vmem:[#allocation2 + $0x90] sm:$0x3] %vm4980_vm4, %v4919_v1  ;;  %v6095_v42 = vrot.slane %v6093_v11, 4  ;;  %v6098_v25 = vrot.slane %v6096_v58, 5  ;;  %v6107_v19 = vshrl.u32 %v6013_v50, 16  ;;  %v6110_v14 = vshll.u32 %v6013_v50, 16 }
 0x220   : > { %v2991_v57 = vpop.f32.mrf.mxu2  ;;  %v4230_v21 = vpack.c.b16 %v4198_v6, %v4197_v3  ;;  %4928 = vrot.lane.b32.xlu0 %v4832_v17, %s13453_s30  ;;  %5281 = vrot.lane.b32.xlu1 %v5173_v46, %s13454_s8  ;;  %339 = vst [vmem:[#allocation2 + $0x4] sm:$0x1] %v338_v40  ;;  %v15427_v31 = vpack.c.bf16 %v4769_v32, %v4769_v32  ;;  %v346_v41 = vsel %vm15416_vm5, 0, %v345_v54  ;;  %v7370_v28 = vshrl.u32 %v7305_v29, 16  ;;  %v349_v32 = vld [vmem:[#allocation2 + $0x1c] sm:$0x1] }
 0x221   : > { %v3081_v12 = vadd.f32 %v2991_v57, %v2453_v63  ;;  %v2455_v8 = vpop.f32.mrf.mxu1  ;;  %v1994_v0 = vpop.f32.mrf.mxu0  ;;  %343 = vst [vmem:[#allocation2 + $0xc] sm:$0x1] %v342_v48  ;;  %v12280_v2 = vor.u32 %v13129_v62, %v12279_v52  ;;  %v12392_v30 = vor.u32 %v13161_v59, %v12391_v18  ;;  %v6099_v23 = vor.u32 %v6098_v25, %v6095_v42  ;;  %v15441_v54 = vld [vmem:[#allocation2 + $0x10] sm:$0xf] }
 0x222   : > { %v5495_v22 = vpop.permute.xlu1 %5494  ;;  %12228 = vmatmul.msk.bf16.gmra.mxu3 %vm1768_vm3, %v4230_v21  ;;  %v6109_v33 = vrot.slane %v6107_v19, 4  ;;  %v6112_v17 = vrot.slane %v6110_v14, 5  ;;  %v4489_v9 = vpop.f32.mrf.mxu3  ;;  %v2456_v15 = vadd.f32 %v2455_v8, %v1994_v0  ;;  %347 = vst [vmem:[#allocation2 + $0x14] sm:$0x1] %v346_v41  ;;  %v7373_v61 = vshll.u32 %v7305_v29, 16 }
 0x223   : > { %5577 = vst.msk [vmem:[#allocation2 + $0x80] sm:$0x3] %vm5561_vm13, %v5495_v22  ;;  %v7384_v63 = vshrl.u32 %v7307_v47, 16  ;;  %v4770_v13 = vsel %vm4642_vm6, %v4578_v56, %v4706_v16  ;;  %v4579_v53 = vadd.f32 %v4489_v9, %v3081_v12  ;;  %v6100_v7 = vrot.slane %v6099_v23, 4 }
 0x224   : > { %v5955_v10 = vld [vmem:[#allocation2 + $0x70] sm:$0x7]  ;;  %6910 = vmatmul.bf16.vlgmr.msrb.gmra.mxu1 %v12280_v2  ;;  %v6113_v20 = vor.u32 %v6112_v17, %v6109_v33  ;;  %v7372_v24 = vrot.slane %v7370_v28, 4  ;;  %v7375_v39 = vrot.slane %v7373_v61, 5  ;;  %v7387_v34 = vshll.u32 %v7307_v47, 16 }
 0x225   : > { %v5956_v4 = vsel %vm14672_vm1, %v15350_v45, %v5955_v10  ;;  %7192 = vmatmul.bf16.vlgmr.msrb.gmra.mxu2 %v12392_v30  ;;  %v7386_v51 = vrot.slane %v7384_v63, 4  ;;  %vm4643_vm3 = vcmp.ge.f32.partialorder %v4579_v53, 0.0  ;;  %v4707_v35 = vmul.f32 0.2, %v4579_v53  ;;  %v6014_v33 = vld [vmem:[#allocation2 + $0x10] sm:$0xf] }
 0x226   : > { %5957 = vst [vmem:[#allocation2 + $0x70] sm:$0x7] %v5956_v4  ;;  %v6114_v49 = vrot.slane %v6113_v20, 4  ;;  %v4834_v50 = vpack.c.bf16 %v4770_v13, %v4770_v13  ;;  %v7376_v56 = vor.u32 %v7375_v39, %v7372_v24  ;;  %v7389_v45 = vrot.slane %v7387_v34, 5  ;;  %v6015_v24 = vld [vmem:[#allocation2 + $0x18] sm:$0xf] }
 0x227   : > { %v6060_v27 = vld [vmem:[#allocation2 + $0x4] sm:$0x1]  ;;  %v350_v59 = vsel %vm15416_vm5, 0, %v349_v32  ;;  %v4771_v6 = vsel %vm4643_vm3, %v4579_v53, %v4707_v35  ;;  %v12284_v16 = vor.u32 %v15437_v43, %v15441_v54  ;;  %v6121_v39 = vshrl.u32 %v6014_v33, 16 }
 0x228   : > { %v2994_v1 = vpop.f32.mrf.mxu2  ;;  %5508 = vrot.lane.b32.xlu1 %v15427_v31, %s13454_s8  ;;  %v6061_v60 = vld [vmem:[#allocation2 + $0xc] sm:$0x1]  ;;  %v6102_v3 = vshll.u32 %v6060_v27, 16  ;;  %v5175_v58 = vshrl.u32 %v4834_v50, 16  ;;  %v7377_v52 = vrot.slane %v7376_v56, 4  ;;  %v7390_v12 = vor.u32 %v7389_v45, %v7386_v51 }
 0x229   : > { %v3082_v26 = vadd.f32 %v2994_v1, %v2456_v15  ;;  %v2457_v62 = vpop.f32.mrf.mxu1  ;;  %v7306_v11 = vld [vmem:[#allocation2 + $0xc] sm:$0x1]  ;;  %v1996_v29 = vpop.f32.mrf.mxu0  ;;  %v6116_v57 = vshll.u32 %v6061_v60, 16  ;;  %v7308_v42 = vld [vmem:[#allocation2 + $0x14] sm:$0x1]  ;;  %v5178_v21 = vshll.u32 %v4834_v50, 16  ;;  %v4835_v23 = vpack.c.bf16 %v4771_v6, %v4771_v6 }
 0x22a   : > { %v5961_v46 = vld [vmem:[#allocation2 + $0x80] sm:$0x7]  ;;  %v7379_v18 = vshll.u32 %v7306_v11, 16  ;;  %v4917_v8 = vpop.permute.xlu1 %4916  ;;  %v6104_v48 = vrot.slane %v6102_v3, 5  ;;  %v5177_v47 = vrot.slane %v5175_v58, 7  ;;  %v7391_v19 = vrot.slane %v7390_v12, 4  ;;  %v15468_v60 = vpop.permute.xlu2 %5852 }
 0x22b   : > { %v5962_v40 = vsel %vm14672_vm1, %v15357_v55, %v5961_v46  ;;  %v6118_v0 = vrot.slane %v6116_v57, 5  ;;  %v7393_v14 = vshll.u32 %v7308_v42, 16  ;;  %4997 = vst.msk [vmem:[#allocation2 + $0x88] sm:$0x3] %vm4980_vm4, %v4917_v8  ;;  %v2458_v41 = vadd.f32 %v2457_v62, %v1996_v29  ;;  %v6062_v4 = vld [vmem:[#allocation2 + $0x14] sm:$0x1]  ;;  %v5270_v57 = vpop.permute.xlu0 %5269 }
 0x22c   : > { %5963 = vst [vmem:[#allocation2 + $0x80] sm:$0x7] %v5962_v40  ;;  %v7381_v25 = vrot.slane %v7379_v18, 5  ;;  %v6105_v22 = vsel %vm13604_vm2, %v6100_v7, %v6104_v48  ;;  %v4492_v2 = vpop.f32.mrf.mxu3  ;;  %v5180_v30 = vor.u32 %v5178_v21, %v5177_v47  ;;  %v5756_v13 = vshrl.u32 %v4835_v23, 16  ;;  %v353_v62 = vld [vmem:[#allocation2 + $0x24] sm:$0x1] }
 0x22d   : > { %v6119_v55 = vsel %vm13604_vm2, %v6114_v49, %v6118_v0  ;;  %v6557_v17 = vunpack.c.l.b16 %v6105_v22  ;;  %v7395_v10 = vrot.slane %v7393_v14, 5  ;;  %351 = vst [vmem:[#allocation2 + $0x1c] sm:$0x1] %v350_v59  ;;  %v15458_v61 = vadd.f32 %v4492_v2, %v3082_v26  ;;  %v13162_v49 = vld [vmem:[#allocation2 + $0x1c] sm:$0xf0] }
 0x22e   : > { %v7382_v28 = vsel %vm13604_vm2, %v7377_v52, %v7381_v25  ;;  %v6558_v9 = vunpack.c.l.b16 %v6119_v55  ;;  %5283 = vrot.lane.b32.xlu2 %v5180_v30, %s13454_s8  ;;  %v5759_v20 = vshll.u32 %v4835_v23, 16  ;;  %v5758_v1 = vrot.slane %v5756_v13, 7  ;;  %v12395_v29 = vld [vmem:[#allocation2 + $0x18] sm:$0xf]  ;;  %v7311_v8 = vld [vmem:[#allocation2 + $0x20] sm:$0xf] }
 0x22f   : > { %v7834_v15 = vunpack.c.l.b16 %v7382_v28  ;;  %v7396_v53 = vsel %vm13604_vm2, %v7391_v19, %v7395_v10  ;;  %vm4644_vm8 = vcmp.ge.f32.partialorder %v15458_v61, 0.0  ;;  %v15465_v35 = vmul.f32 0.2, %v15458_v61  ;;  %v7309_v6 = vld [vmem:[#allocation2 + $0x18] sm:$0xf] }
 0x230   : > { %v2996_v63 = vpop.f32.mrf.mxu2  ;;  %v6589_v51 = vpack.c.b16 %v6558_v9, %v6557_v17  ;;  %v7835_v34 = vunpack.c.l.b16 %v7396_v53  ;;  %4930 = vrot.lane.b32.xlu1 %v4834_v50, %s13453_s30  ;;  %v6123_v56 = vrot.slane %v6121_v39, 4  ;;  %v6124_v45 = vshll.u32 %v6014_v33, 16 }
 0x231   : > { %v3083_v7 = vadd.f32 %v2996_v63, %v2458_v41  ;;  %v2460_v32 = vpop.f32.mrf.mxu1  ;;  %v1999_v27 = vpop.f32.mrf.mxu0  ;;  %v6130_v26 = vshll.u32 %v6062_v4, 16  ;;  %v6135_v11 = vshrl.u32 %v6015_v24, 16  ;;  %v6138_v58 = vshll.u32 %v6015_v24, 16 }
 0x232   : > { %6677 = vmatmul.bf16.vlgmr.msrb.gmra.mxu0 %v6589_v51  ;;  %v7866_v59 = vpack.c.b16 %v7835_v34, %v7834_v15  ;;  %v2461_v3 = vadd.f32 %v2460_v32, %v1999_v27  ;;  %v5384_v46 = vld [vmem:[#allocation2 + $0x88] sm:$0x7]  ;;  %v5761_v52 = vor.u32 %v5759_v20, %v5758_v1  ;;  %v6126_v50 = vrot.slane %v6124_v45, 5  ;;  %v5387_v27 = vld [vmem:[#allocation2 + $0x90] sm:$0x7] }
 0x233   : > { %v6132_v18 = vrot.slane %v6130_v26, 5  ;;  %v12396_v12 = vor.u32 %v13162_v49, %v12395_v29  ;;  %v5385_v40 = vsel %vm14430_vm9, %v5270_v57, %v5384_v46  ;;  %v6137_v47 = vrot.slane %v6135_v11, 4  ;;  %v357_v11 = vld [vmem:[#allocation2 + $0x2c] sm:$0x1] }
 0x234   : > { %6915 = vmatmul.bf16.gmra.mxu1 %v12284_v16  ;;  %7954 = vmatmul.bf16.vlgmr.msrb.gmra.mxu3 %v7866_v59  ;;  %v4494_v48 = vpop.f32.mrf.mxu3  ;;  %v6063_v42 = vld [vmem:[#allocation2 + $0x1c] sm:$0x1]  ;;  %v6140_v21 = vrot.slane %v6138_v58, 5  ;;  %v354_v0 = vsel %vm15416_vm5, 0, %v353_v62  ;;  %5386 = vst [vmem:[#allocation2 + $0x88] sm:$0x7] %v5385_v40  ;;  %v6127_v19 = vor.u32 %v6126_v50, %v6123_v56  ;;  %v4772_v39 = vsel %vm4644_vm8, %v15458_v61, %v15465_v35 }
 0x235   : > { %v4581_v25 = vadd.f32 %v4494_v48, %v3083_v7  ;;  %5864 = vrot.lane.b32.xlu0 %v5761_v52, %s13453_s30  ;;  %v6144_v43 = vshll.u32 %v6063_v42, 16  ;;  %7197 = vmatmul.bf16.gmra.mxu2 %v12396_v12  ;;  %v7310_v54 = vld [vmem:[#allocation2 + $0x1c] sm:$0x1]  ;;  %v7398_v16 = vshrl.u32 %v7309_v6, 16  ;;  %355 = vst [vmem:[#allocation2 + $0x24] sm:$0x1] %v354_v0  ;;  %v4836_v1 = vpack.c.bf16 %v4772_v39, %v4772_v39 }
 0x236   : > { %5510 = vrot.lane.b32.xlu2 %v4835_v23, %s13454_s8  ;;  %v6141_v14 = vor.u32 %v6140_v21, %v6137_v47  ;;  %v7401_v22 = vshll.u32 %v7309_v6, 16  ;;  %v7407_v2 = vshll.u32 %v7310_v54, 16  ;;  %v7412_v30 = vshrl.u32 %v7311_v8, 16  ;;  %v6016_v12 = vld [vmem:[#allocation2 + $0x20] sm:$0xf] }
 0x237   : > { %vm4645_vm10 = vcmp.ge.f32.partialorder %v4581_v25, 0.0  ;;  %v4709_v33 = vmul.f32 0.2, %v4581_v25  ;;  %v6128_v55 = vrot.slane %v6127_v19, 4  ;;  %v6146_v17 = vrot.slane %v6144_v43, 5 }
 0x238   : > { %v2999_v41 = vpop.f32.mrf.mxu2  ;;  %v6142_v10 = vrot.slane %v6141_v14, 4  ;;  %v7400_v9 = vrot.slane %v7398_v16, 4  ;;  %v7403_v15 = vrot.slane %v7401_v22, 5  ;;  %v7409_v63 = vrot.slane %v7407_v2, 5  ;;  %v6017_v21 = vld [vmem:[#allocation2 + $0x28] sm:$0xf] }
 0x239   : > { %v2462_v28 = vpop.f32.mrf.mxu1  ;;  %v6133_v13 = vsel %vm13604_vm2, %v6128_v55, %v6132_v18  ;;  %v7414_v4 = vrot.slane %v7412_v30, 4  ;;  %v7415_v23 = vshll.u32 %v7311_v8, 16  ;;  %v3084_v53 = vadd.f32 %v2999_v41, %v2461_v3  ;;  %v2001_v7 = vpop.f32.mrf.mxu0  ;;  %v12287_v14 = vld [vmem:[#allocation2 + $0x20] sm:$0xf]  ;;  %v12399_v30 = vld [vmem:[#allocation2 + $0x28] sm:$0xf] }
 0x23a   : > { %v6147_v20 = vsel %vm13604_vm2, %v6142_v10, %v6146_v17  ;;  %v6559_v32 = vunpack.c.l.b16 %v6133_v13  ;;  %v7404_v24 = vor.u32 %v7403_v15, %v7400_v9  ;;  %v5272_v56 = vpop.permute.xlu0 %5271  ;;  %v2463_v45 = vadd.f32 %v2462_v28, %v2001_v7  ;;  %v13163_v41 = vld [vmem:[#allocation2 + $0x2c] sm:$0xf0] }
 0x23b   : > { %v6560_v34 = vunpack.c.l.b16 %v6147_v20  ;;  %v7417_v49 = vrot.slane %v7415_v23, 5  ;;  %v5388_v62 = vsel %vm14430_vm9, %v5272_v56, %v5387_v27  ;;  %v5749_v59 = vshrl.u32 %v15427_v31, 16  ;;  %v7313_v23 = vld [vmem:[#allocation2 + $0x28] sm:$0xf]  ;;  %v7315_v39 = vld [vmem:[#allocation2 + $0x30] sm:$0xf] }
 0x23c   : > { %v4923_v51 = vpop.permute.xlu2 %4922  ;;  %v7405_v26 = vrot.slane %v7404_v24, 4  ;;  %v5752_v3 = vshll.u32 %v15427_v31, 16  ;;  %v7312_v61 = vld [vmem:[#allocation2 + $0x24] sm:$0x1]  ;;  %v5182_v29 = vshrl.u32 %v4836_v1, 16  ;;  %v5185_v6 = vshll.u32 %v4836_v1, 16 }
 0x23d   : > { %5000 = vst.msk [vmem:[#allocation2 + $0xa0] sm:$0x3] %vm4980_vm4, %v4923_v51  ;;  %v6590_v58 = vpack.c.b16 %v6560_v34, %v6559_v32  ;;  %v7418_v35 = vor.u32 %v7417_v49, %v7414_v4  ;;  %v7421_v57 = vshll.u32 %v7312_v61, 16  ;;  %v5751_v18 = vrot.slane %v5749_v59, 7  ;;  %v6064_v0 = vld [vmem:[#allocation2 + $0x24] sm:$0x1]  ;;  %v5851_v51 = vpop.permute.xlu1 %5850 }
 0x23e   : > { %5389 = vst [vmem:[#allocation2 + $0x90] sm:$0x7] %v5388_v62  ;;  %v7410_v46 = vsel %vm13604_vm2, %v7405_v26, %v7409_v63  ;;  %v4497_v52 = vpop.f32.mrf.mxu3  ;;  %4932 = vrot.lane.b32.xlu2 %v4836_v1, %s13453_s30  ;;  %v4773_v31 = vsel %vm4645_vm10, %v4581_v25, %v4709_v33  ;;  %v5184_v42 = vrot.slane %v5182_v29, 7  ;;  %v358_v2 = vsel %vm15416_vm5, 0, %v357_v11  ;;  %v361_v4 = vld [vmem:[#allocation2 + $0x34] sm:$0x1] }
 0x23f   : > { %5578 = vst.msk [vmem:[#allocation2 + $0x90] sm:$0x3] %vm5561_vm13, %v15385_v36  ;;  %v7419_v8 = vrot.slane %v7418_v35, 4  ;;  %v7836_v40 = vunpack.c.l.b16 %v7410_v46  ;;  %v15498_v48 = vadd.f32 %v4497_v52, %v3084_v53  ;;  %v7423_v19 = vrot.slane %v7421_v57, 5  ;;  %v13131_v36 = vld [vmem:[#allocation2 + $0x24] sm:$0xf0] }
 0x240   : > { %v3001_v50 = vpop.f32.mrf.mxu2  ;;  %v5754_v54 = vor.u32 %v5752_v3, %v5751_v18  ;;  %v15500_v16 = vpack.c.bf16 %v4773_v31, %v4773_v31  ;;  %v5187_v22 = vor.u32 %v5185_v6, %v5184_v42  ;;  %359 = vst [vmem:[#allocation2 + $0x2c] sm:$0x1] %v358_v2  ;;  %v6149_v55 = vshrl.u32 %v6016_v12, 16  ;;  %v365_v18 = vld [vmem:[#allocation2 + $0x3c] sm:$0x1] }
 0x241   : > { %v2465_v47 = vpop.f32.mrf.mxu1  ;;  %v3085_v43 = vadd.f32 %v3001_v50, %v2463_v45  ;;  %vm4646_vm11 = vcmp.ge.f32.partialorder %v15498_v48, 0.0  ;;  %v4710_v25 = vmul.f32 0.2, %v15498_v48  ;;  %v7424_v33 = vsel %vm13604_vm2, %v7419_v8, %v7423_v19 }
 0x242   : > { %6682 = vmatmul.bf16.gmra.mxu0 %v6590_v58  ;;  %v6152_v17 = vshll.u32 %v6016_v12, 16  ;;  %v6158_v28 = vshll.u32 %v6064_v0, 16  ;;  %v7837_v10 = vunpack.c.l.b16 %v7424_v33  ;;  %5285 = vrot.lane.b32.xlu0 %v5187_v22, %s13454_s8  ;;  %v15509_v9 = vpop.permute.xlu0 %5498  ;;  %v6163_v15 = vshrl.u32 %v6017_v21, 16  ;;  %v2004_v53 = vpop.f32.mrf.mxu0 }
 0x243   : > { %v6166_v63 = vshll.u32 %v6017_v21, 16  ;;  %v12288_v13 = vor.u32 %v13131_v36, %v12287_v14  ;;  %v6151_v7 = vrot.slane %v6149_v55, 4  ;;  %v12400_v24 = vor.u32 %v13163_v41, %v12399_v30 }
 0x244   : > { %v6154_v20 = vrot.slane %v6152_v17, 5  ;;  %v6160_v32 = vrot.slane %v6158_v28, 5  ;;  %v7867_v34 = vpack.c.b16 %v7837_v10, %v7836_v40  ;;  %v2466_v1 = vadd.f32 %v2465_v47, %v2004_v53 }
 0x245   : > { %v6165_v27 = vrot.slane %v6163_v15, 4  ;;  %v6168_v56 = vrot.slane %v6166_v63, 5  ;;  %6920 = vmatmul.bf16.gmra.mxu1 %v12288_v13  ;;  %7202 = vmatmul.bf16.gmra.mxu2 %v12400_v24  ;;  %v362_v59 = vsel %vm15416_vm5, 0, %v361_v4  ;;  %v7426_v3 = vshrl.u32 %v7313_v23, 16  ;;  %v6018_v15 = vld [vmem:[#allocation2 + $0x30] sm:$0xf] }
 0x246   : > { %v5964_v49 = vld [vmem:[#allocation2 + $0x90] sm:$0x7]  ;;  %v4499_v26 = vpop.f32.mrf.mxu3  ;;  %5862 = vrot.lane.b32.xlu2 %v5754_v54, %s13453_s30  ;;  %v6155_v62 = vor.u32 %v6154_v20, %v6151_v7  ;;  %7959 = vmatmul.bf16.gmra.mxu3 %v7867_v34  ;;  %v7429_v35 = vshll.u32 %v7313_v23, 16  ;;  %v7440_v29 = vshrl.u32 %v7315_v39, 16  ;;  %363 = vst [vmem:[#allocation2 + $0x34] sm:$0x1] %v362_v59  ;;  %v4774_v40 = vsel %vm4646_vm11, %v15498_v48, %v4710_v25 }
 0x247   : > { %v5965_v45 = vsel %vm14672_vm1, %v5851_v51, %v5964_v49  ;;  %v4583_v58 = vadd.f32 %v4499_v26, %v3085_v43  ;;  %v6169_v61 = vor.u32 %v6168_v56, %v6165_v27  ;;  %v7428_v57 = vrot.slane %v7426_v3, 4  ;;  %v6065_v12 = vld [vmem:[#allocation2 + $0x2c] sm:$0x1]  ;;  %v6019_v34 = vld [vmem:[#allocation2 + $0x38] sm:$0xf] }
 0x248   : > { %v3004_v11 = vpop.f32.mrf.mxu2  ;;  %5966 = vst [vmem:[#allocation2 + $0x90] sm:$0x7] %v5965_v45  ;;  %v6156_v46 = vrot.slane %v6155_v62, 4  ;;  %v7443_v52 = vshll.u32 %v7315_v39, 16  ;;  %v6172_v47 = vshll.u32 %v6065_v12, 16  ;;  %v7431_v0 = vrot.slane %v7429_v35, 5 }
 0x249   : > { %v2467_v6 = vpop.f32.mrf.mxu1  ;;  %v3086_v50 = vadd.f32 %v3004_v11, %v2466_v1  ;;  %vm4647_vm12 = vcmp.ge.f32.partialorder %v4583_v58, 0.0  ;;  %v4711_v31 = vmul.f32 0.2, %v4583_v58  ;;  %v6170_v8 = vrot.slane %v6169_v61, 4  ;;  %v7314_v21 = vld [vmem:[#allocation2 + $0x2c] sm:$0x1] }
 0x24a   : > { %v6161_v42 = vsel %vm13604_vm2, %v6156_v46, %v6160_v32  ;;  %v7442_v19 = vrot.slane %v7440_v29, 4  ;;  %5512 = vrot.lane.b32.xlu0 %v15500_v16, %s13454_s8  ;;  %v7435_v14 = vshll.u32 %v7314_v21, 16  ;;  %v7445_v36 = vrot.slane %v7443_v52, 5  ;;  %v4921_v22 = vpop.permute.xlu0 %4920  ;;  %v15526_v25 = vpop.permute.xlu2 %5856  ;;  %v13132_v46 = vld [vmem:[#allocation2 + $0x34] sm:$0xf0] }
 0x24b   : > { %v4775_v43 = vsel %vm4647_vm12, %v4583_v58, %v4711_v31  ;;  %v6561_v54 = vunpack.c.l.b16 %v6161_v42  ;;  %v6174_v30 = vrot.slane %v6172_v47, 5  ;;  %v7432_v41 = vor.u32 %v7431_v0, %v7428_v57  ;;  %4999 = vst.msk [vmem:[#allocation2 + $0x98] sm:$0x3] %vm4980_vm4, %v4921_v22  ;;  %v2006_v33 = vpop.f32.mrf.mxu0  ;;  %v12291_v0 = vld [vmem:[#allocation2 + $0x30] sm:$0xf] }
 0x24c   : > { %v15523_v2 = vpack.c.bf16 %v4775_v43, %v4775_v43  ;;  %v4838_v48 = vpack.c.bf16 %v4774_v40, %v4774_v40  ;;  %v7437_v55 = vrot.slane %v7435_v14, 5  ;;  %v7446_v17 = vor.u32 %v7445_v36, %v7442_v19  ;;  %v369_v40 = vld [vmem:[#allocation2 + $0x44] sm:$0x1]  ;;  %v7317_v19 = vld [vmem:[#allocation2 + $0x38] sm:$0xf] }
 0x24d   : > { %v2468_v28 = vadd.f32 %v2467_v6, %v2006_v33  ;;  %v366_v10 = vsel %vm15416_vm5, 0, %v365_v18  ;;  %v6175_v63 = vsel %vm13604_vm2, %v6170_v8, %v6174_v30  ;;  %v7433_v13 = vrot.slane %v7432_v41, 4  ;;  %v7316_v20 = vld [vmem:[#allocation2 + $0x34] sm:$0x1]  ;;  %v13164_v8 = vld [vmem:[#allocation2 + $0x3c] sm:$0xf0] }
 0x24e   : > { %v5189_v4 = vshrl.u32 %v4838_v48, 16  ;;  %v5192_v23 = vshll.u32 %v4838_v48, 16  ;;  %367 = vst [vmem:[#allocation2 + $0x3c] sm:$0x1] %v366_v10  ;;  %v6562_v7 = vunpack.c.l.b16 %v6175_v63  ;;  %v7447_v32 = vrot.slane %v7446_v17, 4 }
 0x24f   : > { %v5770_v39 = vshrl.u32 %v15523_v2, 16  ;;  %v7438_v49 = vsel %vm13604_vm2, %v7433_v13, %v7437_v55  ;;  %v7449_v1 = vshll.u32 %v7316_v20, 16  ;;  %v5274_v56 = vpop.permute.xlu1 %5273  ;;  %v5773_v45 = vshll.u32 %v15523_v2, 16  ;;  %v6066_v26 = vld [vmem:[#allocation2 + $0x34] sm:$0x1]  ;;  %v4502_v3 = vpop.f32.mrf.mxu3 }
 0x250   : > { %v3006_v53 = vpop.f32.mrf.mxu2  ;;  %v5191_v27 = vrot.slane %v5189_v4, 7  ;;  %v6591_v62 = vpack.c.b16 %v6562_v7, %v6561_v54  ;;  %v7838_v59 = vunpack.c.l.b16 %v7438_v49  ;;  %v6177_v58 = vshrl.u32 %v6018_v15, 16  ;;  %v12403_v13 = vld [vmem:[#allocation2 + $0x38] sm:$0xf] }
 0x251   : > { %v15532_v24 = vadd.f32 %v3006_v53, %v2468_v28  ;;  %v2470_v51 = vpop.f32.mrf.mxu1  ;;  %v5772_v11 = vrot.slane %v5770_v39, 7  ;;  %v7451_v61 = vrot.slane %v7449_v1, 5  ;;  %v4584_v35 = vadd.f32 %v4502_v3, %v3086_v50 }
 0x252   : > { %v5194_v29 = vor.u32 %v5192_v23, %v5191_v27  ;;  %v6180_v6 = vshll.u32 %v6018_v15, 16  ;;  %6687 = vmatmul.bf16.gmra.mxu0 %v6591_v62  ;;  %4934 = vrot.lane.b32.xlu0 %v4838_v48, %s13453_s30  ;;  %v5390_v57 = vld [vmem:[#allocation2 + $0x98] sm:$0x7]  ;;  %v6179_v18 = vrot.slane %v6177_v58, 4  ;;  %v6186_v31 = vshll.u32 %v6066_v26, 16 }
 0x253   : > { %v5775_v52 = vor.u32 %v5773_v45, %v5772_v11  ;;  %v6191_v12 = vshrl.u32 %v6019_v34, 16  ;;  %v7452_v42 = vsel %vm13604_vm2, %v7447_v32, %v7451_v61  ;;  %vm4648_vm14 = vcmp.ge.f32.partialorder %v4584_v35, 0.0  ;;  %v2009_v21 = vpop.f32.mrf.mxu0  ;;  %v7319_v23 = vld [vmem:[#allocation2 + $0x40] sm:$0xf]  ;;  %v5501_v45 = vpop.permute.xlu0 %5500 }
 0x254   : > { %v4712_v47 = vmul.f32 0.2, %v4584_v35  ;;  %5287 = vrot.lane.b32.xlu1 %v5194_v29, %s13454_s8  ;;  %v5391_v50 = vsel %vm14430_vm9, %v5274_v56, %v5390_v57  ;;  %v7839_v43 = vunpack.c.l.b16 %v7452_v42  ;;  %v2471_v54 = vadd.f32 %v2470_v51, %v2009_v21  ;;  %v6020_v21 = vld [vmem:[#allocation2 + $0x40] sm:$0xf] }
 0x255   : > { %5392 = vst [vmem:[#allocation2 + $0x98] sm:$0x7] %v5391_v50  ;;  %5868 = vrot.lane.b32.xlu2 %v5775_v52, %s13453_s30  ;;  %v6067_v14 = vld [vmem:[#allocation2 + $0x3c] sm:$0x1]  ;;  %v6182_v36 = vrot.slane %v6180_v6, 5  ;;  %v6188_v22 = vrot.slane %v6186_v31, 5  ;;  %v15547_v30 = vpop.permute.xlu2 %5277  ;;  %v12292_v63 = vor.u32 %v13132_v46, %v12291_v0  ;;  %v12404_v32 = vor.u32 %v13164_v8, %v12403_v13 }
 0x256   : > { %5579 = vst.msk [vmem:[#allocation2 + $0x98] sm:$0x3] %vm5561_vm13, %v15509_v9  ;;  %v4776_v41 = vsel %vm4648_vm14, %v4584_v35, %v4712_v47  ;;  %v6193_v48 = vrot.slane %v6191_v12, 4  ;;  %v6194_v33 = vshll.u32 %v6019_v34, 16  ;;  %v6200_v55 = vshll.u32 %v6067_v14, 16 }
 0x257   : > { %v7868_v28 = vpack.c.b16 %v7839_v43, %v7838_v59  ;;  %v15550_v10 = vpack.c.bf16 %v4776_v41, %v4776_v41  ;;  %v6183_v15 = vor.u32 %v6182_v36, %v6179_v18  ;;  %v7318_v4 = vld [vmem:[#allocation2 + $0x3c] sm:$0x1]  ;;  %v15552_v7 = vpop.permute.xlu1 %5854  ;;  %v370_v39 = vsel %vm15416_vm5, 0, %v369_v40  ;;  %v4504_v51 = vpop.f32.mrf.mxu3  ;;  %6925 = vmatmul.bf16.gmra.mxu1 %v12292_v63  ;;  %7207 = vmatmul.bf16.gmra.mxu2 %v12404_v32  ;;  %v373_v31 = vld [vmem:[#allocation2 + $0x4c] sm:$0x1] }
 0x258   : > { %v3009_v17 = vpop.f32.mrf.mxu2  ;;  %v6196_v9 = vrot.slane %v6194_v33, 5  ;;  %v6202_v20 = vrot.slane %v6200_v55, 5  ;;  %371 = vst [vmem:[#allocation2 + $0x44] sm:$0x1] %v370_v39  ;;  %v7454_v49 = vshrl.u32 %v7317_v19, 16  ;;  %v7457_v1 = vshll.u32 %v7317_v19, 16 }
 0x259   : > { %v2472_v53 = vpop.f32.mrf.mxu1  ;;  %7964 = vmatmul.bf16.gmra.mxu3 %v7868_v28  ;;  %v6184_v34 = vrot.slane %v6183_v15, 4  ;;  %v7463_v27 = vshll.u32 %v7318_v4, 16  ;;  %v15557_v56 = vadd.f32 %v4504_v51, %v15532_v24  ;;  %v7468_v62 = vshrl.u32 %v7319_v23, 16  ;;  %v5393_v36 = vld [vmem:[#allocation2 + $0xa0] sm:$0x7] }
 0x25a   : > { %v6197_v26 = vor.u32 %v6196_v9, %v6193_v48  ;;  %v7471_v59 = vshll.u32 %v7319_v23, 16  ;;  %v7456_v11 = vrot.slane %v7454_v49, 4  ;;  %v7459_v58 = vrot.slane %v7457_v1, 5  ;;  %v13133_v39 = vld [vmem:[#allocation2 + $0x44] sm:$0xf0] }
 0x25b   : > { %v6189_v3 = vsel %vm13604_vm2, %v6184_v34, %v6188_v22  ;;  %v15562_v61 = vmul.f32 0.2, %v15557_v56  ;;  %v7465_v29 = vrot.slane %v7463_v27, 5  ;;  %v7470_v57 = vrot.slane %v7468_v62, 4  ;;  %v2011_v18 = vpop.f32.mrf.mxu0 }
 0x25c   : > { %4936 = vrot.lane.b32.xlu1 %v15550_v10, %s13453_s30  ;;  %v6198_v35 = vrot.slane %v6197_v26, 4  ;;  %v6563_v6 = vunpack.c.l.b16 %v6189_v3  ;;  %v7460_v46 = vor.u32 %v7459_v58, %v7456_v11  ;;  %v7473_v52 = vrot.slane %v7471_v59, 5  ;;  %v13165_v3 = vld [vmem:[#allocation2 + $0x4c] sm:$0xf0] }
 0x25d   : > { %v5967_v24 = vld [vmem:[#allocation2 + $0x98] sm:$0x7]  ;;  %v3088_v40 = vadd.f32 %v3009_v17, %v2471_v54  ;;  %v5196_v42 = vshrl.u32 %v15550_v10, 16  ;;  %v15572_v47 = vpop.permute.xlu2 %5504  ;;  %v5199_v14 = vshll.u32 %v15550_v10, 16  ;;  %v2473_v54 = vadd.f32 %v2472_v53, %v2011_v18 }
 0x25e   : > { %v5968_v12 = vsel %vm14672_vm1, %v15468_v60, %v5967_v24  ;;  %v6203_v8 = vsel %vm13604_vm2, %v6198_v35, %v6202_v20  ;;  %v7461_v19 = vrot.slane %v7460_v46, 4  ;;  %v7474_v43 = vor.u32 %v7473_v52, %v7470_v57  ;;  %v6021_v60 = vld [vmem:[#allocation2 + $0x48] sm:$0xf]  ;;  %v377_v57 = vld [vmem:[#allocation2 + $0x54] sm:$0x1] }
 0x25f   : > { %5969 = vst [vmem:[#allocation2 + $0x98] sm:$0x7] %v5968_v12  ;;  %v6564_v0 = vunpack.c.l.b16 %v6203_v8  ;;  %v7320_v41 = vld [vmem:[#allocation2 + $0x44] sm:$0x1]  ;;  %v5198_v48 = vrot.slane %v5196_v42, 7  ;;  %v5276_v33 = vpop.permute.xlu1 %5275  ;;  %v5763_v55 = vshrl.u32 %v15500_v16, 16 }
 0x260   : > { %v3011_v50 = vpop.f32.mrf.mxu2  ;;  %v374_v17 = vsel %vm15416_vm5, 0, %v373_v31  ;;  %v7466_v15 = vsel %vm13604_vm2, %v7461_v19, %v7465_v29  ;;  %v7475_v63 = vrot.slane %v7474_v43, 4  ;;  %v7477_v13 = vshll.u32 %v7320_v41, 16  ;;  %v6068_v10 = vld [vmem:[#allocation2 + $0x44] sm:$0x1] }
 0x261   : > { %v15575_v22 = vpop.f32.mrf.mxu1  ;;  %v6592_v28 = vpack.c.b16 %v6564_v0, %v6563_v6  ;;  %375 = vst [vmem:[#allocation2 + $0x4c] sm:$0x1] %v374_v17  ;;  %v7840_v4 = vunpack.c.l.b16 %v7466_v15  ;;  %v4507_v23 = vpop.f32.mrf.mxu3  ;;  %v5201_v9 = vor.u32 %v5199_v14, %v5198_v48  ;;  %v5394_v20 = vsel %vm14430_vm9, %v5276_v33, %v5393_v36  ;;  %v7321_v52 = vld [vmem:[#allocation2 + $0x48] sm:$0xf] }
 0x262   : > { %v5766_v53 = vshll.u32 %v15500_v16, 16  ;;  %v7479_v51 = vrot.slane %v7477_v13, 5  ;;  %v4586_v34 = vadd.f32 %v4507_v23, %v3088_v40  ;;  %5395 = vst [vmem:[#allocation2 + $0xa0] sm:$0x7] %v5394_v20  ;;  %v5765_v49 = vrot.slane %v5763_v55, 7 }
 0x263   : > { %6692 = vmatmul.bf16.gmra.mxu0 %v6592_v28  ;;  %v6205_v1 = vshrl.u32 %v6020_v21, 16  ;;  %5289 = vrot.lane.b32.xlu2 %v5201_v9, %s13454_s8  ;;  %5580 = vst.msk [vmem:[#allocation2 + $0xa0] sm:$0x3] %vm5561_vm13, %v5501_v45  ;;  %v6208_v27 = vshll.u32 %v6020_v21, 16  ;;  %v6214_v26 = vshll.u32 %v6068_v10, 16  ;;  %v6219_v62 = vshrl.u32 %v6021_v60, 16 }
 0x264   : > { %v4925_v32 = vpop.permute.xlu0 %4924  ;;  %5514 = vrot.lane.b32.xlu1 %v15523_v2, %s13454_s8  ;;  %v6222_v59 = vshll.u32 %v6021_v60, 16  ;;  %v12295_v16 = vld [vmem:[#allocation2 + $0x40] sm:$0xf]  ;;  %v7480_v11 = vsel %vm13604_vm2, %v7475_v63, %v7479_v51  ;;  %vm4650_vm15 = vcmp.ge.f32.partialorder %v4586_v34, 0.0  ;;  %v4714_v58 = vmul.f32 0.2, %v4586_v34 }
 0x265   : > { %v3089_v35 = vadd.f32 %v3011_v50, %v2473_v54  ;;  %5001 = vst.msk [vmem:[#allocation2 + $0xa8] sm:$0x3] %vm4980_vm4, %v4925_v32  ;;  %v7841_v29 = vunpack.c.l.b16 %v7480_v11  ;;  %v4927_v24 = vpop.permute.xlu2 %4926  ;;  %v5768_v45 = vor.u32 %v5766_v53, %v5765_v49  ;;  %v6207_v6 = vrot.slane %v6205_v1, 4  ;;  %v12407_v2 = vld [vmem:[#allocation2 + $0x48] sm:$0xf] }
 0x266   : > { %v6210_v46 = vrot.slane %v6208_v27, 5  ;;  %5002 = vst.msk [vmem:[#allocation2 + $0xb0] sm:$0x3] %vm4980_vm4, %v4927_v24  ;;  %v4778_v31 = vsel %vm4650_vm15, %v4586_v34, %v4714_v58  ;;  %v2014_v12 = vpop.f32.mrf.mxu0  ;;  %v6221_v8 = vrot.slane %v6219_v62, 4  ;;  %v6224_v40 = vrot.slane %v6222_v59, 5 }
 0x267   : > { %v12296_v42 = vor.u32 %v13133_v39, %v12295_v16  ;;  %v7323_v21 = vld [vmem:[#allocation2 + $0x50] sm:$0xf]  ;;  %v7869_v0 = vpack.c.b16 %v7841_v29, %v7840_v4  ;;  %v15595_v19 = vpack.c.bf16 %v4778_v31, %v4778_v31  ;;  %v6216_v36 = vrot.slane %v6214_v26, 5  ;;  %v381_v34 = vld [vmem:[#allocation2 + $0x5c] sm:$0x1]  ;;  %v5503_v1 = vpop.permute.xlu1 %5502 }
 0x268   : > { %v3014_v18 = vpop.f32.mrf.mxu2  ;;  %v6069_v43 = vld [vmem:[#allocation2 + $0x4c] sm:$0x1]  ;;  %v6211_v14 = vor.u32 %v6210_v46, %v6207_v6  ;;  %v6225_v41 = vor.u32 %v6224_v40, %v6221_v8  ;;  %v12408_v33 = vor.u32 %v13165_v3, %v12407_v2  ;;  %v378_v54 = vsel %vm15416_vm5, 0, %v377_v57  ;;  %v6022_v16 = vld [vmem:[#allocation2 + $0x50] sm:$0xf] }
 0x269   : > { %v15593_v50 = vpop.f32.mrf.mxu1  ;;  %v7322_v60 = vld [vmem:[#allocation2 + $0x4c] sm:$0x1]  ;;  %v6228_v48 = vshll.u32 %v6069_v43, 16  ;;  %6930 = vmatmul.bf16.gmra.mxu1 %v12296_v42  ;;  %7969 = vmatmul.bf16.gmra.mxu3 %v7869_v0  ;;  %v4509_v55 = vpop.f32.mrf.mxu3  ;;  %379 = vst [vmem:[#allocation2 + $0x54] sm:$0x1] %v378_v54  ;;  %v7482_v28 = vshrl.u32 %v7321_v52, 16  ;;  %v2476_v10 = vadd.f32 %v15575_v22, %v2014_v12 }
 0x26a   : > { %v6212_v17 = vrot.slane %v6211_v14, 4  ;;  %v7485_v15 = vshll.u32 %v7321_v52, 16  ;;  %v7491_v63 = vshll.u32 %v7322_v60, 16  ;;  %v5970_v13 = vld [vmem:[#allocation2 + $0xa0] sm:$0x7]  ;;  %v6226_v4 = vrot.slane %v6225_v41, 4  ;;  %7212 = vmatmul.bf16.gmra.mxu2 %v12408_v33 }
 0x26b   : > { %v6230_v23 = vrot.slane %v6228_v48, 5  ;;  %v7496_v9 = vshrl.u32 %v7323_v21, 16  ;;  %v5971_v20 = vsel %vm14672_vm1, %v15552_v7, %v5970_v13  ;;  %4938 = vrot.lane.b32.xlu2 %v15595_v19, %s13453_s30  ;;  %v7484_v39 = vrot.slane %v7482_v28, 4  ;;  %v12299_v14 = vld [vmem:[#allocation2 + $0x50] sm:$0xf] }
 0x26c   : > { %5866 = vrot.lane.b32.xlu1 %v5768_v45, %s13453_s30  ;;  %v5396_v53 = vld [vmem:[#allocation2 + $0xa8] sm:$0x7]  ;;  %v6217_v32 = vsel %vm13604_vm2, %v6212_v17, %v6216_v36  ;;  %v7487_v51 = vrot.slane %v7485_v15, 5  ;;  %vm4649_vm0 = vcmp.ge.f32.partialorder %v15557_v56, 0.0  ;;  %5972 = vst [vmem:[#allocation2 + $0xa0] sm:$0x7] %v5971_v20  ;;  %v15614_v49 = vadd.f32 %v4509_v55, %v3089_v35 }
 0x26d   : > { %v5397_v22 = vsel %vm14430_vm9, %v15547_v30, %v5396_v53  ;;  %v6231_v7 = vsel %vm13604_vm2, %v6226_v4, %v6230_v23  ;;  %v7493_v62 = vrot.slane %v7491_v63, 5  ;;  %v6565_v3 = vunpack.c.l.b16 %v6217_v32  ;;  %v13134_v36 = vld [vmem:[#allocation2 + $0x54] sm:$0xf0]  ;;  %v13166_v60 = vld [vmem:[#allocation2 + $0x5c] sm:$0xf0] }
 0x26e   : > { %5398 = vst [vmem:[#allocation2 + $0xa8] sm:$0x7] %v5397_v22  ;;  %v6566_v27 = vunpack.c.l.b16 %v6231_v7  ;;  %v7488_v26 = vor.u32 %v7487_v51, %v7484_v39  ;;  %v7498_v11 = vrot.slane %v7496_v9, 4  ;;  %v7499_v58 = vshll.u32 %v7323_v21, 16  ;;  %v2016_v29 = vpop.f32.mrf.mxu0  ;;  %v6023_v21 = vld [vmem:[#allocation2 + $0x58] sm:$0xf] }
 0x26f   : > { %5581 = vst.msk [vmem:[#allocation2 + $0xa8] sm:$0x3] %vm5561_vm13, %v5503_v1  ;;  %v5203_v30 = vshrl.u32 %v15595_v19, 16  ;;  %v3090_v35 = vadd.f32 %v3014_v18, %v2476_v10  ;;  %v5206_v6 = vshll.u32 %v15595_v19, 16  ;;  %v4777_v46 = vsel %vm4649_vm0, %v15557_v56, %v15562_v61  ;;  %v12411_v17 = vld [vmem:[#allocation2 + $0x58] sm:$0xf] }
 0x270   : > { %v15616_v59 = vpop.f32.mrf.mxu2  ;;  %v7489_v45 = vrot.slane %v7488_v26, 4  ;;  %v6593_v2 = vpack.c.b16 %v6566_v27, %v6565_v3  ;;  %v7324_v57 = vld [vmem:[#allocation2 + $0x54] sm:$0x1]  ;;  %v7501_v52 = vrot.slane %v7499_v58, 5  ;;  %v15625_v12 = vpack.c.bf16 %v4777_v46, %v4777_v46  ;;  %v385_v13 = vld [vmem:[#allocation2 + $0x64] sm:$0x1] }
 0x271   : > { %v2480_v24 = vpop.f32.mrf.mxu1  ;;  %v5205_v31 = vrot.slane %v5203_v30, 7  ;;  %v6070_v8 = vld [vmem:[#allocation2 + $0x54] sm:$0x1]  ;;  %v7505_v42 = vshll.u32 %v7324_v57, 16  ;;  %v382_v18 = vsel %vm15416_vm5, 0, %v381_v34  ;;  %v6233_v0 = vshrl.u32 %v6022_v16, 16 }
 0x272   : > { %v7494_v40 = vsel %vm13604_vm2, %v7489_v45, %v7493_v62  ;;  %v7502_v19 = vor.u32 %v7501_v52, %v7498_v11  ;;  %v15632_v61 = vadd.f32 %v15593_v50, %v2016_v29  ;;  %383 = vst [vmem:[#allocation2 + $0x5c] sm:$0x1] %v382_v18  ;;  %v6236_v54 = vshll.u32 %v6022_v16, 16  ;;  %v7325_v53 = vld [vmem:[#allocation2 + $0x58] sm:$0xf] }
 0x273   : > { %6697 = vmatmul.bf16.gmra.mxu0 %v6593_v2  ;;  %v7842_v43 = vunpack.c.l.b16 %v7494_v40  ;;  %v5208_v56 = vor.u32 %v5206_v6, %v5205_v31  ;;  %v7507_v41 = vrot.slane %v7505_v42, 5  ;;  %5516 = vrot.lane.b32.xlu2 %v15625_v12, %s13454_s8  ;;  %v6235_v33 = vrot.slane %v6233_v0, 4  ;;  %v15642_v1 = vpop.permute.xlu0 %5858  ;;  %v7327_v3 = vld [vmem:[#allocation2 + $0x60] sm:$0xf] }
 0x274   : > { %v4512_v48 = vpop.f32.mrf.mxu3  ;;  %v6242_v55 = vshll.u32 %v6070_v8, 16  ;;  %v7503_v28 = vrot.slane %v7502_v19, 4  ;;  %v6247_v63 = vshrl.u32 %v6023_v21, 16  ;;  %v6250_v50 = vshll.u32 %v6023_v21, 16 }
 0x275   : > { %v4588_v15 = vadd.f32 %v4512_v48, %v3090_v35  ;;  %5291 = vrot.lane.b32.xlu0 %v5208_v56, %s13454_s8  ;;  %v6238_v4 = vrot.slane %v6236_v54, 5  ;;  %v12300_v9 = vor.u32 %v13134_v36, %v12299_v14  ;;  %v12412_v20 = vor.u32 %v13166_v60, %v12411_v17 }
 0x276   : > { %v5973_v10 = vld [vmem:[#allocation2 + $0xa8] sm:$0x7]  ;;  %v6244_v23 = vrot.slane %v6242_v55, 5  ;;  %v7508_v51 = vsel %vm13604_vm2, %v7503_v28, %v7507_v41  ;;  %v6249_v62 = vrot.slane %v6247_v63, 4  ;;  %v6252_v16 = vrot.slane %v6250_v50, 5 }
 0x277   : > { %v5974_v39 = vsel %vm14672_vm1, %v15526_v25, %v5973_v10  ;;  %vm4652_vm6 = vcmp.ge.f32.partialorder %v4588_v15, 0.0  ;;  %v4716_v22 = vmul.f32 0.2, %v4588_v15  ;;  %v7843_v34 = vunpack.c.l.b16 %v7508_v51  ;;  %v2019_v27 = vpop.f32.mrf.mxu0  ;;  %v5399_v50 = vld [vmem:[#allocation2 + $0xb0] sm:$0x7] }
 0x278   : > { %v3019_v32 = vpop.f32.mrf.mxu2  ;;  %5975 = vst [vmem:[#allocation2 + $0xa8] sm:$0x7] %v5974_v39  ;;  %v6239_v26 = vor.u32 %v6238_v4, %v6235_v33  ;;  %v2481_v58 = vadd.f32 %v2480_v24, %v2019_v27  ;;  %v386_v25 = vsel %vm15416_vm5, 0, %v385_v13  ;;  %v7510_v30 = vshrl.u32 %v7325_v53, 16 }
 0x279   : > { %v2482_v7 = vpop.f32.mrf.mxu1  ;;  %v4780_v11 = vsel %vm4652_vm6, %v4588_v15, %v4716_v22  ;;  %6935 = vmatmul.bf16.gmra.mxu1 %v12300_v9  ;;  %v7870_v29 = vpack.c.b16 %v7843_v34, %v7842_v43  ;;  %v6071_v35 = vld [vmem:[#allocation2 + $0x5c] sm:$0x1]  ;;  %v6253_v46 = vor.u32 %v6252_v16, %v6249_v62  ;;  %387 = vst [vmem:[#allocation2 + $0x64] sm:$0x1] %v386_v25  ;;  %v7513_v31 = vshll.u32 %v7325_v53, 16 }
 0x27a   : > { %v4844_v45 = vpack.c.bf16 %v4780_v11, %v4780_v11  ;;  %v6240_v6 = vrot.slane %v6239_v26, 4  ;;  %v6256_v2 = vshll.u32 %v6071_v35, 16  ;;  %7217 = vmatmul.bf16.gmra.mxu2 %v12412_v20  ;;  %v7326_v57 = vld [vmem:[#allocation2 + $0x5c] sm:$0x1]  ;;  %v7512_v52 = vrot.slane %v7510_v30, 4 }
 0x27b   : > { %v7524_v8 = vshrl.u32 %v7327_v3, 16  ;;  %7974 = vmatmul.bf16.gmra.mxu3 %v7870_v29  ;;  %v6254_v42 = vrot.slane %v6253_v46, 4  ;;  %v7519_v18 = vshll.u32 %v7326_v57, 16  ;;  %v7527_v21 = vshll.u32 %v7327_v3, 16  ;;  %v389_v20 = vld [vmem:[#allocation2 + $0x6c] sm:$0x1] }
 0x27c   : > { %v4514_v40 = vpop.f32.mrf.mxu3  ;;  %v6245_v24 = vsel %vm13604_vm2, %v6240_v6, %v6244_v23  ;;  %vm4651_vm3 = vcmp.ge.f32.partialorder %v15614_v49, 0.0  ;;  %v4715_v0 = vmul.f32 0.2, %v15614_v49  ;;  %v6258_v19 = vrot.slane %v6256_v2, 5  ;;  %v6024_v34 = vld [vmem:[#allocation2 + $0x60] sm:$0xf] }
 0x27d   : > { %4940 = vrot.lane.b32.xlu0 %v4844_v45, %s13453_s30  ;;  %v7515_v43 = vrot.slane %v7513_v31, 5  ;;  %v3091_v56 = vadd.f32 %v15616_v59, %v15632_v61  ;;  %v6567_v14 = vunpack.c.l.b16 %v6245_v24  ;;  %v7526_v36 = vrot.slane %v7524_v8, 4 }
 0x27e   : > { %v7529_v60 = vrot.slane %v7527_v21, 5  ;;  %v6259_v48 = vsel %vm13604_vm2, %v6254_v42, %v6258_v19  ;;  %v7521_v54 = vrot.slane %v7519_v18, 5  ;;  %v3092_v55 = vadd.f32 %v3019_v32, %v2481_v58  ;;  %v12303_v42 = vld [vmem:[#allocation2 + $0x60] sm:$0xf]  ;;  %v13167_v18 = vld [vmem:[#allocation2 + $0x6c] sm:$0xf0] }
 0x27f   : > { %v7516_v33 = vor.u32 %v7515_v43, %v7512_v52  ;;  %v6568_v17 = vunpack.c.l.b16 %v6259_v48  ;;  %v5210_v15 = vshrl.u32 %v4844_v45, 16  ;;  %v5213_v63 = vshll.u32 %v4844_v45, 16  ;;  %v2021_v13 = vpop.f32.mrf.mxu0  ;;  %v393_v21 = vld [vmem:[#allocation2 + $0x74] sm:$0x1] }
 0x280   : > { %v3021_v41 = vpop.f32.mrf.mxu2  ;;  %v7530_v28 = vor.u32 %v7529_v60, %v7526_v36  ;;  %v7328_v4 = vld [vmem:[#allocation2 + $0x64] sm:$0x1]  ;;  %v4779_v61 = vsel %vm4651_vm3, %v15614_v49, %v4715_v0  ;;  %v2483_v23 = vadd.f32 %v2482_v7, %v2021_v13  ;;  %v5777_v9 = vshrl.u32 %v15625_v12, 16  ;;  %v6025_v49 = vld [vmem:[#allocation2 + $0x68] sm:$0xf] }
 0x281   : > { %v15655_v10 = vpop.f32.mrf.mxu1  ;;  %v7517_v59 = vrot.slane %v7516_v33, 4  ;;  %v6594_v53 = vpack.c.b16 %v6568_v17, %v6567_v14  ;;  %v7533_v39 = vshll.u32 %v7328_v4, 16  ;;  %v5212_v51 = vrot.slane %v5210_v15, 7  ;;  %v6072_v7 = vld [vmem:[#allocation2 + $0x64] sm:$0x1] }
 0x282   : > { %v7531_v32 = vrot.slane %v7530_v28, 4  ;;  %v5280_v22 = vpop.permute.xlu0 %5279  ;;  %v15661_v27 = vadd.f32 %v4514_v40, %v3091_v56  ;;  %v15667_v16 = vpack.c.bf16 %v4779_v61, %v4779_v61  ;;  %v15669_v58 = vadd.f32 %v3021_v41, %v2483_v23  ;;  %v7329_v60 = vld [vmem:[#allocation2 + $0x68] sm:$0xf]  ;;  %v7331_v17 = vld [vmem:[#allocation2 + $0x70] sm:$0xf] }
 0x283   : > { %v7522_v26 = vsel %vm13604_vm2, %v7517_v59, %v7521_v54  ;;  %v5400_v62 = vsel %vm14430_vm9, %v5280_v22, %v5399_v50  ;;  %6702 = vmatmul.bf16.gmra.mxu0 %v6594_v53  ;;  %v7535_v3 = vrot.slane %v7533_v39, 5  ;;  %v5215_v11 = vor.u32 %v5213_v63, %v5212_v51 }
 0x284   : > { %5401 = vst [vmem:[#allocation2 + $0xb0] sm:$0x7] %v5400_v62  ;;  %v5779_v25 = vrot.slane %v5777_v9, 7  ;;  %v4517_v30 = vpop.f32.mrf.mxu3  ;;  %v5780_v29 = vshll.u32 %v15625_v12, 16  ;;  %v390_v45 = vsel %vm15416_vm5, 0, %v389_v20  ;;  %v6261_v35 = vshrl.u32 %v6024_v34, 16 }
 0x285   : > { %5582 = vst.msk [vmem:[#allocation2 + $0xb0] sm:$0x3] %vm5561_vm13, %v15572_v47  ;;  %5518 = vrot.lane.b32.xlu0 %v15667_v16, %s13454_s8  ;;  %v6264_v6 = vshll.u32 %v6024_v34, 16  ;;  %v7536_v46 = vsel %vm13604_vm2, %v7531_v32, %v7535_v3  ;;  %v4590_v2 = vadd.f32 %v4517_v30, %v3092_v55  ;;  %5293 = vrot.lane.b32.xlu1 %v5215_v11, %s13454_s8  ;;  %v6270_v57 = vshll.u32 %v6072_v7, 16  ;;  %v13135_v47 = vld [vmem:[#allocation2 + $0x64] sm:$0xf0]  ;;  %v15681_v40 = vpop.permute.xlu1 %5860 }
 0x286   : > { %391 = vst [vmem:[#allocation2 + $0x6c] sm:$0x1] %v390_v45  ;;  %v6275_v52 = vshrl.u32 %v6025_v49, 16  ;;  %v7844_v31 = vunpack.c.l.b16 %v7522_v26  ;;  %v7845_v8 = vunpack.c.l.b16 %v7536_v46  ;;  %v6263_v12 = vrot.slane %v6261_v35, 4  ;;  %v12415_v55 = vld [vmem:[#allocation2 + $0x68] sm:$0xf] }
 0x287   : > { %v6266_v24 = vrot.slane %v6264_v6, 5  ;;  %vm4654_vm8 = vcmp.ge.f32.partialorder %v4590_v2, 0.0  ;;  %v4718_v19 = vmul.f32 0.2, %v4590_v2  ;;  %v5782_v56 = vor.u32 %v5780_v29, %v5779_v25  ;;  %v2024_v14 = vpop.f32.mrf.mxu0 }
 0x288   : > { %v3024_v0 = vpop.f32.mrf.mxu2  ;;  %v15683_v43 = vpop.permute.xlu2 %5283  ;;  %v6272_v36 = vrot.slane %v6270_v57, 5  ;;  %v7871_v41 = vpack.c.b16 %v7845_v8, %v7844_v31  ;;  %v6277_v33 = vrot.slane %v6275_v52, 4  ;;  %v6278_v54 = vshll.u32 %v6025_v49, 16 }
 0x289   : > { %v6267_v48 = vor.u32 %v6266_v24, %v6263_v12  ;;  %v2487_v28 = vpop.f32.mrf.mxu1  ;;  %v4782_v63 = vsel %vm4654_vm8, %v4590_v2, %v4718_v19  ;;  %v12304_v50 = vor.u32 %v13135_v47, %v12303_v42  ;;  %v12416_v13 = vor.u32 %v13167_v18, %v12415_v55  ;;  %v397_v18 = vld [vmem:[#allocation2 + $0x7c] sm:$0x1] }
 0x28a   : > { %v15685_v15 = vpop.permute.xlu0 %5506  ;;  %v394_v4 = vsel %vm15416_vm5, 0, %v393_v21  ;;  %v15689_v59 = vpack.c.bf16 %v4782_v63, %v4782_v63  ;;  %v6280_v23 = vrot.slane %v6278_v54, 5  ;;  %v7538_v9 = vshrl.u32 %v7329_v60, 16  ;;  %v6026_v21 = vld [vmem:[#allocation2 + $0x70] sm:$0xf] }
 0x28b   : > { %v6268_v61 = vrot.slane %v6267_v48, 4  ;;  %395 = vst [vmem:[#allocation2 + $0x74] sm:$0x1] %v394_v4  ;;  %7979 = vmatmul.bf16.gmra.mxu3 %v7871_v41  ;;  %v2486_v53 = vadd.f32 %v15655_v10, %v2024_v14  ;;  %6940 = vmatmul.bf16.gmra.mxu1 %v12304_v50  ;;  %v7541_v32 = vshll.u32 %v7329_v60, 16  ;;  %v7552_v39 = vshrl.u32 %v7331_v17, 16 }
 0x28c   : > { %v5976_v20 = vld [vmem:[#allocation2 + $0xb0] sm:$0x7]  ;;  %v7555_v51 = vshll.u32 %v7331_v17, 16  ;;  %vm4653_vm10 = vcmp.ge.f32.partialorder %v15661_v27, 0.0  ;;  %v4519_v34 = vpop.f32.mrf.mxu3  ;;  %v6281_v62 = vor.u32 %v6280_v23, %v6277_v33  ;;  %7222 = vmatmul.bf16.gmra.mxu2 %v12416_v13  ;;  %v7540_v7 = vrot.slane %v7538_v9, 4 }
 0x28d   : > { %v5977_v22 = vsel %vm14672_vm1, %v15642_v1, %v5976_v20  ;;  %5870 = vrot.lane.b32.xlu0 %v5782_v56, %s13453_s30  ;;  %v6073_v26 = vld [vmem:[#allocation2 + $0x6c] sm:$0x1]  ;;  %v4717_v10 = vmul.f32 0.2, %v15661_v27  ;;  %4942 = vrot.lane.b32.xlu1 %v15689_v59, %s13453_s30  ;;  %v6273_v3 = vsel %vm13604_vm2, %v6268_v61, %v6272_v36  ;;  %v7543_v25 = vrot.slane %v7541_v32, 5 }
 0x28e   : > { %v7330_v49 = vld [vmem:[#allocation2 + $0x6c] sm:$0x1]  ;;  %5978 = vst [vmem:[#allocation2 + $0xb0] sm:$0x7] %v5977_v22  ;;  %v6284_v11 = vshll.u32 %v6073_v26, 16  ;;  %v6282_v1 = vrot.slane %v6281_v62, 4  ;;  %v15703_v6 = vadd.f32 %v4519_v34, %v15669_v58  ;;  %v3094_v57 = vadd.f32 %v3024_v0, %v2486_v53 }
 0x28f   : > { %v7547_v30 = vshll.u32 %v7330_v49, 16  ;;  %v7554_v29 = vrot.slane %v7552_v39, 4  ;;  %v7557_v45 = vrot.slane %v7555_v51, 5  ;;  %v7544_v2 = vor.u32 %v7543_v25, %v7540_v7  ;;  %v2026_v47 = vpop.f32.mrf.mxu0  ;;  %v12307_v51 = vld [vmem:[#allocation2 + $0x70] sm:$0xf] }
 0x290   : > { %v3026_v35 = vpop.f32.mrf.mxu2  ;;  %v6286_v46 = vrot.slane %v6284_v11, 5  ;;  %v15705_v52 = vpop.permute.xlu2 %5510  ;;  %v6569_v31 = vunpack.c.l.b16 %v6273_v3  ;;  %v5784_v24 = vshrl.u32 %v15667_v16, 16  ;;  %v5787_v0 = vshll.u32 %v15667_v16, 16  ;;  %v13136_v62 = vld [vmem:[#allocation2 + $0x74] sm:$0xf0] }
 0x291   : > { %v7549_v8 = vrot.slane %v7547_v30, 5  ;;  %v7558_v12 = vor.u32 %v7557_v45, %v7554_v29  ;;  %v15708_v42 = vpop.f32.mrf.mxu1  ;;  %v7545_v56 = vrot.slane %v7544_v2, 4  ;;  %v2488_v60 = vadd.f32 %v2487_v28, %v2026_v47  ;;  %v6027_v28 = vld [vmem:[#allocation2 + $0x78] sm:$0xf]  ;;  %v401_v49 = vld [vmem:[#allocation2 + $0x84] sm:$0x1] }
 0x292   : > { %v6287_v19 = vsel %vm13604_vm2, %v6282_v1, %v6286_v46  ;;  %v7332_v58 = vld [vmem:[#allocation2 + $0x74] sm:$0x1]  ;;  %v4929_v14 = vpop.permute.xlu0 %4928  ;;  %v15712_v36 = vpop.permute.xlu1 %5281  ;;  %v5786_v55 = vrot.slane %v5784_v24, 7  ;;  %v15717_v17 = vmul.f32 0.2, %v15703_v6  ;;  %v4781_v50 = vsel %vm4653_vm10, %v15661_v27, %v4717_v10 }
 0x293   : > { %v6074_v41 = vld [vmem:[#allocation2 + $0x74] sm:$0x1]  ;;  %v6570_v48 = vunpack.c.l.b16 %v6287_v19  ;;  %v7559_v33 = vrot.slane %v7558_v12, 4  ;;  %v7561_v54 = vshll.u32 %v7332_v58, 16  ;;  %5003 = vst.msk [vmem:[#allocation2 + $0xb8] sm:$0x3] %vm4980_vm4, %v4929_v14  ;;  %v7550_v63 = vsel %vm13604_vm2, %v7545_v56, %v7549_v8 }
 0x294   : > { %v398_v16 = vsel %vm15416_vm5, 0, %v397_v18  ;;  %vm4655_vm11 = vcmp.ge.f32.partialorder %v15703_v6, 0.0  ;;  %v4522_v61 = vpop.f32.mrf.mxu3  ;;  %v5789_v23 = vor.u32 %v5787_v0, %v5786_v55  ;;  %v3095_v9 = vadd.f32 %v3026_v35, %v2488_v60  ;;  %v12419_v1 = vld [vmem:[#allocation2 + $0x78] sm:$0xf]  ;;  %v13168_v30 = vld [vmem:[#allocation2 + $0x7c] sm:$0xf0] }
 0x295   : > { %v6595_v13 = vpack.c.b16 %v6570_v48, %v6569_v31  ;;  %v7563_v4 = vrot.slane %v7561_v54, 5  ;;  %399 = vst [vmem:[#allocation2 + $0x7c] sm:$0x1] %v398_v16  ;;  %v4592_v20 = vadd.f32 %v4522_v61, %v3094_v57  ;;  %v6289_v53 = vshrl.u32 %v6026_v21, 16  ;;  %v7333_v18 = vld [vmem:[#allocation2 + $0x78] sm:$0xf] }
 0x296   : > { %v6292_v32 = vshll.u32 %v6026_v21, 16  ;;  %v6298_v39 = vshll.u32 %v6074_v41, 16  ;;  %v7846_v22 = vunpack.c.l.b16 %v7550_v63  ;;  %5872 = vrot.lane.b32.xlu1 %v5789_v23, %s13453_s30  ;;  %v6303_v34 = vshrl.u32 %v6027_v28, 16  ;;  %v7335_v0 = vld [vmem:[#allocation2 + $0x80] sm:$0xf] }
 0x297   : > { %6707 = vmatmul.bf16.gmra.mxu0 %v6595_v13  ;;  %v7564_v27 = vsel %vm13604_vm2, %v7559_v33, %v7563_v4  ;;  %v6306_v26 = vshll.u32 %v6027_v28, 16  ;;  %vm4656_vm12 = vcmp.ge.f32.partialorder %v4592_v20, 0.0  ;;  %v4720_v3 = vmul.f32 0.2, %v4592_v20 }
 0x298   : > { %v15730_v7 = vpop.f32.mrf.mxu2  ;;  %v7847_v10 = vunpack.c.l.b16 %v7564_v27  ;;  %v4933_v11 = vpop.permute.xlu2 %4932  ;;  %v6291_v25 = vrot.slane %v6289_v53, 4  ;;  %v6294_v29 = vrot.slane %v6292_v32, 5  ;;  %v6305_v45 = vrot.slane %v6303_v34, 4 }
 0x299   : > { %5005 = vst.msk [vmem:[#allocation2 + $0xc8] sm:$0x3] %vm4980_vm4, %v4933_v11  ;;  %v6308_v35 = vrot.slane %v6306_v26, 5  ;;  %v12308_v46 = vor.u32 %v13136_v62, %v12307_v51  ;;  %v15733_v2 = vpop.f32.mrf.mxu1  ;;  %v4784_v8 = vsel %vm4656_vm12, %v4592_v20, %v4720_v3  ;;  %v6300_v12 = vrot.slane %v6298_v39, 5 }
 0x29a   : > { %v7872_v57 = vpack.c.b16 %v7847_v10, %v7846_v22  ;;  %v5402_v47 = vld [vmem:[#allocation2 + $0xb8] sm:$0x7]  ;;  %v15735_v31 = vpop.permute.xlu1 %5508  ;;  %v402_v24 = vsel %vm15416_vm5, 0, %v401_v49  ;;  %v15742_v19 = vpack.c.bf16 %v4784_v8, %v4784_v8  ;;  %v2029_v58 = vpop.f32.mrf.mxu0  ;;  %v6295_v56 = vor.u32 %v6294_v29, %v6291_v25 }
 0x29b   : > { %v5403_v21 = vsel %vm14430_vm9, %v15712_v36, %v5402_v47  ;;  %v12420_v14 = vor.u32 %v13168_v30, %v12419_v1  ;;  %403 = vst [vmem:[#allocation2 + $0x84] sm:$0x1] %v402_v24  ;;  %v15744_v60 = vpack.c.bf16 %v4781_v50, %v4781_v50  ;;  %v2491_v41 = vadd.f32 %v15708_v42, %v2029_v58 }
 0x29c   : > { %7984 = vmatmul.bf16.gmra.mxu3 %v7872_v57  ;;  %5404 = vst [vmem:[#allocation2 + $0xb8] sm:$0x7] %v5403_v21  ;;  %v6075_v48 = vld [vmem:[#allocation2 + $0x7c] sm:$0x1]  ;;  %v6309_v33 = vor.u32 %v6308_v35, %v6305_v45  ;;  %6945 = vmatmul.bf16.gmra.mxu1 %v12308_v46  ;;  %v4524_v36 = vpop.f32.mrf.mxu3  ;;  %v6296_v55 = vrot.slane %v6295_v56, 4  ;;  %v7566_v16 = vshrl.u32 %v7333_v18, 16 }
 0x29d   : > { %v7334_v54 = vld [vmem:[#allocation2 + $0x7c] sm:$0x1]  ;;  %5583 = vst.msk [vmem:[#allocation2 + $0xb8] sm:$0x3] %vm5561_vm13, %v15685_v15  ;;  %4944 = vrot.lane.b32.xlu2 %v15742_v19, %s13453_s30  ;;  %v6312_v63 = vshll.u32 %v6075_v48, 16  ;;  %7227 = vmatmul.bf16.gmra.mxu2 %v12420_v14  ;;  %v7569_v28 = vshll.u32 %v7333_v18, 16  ;;  %v15751_v50 = vadd.f32 %v4524_v36, %v3095_v9  ;;  %v4783_v9 = vsel %vm4655_vm11, %v15703_v6, %v15717_v17 }
 0x29e   : > { %v6310_v13 = vrot.slane %v6309_v33, 4  ;;  %v7575_v42 = vshll.u32 %v7334_v54, 16  ;;  %v7580_v4 = vshrl.u32 %v7335_v0, 16  ;;  %5520 = vrot.lane.b32.xlu1 %v15744_v60, %s13454_s8  ;;  %v6301_v15 = vsel %vm13604_vm2, %v6296_v55, %v6300_v12  ;;  %v405_v21 = vld [vmem:[#allocation2 + $0x8c] sm:$0x1] }
 0x29f   : > { %v6314_v61 = vrot.slane %v6312_v63, 5  ;;  %v7568_v23 = vrot.slane %v7566_v16, 4  ;;  %v7571_v20 = vrot.slane %v7569_v28, 5  ;;  %vm4657_vm14 = vcmp.ge.f32.partialorder %v15751_v50, 0.0  ;;  %v6028_v54 = vld [vmem:[#allocation2 + $0x88] sm:$0xf] }
 0x2a0   : > { %v3031_v53 = vpop.f32.mrf.mxu2  ;;  %v6571_v32 = vunpack.c.l.b16 %v6301_v15  ;;  %v7577_v39 = vrot.slane %v7575_v42, 5  ;;  %v7582_v22 = vrot.slane %v7580_v4, 4  ;;  %v7583_v34 = vshll.u32 %v7335_v0, 16  ;;  %v409_v0 = vld [vmem:[#allocation2 + $0x94] sm:$0x1] }
 0x2a1   : > { %v6315_v51 = vsel %vm13604_vm2, %v6310_v13, %v6314_v61  ;;  %v7572_v27 = vor.u32 %v7571_v20, %v7568_v23  ;;  %v15764_v26 = vpop.f32.mrf.mxu1  ;;  %v4721_v62 = vmul.f32 0.2, %v15751_v50  ;;  %v3096_v3 = vadd.f32 %v15730_v7, %v2491_v41  ;;  %v6029_v28 = vld [vmem:[#allocation2 + $0x90] sm:$0xf]  ;;  %v13169_v15 = vld [vmem:[#allocation2 + $0x94] sm:$0xf0] }
 0x2a2   : > { %v6572_v49 = vunpack.c.l.b16 %v6315_v51  ;;  %v7336_v10 = vld [vmem:[#allocation2 + $0x84] sm:$0x1]  ;;  %v5224_v11 = vshrl.u32 %v15742_v19, 16  ;;  %v4931_v25 = vpop.permute.xlu1 %4930  ;;  %v7585_v30 = vrot.slane %v7583_v34, 5  ;;  %v5791_v17 = vshrl.u32 %v15744_v60, 16  ;;  %v2031_v18 = vpop.f32.mrf.mxu0 }
 0x2a3   : > { %v7573_v1 = vrot.slane %v7572_v27, 4  ;;  %v7589_v6 = vshll.u32 %v7336_v10, 16  ;;  %5004 = vst.msk [vmem:[#allocation2 + $0xc0] sm:$0x3] %vm4980_vm4, %v4931_v25  ;;  %v5227_v46 = vshll.u32 %v15742_v19, 16  ;;  %v5217_v57 = vshrl.u32 %v15689_v59, 16 }
 0x2a4   : > { %v5979_v29 = vld [vmem:[#allocation2 + $0xb8] sm:$0x7]  ;;  %v6596_v45 = vpack.c.b16 %v6572_v49, %v6571_v32  ;;  %v5226_v35 = vrot.slane %v5224_v11, 7  ;;  %v7586_v8 = vor.u32 %v7585_v30, %v7582_v22  ;;  %v5793_v14 = vrot.slane %v5791_v17, 7  ;;  %v12423_v51 = vld [vmem:[#allocation2 + $0x90] sm:$0xf]  ;;  %v5863_v11 = vpop.permute.xlu2 %5862 }
 0x2a5   : > { %v5980_v7 = vsel %vm14672_vm1, %v15681_v40, %v5979_v29  ;;  %v7578_v47 = vsel %vm13604_vm2, %v7573_v1, %v7577_v39  ;;  %v7591_v12 = vrot.slane %v7589_v6, 5  ;;  %v4527_v24 = vpop.f32.mrf.mxu3  ;;  %v5794_v19 = vshll.u32 %v15744_v60, 16  ;;  %v7337_v27 = vld [vmem:[#allocation2 + $0x90] sm:$0xf]  ;;  %v7339_v10 = vld [vmem:[#allocation2 + $0x98] sm:$0xf] }
 0x2a6   : > { %5981 = vst [vmem:[#allocation2 + $0xb8] sm:$0x7] %v5980_v7  ;;  %v4594_v58 = vadd.f32 %v4527_v24, %v3096_v3  ;;  %v5229_v56 = vor.u32 %v5227_v46, %v5226_v35  ;;  %v7587_v41 = vrot.slane %v7586_v8, 4  ;;  %v5219_v48 = vrot.slane %v5217_v57, 7 }
 0x2a7   : > { %6712 = vmatmul.bf16.gmra.mxu0 %v6596_v45  ;;  %v5220_v40 = vshll.u32 %v15689_v59, 16  ;;  %v2493_v33 = vadd.f32 %v15733_v2, %v2031_v18  ;;  %v7848_v55 = vunpack.c.l.b16 %v7578_v47  ;;  %v5796_v16 = vor.u32 %v5794_v19, %v5793_v14  ;;  %v13137_v59 = vld [vmem:[#allocation2 + $0x8c] sm:$0xf0]  ;;  %v413_v2 = vld [vmem:[#allocation2 + $0x9c] sm:$0x1]  ;;  %v15801_v34 = vpop.permute.xlu0 %5864 }
 0x2a8   : > { %v15781_v36 = vpop.f32.mrf.mxu2  ;;  %vm4658_vm15 = vcmp.ge.f32.partialorder %v4594_v58, 0.0  ;;  %v4722_v63 = vmul.f32 0.2, %v4594_v58  ;;  %5297 = vrot.lane.b32.xlu0 %v5229_v56, %s13454_s8  ;;  %v7592_v60 = vsel %vm13604_vm2, %v7587_v41, %v7591_v12  ;;  %v15786_v4 = vpack.c.bf16 %v4783_v9, %v4783_v9  ;;  %v12311_v9 = vld [vmem:[#allocation2 + $0x88] sm:$0xf] }
 0x2a9   : > { %v5222_v13 = vor.u32 %v5220_v40, %v5219_v48  ;;  %v3097_v42 = vadd.f32 %v3031_v53, %v2493_v33  ;;  %v15788_v61 = vpop.f32.mrf.mxu1  ;;  %v7849_v23 = vunpack.c.l.b16 %v7592_v60  ;;  %5874 = vrot.lane.b32.xlu1 %v5796_v16, %s13453_s30  ;;  %v4785_v32 = vsel %vm4657_vm14, %v15751_v50, %v4721_v62 }
 0x2aa   : > { %v5405_v20 = vld [vmem:[#allocation2 + $0xc0] sm:$0x7]  ;;  %v4786_v39 = vsel %vm4658_vm15, %v4594_v58, %v4722_v63  ;;  %v406_v53 = vsel %vm15416_vm5, 0, %v405_v21  ;;  %v410_v50 = vsel %vm15416_vm5, 0, %v409_v0  ;;  %v6317_v62 = vshrl.u32 %v6028_v54, 16 }
 0x2ab   : > { %v5406_v22 = vsel %vm14430_vm9, %v15683_v43, %v5405_v20  ;;  %5295 = vrot.lane.b32.xlu2 %v5222_v13, %s13454_s8  ;;  %v15803_v49 = vpack.c.bf16 %v4786_v39, %v4786_v39  ;;  %407 = vst [vmem:[#allocation2 + $0x8c] sm:$0x1] %v406_v53  ;;  %v7873_v3 = vpack.c.b16 %v7849_v23, %v7848_v55  ;;  %v6320_v25 = vshll.u32 %v6028_v54, 16 }
 0x2ac   : > { %5407 = vst [vmem:[#allocation2 + $0xc0] sm:$0x7] %v5406_v22  ;;  %v6331_v1 = vshrl.u32 %v6029_v28, 16  ;;  %v6334_v30 = vshll.u32 %v6029_v28, 16  ;;  %v6319_v6 = vrot.slane %v6317_v62, 4  ;;  %v12312_v17 = vor.u32 %v13137_v59, %v12311_v9 }
 0x2ad   : > { %5584 = vst.msk [vmem:[#allocation2 + $0xc0] sm:$0x3] %vm5561_vm13, %v15735_v31  ;;  %v4529_v43 = vpop.f32.mrf.mxu3  ;;  %v12424_v29 = vor.u32 %v13169_v15, %v12423_v51  ;;  %v414_v45 = vsel %vm15416_vm5, 0, %v413_v2  ;;  %7989 = vmatmul.bf16.gmra.mxu3 %v7873_v3  ;;  %v6322_v46 = vrot.slane %v6320_v25, 5  ;;  %v7594_v8 = vshrl.u32 %v7337_v27, 16 }
 0x2ae   : > { %v4595_v35 = vadd.f32 %v4529_v43, %v3097_v42  ;;  %411 = vst [vmem:[#allocation2 + $0x94] sm:$0x1] %v410_v50  ;;  %v6333_v57 = vrot.slane %v6331_v1, 4  ;;  %v6336_v7 = vrot.slane %v6334_v30, 5  ;;  %6950 = vmatmul.bf16.gmra.mxu1 %v12312_v17  ;;  %v7597_v12 = vshll.u32 %v7337_v27, 16 }
 0x2af   : > { %v6678_v47 = vpop.f32.mrf.mxu0  ;;  %7232 = vmatmul.bf16.gmra.mxu2 %v12424_v29  ;;  %415 = vst [vmem:[#allocation2 + $0x9c] sm:$0x1] %v414_v45  ;;  %v7608_v31 = vshrl.u32 %v7339_v10, 16  ;;  %v7611_v24 = vshll.u32 %v7339_v10, 16  ;;  %v15811_v21 = vpack.c.bf16 %v4785_v32, %v4785_v32  ;;  %v6323_v56 = vor.u32 %v6322_v46, %v6319_v6  ;;  %v5408_v28 = vld [vmem:[#allocation2 + $0xc8] sm:$0x7]  ;;  %v15825_v59 = vpop.permute.xlu2 %5868 }
 0x2b0   : > { %v4723_v18 = vmul.f32 0.2, %v4595_v35  ;;  %4946 = vrot.lane.b32.xlu0 %v15803_v49, %s13453_s30  ;;  %v6912_v58 = vadd.f32 %v15764_v26, %v6678_v47  ;;  %v15816_v14 = vpop.f32.mrf.mxu2  ;;  %v6337_v19 = vor.u32 %v6336_v7, %v6333_v57  ;;  %v7596_v0 = vrot.slane %v7594_v8, 4 }
 0x2b1   : > { %v7599_v41 = vrot.slane %v7597_v12, 5  ;;  %v7610_v48 = vrot.slane %v7608_v31, 4  ;;  %vm4659_vm0 = vcmp.ge.f32.partialorder %v4595_v35, 0.0  ;;  %5524 = vrot.lane.b32.xlu1 %v15811_v21, %s13454_s8  ;;  %v6324_v33 = vrot.slane %v6323_v56, 4  ;;  %v15823_v60 = vpop.f32.mrf.mxu1  ;;  %v13138_v31 = vld [vmem:[#allocation2 + $0x9c] sm:$0xf0] }
 0x2b2   : > { %v6076_v40 = vld [vmem:[#allocation2 + $0x8c] sm:$0x1]  ;;  %v7613_v54 = vrot.slane %v7611_v24, 5  ;;  %v6338_v63 = vrot.slane %v6337_v19, 4  ;;  %v7273_v16 = vadd.f32 %v15781_v36, %v6912_v58  ;;  %v5798_v15 = vshrl.u32 %v15786_v4, 16 }
 0x2b3   : > { %5522 = vrot.lane.b32.xlu2 %v15786_v4, %s13454_s8  ;;  %v6326_v55 = vshll.u32 %v6076_v40, 16  ;;  %v7600_v26 = vor.u32 %v7599_v41, %v7596_v0  ;;  %v5801_v2 = vshll.u32 %v15786_v4, 16  ;;  %v5231_v23 = vshrl.u32 %v15803_v49, 16  ;;  %v417_v56 = vld [vmem:[#allocation2 + $0xa4] sm:$0x1] }
 0x2b4   : > { %v5982_v13 = vld [vmem:[#allocation2 + $0xc0] sm:$0x7]  ;;  %v7614_v42 = vor.u32 %v7613_v54, %v7610_v48  ;;  %v4787_v32 = vsel %vm4659_vm0, %v4595_v35, %v4723_v18  ;;  %v5286_v51 = vpop.permute.xlu0 %5285  ;;  %v5800_v25 = vrot.slane %v5798_v15, 7  ;;  %v5234_v57 = vshll.u32 %v15803_v49, 16  ;;  %v6030_v49 = vld [vmem:[#allocation2 + $0x98] sm:$0xf] }
 0x2b5   : > { %v5983_v20 = vsel %vm14672_vm1, %v5863_v11, %v5982_v13  ;;  %v6077_v39 = vld [vmem:[#allocation2 + $0x94] sm:$0x1]  ;;  %v6328_v36 = vrot.slane %v6326_v55, 5  ;;  %v7601_v9 = vrot.slane %v7600_v26, 4  ;;  %v5409_v62 = vsel %vm14430_vm9, %v5286_v51, %v5408_v28  ;;  %v12315_v40 = vld [vmem:[#allocation2 + $0x98] sm:$0xf] }
 0x2b6   : > { %v7338_v53 = vld [vmem:[#allocation2 + $0x94] sm:$0x1]  ;;  %5984 = vst [vmem:[#allocation2 + $0xc0] sm:$0x7] %v5983_v20  ;;  %v6340_v27 = vshll.u32 %v6077_v39, 16  ;;  %v7615_v10 = vrot.slane %v7614_v42, 4  ;;  %v15837_v30 = vpack.c.bf16 %v4787_v32, %v4787_v32  ;;  %v5803_v35 = vor.u32 %v5801_v2, %v5800_v25 }
 0x2b7   : > { %v7340_v22 = vld [vmem:[#allocation2 + $0x9c] sm:$0x1]  ;;  %v7603_v50 = vshll.u32 %v7338_v53, 16  ;;  %v6329_v4 = vsel %vm13604_vm2, %v6324_v33, %v6328_v36  ;;  %v7955_v11 = vpop.f32.mrf.mxu3  ;;  %5410 = vst [vmem:[#allocation2 + $0xc8] sm:$0x7] %v5409_v62  ;;  %v6680_v1 = vpop.f32.mrf.mxu0  ;;  %v5233_v46 = vrot.slane %v5231_v23, 7  ;;  %v12316_v26 = vor.u32 %v13138_v31, %v12315_v40 }
 0x2b8   : > { %v7617_v3 = vshll.u32 %v7340_v22, 16  ;;  %v6342_v43 = vrot.slane %v6340_v27, 5  ;;  %v15839_v17 = vadd.f32 %v7955_v11, %v7273_v16  ;;  %5585 = vst.msk [vmem:[#allocation2 + $0xc8] sm:$0x3] %vm5561_vm13, %v15705_v52  ;;  %v15843_v29 = vpop.f32.mrf.mxu2  ;;  %v6573_v47 = vunpack.c.l.b16 %v6329_v4  ;;  %v6031_v15 = vld [vmem:[#allocation2 + $0xa0] sm:$0xf] }
 0x2b9   : > { %v7605_v6 = vrot.slane %v7603_v50, 5  ;;  %v5236_v58 = vor.u32 %v5234_v57, %v5233_v46  ;;  %v6914_v41 = vadd.f32 %v15788_v61, %v6680_v1  ;;  %v5812_v48 = vshrl.u32 %v15837_v30, 16  ;;  %v15861_v16 = vpop.f32.mrf.mxu1  ;;  %v6078_v2 = vld [vmem:[#allocation2 + $0x9c] sm:$0x1]  ;;  %v12427_v22 = vld [vmem:[#allocation2 + $0xa0] sm:$0xf] }
 0x2ba   : > { %v7619_v45 = vrot.slane %v7617_v3, 5  ;;  %v6343_v7 = vsel %vm13604_vm2, %v6338_v63, %v6342_v43  ;;  %v8099_v12 = vmin.f32 %v15839_v17, 0.0  ;;  %v5815_v54 = vshll.u32 %v15837_v30, 16  ;;  %v13170_v50 = vld [vmem:[#allocation2 + $0xa4] sm:$0xf0] }
 0x2bb   : > { %v7606_v8 = vsel %vm13604_vm2, %v7601_v9, %v7605_v6  ;;  %v6574_v24 = vunpack.c.l.b16 %v6343_v7  ;;  %5876 = vrot.lane.b32.xlu2 %v5803_v35, %s13453_s30  ;;  %5299 = vrot.lane.b32.xlu0 %v5236_v58, %s13454_s8  ;;  %v5805_v63 = vshrl.u32 %v15811_v21, 16  ;;  %v7274_v13 = vadd.f32 %v15816_v14, %v6914_v41  ;;  %v421_v62 = vld [vmem:[#allocation2 + $0xac] sm:$0x1]  ;;  %v7341_v4 = vld [vmem:[#allocation2 + $0xa0] sm:$0xf] }
 0x2bc   : > { %v7620_v52 = vsel %vm13604_vm2, %v7615_v10, %v7619_v45  ;;  %v7850_v18 = vunpack.c.l.b16 %v7606_v8  ;;  %v8131_v0 = vmul.f32 1.442695, %v8099_v12  ;;  %v15858_v55 = vpop.permute.xlu0 %5512  ;;  %v5814_v61 = vrot.slane %v5812_v48, 7 }
 0x2bd   : > { %v7851_v19 = vunpack.c.l.b16 %v7620_v52  ;;  %v6597_v33 = vpack.c.b16 %v6574_v24, %v6573_v47  ;;  %v15864_v42 = vpop.permute.xlu2 %5289  ;;  %v5807_v32 = vrot.slane %v5805_v63, 7  ;;  %v418_v36 = vsel %vm15416_vm5, 0, %v417_v56 }
 0x2be   : > { %13317 = vpow2.f32 %v8131_v0  ;;  %v6345_v53 = vshrl.u32 %v6030_v49, 16  ;;  %v6348_v9 = vshll.u32 %v6030_v49, 16  ;;  %6955 = vmatmul.bf16.gmra.mxu1 %v12316_v26  ;;  %v5817_v27 = vor.u32 %v5815_v54, %v5814_v61  ;;  %419 = vst [vmem:[#allocation2 + $0xa4] sm:$0x1] %v418_v36 }
 0x2bf   : > { %v7874_v28 = vpack.c.b16 %v7851_v19, %v7850_v18  ;;  %6717 = vmatmul.bf16.gmra.mxu0 %v6597_v33  ;;  %v5985_v23 = vld [vmem:[#allocation2 + $0xc8] sm:$0x7]  ;;  %v7957_v20 = vpop.f32.mrf.mxu3  ;;  %v6683_v39 = vpop.f32.mrf.mxu0  ;;  %v5808_v3 = vshll.u32 %v15811_v21, 16  ;;  %v6354_v1 = vshll.u32 %v6078_v2, 16  ;;  %v6362_v6 = vshll.u32 %v6031_v15, 16 }
 0x2c0   : > { %v5986_v14 = vsel %vm14672_vm1, %v15801_v34, %v5985_v23  ;;  %v15871_v51 = vadd.f32 %v7957_v20, %v7274_v13  ;;  %v15873_v10 = vpop.f32.mrf.mxu2  ;;  %v6347_v11 = vrot.slane %v6345_v53, 4  ;;  %v6350_v25 = vrot.slane %v6348_v9, 5  ;;  %5880 = vrot.lane.b32.xlu1 %v5817_v27, %s13453_s30  ;;  %v7343_v21 = vld [vmem:[#allocation2 + $0xa8] sm:$0xf] }
 0x2c1   : > { %7994 = vmatmul.bf16.gmra.mxu3 %v7874_v28  ;;  %5987 = vst [vmem:[#allocation2 + $0xc8] sm:$0x7] %v5986_v14  ;;  %v6359_v34 = vshrl.u32 %v6031_v15, 16  ;;  %v5810_v45 = vor.u32 %v5808_v3, %v5807_v32  ;;  %v12428_v46 = vor.u32 %v13170_v50, %v12427_v22  ;;  %v422_v57 = vsel %vm15416_vm5, 0, %v421_v62  ;;  %v425_v15 = vld [vmem:[#allocation2 + $0xb4] sm:$0x1] }
 0x2c2   : > { %v8100_v43 = vmin.f32 %v15871_v51, 0.0  ;;  %v6351_v35 = vor.u32 %v6350_v25, %v6347_v11  ;;  %v6917_v47 = vadd.f32 %v15823_v60, %v6683_v39  ;;  %v6356_v8 = vrot.slane %v6354_v1, 5  ;;  %423 = vst [vmem:[#allocation2 + $0xac] sm:$0x1] %v422_v57  ;;  %v15887_v26 = vpop.f32.mrf.mxu1  ;;  %v6032_v1 = vld [vmem:[#allocation2 + $0xa8] sm:$0xf] }
 0x2c3   : > { %5526 = vrot.lane.b32.xlu2 %v15837_v30, %s13454_s8  ;;  %v6361_v12 = vrot.slane %v6359_v34, 4  ;;  %v6364_v31 = vrot.slane %v6362_v6, 5  ;;  %5878 = vrot.lane.b32.xlu0 %v5810_v45, %s13453_s30  ;;  %v7622_v18 = vshrl.u32 %v7341_v4, 16  ;;  %v7625_v30 = vshll.u32 %v7341_v4, 16  ;;  %s13457_s30 = smov 16  }
 0x2c4   : > { %v13318_v7 = vpop.eup %13317  ;;  %v6352_v52 = vrot.slane %v6351_v35, 4  ;;  %7237 = vmatmul.bf16.gmra.mxu2 %v12428_v46  ;;  %v4935_v58 = vpop.permute.xlu0 %4934  ;;  %v8133_v56 = vmul.f32 1.442695, %v8100_v43  ;;  %v7636_v19 = vshrl.u32 %v7343_v21, 16  ;;  %v7639_v0 = vshll.u32 %v7343_v21, 16 }
 0x2c5   : > { %v12533_v24 = vadd.f32 -1.0, %v13318_v7  ;;  %v6365_v49 = vor.u32 %v6364_v31, %v6361_v12  ;;  %5006 = vst.msk [vmem:[#allocation2 + $0xd0] sm:$0x3] %vm4980_vm4, %v4935_v58  ;;  %v4939_v60 = vpop.permute.xlu2 %4938  ;;  %v7624_v40 = vrot.slane %v7622_v18, 4  ;;  %v7627_v33 = vrot.slane %v7625_v30, 5 }
 0x2c6   : > { %v5288_v41 = vpop.permute.xlu1 %5287  ;;  %v7275_v54 = vadd.f32 %v15843_v29, %v6917_v47  ;;  %5008 = vst.msk [vmem:[#allocation2 + $0xe0] sm:$0x3] %vm4980_vm4, %v4939_v60  ;;  %vm8067_vm6 = vcmp.gt.f32.partialorder %v15839_v17, 0.0  ;;  %v6357_v28 = vsel %vm13604_vm2, %v6352_v52, %v6356_v8  ;;  %v7638_v13 = vrot.slane %v7636_v19, 4  ;;  %v6079_v2 = vld [vmem:[#allocation2 + $0xa4] sm:$0x1] }
 0x2c7   : > { %v8227_v48 = vmul.f32 1.6732632, %v12533_v24  ;;  %v6685_v63 = vpop.f32.mrf.mxu0  ;;  %v7641_v61 = vrot.slane %v7639_v0, 5  ;;  %v6366_v23 = vrot.slane %v6365_v49, 4  ;;  %v7342_v20 = vld [vmem:[#allocation2 + $0xa4] sm:$0x1]  ;;  %v7628_v32 = vor.u32 %v7627_v33, %v7624_v40 }
 0x2c8   : > { %v426_v29 = vsel %vm15416_vm5, 0, %v425_v15  ;;  %v15895_v36 = vpop.f32.mrf.mxu2  ;;  %v6368_v53 = vshll.u32 %v6079_v2, 16  ;;  %v7631_v9 = vshll.u32 %v7342_v20, 16  ;;  %13319 = vpow2.f32 %v8133_v56  ;;  %v6033_v46 = vld [vmem:[#allocation2 + $0xb0] sm:$0xf] }
 0x2c9   : > { %v8259_v39 = vsel %vm8067_vm6, %v15839_v17, %v8227_v48  ;;  %v7642_v14 = vor.u32 %v7641_v61, %v7638_v13  ;;  %v7960_v27 = vpop.f32.mrf.mxu3  ;;  %427 = vst [vmem:[#allocation2 + $0xb4] sm:$0x1] %v426_v29  ;;  %v7344_v50 = vld [vmem:[#allocation2 + $0xac] sm:$0x1]  ;;  %v7629_v62 = vrot.slane %v7628_v32, 4  ;;  %v6575_v43 = vunpack.c.l.b16 %v6357_v28 }
 0x2ca   : > { %v8291_v22 = vmul.f32 1.050701, %v8259_v39  ;;  %v15897_v4 = vadd.f32 %v7960_v27, %v7275_v54  ;;  %v6370_v3 = vrot.slane %v6368_v53, 5  ;;  %v7633_v11 = vrot.slane %v7631_v9, 5  ;;  %v6080_v12 = vld [vmem:[#allocation2 + $0xac] sm:$0x1]  ;;  %v15912_v18 = vpop.f32.mrf.mxu1 }
 0x2cb   : > { %v7643_v25 = vrot.slane %v7642_v14, 4  ;;  %v7645_v17 = vshll.u32 %v7344_v50, 16  ;;  %v6919_v45 = vadd.f32 %v15861_v16, %v6685_v63  ;;  %v6373_v52 = vshrl.u32 %v6032_v1, 16  ;;  %v12319_v40 = vld [vmem:[#allocation2 + $0xa8] sm:$0xf] }
 0x2cc   : > { %v8101_v34 = vmin.f32 %v15897_v4, 0.0  ;;  %v5411_v6 = vld [vmem:[#allocation2 + $0xd0] sm:$0x7]  ;;  %v15901_v35 = vpack.c.bf16 %v8291_v22, %v8291_v22  ;;  %v6371_v57 = vsel %vm13604_vm2, %v6366_v23, %v6370_v3  ;;  %v7634_v21 = vsel %vm13604_vm2, %v7629_v62, %v7633_v11  ;;  %v13171_v32 = vld [vmem:[#allocation2 + $0xb4] sm:$0xf0] }
 0x2cd   : > { %v7647_v7 = vrot.slane %v7645_v17, 5  ;;  %v5412_v47 = vsel %vm14430_vm9, %v5288_v41, %v5411_v6  ;;  %v6576_v31 = vunpack.c.l.b16 %v6371_v57  ;;  %v7276_v16 = vadd.f32 %v15873_v10, %v6919_v45  ;;  %v13139_v33 = vld [vmem:[#allocation2 + $0xac] sm:$0xf0]  ;;  %v429_v39 = vld [vmem:[#allocation2 + $0xbc] sm:$0x1] }
 0x2ce   : > { %v4937_v8 = vpop.permute.xlu1 %4936  ;;  %v8135_v24 = vmul.f32 1.442695, %v8101_v34  ;;  %5413 = vst [vmem:[#allocation2 + $0xd0] sm:$0x7] %v5412_v47  ;;  %8371 = vrot.lane.b32.xlu2 %v15901_v35, %s13456_s14  ;;  %v6376_v56 = vshll.u32 %v6032_v1, 16  ;;  %v6382_v49 = vshll.u32 %v6080_v12, 16  ;;  %v13320_v0 = vpop.eup %13319  ;;  %v7852_v10 = vunpack.c.l.b16 %v7634_v21 }
 0x2cf   : > { %v7648_v30 = vsel %vm13604_vm2, %v7643_v25, %v7647_v7  ;;  %5586 = vst.msk [vmem:[#allocation2 + $0xd0] sm:$0x3] %vm5561_vm13, %v15858_v55  ;;  %v6688_v58 = vpop.f32.mrf.mxu0  ;;  %v6387_v19 = vshrl.u32 %v6033_v46, 16  ;;  %v6598_v41 = vpack.c.b16 %v6576_v31, %v6575_v43  ;;  %v6375_v63 = vrot.slane %v6373_v52, 4  ;;  %v12431_v55 = vld [vmem:[#allocation2 + $0xb0] sm:$0xf] }
 0x2d0   : > { %v7853_v60 = vunpack.c.l.b16 %v7648_v30  ;;  %13321 = vpow2.f32 %v8135_v24  ;;  %5007 = vst.msk [vmem:[#allocation2 + $0xd8] sm:$0x3] %vm4980_vm4, %v4937_v8  ;;  %v6081_v48 = vld [vmem:[#allocation2 + $0xb4] sm:$0x1]  ;;  %v6378_v28 = vrot.slane %v6376_v56, 5  ;;  %v6384_v13 = vrot.slane %v6382_v49, 5  ;;  %v15921_v29 = vpop.f32.mrf.mxu2 }
 0x2d1   : > { %v7962_v54 = vpop.f32.mrf.mxu3  ;;  %v6389_v61 = vrot.slane %v6387_v19, 4  ;;  %6722 = vmatmul.bf16.gmra.mxu0 %v6598_v41  ;;  %v6390_v23 = vshll.u32 %v6033_v46, 16  ;;  %v6396_v20 = vshll.u32 %v6081_v48, 16  ;;  %v12320_v9 = vor.u32 %v13139_v33, %v12319_v40  ;;  %v7345_v22 = vld [vmem:[#allocation2 + $0xb0] sm:$0xf] }
 0x2d2   : > { %v7875_v15 = vpack.c.b16 %v7853_v60, %v7852_v10  ;;  %v15919_v2 = vadd.f32 %v7962_v54, %v7276_v16  ;;  %v6379_v53 = vor.u32 %v6378_v28, %v6375_v63  ;;  %v12432_v14 = vor.u32 %v13171_v32, %v12431_v55  ;;  %v7346_v50 = vld [vmem:[#allocation2 + $0xb4] sm:$0x1]  ;;  %v7347_v17 = vld [vmem:[#allocation2 + $0xb8] sm:$0xf] }
 0x2d3   : > { %v430_v27 = vsel %vm15416_vm5, 0, %v429_v39  ;;  %vm8068_vm3 = vcmp.gt.f32.partialorder %v15871_v51, 0.0  ;;  %v6392_v3 = vrot.slane %v6390_v23, 5  ;;  %v6398_v11 = vrot.slane %v6396_v20, 5  ;;  %6960 = vmatmul.bf16.gmra.mxu1 %v12320_v9 }
 0x2d4   : > { %7999 = vmatmul.bf16.gmra.mxu3 %v7875_v15  ;;  %v8102_v62 = vmin.f32 %v15919_v2, 0.0  ;;  %431 = vst [vmem:[#allocation2 + $0xbc] sm:$0x1] %v430_v27  ;;  %v6380_v25 = vrot.slane %v6379_v53, 4  ;;  %7242 = vmatmul.bf16.gmra.mxu2 %v12432_v14  ;;  %v7650_v1 = vshrl.u32 %v7345_v22, 16  ;;  %v7653_v43 = vshll.u32 %v7345_v22, 16  ;;  %v15929_v52 = vpop.f32.mrf.mxu1 }
 0x2d5   : > { %v7659_v34 = vshll.u32 %v7346_v50, 16  ;;  %v6393_v57 = vor.u32 %v6392_v3, %v6389_v61  ;;  %v7664_v21 = vshrl.u32 %v7347_v17, 16  ;;  %v7667_v7 = vshll.u32 %v7347_v17, 16 }
 0x2d6   : > { %v5515_v6 = vpop.permute.xlu1 %5514  ;;  %v13322_v45 = vpop.eup %13321  ;;  %v8137_v46 = vmul.f32 1.442695, %v8102_v62  ;;  %v12534_v47 = vadd.f32 -1.0, %v13320_v0  ;;  %v6385_v12 = vsel %vm13604_vm2, %v6380_v25, %v6384_v13  ;;  %v7652_v31 = vrot.slane %v7650_v1, 4  ;;  %v5988_v50 = vld [vmem:[#allocation2 + $0xd0] sm:$0x7] }
 0x2d7   : > { %v5414_v8 = vld [vmem:[#allocation2 + $0xd8] sm:$0x7]  ;;  %v7655_v24 = vrot.slane %v7653_v43, 5  ;;  %v6690_v16 = vpop.f32.mrf.mxu0  ;;  %v6922_v30 = vadd.f32 %v15887_v26, %v6688_v58  ;;  %v6394_v49 = vrot.slane %v6393_v57, 4  ;;  %v12535_v19 = vadd.f32 -1.0, %v13322_v45 }
 0x2d8   : > { %13323 = vpow2.f32 %v8137_v46  ;;  %v5415_v56 = vsel %vm14430_vm9, %v15864_v42, %v5414_v8  ;;  %v7661_v41 = vrot.slane %v7659_v34, 5  ;;  %v7666_v10 = vrot.slane %v7664_v21, 4  ;;  %v433_v62 = vld [vmem:[#allocation2 + $0xc4] sm:$0x1]  ;;  %v6034_v43 = vld [vmem:[#allocation2 + $0xb8] sm:$0xf] }
 0x2d9   : > { %5416 = vst [vmem:[#allocation2 + $0xd8] sm:$0x7] %v5415_v56  ;;  %v7656_v0 = vor.u32 %v7655_v24, %v7652_v31  ;;  %vm8070_vm8 = vcmp.gt.f32.partialorder %v15919_v2, 0.0  ;;  %v6399_v60 = vsel %vm13604_vm2, %v6394_v49, %v6398_v11  ;;  %v6577_v48 = vunpack.c.l.b16 %v6385_v12  ;;  %v6035_v45 = vld [vmem:[#allocation2 + $0xc0] sm:$0xf] }
 0x2da   : > { %v7669_v40 = vrot.slane %v7667_v7, 5  ;;  %v8437_v33 = vshrl.u32 %v15901_v35, 16  ;;  %5587 = vst.msk [vmem:[#allocation2 + $0xd8] sm:$0x3] %vm5561_vm13, %v5515_v6  ;;  %v6578_v26 = vunpack.c.l.b16 %v6399_v60  ;;  %v7277_v54 = vadd.f32 %v15895_v36, %v6922_v30  ;;  %v15942_v23 = vpop.f32.mrf.mxu2  ;;  %v13172_v60 = vld [vmem:[#allocation2 + $0xc4] sm:$0xf0] }
 0x2db   : > { %v7348_v58 = vld [vmem:[#allocation2 + $0xbc] sm:$0x1]  ;;  %v7657_v42 = vrot.slane %v7656_v0, 4  ;;  %v8228_v28 = vmul.f32 1.6732632, %v12534_v47  ;;  %v8440_v15 = vshll.u32 %v15901_v35, 16  ;;  %v6924_v35 = vadd.f32 %v15912_v18, %v6690_v16 }
 0x2dc   : > { %v7965_v63 = vpop.f32.mrf.mxu3  ;;  %v7670_v13 = vor.u32 %v7669_v40, %v7666_v10  ;;  %v7673_v61 = vshll.u32 %v7348_v58, 16  ;;  %v8439_v55 = vrot.slane %v8437_v33, 7  ;;  %v15944_v20 = vmul.f32 1.6732632, %v12535_v19  ;;  %v6082_v46 = vld [vmem:[#allocation2 + $0xbc] sm:$0x1]  ;;  %v15961_v12 = vpop.f32.mrf.mxu1 }
 0x2dd   : > { %v7662_v32 = vsel %vm13604_vm2, %v7657_v42, %v7661_v41  ;;  %v15948_v39 = vadd.f32 %v7965_v63, %v7277_v54  ;;  %v8260_v36 = vsel %vm8068_vm3, %v15871_v51, %v8228_v28  ;;  %v6599_v11 = vpack.c.b16 %v6578_v26, %v6577_v48  ;;  %v13140_v0 = vld [vmem:[#allocation2 + $0xbc] sm:$0xf0]  ;;  %v12323_v58 = vld [vmem:[#allocation2 + $0xb8] sm:$0xf]  ;;  %v437_v42 = vld [vmem:[#allocation2 + $0xcc] sm:$0x1] }
 0x2de   : > { %v5867_v53 = vpop.permute.xlu1 %5866  ;;  %v13324_v9 = vpop.eup %13323  ;;  %v7671_v14 = vrot.slane %v7670_v13, 4  ;;  %v7675_v27 = vrot.slane %v7673_v61, 5  ;;  %v8442_v22 = vor.u32 %v8440_v15, %v8439_v55  ;;  %v8292_v17 = vmul.f32 1.050701, %v8260_v36  ;;  %v7349_v61 = vld [vmem:[#allocation2 + $0xc0] sm:$0xf] }
 0x2df   : > { %v12536_v3 = vadd.f32 -1.0, %v13324_v9  ;;  %v8103_v25 = vmin.f32 %v15948_v39, 0.0  ;;  %v7854_v51 = vunpack.c.l.b16 %v7662_v32  ;;  %v7278_v6 = vadd.f32 %v15921_v29, %v6924_v35  ;;  %v12435_v9 = vld [vmem:[#allocation2 + $0xc0] sm:$0xf] }
 0x2e0   : > { %v6693_v1 = vpop.f32.mrf.mxu0  ;;  %v7676_v34 = vsel %vm13604_vm2, %v7671_v14, %v7675_v27  ;;  %8548 = vrot.lane.b32.xlu1 %v8442_v22, %s13457_s30  ;;  %v5989_v18 = vsel %vm14672_vm1, %v5867_v53, %v5988_v50  ;;  %v8324_v47 = vpack.c.bf16 %v8292_v17, %v8292_v17  ;;  %vm8069_vm10 = vcmp.gt.f32.partialorder %v15897_v4, 0.0  ;;  %v7351_v14 = vld [vmem:[#allocation2 + $0xc8] sm:$0xf] }
 0x2e1   : > { %v8230_v57 = vmul.f32 1.6732632, %v12536_v3  ;;  %v7855_v21 = vunpack.c.l.b16 %v7676_v34  ;;  %v8139_v7 = vmul.f32 1.442695, %v8103_v25  ;;  %v5991_v8 = vld [vmem:[#allocation2 + $0xd8] sm:$0x7]  ;;  %6727 = vmatmul.bf16.gmra.mxu0 %v6599_v11  ;;  %v6927_v28 = vadd.f32 %v15929_v52, %v6693_v1 }
 0x2e2   : > { %v5992_v31 = vsel %vm14672_vm1, %v15825_v59, %v5991_v8  ;;  %5990 = vst [vmem:[#allocation2 + $0xd0] sm:$0x7] %v5989_v18  ;;  %v434_v29 = vsel %vm15416_vm5, 0, %v433_v62  ;;  %v6401_v24 = vshrl.u32 %v6034_v43, 16  ;;  %v6404_v16 = vshll.u32 %v6034_v43, 16  ;;  %8662 = vrot.lane.b32.xlu0 %v8324_v47, %s13457_s30  ;;  %v15975_v48 = vpop.f32.mrf.mxu2 }
 0x2e3   : > { %v8262_v30 = vsel %vm8070_vm8, %v15919_v2, %v8230_v57  ;;  %v7876_v56 = vpack.c.b16 %v7855_v21, %v7854_v51  ;;  %13325 = vpow2.f32 %v8139_v7  ;;  %5993 = vst [vmem:[#allocation2 + $0xd8] sm:$0x7] %v5992_v31  ;;  %v8729_v49 = vshrl.u32 %v8324_v47, 16 }
 0x2e4   : > { %v7967_v19 = vpop.f32.mrf.mxu3  ;;  %v8732_v41 = vshll.u32 %v8324_v47, 16  ;;  %435 = vst [vmem:[#allocation2 + $0xc4] sm:$0x1] %v434_v29  ;;  %v6403_v10 = vrot.slane %v6401_v24, 4  ;;  %v6406_v33 = vrot.slane %v6404_v16, 5  ;;  %v6410_v2 = vshll.u32 %v6082_v46, 16 }
 0x2e5   : > { %v15973_v59 = vadd.f32 %v7967_v19, %v7278_v6  ;;  %8004 = vmatmul.bf16.gmra.mxu3 %v7876_v56  ;;  %v8731_v40 = vrot.slane %v8729_v49, 7  ;;  %v6415_v26 = vshrl.u32 %v6035_v45, 16  ;;  %v8294_v54 = vmul.f32 1.050701, %v8262_v30  ;;  %v5417_v49 = vld [vmem:[#allocation2 + $0xe0] sm:$0x7] }
 0x2e6   : > { %v6418_v13 = vshll.u32 %v6035_v45, 16  ;;  %v6407_v32 = vor.u32 %v6406_v33, %v6403_v10  ;;  %v6412_v36 = vrot.slane %v6410_v2, 5  ;;  %v12324_v50 = vor.u32 %v13140_v0, %v12323_v58  ;;  %v15988_v21 = vpop.f32.mrf.mxu1  ;;  %v5517_v0 = vpop.permute.xlu2 %5516 }
 0x2e7   : > { %v8104_v63 = vmin.f32 %v15973_v59, 0.0  ;;  %v5292_v55 = vpop.permute.xlu0 %5291  ;;  %v8734_v15 = vor.u32 %v8732_v41, %v8731_v40  ;;  %v6417_v53 = vrot.slane %v6415_v26, 4  ;;  %v12436_v62 = vor.u32 %v13172_v60, %v12435_v9 }
 0x2e8   : > { %v6695_v27 = vpop.f32.mrf.mxu0  ;;  %v6420_v35 = vrot.slane %v6418_v13, 5  ;;  %v6408_v11 = vrot.slane %v6407_v32, 4  ;;  %v438_v52 = vsel %vm15416_vm5, 0, %v437_v42  ;;  %v7678_v25 = vshrl.u32 %v7349_v61, 16  ;;  %6965 = vmatmul.bf16.gmra.mxu1 %v12324_v50 }
 0x2e9   : > { %v8141_v22 = vmul.f32 1.442695, %v8104_v63  ;;  %v13326_v3 = vpop.eup %13325  ;;  %8840 = vrot.lane.b32.xlu2 %v8734_v15, %s13456_s14  ;;  %v7681_v17 = vshll.u32 %v7349_v61, 16  ;;  %7247 = vmatmul.bf16.gmra.mxu2 %v12436_v62  ;;  %439 = vst [vmem:[#allocation2 + $0xcc] sm:$0x1] %v438_v52  ;;  %v7692_v34 = vshrl.u32 %v7351_v14, 16  ;;  %v15982_v51 = vpack.c.bf16 %v8294_v54, %v8294_v54 }
 0x2ea   : > { %v12537_v1 = vadd.f32 -1.0, %v13326_v3  ;;  %v6421_v43 = vor.u32 %v6420_v35, %v6417_v53  ;;  %v7680_v45 = vrot.slane %v7678_v25, 4  ;;  %v8261_v57 = vsel %vm8069_vm10, %v15897_v4, %v15944_v20 }
 0x2eb   : > { %13327 = vpow2.f32 %v8141_v22  ;;  %v6083_v6 = vld [vmem:[#allocation2 + $0xc4] sm:$0x1]  ;;  %v7683_v46 = vrot.slane %v7681_v17, 5  ;;  %v6413_v47 = vsel %vm13604_vm2, %v6408_v11, %v6412_v36  ;;  %v7694_v30 = vrot.slane %v7692_v34, 4 }
 0x2ec   : > { %v7350_v18 = vld [vmem:[#allocation2 + $0xc4] sm:$0x1]  ;;  %v15990_v7 = vmul.f32 1.6732632, %v12537_v1  ;;  %v6422_v8 = vrot.slane %v6421_v43, 4  ;;  %v6424_v31 = vshll.u32 %v6083_v6, 16  ;;  %v7970_v29 = vpop.f32.mrf.mxu3  ;;  %v7279_v20 = vadd.f32 %v15942_v23, %v6927_v28 }
 0x2ed   : > { %v7684_v24 = vor.u32 %v7683_v46, %v7680_v45  ;;  %v7687_v16 = vshll.u32 %v7350_v18, 16  ;;  %v7695_v56 = vshll.u32 %v7351_v14, 16  ;;  %v15994_v19 = vpop.f32.mrf.mxu2  ;;  %v8293_v4 = vmul.f32 1.050701, %v8261_v57  ;;  %v13141_v1 = vld [vmem:[#allocation2 + $0xcc] sm:$0xf0] }
 0x2ee   : > { %v6426_v41 = vrot.slane %v6424_v31, 5  ;;  %v5418_v10 = vsel %vm14430_vm9, %v5292_v55, %v5417_v49  ;;  %vm8071_vm11 = vcmp.gt.f32.partialorder %v15948_v39, 0.0  ;;  %v16002_v63 = vadd.f32 %v7970_v29, %v7279_v20  ;;  %v6933_v62 = vpop.f32.mrf.mxu1  ;;  %v13173_v43 = vld [vmem:[#allocation2 + $0xd4] sm:$0xf0]  ;;  %v12327_v57 = vld [vmem:[#allocation2 + $0xc8] sm:$0xf] }
 0x2ef   : > { %v4941_v60 = vpop.permute.xlu0 %4940  ;;  %v7685_v40 = vrot.slane %v7684_v24, 4  ;;  %v7689_v33 = vrot.slane %v7687_v16, 5  ;;  %v7697_v2 = vrot.slane %v7695_v56, 5  ;;  %5419 = vst [vmem:[#allocation2 + $0xe0] sm:$0x7] %v5418_v10  ;;  %v8325_v54 = vpack.c.bf16 %v8293_v4, %v8293_v4 }
 0x2f0   : > { %v6698_v26 = vpop.f32.mrf.mxu0  ;;  %v6427_v42 = vsel %vm13604_vm2, %v6422_v8, %v6426_v41  ;;  %5588 = vst.msk [vmem:[#allocation2 + $0xe0] sm:$0x3] %vm5561_vm13, %v5517_v0  ;;  %v8736_v23 = vshrl.u32 %v15982_v51, 16  ;;  %vm8072_vm12 = vcmp.gt.f32.partialorder %v15973_v59, 0.0  ;;  %v6579_v28 = vunpack.c.l.b16 %v6413_v47  ;;  %v7352_v61 = vld [vmem:[#allocation2 + $0xcc] sm:$0x1] }
 0x2f1   : > { %v13328_v58 = vpop.eup %13327  ;;  %v6580_v13 = vunpack.c.l.b16 %v6427_v42  ;;  %v7698_v55 = vor.u32 %v7697_v2, %v7694_v30  ;;  %v6929_v15 = vadd.f32 %v15961_v12, %v6695_v27  ;;  %5009 = vst.msk [vmem:[#allocation2 + $0xe8] sm:$0x3] %vm4980_vm4, %v4941_v60  ;;  %v7690_v36 = vsel %vm13604_vm2, %v7685_v40, %v7689_v33  ;;  %8373 = vrot.lane.b32.xlu2 %v8325_v54, %s13456_s14  ;;  %v12439_v47 = vld [vmem:[#allocation2 + $0xd0] sm:$0xf]  ;;  %v441_v30 = vld [vmem:[#allocation2 + $0xd4] sm:$0x1] }
 0x2f2   : > { %v12538_v32 = vadd.f32 -1.0, %v13328_v58  ;;  %v7701_v53 = vshll.u32 %v7352_v61, 16  ;;  %v8444_v9 = vshrl.u32 %v8325_v54, 16  ;;  %v8447_v35 = vshll.u32 %v8325_v54, 16  ;;  %v6036_v56 = vld [vmem:[#allocation2 + $0xc8] sm:$0xf] }
 0x2f3   : > { %v6600_v14 = vpack.c.b16 %v6580_v13, %v6579_v28  ;;  %v7699_v22 = vrot.slane %v7698_v55, 4  ;;  %v8105_v50 = vmin.f32 %v16002_v63, 0.0  ;;  %v8738_v52 = vrot.slane %v8736_v23, 7  ;;  %v6037_v40 = vld [vmem:[#allocation2 + $0xd0] sm:$0xf] }
 0x2f4   : > { %v7703_v3 = vrot.slane %v7701_v53, 5  ;;  %v8446_v11 = vrot.slane %v8444_v9, 7  ;;  %v8739_v12 = vshll.u32 %v15982_v51, 16  ;;  %v7972_v27 = vpop.f32.mrf.mxu3  ;;  %v7280_v17 = vadd.f32 %v15975_v48, %v6929_v15  ;;  %v6084_v33 = vld [vmem:[#allocation2 + $0xcc] sm:$0x1] }
 0x2f5   : > { %6732 = vmatmul.bf16.gmra.mxu0 %v6600_v14  ;;  %v8143_v25 = vmul.f32 1.442695, %v8105_v50  ;;  %v16015_v34 = vpop.f32.mrf.mxu2  ;;  %v7856_v18 = vunpack.c.l.b16 %v7690_v36  ;;  %v8263_v48 = vsel %vm8071_vm11, %v15948_v39, %v15990_v7  ;;  %v12328_v49 = vor.u32 %v13141_v1, %v12327_v57  ;;  %v445_v23 = vld [vmem:[#allocation2 + $0xdc] sm:$0x1] }
 0x2f6   : > { %v7704_v6 = vsel %vm13604_vm2, %v7699_v22, %v7703_v3  ;;  %v8449_v45 = vor.u32 %v8447_v35, %v8446_v11  ;;  %v8741_v46 = vor.u32 %v8739_v12, %v8738_v52  ;;  %v16019_v29 = vadd.f32 %v7972_v27, %v7280_v17  ;;  %v16040_v14 = vpop.f32.mrf.mxu1  ;;  %v7353_v52 = vld [vmem:[#allocation2 + $0xd0] sm:$0xf]  ;;  %v7355_v17 = vld [vmem:[#allocation2 + $0xd8] sm:$0xf] }
 0x2f7   : > { %v4945_v8 = vpop.permute.xlu2 %4944  ;;  %v7857_v31 = vunpack.c.l.b16 %v7704_v6  ;;  %13329 = vpow2.f32 %v8143_v25  ;;  %v5294_v24 = vpop.permute.xlu1 %5293  ;;  %v12440_v0 = vor.u32 %v13173_v43, %v12439_v47  ;;  %v8295_v41 = vmul.f32 1.050701, %v8263_v48 }
 0x2f8   : > { %v6700_v16 = vpop.f32.mrf.mxu0  ;;  %5011 = vst.msk [vmem:[#allocation2 + $0xf8] sm:$0x3] %vm4980_vm4, %v4945_v8  ;;  %8550 = vrot.lane.b32.xlu1 %v8449_v45, %s13457_s30  ;;  %8842 = vrot.lane.b32.xlu0 %v8741_v46, %s13456_s14  ;;  %v8232_v4 = vmul.f32 1.6732632, %v12538_v32  ;;  %v5420_v20 = vld [vmem:[#allocation2 + $0xe8] sm:$0x7]  ;;  %v6932_v39 = vadd.f32 %v15988_v21, %v6698_v26  ;;  %v5519_v13 = vpop.permute.xlu0 %5518 }
 0x2f9   : > { %v7877_v10 = vpack.c.b16 %v7857_v31, %v7856_v18  ;;  %v8106_v60 = vmin.f32 %v16019_v29, 0.0  ;;  %v5421_v7 = vsel %vm14430_vm9, %v5294_v24, %v5420_v20  ;;  %6970 = vmatmul.bf16.gmra.mxu1 %v12328_v49  ;;  %7252 = vmatmul.bf16.gmra.mxu2 %v12440_v0  ;;  %v8327_v2 = vpack.c.bf16 %v8295_v41, %v8295_v41 }
 0x2fa   : > { %v8264_v58 = vsel %vm8072_vm12, %v15973_v59, %v8232_v4  ;;  %5422 = vst [vmem:[#allocation2 + $0xe8] sm:$0x7] %v5421_v7  ;;  %v442_v42 = vsel %vm15416_vm5, 0, %v441_v30  ;;  %v6429_v54 = vshrl.u32 %v6036_v56, 16  ;;  %v7281_v26 = vadd.f32 %v15994_v19, %v6932_v39 }
 0x2fb   : > { %8009 = vmatmul.bf16.gmra.mxu3 %v7877_v10  ;;  %v8145_v21 = vmul.f32 1.442695, %v8106_v60  ;;  %v8296_v28 = vmul.f32 1.050701, %v8264_v58  ;;  %443 = vst [vmem:[#allocation2 + $0xd4] sm:$0x1] %v442_v42  ;;  %v6934_v55 = vadd.f32 %v6933_v62, %v6700_v16 }
 0x2fc   : > { %vm8073_vm14 = vcmp.gt.f32.partialorder %v16002_v63, 0.0  ;;  %v8451_v61 = vshrl.u32 %v8327_v2, 16  ;;  %v6431_v15 = vrot.slane %v6429_v54, 4  ;;  %v6432_v32 = vshll.u32 %v6036_v56, 16  ;;  %5589 = vst.msk [vmem:[#allocation2 + $0xe8] sm:$0x3] %vm5561_vm13, %v5519_v13 }
 0x2fd   : > { %v13330_v59 = vpop.eup %13329  ;;  %13331 = vpow2.f32 %v8145_v21  ;;  %v8454_v36 = vshll.u32 %v8327_v2, 16  ;;  %v6438_v53 = vshll.u32 %v6084_v33, 16  ;;  %v6443_v9 = vshrl.u32 %v6037_v40, 16  ;;  %v16042_v22 = vpop.f32.mrf.mxu2 }
 0x2fe   : > { %v12539_v19 = vadd.f32 -1.0, %v13330_v59  ;;  %v8453_v35 = vrot.slane %v8451_v61, 7  ;;  %v7975_v50 = vpop.f32.mrf.mxu3  ;;  %v6434_v3 = vrot.slane %v6432_v32, 5  ;;  %v6446_v11 = vshll.u32 %v6037_v40, 16  ;;  %v16065_v58 = vpop.f32.mrf.mxu1 }
 0x2ff   : > { %vm8074_vm15 = vcmp.gt.f32.partialorder %v16019_v29, 0.0  ;;  %v16045_v62 = vadd.f32 %v7975_v50, %v7281_v26  ;;  %v6440_v12 = vrot.slane %v6438_v53, 5  ;;  %v6445_v27 = vrot.slane %v6443_v9, 4  ;;  %v4943_v1 = vpop.permute.xlu1 %4942 }
 0x300   : > { %v446_v25 = vsel %vm15416_vm5, 0, %v445_v23  ;;  %v8233_v43 = vmul.f32 1.6732632, %v12539_v19  ;;  %8664 = vrot.lane.b32.xlu1 %v15982_v51, %s13457_s30  ;;  %8375 = vrot.lane.b32.xlu0 %v8327_v2, %s13456_s14  ;;  %v8456_v6 = vor.u32 %v8454_v36, %v8453_v35  ;;  %v6435_v18 = vor.u32 %v6434_v3, %v6431_v15  ;;  %v16052_v46 = vpop.f32.mrf.mxu0  ;;  %5010 = vst.msk [vmem:[#allocation2 + $0xf0] sm:$0x3] %vm4980_vm4, %v4943_v1 }
 0x301   : > { %v6448_v45 = vrot.slane %v6446_v11, 5  ;;  %447 = vst [vmem:[#allocation2 + $0xdc] sm:$0x1] %v446_v25  ;;  %v8107_v57 = vmin.f32 %v16045_v62, 0.0  ;;  %v7706_v47 = vshrl.u32 %v7353_v52, 16  ;;  %v7709_v8 = vshll.u32 %v7353_v52, 16 }
 0x302   : > { %v7282_v31 = vadd.f32 %v16015_v34, %v6934_v55  ;;  %8552 = vrot.lane.b32.xlu2 %v8456_v6, %s13457_s30  ;;  %v8328_v48 = vpack.c.bf16 %v8296_v28, %v8296_v28  ;;  %v6085_v51 = vld [vmem:[#allocation2 + $0xd4] sm:$0x1]  ;;  %v6436_v24 = vrot.slane %v6435_v18, 4  ;;  %v7720_v56 = vshrl.u32 %v7355_v17, 16 }
 0x303   : > { %v6449_v16 = vor.u32 %v6448_v45, %v6445_v27  ;;  %v7354_v30 = vld [vmem:[#allocation2 + $0xd4] sm:$0x1]  ;;  %v13332_v49 = vpop.eup %13331  ;;  %v8147_v0 = vmul.f32 1.442695, %v8107_v57  ;;  %v6452_v41 = vshll.u32 %v6085_v51, 16  ;;  %v7708_v4 = vrot.slane %v7706_v47, 4 }
 0x304   : > { %v7711_v20 = vrot.slane %v7709_v8, 5  ;;  %v12540_v10 = vadd.f32 -1.0, %v13332_v49  ;;  %v6441_v60 = vsel %vm13604_vm2, %v6436_v24, %v6440_v12  ;;  %v7715_v39 = vshll.u32 %v7354_v30, 16  ;;  %v13232_v45 = vld [vmem:[%s17205_s3 + $0xb8] sm:$0xff]  ;;  %v5994_v51 = vld [vmem:[#allocation2 + $0xe0] sm:$0x7] }
 0x305   : > { %v6450_v34 = vrot.slane %v6449_v16, 4  ;;  %v16060_v7 = vpop.permute.xlu2 %5295  ;;  %13333 = vpow2.f32 %v8147_v0  ;;  %v6454_v40 = vrot.slane %v6452_v41, 5  ;;  %v8265_v2 = vsel %vm8073_vm14, %v16002_v63, %v8233_v43  ;;  %v16067_v28 = vpop.f32.mrf.mxu2  ;;  %v13240_v57 = vld [vmem:[%s17205_s3 + $0xf8] sm:$0xff]  ;;  %9630 = vmatpush.bf16.msra.mxu2 %v13232_v45 }
 0x306   : > { %v7712_v33 = vor.u32 %v7711_v20, %v7708_v4  ;;  %v8234_v42 = vmul.f32 1.6732632, %v12540_v10  ;;  %v7717_v54 = vrot.slane %v7715_v39, 5  ;;  %v7722_v23 = vrot.slane %v7720_v56, 4  ;;  %v7977_v26 = vpop.f32.mrf.mxu3  ;;  %v5997_v20 = vld [vmem:[#allocation2 + $0xe8] sm:$0x7]  ;;  %10048 = vmatpush.bf16.msra.mxu3 %v13240_v57 }
 0x307   : > { %v7723_v21 = vshll.u32 %v7355_v17, 16  ;;  %v6455_v13 = vsel %vm13604_vm2, %v6450_v34, %v6454_v40  ;;  %v6581_v61 = vunpack.c.l.b16 %v6441_v60  ;;  %v8743_v32 = vshrl.u32 %v8328_v48, 16  ;;  %v5871_v17 = vpop.permute.xlu0 %5870 }
 0x308   : > { %v7356_v55 = vld [vmem:[#allocation2 + $0xdc] sm:$0x1]  ;;  %v7713_v15 = vrot.slane %v7712_v33, 4  ;;  %v8266_v63 = vsel %vm8074_vm15, %v16019_v29, %v8234_v42  ;;  %8666 = vrot.lane.b32.xlu1 %v8328_v48, %s13457_s30  ;;  %v6582_v59 = vunpack.c.l.b16 %v6455_v13  ;;  %v5873_v9 = vpop.permute.xlu1 %5872  ;;  %v8746_v50 = vshll.u32 %v8328_v48, 16  ;;  %v6705_v11 = vpop.f32.mrf.mxu0  ;;  %v5423_v29 = vld [vmem:[#allocation2 + $0xf0] sm:$0x7] }
 0x309   : > { %v7725_v36 = vrot.slane %v7723_v21, 5  ;;  %v7729_v53 = vshll.u32 %v7356_v55, 16  ;;  %v8298_v19 = vmul.f32 1.050701, %v8266_v63  ;;  %v8745_v35 = vrot.slane %v8743_v32, 7  ;;  %v16101_v10 = vpop.f32.mrf.mxu1  ;;  %v13216_v63 = vld [vmem:[%s17205_s3 + $0x78] sm:$0xff] }
 0x30a   : > { %v16075_v3 = vadd.f32 %v7977_v26, %v7282_v31  ;;  %v6601_v52 = vpack.c.b16 %v6582_v59, %v6581_v61  ;;  %v7718_v12 = vsel %vm13604_vm2, %v7713_v15, %v7717_v54  ;;  %v8297_v31 = vmul.f32 1.050701, %v8265_v2  ;;  %v12331_v15 = vld [vmem:[#allocation2 + $0xd8] sm:$0xf]  ;;  %9307 = vmatpush.bf16.msra.mxu0 %v13216_v63  ;;  %v6086_v57 = vld [vmem:[#allocation2 + $0xdc] sm:$0x1] }
 0x30b   : > { %v7726_v27 = vor.u32 %v7725_v36, %v7722_v23  ;;  %v7731_v25 = vrot.slane %v7729_v53, 5  ;;  %v13334_v1 = vpop.eup %13333  ;;  %v16079_v43 = vpack.c.bf16 %v8298_v19, %v8298_v19  ;;  %v8748_v6 = vor.u32 %v8746_v50, %v8745_v35  ;;  %v449_v35 = vld [vmem:[#allocation2 + $0xe4] sm:$0x1]  ;;  %v6038_v50 = vld [vmem:[#allocation2 + $0xd8] sm:$0xf] }
 0x30c   : > { %v8108_v18 = vmin.f32 %v16075_v3, 0.0  ;;  %v12541_v47 = vadd.f32 -1.0, %v13334_v1  ;;  %6737 = vmatmul.bf16.gmra.mxu0 %v6601_v52  ;;  %v6937_v48 = vadd.f32 %v16040_v14, %v16052_v46  ;;  %v7858_v16 = vunpack.c.l.b16 %v7718_v12 }
 0x30d   : > { %v7727_v8 = vrot.slane %v7726_v27, 4  ;;  %v16090_v24 = vpop.permute.xlu2 %5522  ;;  %8844 = vrot.lane.b32.xlu2 %v8748_v6, %s13456_s14  ;;  %v5995_v56 = vsel %vm14672_vm1, %v5871_v17, %v5994_v51  ;;  %v5424_v49 = vsel %vm14430_vm9, %v16060_v7, %v5423_v29  ;;  %v8329_v14 = vpack.c.bf16 %v8297_v31, %v8297_v31 }
 0x30e   : > { %v8149_v30 = vmul.f32 1.442695, %v8108_v18  ;;  %v8235_v0 = vmul.f32 1.6732632, %v12541_v47  ;;  %5996 = vst [vmem:[#allocation2 + $0xe0] sm:$0x7] %v5995_v56  ;;  %v7283_v46 = vadd.f32 %v16042_v22, %v6937_v48  ;;  %v7980_v4 = vpop.f32.mrf.mxu3  ;;  %v5998_v34 = vsel %vm14672_vm1, %v5873_v9, %v5997_v20 }
 0x30f   : > { %v7732_v41 = vsel %vm13604_vm2, %v7727_v8, %v7731_v25  ;;  %5425 = vst [vmem:[#allocation2 + $0xf0] sm:$0x7] %v5424_v49  ;;  %v8750_v39 = vshrl.u32 %v16079_v43, 16  ;;  %vm8075_vm0 = vcmp.gt.f32.partialorder %v16045_v62, 0.0  ;;  %8377 = vrot.lane.b32.xlu0 %v8329_v14, %s13456_s14  ;;  %v8458_v7 = vshrl.u32 %v8329_v14, 16  ;;  %v16111_v2 = vpop.f32.mrf.mxu2 }
 0x310   : > { %v7859_v60 = vunpack.c.l.b16 %v7732_v41  ;;  %13335 = vpow2.f32 %v8149_v30  ;;  %v16108_v40 = vadd.f32 %v7980_v4, %v7283_v46  ;;  %v6939_v22 = vadd.f32 %v16065_v58, %v6705_v11  ;;  %5999 = vst [vmem:[#allocation2 + $0xe8] sm:$0x7] %v5998_v34  ;;  %v5521_v33 = vpop.permute.xlu1 %5520  ;;  %v5426_v49 = vld [vmem:[#allocation2 + $0xf8] sm:$0x7] }
 0x311   : > { %v8461_v54 = vshll.u32 %v8329_v14, 16  ;;  %v8752_v23 = vrot.slane %v8750_v39, 7  ;;  %v8267_v21 = vsel %vm8075_vm0, %v16045_v62, %v8235_v0  ;;  %5590 = vst.msk [vmem:[#allocation2 + $0xf0] sm:$0x3] %vm5561_vm13, %v5521_v33  ;;  %v8460_v26 = vrot.slane %v8458_v7, 7  ;;  %v13208_v62 = vld [vmem:[%s17205_s3 + $0x38] sm:$0xff]  ;;  %v6943_v51 = vpop.f32.mrf.mxu1 }
 0x312   : > { %v7878_v42 = vpack.c.b16 %v7859_v60, %v7858_v16  ;;  %v8109_v13 = vmin.f32 %v16108_v40, 0.0  ;;  %v8753_v61 = vshll.u32 %v16079_v43, 16  ;;  %v8299_v55 = vmul.f32 1.050701, %v8267_v21  ;;  %9452 = vmatpush.bf16.msra.mxu1 %v13208_v62 }
 0x313   : > { %v7284_v58 = vadd.f32 %v16067_v28, %v6939_v22  ;;  %v8463_v59 = vor.u32 %v8461_v54, %v8460_v26  ;;  %v450_v12 = vsel %vm15416_vm5, 0, %v449_v35  ;;  %v6457_v27 = vshrl.u32 %v6038_v50, 16 }
 0x314   : > { %8014 = vmatmul.bf16.gmra.mxu3 %v7878_v42  ;;  %v6708_v32 = vpop.f32.mrf.mxu0  ;;  %v8151_v36 = vmul.f32 1.442695, %v8109_v13  ;;  %v8755_v53 = vor.u32 %v8753_v61, %v8752_v23  ;;  %v8331_v9 = vpack.c.bf16 %v8299_v55, %v8299_v55  ;;  %451 = vst [vmem:[#allocation2 + $0xe4] sm:$0x1] %v450_v12  ;;  %v6460_v16 = vshll.u32 %v6038_v50, 16 }
 0x315   : > { %v16124_v19 = vpop.permute.xlu2 %5876  ;;  %v13142_v52 = vld [vmem:[#allocation2 + $0xdc] sm:$0xf0]  ;;  %8554 = vrot.lane.b32.xlu2 %v8463_v59, %s13457_s30  ;;  %v6459_v47 = vrot.slane %v6457_v27, 4  ;;  %v6942_v56 = vadd.f32 %v16101_v10, %v6708_v32  ;;  %v6466_v41 = vshll.u32 %v6086_v57, 16  ;;  %vm8076_vm6 = vcmp.gt.f32.partialorder %v16075_v3, 0.0 }
 0x316   : > { %v13336_v11 = vpop.eup %13335  ;;  %v12443_v28 = vld [vmem:[#allocation2 + $0xe0] sm:$0xf]  ;;  %13337 = vpow2.f32 %v8151_v36  ;;  %v12332_v17 = vor.u32 %v13142_v52, %v12331_v15  ;;  %v7982_v29 = vpop.f32.mrf.mxu3  ;;  %8379 = vrot.lane.b32.xlu1 %v8331_v9, %s13456_s14  ;;  %v8465_v1 = vshrl.u32 %v8331_v9, 16  ;;  %v8468_v46 = vshll.u32 %v8331_v9, 16  ;;  %v453_v61 = vld [vmem:[#allocation2 + $0xec] sm:$0x1] }
 0x317   : > { %v12542_v25 = vadd.f32 -1.0, %v13336_v11  ;;  %v6039_v6 = vld [vmem:[#allocation2 + $0xe0] sm:$0xf]  ;;  %v16130_v18 = vadd.f32 %v7982_v29, %v7284_v58  ;;  %v13174_v45 = vld [vmem:[#allocation2 + $0xe4] sm:$0xf0]  ;;  %8846 = vrot.lane.b32.xlu0 %v8755_v53, %s13456_s14  ;;  %v6462_v20 = vrot.slane %v6460_v16, 5  ;;  %v7225_v60 = vpop.f32.mrf.mxu2  ;;  %v7285_v7 = vadd.f32 %v16111_v2, %v6942_v56 }
 0x318   : > { %6975 = vmatmul.bf16.gmra.mxu1 %v12332_v17  ;;  %v8467_v31 = vrot.slane %v8465_v1, 7  ;;  %v12444_v48 = vor.u32 %v13174_v45, %v12443_v28  ;;  %v6471_v14 = vshrl.u32 %v6039_v6, 16  ;;  %v6000_v22 = vld [vmem:[#allocation2 + $0xf0] sm:$0x7]  ;;  %v6468_v21 = vrot.slane %v6466_v41, 5 }
 0x319   : > { %v8236_v8 = vmul.f32 1.6732632, %v12542_v25  ;;  %v8110_v30 = vmin.f32 %v16130_v18, 0.0  ;;  %v6463_v23 = vor.u32 %v6462_v20, %v6459_v47  ;;  %v6474_v15 = vshll.u32 %v6039_v6, 16  ;;  %v7357_v62 = vld [vmem:[#allocation2 + $0xe0] sm:$0xf]  ;;  %v6946_v6 = vpop.f32.mrf.mxu1 }
 0x31a   : > { %v5298_v0 = vpop.permute.xlu0 %5297  ;;  %7257 = vmatmul.bf16.gmra.mxu2 %v12444_v48  ;;  %v8470_v42 = vor.u32 %v8468_v46, %v8467_v31  ;;  %v6473_v26 = vrot.slane %v6471_v14, 4  ;;  %v454_v9 = vsel %vm15416_vm5, 0, %v453_v61  ;;  %vm8077_vm3 = vcmp.gt.f32.partialorder %v16108_v40, 0.0  ;;  %v7359_v25 = vld [vmem:[#allocation2 + $0xe8] sm:$0xf] }
 0x31b   : > { %v5427_v4 = vsel %vm14430_vm9, %v5298_v0, %v5426_v49  ;;  %v8268_v34 = vsel %vm8076_vm6, %v16075_v3, %v8236_v8  ;;  %v8153_v39 = vmul.f32 1.442695, %v8110_v30  ;;  %v5875_v10 = vpop.permute.xlu1 %5874  ;;  %v6087_v3 = vld [vmem:[#allocation2 + $0xe4] sm:$0x1]  ;;  %v6464_v32 = vrot.slane %v6463_v23, 4 }
 0x31c   : > { %5428 = vst [vmem:[#allocation2 + $0xf8] sm:$0x7] %v5427_v4  ;;  %v13338_v33 = vpop.eup %13337  ;;  %v6710_v54 = vpop.f32.mrf.mxu0  ;;  %v8300_v2 = vmul.f32 1.050701, %v8268_v34  ;;  %v6480_v63 = vshll.u32 %v6087_v3, 16  ;;  %v6476_v53 = vrot.slane %v6474_v15, 5 }
 0x31d   : > { %5591 = vst.msk [vmem:[#allocation2 + $0xf8] sm:$0x3] %vm5561_vm13, %v16090_v24  ;;  %v5527_v13 = vpop.permute.xlu2 %5526  ;;  %v12543_v55 = vadd.f32 -1.0, %v13338_v33  ;;  %13339 = vpow2.f32 %v8153_v39  ;;  %8668 = vrot.lane.b32.xlu2 %v16079_v43, %s13457_s30  ;;  %v6001_v24 = vsel %vm14672_vm1, %v5875_v10, %v6000_v22  ;;  %v6944_v43 = vadd.f32 %v6943_v51, %v6710_v54  ;;  %v7358_v50 = vld [vmem:[#allocation2 + $0xe4] sm:$0x1] }
 0x31e   : > { %5593 = vst.msk [vmem:[#allocation2 + $0x108] sm:$0x3] %vm5561_vm13, %v5527_v13  ;;  %v6469_v35 = vsel %vm13604_vm2, %v6464_v32, %v6468_v21  ;;  %v7734_v11 = vshrl.u32 %v7357_v62, 16  ;;  %v6477_v12 = vor.u32 %v6476_v53, %v6473_v26  ;;  %v6482_v27 = vrot.slane %v6480_v63, 5 }
 0x31f   : > { %v7985_v58 = vpop.f32.mrf.mxu3  ;;  %v8237_v59 = vmul.f32 1.6732632, %v12543_v55  ;;  %6002 = vst [vmem:[#allocation2 + $0xf0] sm:$0x7] %v6001_v24  ;;  %8556 = vrot.lane.b32.xlu0 %v8470_v42, %s13457_s30  ;;  %v16157_v29 = vpack.c.bf16 %v8300_v2, %v8300_v2  ;;  %v7737_v57 = vshll.u32 %v7357_v62, 16  ;;  %v7286_v51 = vadd.f32 %v7225_v60, %v6944_v43 }
 0x320   : > { %v16147_v36 = vadd.f32 %v7985_v58, %v7285_v7  ;;  %455 = vst [vmem:[#allocation2 + $0xec] sm:$0x1] %v454_v9  ;;  %v7736_v45 = vrot.slane %v7734_v11, 4  ;;  %v6478_v48 = vrot.slane %v6477_v12, 4  ;;  %vm8078_vm8 = vcmp.gt.f32.partialorder %v16130_v18, 0.0  ;;  %v7228_v49 = vpop.f32.mrf.mxu2 }
 0x321   : > { %v8269_v52 = vsel %vm8077_vm3, %v16108_v40, %v8237_v59  ;;  %v7743_v40 = vshll.u32 %v7358_v50, 16  ;;  %v6583_v56 = vunpack.c.l.b16 %v6469_v35  ;;  %v7739_v14 = vrot.slane %v7737_v57, 5  ;;  %v12335_v58 = vld [vmem:[#allocation2 + $0xe8] sm:$0xf]  ;;  %v6948_v11 = vpop.f32.mrf.mxu1 }
 0x322   : > { %v8111_v28 = vmin.f32 %v16147_v36, 0.0  ;;  %v4947_v17 = vpop.permute.xlu0 %4946  ;;  %v8301_v1 = vmul.f32 1.050701, %v8269_v52  ;;  %v6483_v41 = vsel %vm13604_vm2, %v6478_v48, %v6482_v27  ;;  %v7748_v34 = vshrl.u32 %v7359_v25, 16 }
 0x323   : > { %5012 = vst.msk [vmem:[#allocation2 + $0x100] sm:$0x3] %vm4980_vm4, %v4947_v17  ;;  %v13340_v47 = vpop.eup %13339  ;;  %v6584_v4 = vunpack.c.l.b16 %v6483_v41  ;;  %v7751_v39 = vshll.u32 %v7359_v25, 16  ;;  %v7745_v22 = vrot.slane %v7743_v40, 5  ;;  %v8757_v33 = vshrl.u32 %v16157_v29, 16  ;;  %v5525_v59 = vpop.permute.xlu1 %5524 }
 0x324   : > { %v8155_v8 = vmul.f32 1.442695, %v8111_v28  ;;  %v6003_v31 = vld [vmem:[#allocation2 + $0xf8] sm:$0x7]  ;;  %v12544_v16 = vadd.f32 -1.0, %v13340_v47  ;;  %v16164_v0 = vpack.c.bf16 %v8301_v1, %v8301_v1  ;;  %v6713_v60 = vpop.f32.mrf.mxu0  ;;  %v7750_v23 = vrot.slane %v7748_v34, 4 }
 0x325   : > { %v6004_v30 = vsel %vm14672_vm1, %v16124_v19, %v6003_v31  ;;  %v7740_v19 = vor.u32 %v7739_v14, %v7736_v45  ;;  %v6602_v54 = vpack.c.b16 %v6584_v4, %v6583_v56  ;;  %v7753_v21 = vrot.slane %v7751_v39, 5  ;;  %v457_v1 = vld [vmem:[#allocation2 + $0xf4] sm:$0x1] }
 0x326   : > { %13341 = vpow2.f32 %v8155_v8  ;;  %6005 = vst [vmem:[#allocation2 + $0xf8] sm:$0x7] %v6004_v30  ;;  %v8238_v46 = vmul.f32 1.6732632, %v12544_v16  ;;  %vm8079_vm4 = vcmp.gt.f32.partialorder %v16147_v36, 0.0  ;;  %v6947_v13 = vadd.f32 %v6946_v6, %v6713_v60  ;;  %v13231_v6 = vld [vmem:[%s17205_s3 + $0xb0] sm:$0xff] }
 0x327   : > { %v7987_v20 = vpop.f32.mrf.mxu3  ;;  %v7360_v10 = vld [vmem:[#allocation2 + $0xec] sm:$0x1]  ;;  %8670 = vrot.lane.b32.xlu0 %v16157_v29, %s13457_s30  ;;  %v7741_v61 = vrot.slane %v7740_v19, 4  ;;  %6742 = vmatmul.bf16.gmra.mxu0 %v6602_v54  ;;  %v7754_v55 = vor.u32 %v7753_v21, %v7750_v23  ;;  %v8759_v15 = vrot.slane %v8757_v33, 7  ;;  %v8472_v2 = vshrl.u32 %v16164_v0, 16  ;;  %v13239_v14 = vld [vmem:[%s17205_s3 + $0xf0] sm:$0xff] }
 0x328   : > { %v16168_v7 = vadd.f32 %v7987_v20, %v7286_v51  ;;  %v8270_v42 = vsel %vm8078_vm8, %v16130_v18, %v8238_v46  ;;  %v7757_v3 = vshll.u32 %v7360_v10, 16  ;;  %v13143_v18 = vld [vmem:[#allocation2 + $0xec] sm:$0xf0]  ;;  %v8760_v53 = vshll.u32 %v16157_v29, 16  ;;  %v8372_v25 = vpop.permute.xlu2 %8371  ;;  %v7230_v31 = vpop.f32.mrf.mxu2  ;;  %v6040_v51 = vld [vmem:[#allocation2 + $0xe8] sm:$0xf]  ;;  %9631 = vmatpush.bf16.msra.mxu2 %v13231_v6  ;;  %10049 = vmatpush.bf16.msra.mxu3 %v13239_v14 }
 0x329   : > { %v8302_v63 = vmul.f32 1.050701, %v8270_v42  ;;  %v7746_v62 = vsel %vm13604_vm2, %v7741_v61, %v7745_v22  ;;  %v7755_v43 = vrot.slane %v7754_v55, 4  ;;  %v8475_v50 = vshll.u32 %v16164_v0, 16  ;;  %v12447_v48 = vld [vmem:[#allocation2 + $0xf0] sm:$0xf] }
 0x32a   : > { %v8112_v26 = vmin.f32 %v16168_v7, 0.0  ;;  %v7759_v35 = vrot.slane %v7757_v3, 5  ;;  %v5429_v52 = vld [vmem:[#allocation2 + $0x100] sm:$0x7]  ;;  %v7860_v28 = vunpack.c.l.b16 %v7746_v62  ;;  %v8474_v12 = vrot.slane %v8472_v2, 7 }
 0x32b   : > { %v12336_v27 = vor.u32 %v13143_v18, %v12335_v58  ;;  %v8762_v57 = vor.u32 %v8760_v53, %v8759_v15  ;;  %v7287_v47 = vadd.f32 %v7228_v49, %v6947_v13  ;;  %vm8419_vm10 = vcmask 1042048   ;;  %v6041_v56 = vld [vmem:[#allocation2 + $0xf0] sm:$0xf]  ;;  %v6088_v41 = vld [vmem:[#allocation2 + $0xec] sm:$0x1]  ;;  %v6951_v62 = vpop.f32.mrf.mxu1 }
 0x32c   : > { %v13342_v32 = vpop.eup %13341  ;;  %v8157_v24 = vmul.f32 1.442695, %v8112_v26  ;;  %v7760_v29 = vsel %vm13604_vm2, %v7755_v43, %v7759_v35  ;;  %v8477_v16 = vor.u32 %v8475_v50, %v8474_v12  ;;  %v16193_v46 = vpack.c.bf16 %v8302_v63, %v8302_v63  ;;  %v6715_v20 = vpop.f32.mrf.mxu0  ;;  %8420 = vst.msk [vmem:[#allocation3] sm:$0x3] %vm8419_vm10, %v8372_v25  ;;  %v6009_v13 = vld [vmem:[#allocation2 + $0x108] sm:$0x7] }
 0x32d   : > { %v12545_v9 = vadd.f32 -1.0, %v13342_v32  ;;  %v13175_v17 = vld [vmem:[#allocation2 + $0xf4] sm:$0xf0]  ;;  %v5300_v8 = vpop.permute.xlu0 %5299  ;;  %v7861_v40 = vunpack.c.l.b16 %v7760_v29  ;;  %6980 = vmatmul.bf16.gmra.mxu1 %v12336_v27  ;;  %v458_v60 = vsel %vm15416_vm5, 0, %v457_v1  ;;  %v6485_v19 = vshrl.u32 %v6040_v51, 16 }
 0x32e   : > { %13343 = vpow2.f32 %v8157_v24  ;;  %v5430_v30 = vsel %vm14430_vm9, %v5300_v8, %v5429_v52  ;;  %v12448_v38 = vor.u32 %v13175_v17, %v12447_v48  ;;  %8558 = vrot.lane.b32.xlu1 %v8477_v16, %s13457_s30  ;;  %v6494_v22 = vshll.u32 %v6088_v41, 16  ;;  %459 = vst [vmem:[#allocation2 + $0xf4] sm:$0x1] %v458_v60  ;;  %v13207_v52 = vld [vmem:[%s17205_s3 + $0x30] sm:$0xff]  ;;  %v7363_v5 = vld [vmem:[#allocation2 + $0xf8] sm:$0xf] }
 0x32f   : > { %v8239_v45 = vmul.f32 1.6732632, %v12545_v9  ;;  %8848 = vrot.lane.b32.xlu0 %v8762_v57, %s13456_s14  ;;  %v7879_v39 = vpack.c.b16 %v7861_v40, %v7860_v28  ;;  %5431 = vst [vmem:[#allocation2 + $0x100] sm:$0x7] %v5430_v30  ;;  %v6499_v33 = vshrl.u32 %v6041_v56, 16  ;;  %v6502_v42 = vshll.u32 %v6041_v56, 16  ;;  %9453 = vmatpush.bf16.msra.mxu1 %v13207_v52 }
 0x330   : > { %v7990_v4 = vpop.f32.mrf.mxu3  ;;  %5592 = vst.msk [vmem:[#allocation2 + $0x100] sm:$0x3] %vm5561_vm13, %v5525_v59  ;;  %7262 = vmatmul.bf16.gmra.mxu2 %v12448_v38  ;;  %v6949_v26 = vadd.f32 %v6948_v11, %v6715_v20  ;;  %v6487_v55 = vrot.slane %v6485_v19, 4  ;;  %vm8080_vm9 = vcmp.gt.f32.partialorder %v16168_v7, 0.0  ;;  %v6496_v53 = vrot.slane %v6494_v22, 5  ;;  %v13215_v11 = vld [vmem:[%s17205_s3 + $0x70] sm:$0xff] }
 0x331   : > { %v8271_v49 = vsel %vm8079_vm4, %v16147_v36, %v8239_v45  ;;  %v16203_v10 = vadd.f32 %v7990_v4, %v7287_v47  ;;  %v6488_v36 = vshll.u32 %v6040_v51, 16  ;;  %8019 = vmatmul.bf16.gmra.mxu3 %v7879_v39  ;;  %v6501_v32 = vrot.slane %v6499_v33, 4  ;;  %v461_v28 = vld [vmem:[#allocation2 + $0xfc] sm:$0x1]  ;;  %v7361_v45 = vld [vmem:[#allocation2 + $0xf0] sm:$0xf]  ;;  %9308 = vmatpush.bf16.msra.mxu0 %v13215_v11 }
 0x332   : > { %v8303_v34 = vmul.f32 1.050701, %v8271_v49  ;;  %v5881_v61 = vpop.permute.xlu1 %5880  ;;  %v7288_v18 = vadd.f32 %v7230_v31, %v6949_v26  ;;  %v6504_v63 = vrot.slane %v6502_v42, 5  ;;  %v8764_v50 = vshrl.u32 %v16193_v46, 16  ;;  %v7233_v1 = vpop.f32.mrf.mxu2 }
 0x333   : > { %v8113_v21 = vmin.f32 %v16203_v10, 0.0  ;;  %v6010_v15 = vsel %vm14672_vm1, %v5881_v61, %v6009_v13  ;;  %v6490_v2 = vrot.slane %v6488_v36, 5  ;;  %v462_v6 = vsel %vm15416_vm5, 0, %v461_v28 }
 0x334   : > { %v13344_v54 = vpop.eup %13343  ;;  %v16206_v23 = vpack.c.bf16 %v8303_v34, %v8303_v34  ;;  %6011 = vst [vmem:[#allocation2 + $0x108] sm:$0x7] %v6010_v15  ;;  %v6505_v43 = vor.u32 %v6504_v63, %v6501_v32  ;;  %v8767_v14 = vshll.u32 %v16193_v46, 16  ;;  %v7762_v38 = vshrl.u32 %v7361_v45, 16  ;;  %v12339_v32 = vld [vmem:[#allocation2 + $0xf8] sm:$0xf] }
 0x335   : > { %v12546_v3 = vadd.f32 -1.0, %v13344_v54  ;;  %v8159_v58 = vmul.f32 1.442695, %v8113_v21  ;;  %v6491_v59 = vor.u32 %v6490_v2, %v6487_v55  ;;  %v5879_v8 = vpop.permute.xlu0 %5878  ;;  %v6089_v31 = vld [vmem:[#allocation2 + $0xf4] sm:$0x1]  ;;  %v7765_v19 = vshll.u32 %v7361_v45, 16  ;;  %v6953_v55 = vpop.f32.mrf.mxu1 }
 0x336   : > { %v8479_v9 = vshrl.u32 %v16206_v23, 16  ;;  %v8482_v35 = vshll.u32 %v16206_v23, 16  ;;  %8672 = vrot.lane.b32.xlu1 %v16193_v46, %s13457_s30  ;;  %463 = vst [vmem:[#allocation2 + $0xfc] sm:$0x1] %v462_v6  ;;  %v7362_v40 = vld [vmem:[#allocation2 + $0xf4] sm:$0x1] }
 0x337   : > { %v8240_v24 = vmul.f32 1.6732632, %v12546_v3  ;;  %13345 = vpow2.f32 %v8159_v58  ;;  %8381 = vrot.lane.b32.xlu0 %v16164_v0, %s13456_s14  ;;  %v6492_v25 = vrot.slane %v6491_v59, 4  ;;  %v6006_v47 = vld [vmem:[#allocation2 + $0x100] sm:$0x7]  ;;  %v6506_v56 = vrot.slane %v6505_v43, 4 }
 0x338   : > { %v7992_v27 = vpop.f32.mrf.mxu3  ;;  %v8481_v17 = vrot.slane %v8479_v9, 7  ;;  %v6007_v48 = vsel %vm14672_vm1, %v5879_v8, %v6006_v47  ;;  %v6508_v41 = vshll.u32 %v6089_v31, 16  ;;  %v7771_v36 = vshll.u32 %v7362_v40, 16 }
 0x339   : > { %v8272_v12 = vsel %vm8080_vm9, %v16168_v7, %v8240_v24  ;;  %v16230_v57 = vadd.f32 %v7992_v27, %v7288_v18  ;;  %v8766_v7 = vrot.slane %v8764_v50, 7  ;;  %v6497_v0 = vsel %vm13604_vm2, %v6492_v25, %v6496_v53  ;;  %6008 = vst [vmem:[#allocation2 + $0x100] sm:$0x7] %v6007_v48 }
 0x33a   : > { %v8304_v29 = vmul.f32 1.050701, %v8272_v12  ;;  %v8484_v51 = vor.u32 %v8482_v35, %v8481_v17  ;;  %v6585_v20 = vunpack.c.l.b16 %v6497_v0  ;;  %v6510_v39 = vrot.slane %v6508_v41, 5  ;;  %v7235_v9 = vpop.f32.mrf.mxu2 }
 0x33b   : > { %v8114_v16 = vmin.f32 %v16230_v57, 0.0  ;;  %v8769_v33 = vor.u32 %v8767_v14, %v8766_v7  ;;  %v7764_v42 = vrot.slane %v7762_v38, 4  ;;  %v7776_v54 = vshrl.u32 %v7363_v5, 16  ;;  %v13176_v25 = vld [vmem:[#allocation2 + $0x104] sm:$0xf0] }
 0x33c   : > { %v6718_v30 = vpop.f32.mrf.mxu0  ;;  %v16238_v49 = vpack.c.bf16 %v8304_v29, %v8304_v29  ;;  %8560 = vrot.lane.b32.xlu2 %v8484_v51, %s13457_s30  ;;  %v6511_v46 = vsel %vm13604_vm2, %v6506_v56, %v6510_v39  ;;  %v7767_v26 = vrot.slane %v7765_v19, 5  ;;  %v7779_v15 = vshll.u32 %v7363_v5, 16 }
 0x33d   : > { %v6952_v4 = vadd.f32 %v6951_v62, %v6718_v30  ;;  %v13346_v60 = vpop.eup %13345  ;;  %v8161_v34 = vmul.f32 1.442695, %v8114_v16  ;;  %v6586_v61 = vunpack.c.l.b16 %v6511_v46  ;;  %v7778_v3 = vrot.slane %v7776_v54, 4  ;;  %v7364_v2 = vld [vmem:[#allocation2 + $0xfc] sm:$0x1] }
 0x33e   : > { %v12547_v22 = vadd.f32 -1.0, %v13346_v60  ;;  %vm8081_vm13 = vcmp.gt.f32.partialorder %v16203_v10, 0.0  ;;  %8850 = vrot.lane.b32.xlu1 %v8769_v33, %s13456_s14  ;;  %v7768_v58 = vor.u32 %v7767_v26, %v7764_v42  ;;  %v7773_v18 = vrot.slane %v7771_v36, 5  ;;  %v6042_v54 = vld [vmem:[#allocation2 + $0xf8] sm:$0xf] }
 0x33f   : > { %13347 = vpow2.f32 %v8161_v34  ;;  %v7289_v21 = vadd.f32 %v7233_v1, %v6952_v4  ;;  %8674 = vrot.lane.b32.xlu0 %v16238_v49, %s13457_s30  ;;  %v6603_v24 = vpack.c.b16 %v6586_v61, %v6585_v20  ;;  %v7781_v59 = vrot.slane %v7779_v15, 5  ;;  %v6956_v4 = vpop.f32.mrf.mxu1  ;;  %v6090_v61 = vld [vmem:[#allocation2 + $0xfc] sm:$0x1] }
 0x340   : > { %v8241_v13 = vmul.f32 1.6732632, %v12547_v22  ;;  %v7785_v53 = vshll.u32 %v7364_v2, 16  ;;  %v13144_v43 = vld [vmem:[#allocation2 + $0xfc] sm:$0xf0]  ;;  %v7769_v12 = vrot.slane %v7768_v58, 4 }
 0x341   : > { %v12451_v35 = vld [vmem:[#allocation2 + $0x100] sm:$0xf]  ;;  %v12340_v27 = vor.u32 %v13144_v43, %v12339_v32  ;;  %6747 = vmatmul.bf16.gmra.mxu0 %v6603_v24  ;;  %v7782_v17 = vor.u32 %v7781_v59, %v7778_v3  ;;  %v8771_v51 = vshrl.u32 %v16238_v49, 16  ;;  %vm8082_vm1 = vcmp.gt.f32.partialorder %v16230_v57, 0.0 }
 0x342   : > { %v8273_v63 = vsel %vm8081_vm13, %v16203_v10, %v8241_v13  ;;  %v7787_v1 = vrot.slane %v7785_v53, 5  ;;  %v12452_v10 = vor.u32 %v13176_v25, %v12451_v35  ;;  %v7774_v7 = vsel %vm13604_vm2, %v7769_v12, %v7773_v18  ;;  %v469_v18 = vld [vmem:[#allocation2 + $0x10c] sm:$0x1]  ;;  %v8598_v53 = vld [vmem:[#allocation3] sm:$0x7] }
 0x343   : > { %v8305_v50 = vmul.f32 1.050701, %v8273_v63  ;;  %v16250_v52 = vpop.permute.xlu2 %8840  ;;  %6985 = vmatmul.bf16.gmra.mxu1 %v12340_v27  ;;  %v7783_v31 = vrot.slane %v7782_v17, 4  ;;  %v7862_v30 = vunpack.c.l.b16 %v7774_v7  ;;  %v8773_v38 = vrot.slane %v8771_v51, 7  ;;  %v7367_v25 = vld [vmem:[#allocation2 + $0x108] sm:$0xf] }
 0x344   : > { %v7995_v62 = vpop.f32.mrf.mxu3  ;;  %v6720_v28 = vpop.f32.mrf.mxu0  ;;  %7267 = vmatmul.bf16.gmra.mxu2 %v12452_v10  ;;  %v8774_v60 = vshll.u32 %v16238_v49, 16  ;;  %vm8596_vm12 = vcmask 649728   ;;  %v6043_v49 = vld [vmem:[#allocation2 + $0x100] sm:$0xf]  ;;  %v6513_v58 = vshrl.u32 %v6042_v54, 16  ;;  %v6516_v32 = vshll.u32 %v6042_v54, 16 }
 0x345   : > { %v16248_v11 = vadd.f32 %v7995_v62, %v7289_v21  ;;  %v13348_v6 = vpop.eup %13347  ;;  %v8337_v45 = vpack.c.bf16 %v8305_v50, %v8305_v50  ;;  %v6954_v47 = vadd.f32 %v6953_v55, %v6720_v28  ;;  %v7788_v16 = vsel %vm13604_vm2, %v7783_v31, %v7787_v1  ;;  %vm16273_vm14 = vmand %vm8596_vm12, %vm5334_vm7  ;;  %v7365_v62 = vld [vmem:[#allocation2 + $0x100] sm:$0xf] }
 0x346   : > { %v12548_v8 = vadd.f32 -1.0, %v13348_v6  ;;  %v7863_v56 = vunpack.c.l.b16 %v7788_v16  ;;  %8383 = vrot.lane.b32.xlu1 %v16206_v23, %s13456_s14  ;;  %v8776_v13 = vor.u32 %v8774_v60, %v8773_v38  ;;  %v6522_v63 = vshll.u32 %v6090_v61, 16  ;;  %v13238_v60 = vld [vmem:[%s17205_s3 + $0xe8] sm:$0xff] }
 0x347   : > { %v8115_v29 = vmin.f32 %v16248_v11, 0.0  ;;  %v7290_v48 = vadd.f32 %v7235_v9, %v6954_v47  ;;  %8385 = vrot.lane.b32.xlu2 %v8337_v45, %s13456_s14  ;;  %vm8083_vm11 = vcmp.gt.f32.partialorder %v16248_v11, 0.0  ;;  %v7238_v19 = vpop.f32.mrf.mxu2  ;;  %v8486_v36 = vshrl.u32 %v8337_v45, 16  ;;  %v6958_v1 = vpop.f32.mrf.mxu1  ;;  %10050 = vmatpush.bf16.msra.mxu3 %v13238_v60  ;;  %v13213_v60 = vld [vmem:[%s17205_s3 + $0x60] sm:$0xff] }
 0x348   : > { %v8242_v40 = vmul.f32 1.6732632, %v12548_v8  ;;  %v7880_v20 = vpack.c.b16 %v7863_v56, %v7862_v30  ;;  %v8489_v22 = vshll.u32 %v8337_v45, 16  ;;  %v6527_v24 = vshrl.u32 %v6043_v49, 16 }
 0x349   : > { %v8163_v0 = vmul.f32 1.442695, %v8115_v29  ;;  %v8488_v33 = vrot.slane %v8486_v36, 7  ;;  %v6515_v43 = vrot.slane %v6513_v58, 4  ;;  %v6530_v35 = vshll.u32 %v6043_v49, 16  ;;  %v13230_v29 = vld [vmem:[%s17205_s3 + $0xa8] sm:$0xff] }
 0x34a   : > { %v8274_v41 = vsel %vm8082_vm1, %v16230_v57, %v8242_v40  ;;  %8024 = vmatmul.bf16.gmra.mxu3 %v7880_v20  ;;  %v465_v57 = vld [vmem:[#allocation2 + $0x104] sm:$0x1]  ;;  %v6518_v12 = vrot.slane %v6516_v32, 5  ;;  %v6529_v27 = vrot.slane %v6527_v24, 4  ;;  %v470_v6 = vsel %vm15416_vm5, 0, %v469_v18  ;;  %9632 = vmatpush.bf16.msra.mxu2 %v13230_v29 }
 0x34b   : > { %13349 = vpow2.f32 %v8163_v0  ;;  %v8306_v34 = vmul.f32 1.050701, %v8274_v41  ;;  %v8374_v39 = vpop.permute.xlu2 %8373  ;;  %v466_v42 = vsel %vm15416_vm5, 0, %v465_v57  ;;  %v8491_v15 = vor.u32 %v8489_v22, %v8488_v33  ;;  %471 = vst [vmem:[#allocation2 + $0x10c] sm:$0x1] %v470_v6 }
 0x34c   : > { %v7997_v14 = vpop.f32.mrf.mxu3  ;;  %8421 = vst.msk [vmem:[#allocation3 + $0x8] sm:$0x3] %vm8419_vm10, %v8374_v39  ;;  %v6532_v10 = vrot.slane %v6530_v35, 5  ;;  %v7790_v45 = vshrl.u32 %v7365_v62, 16  ;;  %v6519_v8 = vor.u32 %v6518_v12, %v6515_v43  ;;  %v6524_v7 = vrot.slane %v6522_v63, 5 }
 0x34d   : > { %v16263_v5 = vadd.f32 %v7997_v14, %v7290_v48  ;;  %467 = vst [vmem:[#allocation2 + $0x104] sm:$0x1] %v466_v42  ;;  %v7793_v31 = vshll.u32 %v7365_v62, 16  ;;  %v16289_v0 = vpack.c.bf16 %v8306_v34, %v8306_v34  ;;  %v7804_v38 = vshrl.u32 %v7367_v25, 16  ;;  %v13214_v62 = vld [vmem:[%s17205_s3 + $0x68] sm:$0xff] }
 0x34e   : > { %v6723_v26 = vpop.f32.mrf.mxu0  ;;  %8852 = vrot.lane.b32.xlu1 %v8776_v13, %s13456_s14  ;;  %v6533_v48 = vor.u32 %v6532_v10, %v6529_v27  ;;  %v7792_v40 = vrot.slane %v7790_v45, 4  ;;  %v6520_v14 = vrot.slane %v6519_v8, 4  ;;  %v7807_v36 = vshll.u32 %v7367_v25, 16  ;;  %9309 = vmatpush.bf16.msra.mxu0 %v13214_v62 }
 0x34f   : > { %v8116_v23 = vmin.f32 %v16263_v5, 0.0  ;;  %v6957_v3 = vadd.f32 %v6956_v4, %v6723_v26  ;;  %8562 = vrot.lane.b32.xlu2 %v8491_v15, %s13457_s30  ;;  %vm8084_vm15 = vcmp.gt.f32.partialorder %v16263_v5, 0.0  ;;  %v7240_v16 = vpop.f32.mrf.mxu2  ;;  %v7795_v20 = vrot.slane %v7793_v31, 5 }
 0x350   : > { %v6525_v22 = vsel %vm13604_vm2, %v6520_v14, %v6524_v7  ;;  %v7806_v61 = vrot.slane %v7804_v38, 4  ;;  %v7809_v18 = vrot.slane %v7807_v36, 5  ;;  %v6961_v43 = vpop.f32.mrf.mxu1  ;;  %v8778_v27 = vshrl.u32 %v16289_v0, 16  ;;  %v13204_v38 = vld [vmem:[%s17205_s3 + $0x18] sm:$0xff] }
 0x351   : > { %v13350_v46 = vpop.eup %13349  ;;  %v8165_v21 = vmul.f32 1.442695, %v8116_v23  ;;  %v7291_v50 = vadd.f32 %v7238_v19, %v6957_v3  ;;  %v6534_v19 = vrot.slane %v6533_v48, 4  ;;  %v7796_v57 = vor.u32 %v7795_v20, %v7792_v40 }
 0x352   : > { %v12549_v55 = vadd.f32 -1.0, %v13350_v46  ;;  %v8549_v9 = vpop.permute.xlu1 %8548  ;;  %v6587_v46 = vunpack.c.l.b16 %v6525_v22  ;;  %v7368_v58 = vld [vmem:[#allocation2 + $0x10c] sm:$0x1]  ;;  %v8780_v45 = vrot.slane %v8778_v27, 7  ;;  %v8781_v29 = vshll.u32 %v16289_v0, 16  ;;  %9310 = vmatpush.bf16.msra.mxu0 %v13213_v60 }
 0x353   : > { %13351 = vpow2.f32 %v8165_v21  ;;  %v8599_v28 = vsel %vm16273_vm14, %v8549_v9, %v8598_v53  ;;  %v7797_v26 = vrot.slane %v7796_v57, 4  ;;  %v7813_v63 = vshll.u32 %v7368_v58, 16 }
 0x354   : > { %v8243_v59 = vmul.f32 1.6732632, %v12549_v55  ;;  %8600 = vst [vmem:[#allocation3] sm:$0x7] %v8599_v28  ;;  %v7366_v51 = vld [vmem:[#allocation2 + $0x104] sm:$0x1]  ;;  %v7810_v9 = vor.u32 %v7809_v18, %v7806_v61  ;;  %v8663_v7 = vpop.permute.xlu0 %8662  ;;  %v8783_v40 = vor.u32 %v8781_v29, %v8780_v45 }
 0x355   : > { %v7799_v33 = vshll.u32 %v7366_v51, 16  ;;  %v7815_v28 = vrot.slane %v7813_v63, 5  ;;  %vm8711_vm6 = vcmask 517248   ;;  %vm8888_vm3 = vcmask 124928   ;;  %v13201_v29 = vld [vmem:[%s17205_s3] sm:$0xff] }
 0x356   : > { %v8275_v17 = vsel %vm8083_vm11, %v16248_v11, %v8243_v59  ;;  %v6091_v11 = vld [vmem:[#allocation2 + $0x104] sm:$0x1]  ;;  %v6725_v41 = vpop.f32.mrf.mxu0  ;;  %8676 = vrot.lane.b32.xlu1 %v16289_v0, %s13457_s30  ;;  %v13206_v59 = vld [vmem:[%s17205_s3 + $0x28] sm:$0xff]  ;;  %vm16354_vm4 = vmand %vm8888_vm3, %vm5334_vm7 }
 0x357   : > { %v8307_v47 = vmul.f32 1.050701, %v8275_v17  ;;  %v8000_v56 = vpop.f32.mrf.mxu3  ;;  %v6536_v4 = vshll.u32 %v6091_v11, 16  ;;  %v6959_v49 = vadd.f32 %v6958_v1, %v6725_v41  ;;  %v7801_v13 = vrot.slane %v7799_v33, 5  ;;  %9454 = vmatpush.bf16.msra.mxu1 %v13206_v59  ;;  %v13205_v17 = vld [vmem:[%s17205_s3 + $0x20] sm:$0xff]  ;;  %8854 = vrot.lane.b32.xlu2 %v8783_v40, %s13456_s14 }
 0x358   : > { %v16295_v39 = vadd.f32 %v8000_v56, %v7291_v50  ;;  %v7811_v1 = vrot.slane %v7810_v9, 4  ;;  %v6963_v33 = vpop.f32.mrf.mxu1 }
 0x359   : > { %v13352_v30 = vpop.eup %13351  ;;  %v6538_v23 = vrot.slane %v6536_v4, 5  ;;  %v7292_v24 = vadd.f32 %v7240_v16, %v6959_v49  ;;  %v16315_v35 = vpack.c.bf16 %v8307_v47, %v8307_v47  ;;  %v7243_v47 = vpop.f32.mrf.mxu2 }
 0x35a   : > { %v12550_v34 = vadd.f32 -1.0, %v13352_v30  ;;  %v8117_v54 = vmin.f32 %v16295_v39, 0.0  ;;  %v7816_v31 = vsel %vm13604_vm2, %v7811_v1, %v7815_v28  ;;  %vm8085_vm0 = vcmp.gt.f32.partialorder %v16295_v39, 0.0 }
 0x35b   : > { %v6539_v21 = vsel %vm13604_vm2, %v6534_v19, %v6538_v23  ;;  %v7865_v51 = vunpack.c.l.b16 %v7816_v31  ;;  %9455 = vmatpush.bf16.msra.mxu1 %v13205_v17  ;;  %v13203_v19 = vld [vmem:[%s17205_s3 + $0x10] sm:$0xff] }
 0x35c   : > { %v8244_v42 = vmul.f32 1.6732632, %v12550_v34  ;;  %v8167_v3 = vmul.f32 1.442695, %v8117_v54  ;;  %v6588_v15 = vunpack.c.l.b16 %v6539_v21  ;;  %v8601_v54 = vld [vmem:[#allocation3 + $0x8] sm:$0x7] }
 0x35d   : > { %v13211_v31 = vld [vmem:[%s17205_s3 + $0x50] sm:$0xff] }
 0x35e   : > { %v8276_v55 = vsel %vm8084_vm15, %v16263_v5, %v8244_v42  ;;  %13353 = vpow2.f32 %v8167_v3  ;;  %v6604_v53 = vpack.c.b16 %v6588_v15, %v6587_v46  ;;  %v7802_v5 = vsel %vm13604_vm2, %v7797_v26, %v7801_v13  ;;  %v6728_v25 = vpop.f32.mrf.mxu0  ;;  %8387 = vrot.lane.b32.xlu1 %v16315_v35, %s13456_s14 }
 0x35f   : > { %v8308_v32 = vmul.f32 1.050701, %v8276_v55  ;;  %v8002_v12 = vpop.f32.mrf.mxu3  ;;  %v7864_v6 = vunpack.c.l.b16 %v7802_v5  ;;  %v6962_v48 = vadd.f32 %v6961_v43, %v6728_v25  ;;  %9456 = vmatpush.bf16.msra.mxu1 %v13204_v38  ;;  %v8553_v5 = vpop.permute.xlu2 %8552  ;;  %v13212_v25 = vld [vmem:[%s17205_s3 + $0x58] sm:$0xff]  ;;  %v13229_v38 = vld [vmem:[%s17205_s3 + $0xa0] sm:$0xff] }
 0x360   : > { %6752 = vmatmul.bf16.gmra.mxu0 %v6604_v53  ;;  %v16321_v10 = vadd.f32 %v8002_v12, %v7292_v24  ;;  %v13202_v12 = vld [vmem:[%s17205_s3 + $0x8] sm:$0xff]  ;;  %9633 = vmatpush.bf16.msra.mxu2 %v13229_v38 }
 0x361   : > { %v8340_v50 = vpack.c.bf16 %v8308_v32, %v8308_v32  ;;  %v7881_v14 = vpack.c.b16 %v7865_v51, %v7864_v6  ;;  %v7293_v4 = vadd.f32 %v7243_v47, %v6962_v48  ;;  %v7245_v13 = vpop.f32.mrf.mxu2  ;;  %9311 = vmatpush.bf16.msra.mxu0 %v13212_v25 }
 0x362   : > { %v8118_v11 = vmin.f32 %v16321_v10, 0.0  ;;  %vm8086_vm8 = vcmp.gt.f32.partialorder %v16321_v10, 0.0 }
 0x363   : > { %v8785_v8 = vshrl.u32 %v8340_v50, 16  ;;  %v8788_v30 = vshll.u32 %v8340_v50, 16  ;;  %8029 = vmatmul.bf16.gmra.mxu3 %v7881_v14  ;;  %9457 = vmatpush.bf16.msra.mxu1 %v13203_v19  ;;  %v13237_v19 = vld [vmem:[%s17205_s3 + $0xe0] sm:$0xff] }
 0x364   : > { %v13354_v56 = vpop.eup %13353  ;;  %v8169_v41 = vmul.f32 1.442695, %v8118_v11  ;;  %8678 = vrot.lane.b32.xlu2 %v8340_v50, %s13457_s30  ;;  %10051 = vmatpush.bf16.msra.mxu3 %v13237_v19 }
 0x365   : > { %v8787_v16 = vrot.slane %v8785_v8, 7  ;;  %v12551_v0 = vadd.f32 -1.0, %v13354_v56  ;;  %v6966_v28 = vpop.f32.mrf.mxu1  ;;  %9312 = vmatpush.bf16.msra.mxu0 %v13211_v31 }
 0x366   : > { %13355 = vpow2.f32 %v8169_v41  ;;  %v6730_v57 = vpop.f32.mrf.mxu0 }
 0x367   : > { %v8790_v20 = vor.u32 %v8788_v30, %v8787_v16  ;;  %v8245_v34 = vmul.f32 1.6732632, %v12551_v0  ;;  %v6964_v55 = vadd.f32 %v6963_v33, %v6730_v57  ;;  %9458 = vmatpush.bf16.msra.mxu1 %v13202_v12 }
 0x368   : > { %v8005_v36 = vpop.f32.mrf.mxu3 }
 0x369   : > { %v8277_v22 = vsel %vm8085_vm0, %v16295_v39, %v8245_v34  ;;  %v16341_v23 = vadd.f32 %v8005_v36, %v7293_v4  ;;  %8856 = vrot.lane.b32.xlu1 %v8790_v20, %s13456_s14  ;;  %v7294_v58 = vadd.f32 %v7245_v13, %v6964_v55  ;;  %v13210_v20 = vld [vmem:[%s17205_s3 + $0x48] sm:$0xff]  ;;  %v12615_v34 = vld [vmem:[#allocation3] sm:$0xf]  ;;  %v13228_v36 = vld [vmem:[%s17205_s3 + $0x98] sm:$0xff] }
 0x36a   : > { %v8309_v42 = vmul.f32 1.050701, %v8277_v22  ;;  %v8551_v49 = vpop.permute.xlu1 %8550  ;;  %v16344_v46 = vpop.permute.xlu0 %8842  ;;  %9313 = vmatpush.bf16.msra.mxu0 %v13210_v20  ;;  %9634 = vmatpush.bf16.msra.mxu2 %v13228_v36 }
 0x36b   : > { %v8119_v21 = vmin.f32 %v16341_v23, 0.0  ;;  %v8602_v26 = vsel %vm16273_vm14, %v8551_v49, %v8601_v54  ;;  %vm8087_vm9 = vcmp.gt.f32.partialorder %v16341_v23, 0.0  ;;  %9459 = vmatpush.bf16.msra.mxu1 %v13201_v29 }
 0x36c   : > { %v13356_v39 = vpop.eup %13355  ;;  %v8341_v61 = vpack.c.bf16 %v8309_v42, %v8309_v42  ;;  %8603 = vst [vmem:[#allocation3 + $0x8] sm:$0x7] %v8602_v26  ;;  %v473_v42 = vld [vmem:[#allocation3 + $0x4] sm:$0x1]  ;;  %v13209_v26 = vld [vmem:[%s17205_s3 + $0x40] sm:$0xff] }
 0x36d   : > { %v12552_v3 = vadd.f32 -1.0, %v13356_v39  ;;  %v8171_v15 = vmul.f32 1.442695, %v8119_v21  ;;  %8712 = vst.msk [vmem:[#allocation3 + $0x8] sm:$0x3] %vm8711_vm6, %v8663_v7  ;;  %v7248_v7 = vpop.f32.mrf.mxu2  ;;  %v6968_v57 = vpop.f32.mrf.mxu1  ;;  %v474_v13 = vsel %vm15416_vm5, 0, %v473_v42 }
 0x36e   : > { %v8500_v18 = vshrl.u32 %v8341_v61, 16  ;;  %v8503_v24 = vshll.u32 %v8341_v61, 16  ;;  %8389 = vrot.lane.b32.xlu2 %v8341_v61, %s13456_s14  ;;  %v477_v39 = vld [vmem:[#allocation3 + $0xc] sm:$0x1]  ;;  %475 = vst [vmem:[#allocation3 + $0x4] sm:$0x1] %v474_v13  ;;  %9314 = vmatpush.bf16.msra.mxu0 %v13209_v26 }
 0x36f   : > { %v8246_v32 = vmul.f32 1.6732632, %v12552_v3  ;;  %13357 = vpow2.f32 %v8171_v15  ;;  %v478_v3 = vsel %vm15416_vm5, 0, %v477_v39 }
 0x370   : > { %v8502_v63 = vrot.slane %v8500_v18, 7  ;;  %v8007_v59 = vpop.f32.mrf.mxu3  ;;  %479 = vst [vmem:[#allocation3 + $0xc] sm:$0x1] %v478_v3  ;;  %v8938_v18 = vld [vmem:[#allocation3] sm:$0xf] }
 0x371   : > { %v8278_v62 = vsel %vm8086_vm8, %v16321_v10, %v8246_v32  ;;  %v16358_v43 = vadd.f32 %v8007_v59, %v7294_v58  ;;  %v8987_v59 = vshrl.u32 %v8938_v18, 16 }
 0x372   : > { %v8310_v53 = vmul.f32 1.050701, %v8278_v62  ;;  %v8505_v50 = vor.u32 %v8503_v24, %v8502_v63  ;;  %v8376_v27 = vpop.permute.xlu0 %8375  ;;  %v6733_v10 = vpop.f32.mrf.mxu0 }
 0x373   : > { %8422 = vst.msk [vmem:[#allocation3 + $0x10] sm:$0x3] %vm8419_vm10, %v8376_v27  ;;  %v8120_v8 = vmin.f32 %v16358_v43, 0.0  ;;  %v6967_v40 = vadd.f32 %v6966_v28, %v6733_v10  ;;  %v8665_v0 = vpop.permute.xlu1 %8664  ;;  %v8493_v27 = vshrl.u32 %v16315_v35, 16  ;;  %vm8088_vm13 = vcmp.gt.f32.partialorder %v16358_v43, 0.0 }
 0x374   : > { %v8342_v17 = vpack.c.bf16 %v8310_v53, %v8310_v53  ;;  %v8890_v1 = vld [vmem:[#allocation3 + $0x8] sm:$0x7]  ;;  %8566 = vrot.lane.b32.xlu0 %v8505_v50, %s13457_s30  ;;  %v13227_v53 = vld [vmem:[%s17205_s3 + $0x90] sm:$0xff]  ;;  %v8990_v50 = vshll.u32 %v8938_v18, 16 }
 0x375   : > { %v13358_v6 = vpop.eup %13357  ;;  %v8891_v45 = vsel %vm16354_vm4, %v16250_v52, %v8890_v1  ;;  %v8173_v30 = vmul.f32 1.442695, %v8120_v8  ;;  %v7295_v14 = vadd.f32 %v7248_v7, %v6967_v40  ;;  %v7250_v15 = vpop.f32.mrf.mxu2  ;;  %9635 = vmatpush.bf16.msra.mxu2 %v13227_v53  ;;  %v8495_v40 = vrot.slane %v8493_v27, 7  ;;  %v13235_v18 = vld [vmem:[%s17205_s3 + $0xd0] sm:$0xff] }
 0x376   : > { %v12553_v47 = vadd.f32 -1.0, %v13358_v6  ;;  %8892 = vst [vmem:[#allocation3 + $0x8] sm:$0x7] %v8891_v45  ;;  %v8792_v11 = vshrl.u32 %v8342_v17, 16  ;;  %v8795_v51 = vshll.u32 %v8342_v17, 16  ;;  %v8989_v6 = vrot.slane %v8987_v59, 4 }
 0x377   : > { %13359 = vpow2.f32 %v8173_v30  ;;  %v8992_v45 = vrot.slane %v8990_v50, 5 }
 0x378   : > { %v8247_v48 = vmul.f32 1.6732632, %v12553_v47  ;;  %v8794_v52 = vrot.slane %v8792_v11, 7 }
 0x37a   : > { %v8279_v16 = vsel %vm8087_vm9, %v16341_v23, %v8247_v48  ;;  %v8797_v56 = vor.u32 %v8795_v51, %v8794_v52  ;;  %v8604_v4 = vld [vmem:[#allocation3 + $0x10] sm:$0x7]  ;;  %v16396_v23 = vpop.permute.xlu2 %8844  ;;  %v6735_v49 = vpop.f32.mrf.mxu0  ;;  %v8970_v48 = vld [vmem:[#allocation3 + $0x4] sm:$0x1]  ;;  %v8993_v52 = vor.u32 %v8992_v45, %v8989_v6  ;;  %v13234_v45 = vld [vmem:[%s17205_s3 + $0xc8] sm:$0xff] }
 0x37b   : > { %v8311_v41 = vmul.f32 1.050701, %v8279_v16  ;;  %v8605_v60 = vsel %vm16273_vm14, %v8553_v5, %v8604_v4  ;;  %v6969_v63 = vadd.f32 %v6968_v57, %v6735_v49  ;;  %v13236_v49 = vld [vmem:[%s17205_s3 + $0xd8] sm:$0xff] }
 0x37c   : > { %8680 = vrot.lane.b32.xlu0 %v8342_v17, %s13457_s30  ;;  %8606 = vst [vmem:[#allocation3 + $0x10] sm:$0x7] %v8605_v60  ;;  %8858 = vrot.lane.b32.xlu2 %v8797_v56, %s13456_s14  ;;  %v8667_v17 = vpop.permute.xlu1 %8666  ;;  %v8971_v56 = vld [vmem:[#allocation3 + $0xc] sm:$0x1]  ;;  %v8994_v4 = vrot.slane %v8993_v52, 4 }
 0x37d   : > { %v8343_v22 = vpack.c.bf16 %v8311_v41, %v8311_v41  ;;  %v13193_v33 = vld [vmem:[#allocation3 + $0x4] sm:$0xf0]  ;;  %8713 = vst.msk [vmem:[#allocation3 + $0x10] sm:$0x3] %vm8711_vm6, %v8665_v0  ;;  %v7296_v1 = vadd.f32 %v7250_v15, %v6969_v63  ;;  %v13360_v8 = vpop.eup %13359  ;;  %v8996_v41 = vshll.u32 %v8970_v48, 16  ;;  %v8496_v0 = vshll.u32 %v16315_v35, 16  ;;  %10052 = vmatpush.bf16.msra.mxu3 %v13236_v49 }
 0x37e   : > { %v8010_v54 = vpop.f32.mrf.mxu3  ;;  %v12616_v21 = vor.u32 %v13193_v33, %v12615_v34  ;;  %v8939_v62 = vld [vmem:[#allocation3 + $0x8] sm:$0xf]  ;;  %v9010_v38 = vshll.u32 %v8971_v56, 16  ;;  %v13226_v35 = vld [vmem:[%s17205_s3 + $0x88] sm:$0xff]  ;;  %v13233_v48 = vld [vmem:[%s17205_s3 + $0xc0] sm:$0xff] }
 0x37f   : > { %v16405_v61 = vadd.f32 %v8010_v54, %v7295_v14  ;;  %v8507_v55 = vshrl.u32 %v8343_v22, 16  ;;  %v8510_v58 = vshll.u32 %v8343_v22, 16  ;;  %v9001_v28 = vshrl.u32 %v8939_v62, 16  ;;  %9636 = vmatpush.bf16.msra.mxu2 %v13226_v35  ;;  %v12695_v59 = vld [vmem:[#allocation3 + $0x8] sm:$0xf] }
 0x380   : > { %9460 = vmatmul.bf16.vlgmr.msra.gmra.mxu1 %v12616_v21  ;;  %v9004_v12 = vshll.u32 %v8939_v62, 16  ;;  %v12554_v14 = vadd.f32 -1.0, %v13360_v8  ;;  %v9012_v19 = vrot.slane %v9010_v38, 5  ;;  %v8498_v36 = vor.u32 %v8496_v0, %v8495_v40  ;;  %v9696_v0 = vld [vmem:[#allocation3 + $0xc] sm:$0x1] }
 0x381   : > { %v8121_v32 = vmin.f32 %v16405_v61, 0.0  ;;  %v8509_v24 = vrot.slane %v8507_v55, 7  ;;  %v8378_v5 = vpop.permute.xlu0 %8377  ;;  %v9003_v29 = vrot.slane %v9001_v28, 4  ;;  %vm8089_vm1 = vcmp.gt.f32.partialorder %v16405_v61, 0.0  ;;  %10053 = vmatpush.bf16.msra.mxu3 %v13235_v18 }
 0x382   : > { %8423 = vst.msk [vmem:[#allocation3 + $0x18] sm:$0x3] %vm8419_vm10, %v8378_v5  ;;  %v9006_v47 = vrot.slane %v9004_v12, 5  ;;  %v8555_v16 = vpop.permute.xlu2 %8554  ;;  %v8248_v26 = vmul.f32 1.6732632, %v12554_v14 }
 0x383   : > { %v8175_v25 = vmul.f32 1.442695, %v8121_v32  ;;  %v8512_v10 = vor.u32 %v8510_v58, %v8509_v24  ;;  %v13225_v58 = vld [vmem:[%s17205_s3 + $0x80] sm:$0xff]  ;;  %v6971_v24 = vpop.f32.mrf.mxu1 }
 0x384   : > { %8391 = vrot.lane.b32.xlu0 %v8343_v22, %s13456_s14  ;;  %v8893_v7 = vld [vmem:[#allocation3 + $0x10] sm:$0x7]  ;;  %v9007_v51 = vor.u32 %v9006_v47, %v9003_v29  ;;  %v8280_v53 = vsel %vm8088_vm13, %v16358_v43, %v8248_v26  ;;  %9637 = vmatpush.bf16.msra.mxu2 %v13225_v58  ;;  %v481_v47 = vld [vmem:[#allocation3 + $0x14] sm:$0x1] }
 0x385   : > { %13361 = vpow2.f32 %v8175_v25  ;;  %8568 = vrot.lane.b32.xlu1 %v8512_v10, %s13457_s30  ;;  %v8894_v31 = vsel %vm16354_vm4, %v16344_v46, %v8893_v7  ;;  %v8998_v46 = vrot.slane %v8996_v41, 5  ;;  %v7253_v10 = vpop.f32.mrf.mxu2  ;;  %v482_v52 = vsel %vm15416_vm5, 0, %v481_v47  ;;  %10054 = vmatpush.bf16.msra.mxu3 %v13234_v45 }
 0x386   : > { %v8012_v11 = vpop.f32.mrf.mxu3  ;;  %8895 = vst [vmem:[#allocation3 + $0x10] sm:$0x7] %v8894_v31  ;;  %v9008_v20 = vrot.slane %v9007_v51, 4 }
 0x387   : > { %v16420_v30 = vadd.f32 %v8012_v11, %v7296_v1  ;;  %v8999_v42 = vsel %vm13604_vm2, %v8994_v4, %v8998_v46  ;;  %483 = vst [vmem:[#allocation3 + $0x14] sm:$0x1] %v482_v52 }
 0x388   : > { %v8380_v21 = vpop.permute.xlu1 %8379  ;;  %v9013_v39 = vsel %vm13604_vm2, %v9008_v20, %v9012_v19  ;;  %v9227_v3 = vunpack.c.l.b16 %v8999_v42  ;;  %v485_v42 = vld [vmem:[#allocation3 + $0x1c] sm:$0x1] }
 0x389   : > { %v8122_v60 = vmin.f32 %v16420_v30, 0.0  ;;  %v8607_v34 = vld [vmem:[#allocation3 + $0x18] sm:$0x7]  ;;  %v16431_v54 = vpop.permute.xlu0 %8846  ;;  %v6738_v55 = vpop.f32.mrf.mxu0  ;;  %v9228_v15 = vunpack.c.l.b16 %v9013_v39  ;;  %8424 = vst.msk [vmem:[#allocation3 + $0x20] sm:$0x3] %vm8419_vm10, %v8380_v21  ;;  %vm8090_vm11 = vcmp.gt.f32.partialorder %v16420_v30, 0.0  ;;  %10055 = vmatpush.bf16.msra.mxu3 %v13233_v48 }
 0x38a   : > { %v8608_v33 = vsel %vm16273_vm14, %v8555_v16, %v8607_v34  ;;  %v6972_v50 = vadd.f32 %v6971_v24, %v6738_v55  ;;  %v8669_v27 = vpop.permute.xlu2 %8668  ;;  %v486_v55 = vsel %vm15416_vm5, 0, %v485_v42 }
 0x38b   : > { %v13362_v22 = vpop.eup %13361  ;;  %v8177_v57 = vmul.f32 1.442695, %v8122_v60  ;;  %8609 = vst [vmem:[#allocation3 + $0x18] sm:$0x7] %v8608_v33  ;;  %v9243_v62 = vpack.c.b16 %v9228_v15, %v9227_v3 }
 0x38c   : > { %v12555_v13 = vadd.f32 -1.0, %v13362_v22  ;;  %8564 = vrot.lane.b32.xlu0 %v8498_v36, %s13457_s30  ;;  %8714 = vst.msk [vmem:[#allocation3 + $0x18] sm:$0x3] %vm8711_vm6, %v8667_v17  ;;  %v8312_v17 = vmul.f32 1.050701, %v8280_v53  ;;  %v7297_v29 = vadd.f32 %v7253_v10, %v6972_v50 }
 0x38d   : > { %13363 = vpow2.f32 %v8177_v57  ;;  %v13217_v63 = vld [vmem:[#allocation3 + $0xc] sm:$0xf0]  ;;  %9315 = vmatmul.bf16.vlgmr.msra.gmra.mxu0 %v9243_v62  ;;  %v9737_v57 = vshll.u32 %v9696_v0, 16  ;;  %487 = vst [vmem:[#allocation3 + $0x1c] sm:$0x1] %v486_v55 }
 0x38e   : > { %v8249_v32 = vmul.f32 1.6732632, %v12555_v13  ;;  %v12696_v28 = vor.u32 %v13217_v63, %v12695_v59  ;;  %v9697_v20 = vld [vmem:[#allocation3 + $0x10] sm:$0xf]  ;;  %v16480_v15 = vpack.c.bf16 %v8312_v17, %v8312_v17  ;;  %v8972_v17 = vld [vmem:[#allocation3 + $0x14] sm:$0x1] }
 0x38f   : > { %v9742_v33 = vshrl.u32 %v9697_v20, 16  ;;  %v9745_v49 = vshll.u32 %v9697_v20, 16  ;;  %v8940_v21 = vld [vmem:[#allocation3 + $0x10] sm:$0xf]  ;;  %v9739_v24 = vrot.slane %v9737_v57, 5  ;;  %v9024_v47 = vshll.u32 %v8972_v17, 16 }
 0x390   : > { %v8281_v5 = vsel %vm8089_vm1, %v16405_v61, %v8249_v32  ;;  %9638 = vmatmul.bf16.vlgmr.msra.gmra.mxu2 %v12696_v28  ;;  %v8610_v11 = vld [vmem:[#allocation3 + $0x20] sm:$0x7]  ;;  %v12619_v26 = vld [vmem:[#allocation3 + $0x10] sm:$0xf]  ;;  %v9015_v3 = vshrl.u32 %v8940_v21, 16  ;;  %v9018_v32 = vshll.u32 %v8940_v21, 16 }
 0x391   : > { %v8313_v12 = vmul.f32 1.050701, %v8281_v5  ;;  %v8557_v6 = vpop.permute.xlu0 %8556  ;;  %v9744_v39 = vrot.slane %v9742_v33, 4  ;;  %v9747_v18 = vrot.slane %v9745_v49, 5  ;;  %v6740_v20 = vpop.f32.mrf.mxu0 }
 0x392   : > { %v8611_v16 = vsel %vm16273_vm14, %v8557_v6, %v8610_v11  ;;  %v9017_v59 = vrot.slane %v9015_v3, 4  ;;  %v9020_v28 = vrot.slane %v9018_v32, 5  ;;  %v6973_v33 = vpop.f32.mrf.mxu1  ;;  %v7255_v3 = vpop.f32.mrf.mxu2 }
 0x393   : > { %v13364_v25 = vpop.eup %13363  ;;  %v8345_v1 = vpack.c.bf16 %v8313_v12, %v8313_v12  ;;  %v8896_v61 = vld [vmem:[#allocation3 + $0x18] sm:$0x7]  ;;  %8612 = vst [vmem:[#allocation3 + $0x20] sm:$0x7] %v8611_v16  ;;  %v9748_v50 = vor.u32 %v9747_v18, %v9744_v39 }
 0x394   : > { %v12556_v43 = vadd.f32 -1.0, %v13364_v25  ;;  %v8897_v8 = vsel %vm16354_vm4, %v16396_v23, %v8896_v61  ;;  %v9695_v23 = vld [vmem:[#allocation3 + $0x8] sm:$0xf]  ;;  %8715 = vst.msk [vmem:[#allocation3 + $0x20] sm:$0x3] %vm8711_vm6, %v8669_v27 }
 0x395   : > { %8393 = vrot.lane.b32.xlu2 %v8345_v1, %s13456_s14  ;;  %v8514_v7 = vshrl.u32 %v8345_v1, 16  ;;  %v8517_v31 = vshll.u32 %v8345_v1, 16  ;;  %8898 = vst [vmem:[#allocation3 + $0x18] sm:$0x7] %v8897_v8  ;;  %v9728_v14 = vshrl.u32 %v9695_v23, 16  ;;  %v9731_v38 = vshll.u32 %v9695_v23, 16 }
 0x396   : > { %v8250_v51 = vmul.f32 1.6732632, %v12556_v43  ;;  %v16473_v19 = vpop.permute.xlu2 %8560  ;;  %v9698_v25 = vld [vmem:[#allocation3 + $0x14] sm:$0x1]  ;;  %v9749_v6 = vrot.slane %v9748_v50, 4  ;;  %v8799_v43 = vshrl.u32 %v16480_v15, 16 }
 0x397   : > { %v8015_v40 = vpop.f32.mrf.mxu3  ;;  %v8516_v41 = vrot.slane %v8514_v7, 7  ;;  %v9730_v36 = vrot.slane %v9728_v14, 4  ;;  %v9733_v22 = vrot.slane %v9731_v38, 5  ;;  %v9751_v45 = vshll.u32 %v9698_v25, 16 }
 0x398   : > { %v16466_v56 = vadd.f32 %v8015_v40, %v7297_v29  ;;  %v8282_v4 = vsel %vm8090_vm11, %v16420_v30, %v8250_v51  ;;  %v9021_v29 = vor.u32 %v9020_v28, %v9017_v59  ;;  %v8973_v40 = vld [vmem:[#allocation3 + $0x1c] sm:$0x1]  ;;  %v9026_v23 = vrot.slane %v9024_v47, 5 }
 0x399   : > { %v8314_v60 = vmul.f32 1.050701, %v8282_v4  ;;  %v8519_v34 = vor.u32 %v8517_v31, %v8516_v41  ;;  %v16476_v30 = vpop.permute.xlu0 %8670  ;;  %v9734_v13 = vor.u32 %v9733_v22, %v9730_v36  ;;  %v9753_v31 = vrot.slane %v9751_v45, 5 }
 0x39a   : > { %v8123_v46 = vmin.f32 %v16466_v56, 0.0  ;;  %v9022_v16 = vrot.slane %v9021_v29, 4  ;;  %v8801_v0 = vrot.slane %v8799_v43, 7  ;;  %v9038_v4 = vshll.u32 %v8973_v40, 16 }
 0x39b   : > { %8570 = vrot.lane.b32.xlu1 %v8519_v34, %s13457_s30  ;;  %v8899_v53 = vld [vmem:[#allocation3 + $0x20] sm:$0x7]  ;;  %v9735_v5 = vrot.slane %v9734_v13, 4  ;;  %v16485_v10 = vpack.c.bf16 %v8314_v60, %v8314_v60  ;;  %v9754_v41 = vsel %vm13604_vm2, %v9749_v6, %v9753_v31  ;;  %v8802_v34 = vshll.u32 %v16480_v15, 16 }
 0x39c   : > { %v8179_v35 = vmul.f32 1.442695, %v8123_v46  ;;  %v13194_v58 = vld [vmem:[#allocation3 + $0x14] sm:$0xf0]  ;;  %v8900_v27 = vsel %vm16354_vm4, %v16431_v54, %v8899_v53  ;;  %v9969_v46 = vunpack.c.l.b16 %v9754_v41  ;;  %vm8091_vm12 = vcmp.gt.f32.partialorder %v16466_v56, 0.0 }
 0x39d   : > { %v12620_v63 = vor.u32 %v13194_v58, %v12619_v26  ;;  %v8941_v62 = vld [vmem:[#allocation3 + $0x18] sm:$0xf]  ;;  %8901 = vst [vmem:[#allocation3 + $0x20] sm:$0x7] %v8900_v27  ;;  %v9740_v54 = vsel %vm13604_vm2, %v9735_v5, %v9739_v24  ;;  %v9027_v36 = vsel %vm13604_vm2, %v9022_v16, %v9026_v23  ;;  %v9040_v57 = vrot.slane %v9038_v4, 5 }
 0x39e   : > { %13365 = vpow2.f32 %v8179_v35  ;;  %v9029_v12 = vshrl.u32 %v8941_v62, 16  ;;  %v9032_v1 = vshll.u32 %v8941_v62, 16  ;;  %v9968_v60 = vunpack.c.l.b16 %v9740_v54  ;;  %v12699_v49 = vld [vmem:[#allocation3 + $0x18] sm:$0xf]  ;;  %v489_v62 = vld [vmem:[#allocation3 + $0x24] sm:$0x1] }
 0x39f   : > { %9465 = vmatmul.bf16.gmra.mxu1 %v12620_v63  ;;  %v8804_v13 = vor.u32 %v8802_v34, %v8801_v0  ;;  %v9229_v58 = vunpack.c.l.b16 %v9027_v36  ;;  %v9699_v59 = vld [vmem:[#allocation3 + $0x18] sm:$0xf]  ;;  %v9700_v53 = vld [vmem:[#allocation3 + $0x1c] sm:$0x1]  ;;  %v6974_v5 = vadd.f32 %v6973_v33, %v6740_v20  ;;  %v8017_v6 = vpop.f32.mrf.mxu3  ;;  %v7258_v0 = vpop.f32.mrf.mxu2 }
 0x3a0   : > { %v9031_v8 = vrot.slane %v9029_v12, 4  ;;  %v16495_v48 = vpop.permute.xlu1 %8558  ;;  %v9034_v52 = vrot.slane %v9032_v1, 5  ;;  %v9984_v35 = vpack.c.b16 %v9969_v46, %v9968_v60  ;;  %v490_v12 = vsel %vm15416_vm5, 0, %v489_v62 }
 0x3a1   : > { %v8386_v61 = vpop.permute.xlu2 %8385  ;;  %v16493_v11 = vpop.permute.xlu0 %8848  ;;  %491 = vst [vmem:[#allocation3 + $0x24] sm:$0x1] %v490_v12  ;;  %v9756_v1 = vshrl.u32 %v9699_v59, 16  ;;  %v9765_v29 = vshll.u32 %v9700_v53, 16  ;;  %v7298_v31 = vadd.f32 %v7255_v3, %v6974_v5 }
 0x3a2   : > { %8427 = vst.msk [vmem:[#allocation3 + $0x38] sm:$0x3] %vm8419_vm10, %v8386_v61  ;;  %v9035_v14 = vor.u32 %v9034_v52, %v9031_v8  ;;  %10056 = vmatmul.bf16.vlgmr.msra.gmra.mxu3 %v9984_v35  ;;  %v9759_v61 = vshll.u32 %v9699_v59, 16  ;;  %v6976_v52 = vpop.f32.mrf.mxu1 }
 0x3a3   : > { %8684 = vrot.lane.b32.xlu1 %v16485_v10, %s13457_s30  ;;  %v9758_v8 = vrot.slane %v9756_v1, 4  ;;  %v16515_v4 = vadd.f32 %v8017_v6, %v7298_v31  ;;  %v9767_v46 = vrot.slane %v9765_v29, 5 }
 0x3a4   : > { %v13366_v7 = vpop.eup %13365  ;;  %v9036_v22 = vrot.slane %v9035_v14, 4  ;;  %v13218_v21 = vld [vmem:[#allocation3 + $0x1c] sm:$0xf0]  ;;  %v6743_v45 = vpop.f32.mrf.mxu0 }
 0x3a5   : > { %v12557_v51 = vadd.f32 -1.0, %v13366_v7  ;;  %v12700_v55 = vor.u32 %v13218_v21, %v12699_v49  ;;  %v9701_v27 = vld [vmem:[#allocation3 + $0x20] sm:$0xf]  ;;  %v6977_v40 = vadd.f32 %v6976_v52, %v6743_v45  ;;  %v8124_v21 = vmin.f32 %v16515_v4, 0.0 }
 0x3a6   : > { %v9041_v39 = vsel %vm13604_vm2, %v9036_v22, %v9040_v57  ;;  %v9770_v7 = vshrl.u32 %v9701_v27, 16  ;;  %v9773_v54 = vshll.u32 %v9701_v27, 16  ;;  %vm8092_vm0 = vcmp.gt.f32.partialorder %v16515_v4, 0.0 }
 0x3a7   : > { %v8251_v38 = vmul.f32 1.6732632, %v12557_v51  ;;  %v9230_v18 = vunpack.c.l.b16 %v9041_v39  ;;  %9643 = vmatmul.bf16.gmra.mxu2 %v12700_v55  ;;  %v9761_v51 = vrot.slane %v9759_v61, 5  ;;  %v7299_v33 = vadd.f32 %v7258_v0, %v6977_v40  ;;  %v7260_v5 = vpop.f32.mrf.mxu2 }
 0x3a8   : > { %v9772_v23 = vrot.slane %v9770_v7, 4  ;;  %v9775_v41 = vrot.slane %v9773_v54, 5  ;;  %v9702_v22 = vld [vmem:[#allocation3 + $0x24] sm:$0x1] }
 0x3a9   : > { %v8283_v42 = vsel %vm8091_vm12, %v16466_v56, %v8251_v38  ;;  %v8619_v32 = vld [vmem:[#allocation3 + $0x38] sm:$0x7]  ;;  %v8382_v24 = vpop.permute.xlu0 %8381  ;;  %v16507_v56 = vpop.permute.xlu1 %8672  ;;  %v9244_v50 = vpack.c.b16 %v9230_v18, %v9229_v58  ;;  %v9762_v14 = vor.u32 %v9761_v51, %v9758_v8  ;;  %v9779_v35 = vshll.u32 %v9702_v22, 16 }
 0x3aa   : > { %v8315_v26 = vmul.f32 1.050701, %v8283_v42  ;;  %8425 = vst.msk [vmem:[#allocation3 + $0x28] sm:$0x3] %vm8419_vm10, %v8382_v24  ;;  %v8563_v28 = vpop.permute.xlu2 %8562  ;;  %v9776_v34 = vor.u32 %v9775_v41, %v9772_v23  ;;  %v8181_v58 = vmul.f32 1.442695, %v8124_v21 }
 0x3ab   : > { %8860 = vrot.lane.b32.xlu1 %v8804_v13, %s13456_s14  ;;  %v8620_v17 = vsel %vm16273_vm14, %v8563_v28, %v8619_v32  ;;  %9320 = vmatmul.bf16.gmra.mxu0 %v9244_v50  ;;  %v9763_v57 = vrot.slane %v9762_v14, 4  ;;  %v9781_v13 = vrot.slane %v9779_v35, 5  ;;  %v8806_v41 = vshrl.u32 %v16485_v10, 16 }
 0x3ac   : > { %v8347_v63 = vpack.c.bf16 %v8315_v26, %v8315_v26  ;;  %8621 = vst [vmem:[#allocation3 + $0x38] sm:$0x7] %v8620_v17  ;;  %v9777_v42 = vrot.slane %v9776_v34, 4  ;;  %v6745_v18 = vpop.f32.mrf.mxu0  ;;  %v493_v34 = vld [vmem:[#allocation3 + $0x2c] sm:$0x1] }
 0x3ae   : > { %8395 = vrot.lane.b32.xlu0 %v8347_v63, %s13456_s14  ;;  %v8521_v25 = vshrl.u32 %v8347_v63, 16  ;;  %v8524_v43 = vshll.u32 %v8347_v63, 16  ;;  %v9782_v55 = vsel %vm13604_vm2, %v9777_v42, %v9781_v13 }
 0x3b0   : > { %v8523_v47 = vrot.slane %v8521_v25, 7 }
 0x3b1   : > { %v8613_v20 = vld [vmem:[#allocation3 + $0x28] sm:$0x7]  ;;  %v16518_v38 = vpop.permute.xlu1 %8850  ;;  %v8675_v60 = vpop.permute.xlu0 %8674 }
 0x3b2   : > { %v8526_v16 = vor.u32 %v8524_v43, %v8523_v47  ;;  %v8614_v36 = vsel %vm16273_vm14, %v16495_v48, %v8613_v20  ;;  %8718 = vst.msk [vmem:[#allocation3 + $0x38] sm:$0x3] %vm8711_vm6, %v8675_v60  ;;  %v9768_v48 = vsel %vm13604_vm2, %v9763_v57, %v9767_v46  ;;  %v16537_v50 = vpop.permute.xlu2 %8854  ;;  %v12623_v47 = vld [vmem:[#allocation3 + $0x20] sm:$0xf]  ;;  %v8808_v57 = vrot.slane %v8806_v41, 7 }
 0x3b3   : > { %8615 = vst [vmem:[#allocation3 + $0x28] sm:$0x7] %v8614_v36  ;;  %v9970_v3 = vunpack.c.l.b16 %v9768_v48  ;;  %v7263_v23 = vpop.f32.mrf.mxu2  ;;  %v8942_v36 = vld [vmem:[#allocation3 + $0x20] sm:$0xf]  ;;  %v8974_v48 = vld [vmem:[#allocation3 + $0x24] sm:$0x1] }
 0x3b4   : > { %8572 = vrot.lane.b32.xlu2 %v8526_v16, %s13457_s30  ;;  %8716 = vst.msk [vmem:[#allocation3 + $0x28] sm:$0x3] %vm8711_vm6, %v16476_v30  ;;  %v8020_v49 = vpop.f32.mrf.mxu3  ;;  %v6978_v30 = vpop.f32.mrf.mxu1  ;;  %v9043_v35 = vshrl.u32 %v8942_v36, 16  ;;  %v9046_v13 = vshll.u32 %v8942_v36, 16 }
 0x3b5   : > { %v8061_v26 = vadd.f32 %v8020_v49, %v7299_v33  ;;  %v6979_v59 = vadd.f32 %v6978_v30, %v6745_v18  ;;  %v494_v33 = vsel %vm15416_vm5, 0, %v493_v34 }
 0x3b6   : > { %8682 = vrot.lane.b32.xlu0 %v16480_v15, %s13457_s30  ;;  %v9971_v15 = vunpack.c.l.b16 %v9782_v55  ;;  %495 = vst [vmem:[#allocation3 + $0x2c] sm:$0x1] %v494_v33 }
 0x3b7   : > { %v8125_v39 = vmin.f32 %v8061_v26, 0.0  ;;  %v7300_v12 = vadd.f32 %v7260_v5, %v6979_v59  ;;  %vm8093_vm15 = vcmp.gt.f32.partialorder %v8061_v26, 0.0 }
 0x3b8   : > { %v9985_v24 = vpack.c.b16 %v9971_v15, %v9970_v3  ;;  %v9045_v3 = vrot.slane %v9043_v35, 4  ;;  %v9052_v15 = vshll.u32 %v8974_v48, 16 }
 0x3b9   : > { %v8183_v32 = vmul.f32 1.442695, %v8125_v39  ;;  %v8384_v63 = vpop.permute.xlu1 %8383  ;;  %v8908_v17 = vld [vmem:[#allocation3 + $0x38] sm:$0x7] }
 0x3ba   : > { %8426 = vst.msk [vmem:[#allocation3 + $0x30] sm:$0x3] %vm8419_vm10, %v8384_v63  ;;  %10061 = vmatmul.bf16.gmra.mxu3 %v9985_v24  ;;  %v8809_v63 = vshll.u32 %v16485_v10, 16  ;;  %v9048_v24 = vrot.slane %v9046_v13, 5  ;;  %v9054_v10 = vrot.slane %v9052_v15, 5 }
 0x3bb   : > { %v8902_v62 = vld [vmem:[#allocation3 + $0x28] sm:$0x7]  ;;  %13367 = vpow2.f32 %v8183_v32 }
 0x3bc   : > { %v8903_v53 = vsel %vm16354_vm4, %v16493_v11, %v8902_v62  ;;  %13369 = vpow2.f32 %v8181_v58  ;;  %v8022_v28 = vpop.f32.mrf.mxu3  ;;  %v6981_v54 = vpop.f32.mrf.mxu1 }
 0x3bd   : > { %8904 = vst [vmem:[#allocation3 + $0x28] sm:$0x7] %v8903_v53  ;;  %v16539_v45 = vadd.f32 %v8022_v28, %v7300_v12  ;;  %v7265_v53 = vpop.f32.mrf.mxu2  ;;  %v8811_v28 = vor.u32 %v8809_v63, %v8808_v57 }
 0x3be   : > { %v6748_v29 = vpop.f32.mrf.mxu0  ;;  %v16548_v31 = vpop.permute.xlu2 %8678 }
 0x3bf   : > { %v8126_v40 = vmin.f32 %v16539_v45, 0.0  ;;  %vm8094_vm8 = vcmp.gt.f32.partialorder %v16539_v45, 0.0 }
 0x3c1   : > { %v13368_v27 = vpop.eup %13367  ;;  %v8616_v25 = vld [vmem:[#allocation3 + $0x30] sm:$0x7]  ;;  %v8853_v1 = vpop.permute.xlu1 %8852  ;;  %v8185_v60 = vmul.f32 1.442695, %v8126_v40 }
 0x3c2   : > { %v12559_v6 = vadd.f32 -1.0, %v13368_v27  ;;  %v8617_v43 = vsel %vm16273_vm14, %v16473_v19, %v8616_v25  ;;  %v8909_v11 = vsel %vm16354_vm4, %v8853_v1, %v8908_v17  ;;  %v13370_v61 = vpop.eup %13369  ;;  %v9049_v27 = vor.u32 %v9048_v24, %v9045_v3 }
 0x3c3   : > { %8618 = vst [vmem:[#allocation3 + $0x30] sm:$0x7] %v8617_v43  ;;  %v12558_v51 = vadd.f32 -1.0, %v13370_v61  ;;  %13371 = vpow2.f32 %v8185_v60 }
 0x3c4   : > { %v8253_v8 = vmul.f32 1.6732632, %v12559_v6  ;;  %8717 = vst.msk [vmem:[#allocation3 + $0x30] sm:$0x3] %vm8711_vm6, %v16507_v56  ;;  %v13195_v7 = vld [vmem:[#allocation3 + $0x24] sm:$0xf0]  ;;  %v6982_v56 = vadd.f32 %v6981_v54, %v6748_v29  ;;  %v6983_v18 = vpop.f32.mrf.mxu1 }
 0x3c5   : > { %8910 = vst [vmem:[#allocation3 + $0x38] sm:$0x7] %v8909_v11  ;;  %v12624_v52 = vor.u32 %v13195_v7, %v12623_v47  ;;  %v8252_v20 = vmul.f32 1.6732632, %v12558_v51  ;;  %v8943_v42 = vld [vmem:[#allocation3 + $0x28] sm:$0xf] }
 0x3c6   : > { %v8285_v19 = vsel %vm8093_vm15, %v8061_v26, %v8253_v8  ;;  %v7301_v49 = vadd.f32 %v7263_v23, %v6982_v56  ;;  %v6750_v21 = vpop.f32.mrf.mxu0  ;;  %v9057_v39 = vshrl.u32 %v8943_v42, 16  ;;  %v9060_v58 = vshll.u32 %v8943_v42, 16  ;;  %v12703_v29 = vld [vmem:[#allocation3 + $0x28] sm:$0xf] }
 0x3c7   : > { %v8317_v16 = vmul.f32 1.050701, %v8285_v19  ;;  %9470 = vmatmul.bf16.gmra.mxu1 %v12624_v52  ;;  %v8284_v55 = vsel %vm8092_vm0, %v16515_v4, %v8252_v20  ;;  %v6984_v62 = vadd.f32 %v6983_v18, %v6750_v21  ;;  %v9050_v8 = vrot.slane %v9049_v27, 4 }
 0x3c8   : > { %v8390_v26 = vpop.permute.xlu2 %8389  ;;  %v9059_v30 = vrot.slane %v9057_v39, 4  ;;  %v9062_v59 = vrot.slane %v9060_v58, 5  ;;  %v8316_v25 = vmul.f32 1.050701, %v8284_v55  ;;  %v7268_v55 = vpop.f32.mrf.mxu2 }
 0x3c9   : > { %v16553_v0 = vpack.c.bf16 %v8317_v16, %v8317_v16  ;;  %v8677_v14 = vpop.permute.xlu1 %8676  ;;  %8429 = vst.msk [vmem:[#allocation3 + $0x50] sm:$0x3] %vm8419_vm10, %v8390_v26  ;;  %v7302_v11 = vadd.f32 %v7265_v53, %v6984_v62  ;;  %v13372_v52 = vpop.eup %13371 }
 0x3ca   : > { %8719 = vst.msk [vmem:[#allocation3 + $0x40] sm:$0x3] %vm8711_vm6, %v8677_v14  ;;  %v9063_v6 = vor.u32 %v9062_v59, %v9059_v30  ;;  %v8348_v23 = vpack.c.bf16 %v8316_v25, %v8316_v25  ;;  %v12560_v41 = vadd.f32 -1.0, %v13372_v52  ;;  %v9055_v14 = vsel %vm13604_vm2, %v9050_v8, %v9054_v10 }
 0x3cb   : > { %v8905_v46 = vld [vmem:[#allocation3 + $0x30] sm:$0x7]  ;;  %8397 = vrot.lane.b32.xlu2 %v16553_v0, %s13456_s14  ;;  %v9231_v33 = vunpack.c.l.b16 %v9055_v14  ;;  %v9704_v14 = vld [vmem:[#allocation3 + $0x2c] sm:$0x1] }
 0x3cc   : > { %v8906_v22 = vsel %vm16354_vm4, %v16518_v38, %v8905_v46  ;;  %v13196_v43 = vld [vmem:[#allocation3 + $0x34] sm:$0xf0]  ;;  %v9064_v40 = vrot.slane %v9063_v6, 4  ;;  %v6986_v57 = vpop.f32.mrf.mxu1  ;;  %v8254_v35 = vmul.f32 1.6732632, %v12560_v41  ;;  %v8816_v13 = vshll.u32 %v8348_v23, 16 }
 0x3cd   : > { %8907 = vst [vmem:[#allocation3 + $0x30] sm:$0x7] %v8906_v22  ;;  %v8025_v38 = vpop.f32.mrf.mxu3  ;;  %v8945_v6 = vld [vmem:[#allocation3 + $0x38] sm:$0xf] }
 0x3ce   : > { %v16567_v32 = vadd.f32 %v8025_v38, %v7301_v49  ;;  %v8813_v49 = vshrl.u32 %v8348_v23, 16  ;;  %v8286_v38 = vsel %vm8094_vm8, %v16539_v45, %v8254_v35  ;;  %v501_v45 = vld [vmem:[#allocation3 + $0x3c] sm:$0x1]  ;;  %v9088_v8 = vshll.u32 %v8945_v6, 16 }
 0x3cf   : > { %v8318_v24 = vmul.f32 1.050701, %v8286_v38  ;;  %vm10378_vm8 = vcmask 780800  }
 0x3d0   : > { %v8127_v4 = vmin.f32 %v16567_v32, 0.0  ;;  %vm8095_vm3 = vcmp.gt.f32.partialorder %v16567_v32, 0.0  ;;  %v8815_v48 = vrot.slane %v8813_v49, 7  ;;  %v8625_v53 = vld [vmem:[#allocation3 + $0x50] sm:$0x7] }
 0x3d1   : > { %v8911_v5 = vld [vmem:[#allocation3 + $0x40] sm:$0x7]  ;;  %v8388_v12 = vpop.permute.xlu1 %8387 }
 0x3d2   : > { %v8912_v17 = vsel %vm16354_vm4, %v16537_v50, %v8911_v5  ;;  %8428 = vst.msk [vmem:[#allocation3 + $0x48] sm:$0x3] %vm8419_vm10, %v8388_v12  ;;  %v8187_v1 = vmul.f32 1.442695, %v8127_v4  ;;  %v8975_v50 = vld [vmem:[#allocation3 + $0x2c] sm:$0x1]  ;;  %v8818_v15 = vor.u32 %v8816_v13, %v8815_v48 }
 0x3d3   : > { %8913 = vst [vmem:[#allocation3 + $0x40] sm:$0x7] %v8912_v17  ;;  %8862 = vrot.lane.b32.xlu2 %v8811_v28, %s13456_s14  ;;  %v9066_v16 = vshll.u32 %v8975_v50, 16  ;;  %v497_v4 = vld [vmem:[#allocation3 + $0x34] sm:$0x1]  ;;  %v7270_v50 = vpop.f32.mrf.mxu2 }
 0x3d4   : > { %v12627_v61 = vld [vmem:[#allocation3 + $0x30] sm:$0xf]  ;;  %13373 = vpow2.f32 %v8187_v1  ;;  %v6988_v28 = vpop.f32.mrf.mxu1  ;;  %v498_v27 = vsel %vm15416_vm5, 0, %v497_v4  ;;  %v502_v1 = vsel %vm15416_vm5, 0, %v501_v45 }
 0x3d5   : > { %v13219_v47 = vld [vmem:[#allocation3 + $0x2c] sm:$0xf0]  ;;  %v12628_v7 = vor.u32 %v13196_v43, %v12627_v61  ;;  %v8027_v51 = vpop.f32.mrf.mxu3  ;;  %v9068_v20 = vrot.slane %v9066_v16, 5  ;;  %499 = vst [vmem:[#allocation3 + $0x34] sm:$0x1] %v498_v27 }
 0x3d6   : > { %v12704_v54 = vor.u32 %v13219_v47, %v12703_v29  ;;  %v8064_v19 = vadd.f32 %v8027_v51, %v7302_v11  ;;  %v16588_v59 = vpop.permute.xlu2 %8858  ;;  %v8944_v25 = vld [vmem:[#allocation3 + $0x30] sm:$0xf]  ;;  %v9085_v47 = vshrl.u32 %v8945_v6, 16  ;;  %v16602_v51 = vpack.c.bf16 %v8318_v24, %v8318_v24  ;;  %503 = vst [vmem:[#allocation3 + $0x3c] sm:$0x1] %v502_v1 }
 0x3d7   : > { %9475 = vmatmul.bf16.gmra.mxu1 %v12628_v7  ;;  %v9069_v36 = vsel %vm13604_vm2, %v9064_v40, %v9068_v20  ;;  %v9071_v43 = vshrl.u32 %v8944_v25, 16  ;;  %v9074_v29 = vshll.u32 %v8944_v25, 16 }
 0x3d8   : > { %9648 = vmatmul.bf16.gmra.mxu2 %v12704_v54  ;;  %v8128_v56 = vmin.f32 %v8064_v19, 0.0  ;;  %v9232_v42 = vunpack.c.l.b16 %v9069_v36  ;;  %vm8096_vm9 = vcmp.gt.f32.partialorder %v8064_v19, 0.0  ;;  %v9087_v16 = vrot.slane %v9085_v47, 4 }
 0x3d9   : > { %v9073_v52 = vrot.slane %v9071_v43, 4  ;;  %v9076_v40 = vrot.slane %v9074_v29, 5  ;;  %v12707_v29 = vld [vmem:[#allocation3 + $0x38] sm:$0xf] }
 0x3da   : > { %v13374_v60 = vpop.eup %13373  ;;  %v8189_v46 = vmul.f32 1.442695, %v8128_v56  ;;  %v9245_v26 = vpack.c.b16 %v9232_v42, %v9231_v33  ;;  %v9703_v56 = vld [vmem:[#allocation3 + $0x28] sm:$0xf]  ;;  %v9793_v33 = vshll.u32 %v9704_v14, 16 }
 0x3db   : > { %8686 = vrot.lane.b32.xlu2 %v8348_v23, %s13457_s30  ;;  %v12561_v22 = vadd.f32 -1.0, %v13374_v60  ;;  %v9090_v23 = vrot.slane %v9088_v8, 5  ;;  %v9077_v60 = vor.u32 %v9076_v40, %v9073_v52  ;;  %v9787_v36 = vshll.u32 %v9703_v56, 16  ;;  %v13220_v1 = vld [vmem:[#allocation3 + $0x3c] sm:$0xf0] }
 0x3dc   : > { %13375 = vpow2.f32 %v8189_v46  ;;  %9325 = vmatmul.bf16.gmra.mxu0 %v9245_v26  ;;  %v9705_v46 = vld [vmem:[#allocation3 + $0x30] sm:$0xf]  ;;  %v8976_v24 = vld [vmem:[#allocation3 + $0x34] sm:$0x1]  ;;  %v8531_v52 = vshll.u32 %v16553_v0, 16 }
 0x3dd   : > { %v6753_v34 = vpop.f32.mrf.mxu0  ;;  %v8255_v21 = vmul.f32 1.6732632, %v12561_v22  ;;  %v9798_v42 = vshrl.u32 %v9705_v46, 16  ;;  %v9801_v35 = vshll.u32 %v9705_v46, 16  ;;  %v9078_v26 = vrot.slane %v9077_v60, 4 }
 0x3de   : > { %v6987_v63 = vadd.f32 %v6986_v57, %v6753_v34  ;;  %v9784_v34 = vshrl.u32 %v9703_v56, 16  ;;  %v9091_v48 = vor.u32 %v9090_v23, %v9087_v16  ;;  %v8977_v45 = vld [vmem:[#allocation3 + $0x3c] sm:$0x1]  ;;  %v9707_v14 = vld [vmem:[#allocation3 + $0x38] sm:$0xf] }
 0x3df   : > { %v8287_v39 = vsel %vm8095_vm3, %v16567_v32, %v8255_v21  ;;  %v9094_v25 = vshll.u32 %v8977_v45, 16  ;;  %vm10289_vm3 = vcmask 1042176  }
 0x3e0   : > { %v8319_v3 = vmul.f32 1.050701, %v8287_v39  ;;  %v7303_v17 = vadd.f32 %v7268_v55, %v6987_v63  ;;  %v9786_v13 = vrot.slane %v9784_v34, 4  ;;  %v9789_v39 = vrot.slane %v9787_v36, 5  ;;  %v8857_v55 = vpop.permute.xlu1 %8856 }
 0x3e1   : > { %v9092_v27 = vrot.slane %v9091_v48, 4  ;;  %v9096_v47 = vrot.slane %v9094_v25, 5 }
 0x3e2   : > { %v13376_v58 = vpop.eup %13375  ;;  %v16585_v18 = vpack.c.bf16 %v8319_v3, %v8319_v3  ;;  %v9795_v3 = vrot.slane %v9793_v33, 5 }
 0x3e3   : > { %8864 = vrot.lane.b32.xlu2 %v8818_v15, %s13456_s14  ;;  %v12562_v30 = vadd.f32 -1.0, %v13376_v58  ;;  %v9800_v15 = vrot.slane %v9798_v42, 4  ;;  %v9803_v58 = vrot.slane %v9801_v35, 5  ;;  %v9097_v46 = vsel %vm13604_vm2, %v9092_v27, %v9096_v47 }
 0x3e4   : > { %8399 = vrot.lane.b32.xlu0 %v16585_v18, %s13456_s14  ;;  %v8535_v20 = vshrl.u32 %v16585_v18, 16  ;;  %v8538_v22 = vshll.u32 %v16585_v18, 16 }
 0x3e5   : > { %v6755_v62 = vpop.f32.mrf.mxu0  ;;  %v8256_v5 = vmul.f32 1.6732632, %v12562_v30  ;;  %v9706_v30 = vld [vmem:[#allocation3 + $0x34] sm:$0x1] }
 0x3e6   : > { %v8567_v32 = vpop.permute.xlu0 %8566  ;;  %v6989_v10 = vadd.f32 %v6988_v28, %v6755_v62  ;;  %v8030_v61 = vpop.f32.mrf.mxu3  ;;  %v9790_v62 = vor.u32 %v9789_v39, %v9786_v13  ;;  %v9804_v28 = vor.u32 %v9803_v58, %v9800_v15 }
 0x3e7   : > { %v8626_v12 = vsel %vm16273_vm14, %v8567_v32, %v8625_v53  ;;  %v8288_v11 = vsel %vm8096_vm9, %v8064_v19, %v8256_v5  ;;  %v16600_v54 = vadd.f32 %v8030_v61, %v7303_v17  ;;  %v8537_v32 = vrot.slane %v8535_v20, 7  ;;  %v9708_v20 = vld [vmem:[#allocation3 + $0x3c] sm:$0x1]  ;;  %vm16818_vm9 = vmand %vm10378_vm8, %vm5334_vm7 }
 0x3e8   : > { %8627 = vst [vmem:[#allocation3 + $0x50] sm:$0x7] %v8626_v12  ;;  %v8320_v7 = vmul.f32 1.050701, %v8288_v11  ;;  %v8528_v53 = vshrl.u32 %v16553_v0, 16  ;;  %v9080_v5 = vshll.u32 %v8976_v24, 16 }
 0x3e9   : > { %8720 = vst.msk [vmem:[#allocation3 + $0x50] sm:$0x3] %vm8711_vm6, %v16548_v31  ;;  %v8129_v41 = vmin.f32 %v16600_v54, 0.0  ;;  %v7304_v31 = vadd.f32 %v7270_v50, %v6989_v10  ;;  %vm8097_vm13 = vcmp.gt.f32.partialorder %v16600_v54, 0.0  ;;  %v9807_v12 = vshll.u32 %v9706_v30, 16 }
 0x3ea   : > { %v16604_v19 = vpack.c.bf16 %v8320_v7, %v8320_v7  ;;  %v9791_v17 = vrot.slane %v9790_v62, 4  ;;  %v8540_v10 = vor.u32 %v8538_v22, %v8537_v32  ;;  %v9082_v43 = vrot.slane %v9080_v5, 5  ;;  %v505_v50 = vld [vmem:[#allocation3 + $0x44] sm:$0x1]  ;;  %v9709_v0 = vld [vmem:[#allocation3 + $0x40] sm:$0xf] }
 0x3eb   : > { %v8191_v57 = vmul.f32 1.442695, %v8129_v41  ;;  %v9805_v11 = vrot.slane %v9804_v28, 4  ;;  %v8530_v61 = vrot.slane %v8528_v53, 7  ;;  %v9809_v7 = vrot.slane %v9807_v12, 5 }
 0x3ec   : > { %8690 = vrot.lane.b32.xlu2 %v16604_v19, %s13457_s30  ;;  %v9796_v8 = vsel %vm13604_vm2, %v9791_v17, %v9795_v3  ;;  %8576 = vrot.lane.b32.xlu1 %v8540_v10, %s13457_s30  ;;  %v9083_v23 = vsel %vm13604_vm2, %v9078_v26, %v9082_v43  ;;  %v9234_v22 = vunpack.c.l.b16 %v9097_v46  ;;  %v506_v35 = vsel %vm15416_vm5, 0, %v505_v50  ;;  %v8622_v32 = vld [vmem:[#allocation3 + $0x48] sm:$0x7]  ;;  %v513_v43 = vld [vmem:[#allocation3 + $0x54] sm:$0x1] }
 0x3ed   : > { %13377 = vpow2.f32 %v8191_v57  ;;  %v9972_v41 = vunpack.c.l.b16 %v9796_v8  ;;  %v9233_v34 = vunpack.c.l.b16 %v9083_v23  ;;  %v9810_v36 = vsel %vm13604_vm2, %v9805_v11, %v9809_v7  ;;  %507 = vst [vmem:[#allocation3 + $0x44] sm:$0x1] %v506_v35 }
 0x3ee   : > { %v16611_v21 = vpop.permute.xlu0 %8680  ;;  %v8032_v18 = vpop.f32.mrf.mxu3  ;;  %v9973_v57 = vunpack.c.l.b16 %v9810_v36  ;;  %v8533_v33 = vor.u32 %v8531_v52, %v8530_v61  ;;  %v9815_v26 = vshll.u32 %v9707_v14, 16  ;;  %v9821_v39 = vshll.u32 %v9708_v20, 16 }
 0x3ef   : > { %v8394_v49 = vpop.permute.xlu2 %8393  ;;  %v16618_v4 = vadd.f32 %v8032_v18, %v7304_v31  ;;  %v12708_v31 = vor.u32 %v13220_v1, %v12707_v29  ;;  %v9246_v48 = vpack.c.b16 %v9234_v22, %v9233_v34  ;;  %v9829_v58 = vshll.u32 %v9709_v0, 16  ;;  %v509_v18 = vld [vmem:[#allocation3 + $0x4c] sm:$0x1] }
 0x3f0   : > { %8431 = vst.msk [vmem:[#allocation3 + $0x60] sm:$0x3] %vm8419_vm10, %v8394_v49  ;;  %v8914_v38 = vld [vmem:[#allocation3 + $0x50] sm:$0x7]  ;;  %v9812_v49 = vshrl.u32 %v9707_v14, 16  ;;  %v9986_v13 = vpack.c.b16 %v9973_v57, %v9972_v41  ;;  %8574 = vrot.lane.b32.xlu0 %v8533_v33, %s13457_s30  ;;  %v9817_v15 = vrot.slane %v9815_v26, 5 }
 0x3f1   : > { %v8915_v63 = vsel %vm16354_vm4, %v8857_v55, %v8914_v38  ;;  %v8130_v6 = vmin.f32 %v16618_v4, 0.0  ;;  %9653 = vmatmul.bf16.gmra.mxu2 %v12708_v31  ;;  %v9826_v55 = vshrl.u32 %v9709_v0, 16  ;;  %9330 = vmatmul.bf16.gmra.mxu0 %v9246_v48  ;;  %vm8098_vm1 = vcmp.gt.f32.partialorder %v16618_v4, 0.0 }
 0x3f2   : > { %8916 = vst [vmem:[#allocation3 + $0x50] sm:$0x7] %v8915_v63  ;;  %v9814_v3 = vrot.slane %v9812_v49, 4  ;;  %10066 = vmatmul.bf16.gmra.mxu3 %v9986_v13  ;;  %v9831_v62 = vrot.slane %v9829_v58, 5  ;;  %v9823_v12 = vrot.slane %v9821_v39, 5  ;;  %v510_v25 = vsel %vm15416_vm5, 0, %v509_v18 }
 0x3f3   : > { %v13378_v40 = vpop.eup %13377  ;;  %v8193_v16 = vmul.f32 1.442695, %v8130_v6  ;;  %v9828_v24 = vrot.slane %v9826_v55, 4  ;;  %v8827_v6 = vshrl.u32 %v16604_v19, 16  ;;  %511 = vst [vmem:[#allocation3 + $0x4c] sm:$0x1] %v510_v25 }
 0x3f4   : > { %v12563_v60 = vadd.f32 -1.0, %v13378_v40  ;;  %v9818_v30 = vor.u32 %v9817_v15, %v9814_v3  ;;  %v9710_v7 = vld [vmem:[#allocation3 + $0x44] sm:$0x1]  ;;  %v514_v31 = vsel %vm15416_vm5, 0, %v513_v43  ;;  %v8823_v46 = vshll.u32 %v16602_v51, 16 }
 0x3f5   : > { %13379 = vpow2.f32 %v8193_v16  ;;  %v9832_v1 = vor.u32 %v9831_v62, %v9828_v24  ;;  %v9835_v50 = vshll.u32 %v9710_v7, 16  ;;  %515 = vst [vmem:[#allocation3 + $0x54] sm:$0x1] %v514_v31  ;;  %v8829_v48 = vrot.slane %v8827_v6, 7 }
 0x3f6   : > { %v8392_v56 = vpop.permute.xlu0 %8391  ;;  %v8257_v42 = vmul.f32 1.6732632, %v12563_v60  ;;  %v9819_v11 = vrot.slane %v9818_v30, 4  ;;  %v8830_v62 = vshll.u32 %v16604_v19, 16 }
 0x3f7   : > { %8430 = vst.msk [vmem:[#allocation3 + $0x58] sm:$0x3] %vm8419_vm10, %v8392_v56  ;;  %v8569_v28 = vpop.permute.xlu1 %8568  ;;  %v9833_v52 = vrot.slane %v9832_v1, 4  ;;  %v9837_v20 = vrot.slane %v9835_v50, 5 }
 0x3f8   : > { %v8289_v38 = vsel %vm8097_vm13, %v16600_v54, %v8257_v42  ;;  %v8820_v54 = vshrl.u32 %v16602_v51, 16  ;;  %8688 = vrot.lane.b32.xlu0 %v16602_v51, %s13457_s30  ;;  %v8832_v25 = vor.u32 %v8830_v62, %v8829_v48  ;;  %vm10437_vm13 = vcmask 517376  }
 0x3f9   : > { %v8321_v63 = vmul.f32 1.050701, %v8289_v38  ;;  %v8947_v47 = vld [vmem:[#allocation3 + $0x50] sm:$0xf]  ;;  %v9838_v0 = vsel %vm13604_vm2, %v9833_v52, %v9837_v20 }
 0x3fa   : > { %v8822_v40 = vrot.slane %v8820_v54, 7  ;;  %v9113_v56 = vshrl.u32 %v8947_v47, 16  ;;  %v9116_v60 = vshll.u32 %v8947_v47, 16  ;;  %v8978_v22 = vld [vmem:[#allocation3 + $0x4c] sm:$0x1]  ;;  %v9975_v42 = vunpack.c.l.b16 %v9838_v0 }
 0x3fb   : > { %v13380_v53 = vpop.eup %13379  ;;  %v8353_v45 = vpack.c.bf16 %v8321_v63, %v8321_v63  ;;  %v13197_v13 = vld [vmem:[#allocation3 + $0x4c] sm:$0xf0]  ;;  %v9108_v58 = vshll.u32 %v8978_v22, 16 }
 0x3fc   : > { %v12564_v17 = vadd.f32 -1.0, %v13380_v53  ;;  %v9115_v34 = vrot.slane %v9113_v56, 4  ;;  %v9118_v57 = vrot.slane %v9116_v60, 5  ;;  %v8825_v49 = vor.u32 %v8823_v46, %v8822_v40  ;;  %v12711_v1 = vld [vmem:[#allocation3 + $0x50] sm:$0xf] }
 0x3fd   : > { %8401 = vrot.lane.b32.xlu1 %v8353_v45, %s13456_s14  ;;  %v8542_v61 = vshrl.u32 %v8353_v45, 16  ;;  %v8545_v41 = vshll.u32 %v8353_v45, 16 }
 0x3fe   : > { %v8628_v5 = vld [vmem:[#allocation3 + $0x58] sm:$0x7]  ;;  %v8565_v27 = vpop.permute.xlu0 %8564  ;;  %v8258_v8 = vmul.f32 1.6732632, %v12564_v17  ;;  %v9119_v39 = vor.u32 %v9118_v57, %v9115_v34 }
 0x3ff   : > { %v8629_v10 = vsel %vm16273_vm14, %v8569_v28, %v8628_v5  ;;  %v8623_v29 = vsel %vm16273_vm14, %v8565_v27, %v8622_v32  ;;  %v8544_v16 = vrot.slane %v8542_v61, 7  ;;  %v8979_v32 = vld [vmem:[#allocation3 + $0x54] sm:$0x1]  ;;  %v8631_v5 = vld [vmem:[#allocation3 + $0x60] sm:$0x7] }
 0x400   : > { %8630 = vst [vmem:[#allocation3 + $0x58] sm:$0x7] %v8629_v10  ;;  %v8290_v23 = vsel %vm8098_vm1, %v16618_v4, %v8258_v8  ;;  %8866 = vrot.lane.b32.xlu0 %v8825_v49, %s13456_s14  ;;  %v9120_v53 = vrot.slane %v9119_v39, 4  ;;  %v9122_v54 = vshll.u32 %v8979_v32, 16  ;;  %v9110_v10 = vrot.slane %v9108_v58, 5 }
 0x401   : > { %8721 = vst.msk [vmem:[#allocation3 + $0x58] sm:$0x3] %vm8711_vm6, %v16611_v21  ;;  %v8322_v14 = vmul.f32 1.050701, %v8290_v23  ;;  %v9824_v21 = vsel %vm13604_vm2, %v9819_v11, %v9823_v12  ;;  %v8547_v4 = vor.u32 %v8545_v41, %v8544_v16  ;;  %v517_v11 = vld [vmem:[#allocation3 + $0x5c] sm:$0x1] }
 0x402   : > { %8624 = vst [vmem:[#allocation3 + $0x48] sm:$0x7] %v8623_v29  ;;  %v9974_v33 = vunpack.c.l.b16 %v9824_v21  ;;  %v9124_v19 = vrot.slane %v9122_v54, 5  ;;  %v9711_v61 = vld [vmem:[#allocation3 + $0x50] sm:$0xf]  ;;  %v518_v47 = vsel %vm15416_vm5, 0, %v517_v11 }
 0x403   : > { %v8354_v36 = vpack.c.bf16 %v8322_v14, %v8322_v14  ;;  %v9712_v8 = vld [vmem:[#allocation3 + $0x54] sm:$0x1]  ;;  %v9840_v7 = vshrl.u32 %v9711_v61, 16  ;;  %519 = vst [vmem:[#allocation3 + $0x5c] sm:$0x1] %v518_v47  ;;  %v9843_v23 = vshll.u32 %v9711_v61, 16 }
 0x404   : > { %v9987_v55 = vpack.c.b16 %v9975_v42, %v9974_v33  ;;  %v9125_v43 = vsel %vm13604_vm2, %v9120_v53, %v9124_v19  ;;  %v9849_v20 = vshll.u32 %v9712_v8, 16  ;;  %v521_v47 = vld [vmem:[#allocation3 + $0x64] sm:$0x1]  ;;  %vm10526_vm1 = vcmask 256000  }
 0x405   : > { %8578 = vrot.lane.b32.xlu1 %v8547_v4, %s13457_s30  ;;  %v8834_v26 = vshrl.u32 %v8354_v36, 16  ;;  %v8837_v38 = vshll.u32 %v8354_v36, 16  ;;  %v9236_v40 = vunpack.c.l.b16 %v9125_v43  ;;  %v9842_v31 = vrot.slane %v9840_v7, 4 }
 0x406   : > { %10071 = vmatmul.bf16.gmra.mxu3 %v9987_v55  ;;  %v9845_v21 = vrot.slane %v9843_v23, 5  ;;  %v9851_v22 = vrot.slane %v9849_v20, 5  ;;  %v525_v23 = vld [vmem:[#allocation3 + $0x6c] sm:$0x1] }
 0x407   : > { %v8836_v18 = vrot.slane %v8834_v26, 7 }
 0x408   : > { %v8917_v35 = vld [vmem:[#allocation3 + $0x58] sm:$0x7]  ;;  %8692 = vrot.lane.b32.xlu0 %v8354_v36, %s13457_s30  ;;  %v9846_v0 = vor.u32 %v9845_v21, %v9842_v31  ;;  %s13459_s30 = smov 32  }
 0x409   : > { %v8918_v51 = vsel %vm16354_vm4, %v16588_v59, %v8917_v35  ;;  %v12631_v3 = vld [vmem:[#allocation3 + $0x48] sm:$0xf]  ;;  %v8839_v45 = vor.u32 %v8837_v38, %v8836_v18 }
 0x40a   : > { %v8946_v15 = vld [vmem:[#allocation3 + $0x48] sm:$0xf]  ;;  %8919 = vst [vmem:[#allocation3 + $0x58] sm:$0x7] %v8918_v51  ;;  %v12632_v63 = vor.u32 %v13197_v13, %v12631_v3  ;;  %v9847_v4 = vrot.slane %v9846_v0, 4  ;;  %v9316_v38 = vpop.f32.mrf.mxu0 }
 0x40b   : > { %v9099_v24 = vshrl.u32 %v8946_v15, 16  ;;  %v9102_v30 = vshll.u32 %v8946_v15, 16  ;;  %8870 = vrot.lane.b32.xlu2 %v8839_v45, %s13456_s14  ;;  %v9714_v57 = vld [vmem:[#allocation3 + $0x5c] sm:$0x1]  ;;  %v9461_v15 = vpop.f32.mrf.mxu1 }
 0x40c   : > { %9480 = vmatmul.bf16.gmra.mxu1 %v12632_v63  ;;  %v9863_v42 = vshll.u32 %v9714_v57, 16  ;;  %v9852_v35 = vsel %vm13604_vm2, %v9847_v4, %v9851_v22  ;;  %v9462_v62 = vadd.f32 %v9461_v15, %v9316_v38  ;;  %v8980_v7 = vld [vmem:[#allocation3 + $0x5c] sm:$0x1] }
 0x40d   : > { %v8571_v59 = vpop.permute.xlu1 %8570  ;;  %v9101_v28 = vrot.slane %v9099_v24, 4  ;;  %v9104_v12 = vrot.slane %v9102_v30, 5  ;;  %8868 = vrot.lane.b32.xlu1 %v8832_v25, %s13456_s14  ;;  %v9976_v39 = vunpack.c.l.b16 %v9852_v35  ;;  %v9136_v22 = vshll.u32 %v8980_v7, 16  ;;  %s13458_s14 = smov 96  }
 0x40e   : > { %v8632_v27 = vsel %vm16273_vm14, %v8571_v59, %v8631_v5  ;;  %v9865_v49 = vrot.slane %v9863_v42, 5  ;;  %v8573_v26 = vpop.permute.xlu2 %8572 }
 0x40f   : > { %8633 = vst [vmem:[#allocation3 + $0x60] sm:$0x7] %v8632_v27  ;;  %v9105_v17 = vor.u32 %v9104_v12, %v9101_v28 }
 0x411   : > { %v9106_v6 = vrot.slane %v9105_v17, 4  ;;  %v13221_v29 = vld [vmem:[#allocation3 + $0x54] sm:$0xf0] }
 0x412   : > { %v12712_v52 = vor.u32 %v13221_v29, %v12711_v1  ;;  %v9713_v16 = vld [vmem:[#allocation3 + $0x58] sm:$0xf]  ;;  %v9318_v45 = vpop.f32.mrf.mxu0 }
 0x413   : > { %v9111_v50 = vsel %vm13604_vm2, %v9106_v6, %v9110_v10  ;;  %v9854_v56 = vshrl.u32 %v9713_v16, 16  ;;  %v9857_v14 = vshll.u32 %v9713_v16, 16  ;;  %v9639_v58 = vpop.f32.mrf.mxu2  ;;  %v9463_v25 = vpop.f32.mrf.mxu1  ;;  %v12635_v29 = vld [vmem:[#allocation3 + $0x58] sm:$0xf] }
 0x414   : > { %v9235_v41 = vunpack.c.l.b16 %v9111_v50  ;;  %9658 = vmatmul.bf16.gmra.mxu2 %v12712_v52  ;;  %v9679_v32 = vadd.f32 %v9639_v58, %v9462_v62  ;;  %v9464_v19 = vadd.f32 %v9463_v25, %v9318_v45  ;;  %v8948_v8 = vld [vmem:[#allocation3 + $0x58] sm:$0xf]  ;;  %v522_v50 = vsel %vm15416_vm5, 0, %v521_v47 }
 0x415   : > { %v9856_v46 = vrot.slane %v9854_v56, 4  ;;  %v9859_v34 = vrot.slane %v9857_v14, 5  ;;  %v8685_v3 = vpop.permute.xlu1 %8684  ;;  %v9130_v16 = vshll.u32 %v8948_v8, 16  ;;  %523 = vst [vmem:[#allocation3 + $0x64] sm:$0x1] %v522_v50 }
 0x416   : > { %v9247_v60 = vpack.c.b16 %v9236_v40, %v9235_v41  ;;  %v9127_v40 = vshrl.u32 %v8948_v8, 16 }
 0x417   : > { %v9860_v36 = vor.u32 %v9859_v34, %v9856_v46  ;;  %v9132_v46 = vrot.slane %v9130_v16, 5 }
 0x418   : > { %9335 = vmatmul.bf16.gmra.mxu0 %v9247_v60  ;;  %v9129_v60 = vrot.slane %v9127_v40, 4 }
 0x419   : > { %v9861_v33 = vrot.slane %v9860_v36, 4 }
 0x41a   : > { %v9133_v35 = vor.u32 %v9132_v46, %v9129_v60 }
 0x41b   : > { %v9866_v13 = vsel %vm13604_vm2, %v9861_v33, %v9865_v49  ;;  %v9641_v17 = vpop.f32.mrf.mxu2 }
 0x41c   : > { %v9977_v51 = vunpack.c.l.b16 %v9866_v13  ;;  %v9680_v43 = vadd.f32 %v9641_v17, %v9464_v19  ;;  %v9466_v14 = vpop.f32.mrf.mxu1  ;;  %v9138_v13 = vrot.slane %v9136_v22, 5  ;;  %v8981_v45 = vld [vmem:[#allocation3 + $0x64] sm:$0x1] }
 0x41d   : > { %v8861_v59 = vpop.permute.xlu1 %8860  ;;  %v9150_v25 = vshll.u32 %v8981_v45, 16 }
 0x41e   : > { %v9988_v55 = vpack.c.b16 %v9977_v51, %v9976_v39  ;;  %v526_v51 = vsel %vm15416_vm5, 0, %v525_v23 }
 0x41f   : > { %527 = vst [vmem:[#allocation3 + $0x6c] sm:$0x1] %v526_v51  ;;  %v9152_v47 = vrot.slane %v9150_v25, 5 }
 0x420   : > { %v8396_v48 = vpop.permute.xlu0 %8395  ;;  %10076 = vmatmul.bf16.gmra.mxu3 %v9988_v55 }
 0x421   : > { %8432 = vst.msk [vmem:[#allocation3 + $0x68] sm:$0x3] %vm8419_vm10, %v8396_v48 }
 0x425   : > { %v8398_v24 = vpop.permute.xlu2 %8397  ;;  %v10057_v53 = vpop.f32.mrf.mxu3 }
 0x426   : > { %8433 = vst.msk [vmem:[#allocation3 + $0x70] sm:$0x3] %vm8419_vm10, %v8398_v24  ;;  %v16689_v5 = vadd.f32 %v10057_v53, %v9679_v32  ;;  %v9718_v16 = vld [vmem:[#allocation3 + $0x6c] sm:$0x1] }
 0x427   : > { %v9891_v46 = vshll.u32 %v9718_v16, 16 }
 0x428   : > { %v8634_v18 = vld [vmem:[#allocation3 + $0x68] sm:$0x7]  ;;  %v8683_v63 = vpop.permute.xlu0 %8682  ;;  %v10129_v27 = vmin.f32 %v16689_v5, 0.0  ;;  %v9321_v52 = vpop.f32.mrf.mxu0  ;;  %vm10113_vm11 = vcmp.gt.f32.partialorder %v16689_v5, 0.0 }
 0x429   : > { %v8635_v30 = vsel %vm16273_vm14, %v8573_v26, %v8634_v18  ;;  %8722 = vst.msk [vmem:[#allocation3 + $0x60] sm:$0x3] %vm8711_vm6, %v8683_v63  ;;  %v9467_v38 = vadd.f32 %v9466_v14, %v9321_v52 }
 0x42a   : > { %8636 = vst [vmem:[#allocation3 + $0x68] sm:$0x7] %v8635_v30  ;;  %v10145_v1 = vmul.f32 1.442695, %v10129_v27  ;;  %v9644_v36 = vpop.f32.mrf.mxu2 }
 0x42b   : > { %8723 = vst.msk [vmem:[#allocation3 + $0x68] sm:$0x3] %vm8711_vm6, %v8685_v3  ;;  %v9134_v3 = vrot.slane %v9133_v35, 4  ;;  %v9681_v53 = vadd.f32 %v9644_v36, %v9467_v38 }
 0x42c   : > { %13381 = vpow2.f32 %v10145_v1 }
 0x42d   : > { %v8863_v12 = vpop.permute.xlu2 %8862  ;;  %v10059_v11 = vpop.f32.mrf.mxu3 }
 0x42e   : > { %v16696_v61 = vadd.f32 %v10059_v11, %v9680_v43  ;;  %v9468_v11 = vpop.f32.mrf.mxu1 }
 0x430   : > { %v8920_v28 = vld [vmem:[#allocation3 + $0x60] sm:$0x7]  ;;  %v10130_v41 = vmin.f32 %v16696_v61, 0.0  ;;  %vm10114_vm12 = vcmp.gt.f32.partialorder %v16696_v61, 0.0 }
 0x431   : > { %v8921_v54 = vsel %vm16354_vm4, %v8861_v59, %v8920_v28  ;;  %v9139_v59 = vsel %vm13604_vm2, %v9134_v3, %v9138_v13  ;;  %v9716_v28 = vld [vmem:[#allocation3 + $0x64] sm:$0x1] }
 0x432   : > { %8922 = vst [vmem:[#allocation3 + $0x60] sm:$0x7] %v8921_v54  ;;  %v8923_v10 = vld [vmem:[#allocation3 + $0x68] sm:$0x7]  ;;  %v13382_v34 = vpop.eup %13381  ;;  %v10147_v0 = vmul.f32 1.442695, %v10130_v41  ;;  %v9646_v50 = vpop.f32.mrf.mxu2 }
 0x433   : > { %v8924_v6 = vsel %vm16354_vm4, %v8863_v12, %v8923_v10  ;;  %v12805_v33 = vadd.f32 -1.0, %v13382_v34  ;;  %v9323_v12 = vpop.f32.mrf.mxu0 }
 0x434   : > { %8925 = vst [vmem:[#allocation3 + $0x68] sm:$0x7] %v8924_v6  ;;  %13383 = vpow2.f32 %v10147_v0  ;;  %v9469_v52 = vadd.f32 %v9468_v11, %v9323_v12 }
 0x435   : > { %v10193_v55 = vmul.f32 1.6732632, %v12805_v33  ;;  %v9893_v33 = vrot.slane %v9891_v46, 5 }
 0x436   : > { %v9682_v0 = vadd.f32 %v9646_v50, %v9469_v52  ;;  %v8637_v50 = vld [vmem:[#allocation3 + $0x70] sm:$0x7] }
 0x437   : > { %v10209_v24 = vsel %vm10113_vm11, %v16689_v5, %v10193_v55  ;;  %v9877_v5 = vshll.u32 %v9716_v28, 16  ;;  %vm16832_vm11 = vmand %vm10526_vm1, %vm5334_vm7 }
 0x438   : > { %v10225_v32 = vmul.f32 1.050701, %v10209_v24 }
 0x439   : > { %v13198_v31 = vld [vmem:[#allocation3 + $0x5c] sm:$0xf0]  ;;  %v9879_v23 = vrot.slane %v9877_v5, 5 }
 0x43a   : > { %v12715_v56 = vld [vmem:[#allocation3 + $0x60] sm:$0xf]  ;;  %v12636_v21 = vor.u32 %v13198_v31, %v12635_v29  ;;  %v13384_v19 = vpop.eup %13383  ;;  %v16707_v1 = vpack.c.bf16 %v10225_v32, %v10225_v32 }
 0x43b   : > { %v8949_v20 = vld [vmem:[#allocation3 + $0x60] sm:$0xf]  ;;  %v13222_v4 = vld [vmem:[#allocation3 + $0x64] sm:$0xf0]  ;;  %v12806_v29 = vadd.f32 -1.0, %v13384_v19 }
 0x43c   : > { %v9141_v57 = vshrl.u32 %v8949_v20, 16  ;;  %9485 = vmatmul.bf16.gmra.mxu1 %v12636_v21  ;;  %v12716_v42 = vor.u32 %v13222_v4, %v12715_v56  ;;  %v9144_v49 = vshll.u32 %v8949_v20, 16  ;;  %v9715_v26 = vld [vmem:[#allocation3 + $0x60] sm:$0xf]  ;;  %v9717_v48 = vld [vmem:[#allocation3 + $0x68] sm:$0xf]  ;;  %10265 = vrot.lane.b32.xlu0 %v16707_v1, %s13458_s14  ;;  %v9237_v20 = vunpack.c.l.b16 %v9139_v59 }
 0x43d   : > { %v9868_v58 = vshrl.u32 %v9715_v26, 16  ;;  %v9871_v18 = vshll.u32 %v9715_v26, 16  ;;  %v9882_v63 = vshrl.u32 %v9717_v48, 16  ;;  %v9885_v62 = vshll.u32 %v9717_v48, 16  ;;  %v10062_v54 = vpop.f32.mrf.mxu3 }
 0x43e   : > { %v9143_v39 = vrot.slane %v9141_v57, 4  ;;  %9663 = vmatmul.bf16.gmra.mxu2 %v12716_v42  ;;  %v9146_v15 = vrot.slane %v9144_v49, 5  ;;  %v10099_v6 = vadd.f32 %v10062_v54, %v9681_v53  ;;  %v10194_v41 = vmul.f32 1.6732632, %v12806_v29 }
 0x43f   : > { %v9870_v17 = vrot.slane %v9868_v58, 4  ;;  %v9873_v10 = vrot.slane %v9871_v18, 5  ;;  %v9884_v43 = vrot.slane %v9882_v63, 4  ;;  %v9887_v7 = vrot.slane %v9885_v62, 5 }
 0x440   : > { %v9147_v30 = vor.u32 %v9146_v15, %v9143_v39  ;;  %v10131_v40 = vmin.f32 %v10099_v6, 0.0  ;;  %v10210_v34 = vsel %vm10114_vm12, %v16696_v61, %v10194_v41  ;;  %vm10115_vm15 = vcmp.gt.f32.partialorder %v10099_v6, 0.0 }
 0x441   : > { %v9874_v8 = vor.u32 %v9873_v10, %v9870_v17  ;;  %v9888_v14 = vor.u32 %v9887_v7, %v9884_v43  ;;  %v10226_v22 = vmul.f32 1.050701, %v10210_v34 }
 0x442   : > { %v9148_v27 = vrot.slane %v9147_v30, 4  ;;  %v10149_v21 = vmul.f32 1.442695, %v10131_v40 }
 0x443   : > { %v9875_v56 = vrot.slane %v9874_v8, 4  ;;  %v9889_v4 = vrot.slane %v9888_v14, 4  ;;  %v10242_v35 = vpack.c.bf16 %v10226_v22, %v10226_v22 }
 0x444   : > { %v9153_v31 = vsel %vm13604_vm2, %v9148_v27, %v9152_v47  ;;  %13385 = vpow2.f32 %v10149_v21  ;;  %v8687_v47 = vpop.permute.xlu2 %8686  ;;  %v9471_v40 = vpop.f32.mrf.mxu1 }
 0x445   : > { %v9238_v60 = vunpack.c.l.b16 %v9153_v31  ;;  %v9880_v36 = vsel %vm13604_vm2, %v9875_v56, %v9879_v23  ;;  %v10064_v42 = vpop.f32.mrf.mxu3  ;;  %v9894_v49 = vsel %vm13604_vm2, %v9889_v4, %v9893_v33  ;;  %10412 = vrot.lane.b32.xlu1 %v10242_v35, %s13459_s30  ;;  %v10447_v39 = vshrl.u32 %v10242_v35, 16 }
 0x446   : > { %v10100_v26 = vadd.f32 %v10064_v42, %v9682_v0  ;;  %v9978_v48 = vunpack.c.l.b16 %v9880_v36  ;;  %v9979_v13 = vunpack.c.l.b16 %v9894_v49  ;;  %v10450_v15 = vshll.u32 %v10242_v35, 16 }
 0x447   : > { %v9248_v57 = vpack.c.b16 %v9238_v60, %v9237_v20  ;;  %v10449_v3 = vrot.slane %v10447_v39, 7 }
 0x448   : > { %v10132_v61 = vmin.f32 %v10100_v26, 0.0  ;;  %v9989_v51 = vpack.c.b16 %v9979_v13, %v9978_v48  ;;  %vm10116_vm0 = vcmp.gt.f32.partialorder %v10100_v26, 0.0  ;;  %v12639_v48 = vld [vmem:[#allocation3 + $0x68] sm:$0xf] }
 0x449   : > { %9340 = vmatmul.bf16.gmra.mxu0 %v9248_v57  ;;  %v10452_v18 = vor.u32 %v10450_v15, %v10449_v3 }
 0x44a   : > { %v13386_v55 = vpop.eup %13385  ;;  %v10151_v38 = vmul.f32 1.442695, %v10132_v61  ;;  %10081 = vmatmul.bf16.gmra.mxu3 %v9989_v51 }
 0x44b   : > { %v12807_v58 = vadd.f32 -1.0, %v13386_v55  ;;  %10502 = vrot.lane.b32.xlu2 %v10452_v18, %s13458_s14 }
 0x44c   : > { %13387 = vpow2.f32 %v10151_v38  ;;  %v8865_v41 = vpop.permute.xlu2 %8864  ;;  %v9473_v20 = vpop.f32.mrf.mxu1 }
 0x44d   : > { %v10195_v63 = vmul.f32 1.6732632, %v12807_v58 }
 0x44f   : > { %v10211_v24 = vsel %vm10115_vm15, %v10099_v6, %v10195_v63 }
 0x450   : > { %v10227_v30 = vmul.f32 1.050701, %v10211_v24  ;;  %v529_v24 = vld [vmem:[#allocation3 + $0x74] sm:$0x1] }
 0x452   : > { %v13388_v62 = vpop.eup %13387  ;;  %v10243_v32 = vpack.c.bf16 %v10227_v30, %v10227_v30 }
 0x453   : > { %v12808_v53 = vadd.f32 -1.0, %v13388_v62 }
 0x454   : > { %10267 = vrot.lane.b32.xlu0 %v10243_v32, %s13458_s14  ;;  %v10306_v45 = vshrl.u32 %v10243_v32, 16  ;;  %v10309_v54 = vshll.u32 %v10243_v32, 16  ;;  %v8691_v4 = vpop.permute.xlu2 %8690  ;;  %v9476_v39 = vpop.f32.mrf.mxu1  ;;  %v530_v32 = vsel %vm15416_vm5, 0, %v529_v24 }
 0x455   : > { %v10196_v59 = vmul.f32 1.6732632, %v12808_v53  ;;  %531 = vst [vmem:[#allocation3 + $0x74] sm:$0x1] %v530_v32 }
 0x456   : > { %v8400_v28 = vpop.permute.xlu0 %8399  ;;  %v10308_v12 = vrot.slane %v10306_v45, 7 }
 0x457   : > { %8434 = vst.msk [vmem:[#allocation3 + $0x78] sm:$0x3] %vm8419_vm10, %v8400_v28  ;;  %v10212_v27 = vsel %vm10116_vm0, %v10100_v26, %v10196_v59  ;;  %v8950_v59 = vld [vmem:[#allocation3 + $0x68] sm:$0xf] }
 0x458   : > { %v10228_v25 = vmul.f32 1.050701, %v10212_v27  ;;  %v10311_v17 = vor.u32 %v10309_v54, %v10308_v12  ;;  %v8982_v54 = vld [vmem:[#allocation3 + $0x6c] sm:$0x1]  ;;  %v9155_v27 = vshrl.u32 %v8950_v59, 16 }
 0x459   : > { %v9326_v7 = vpop.f32.mrf.mxu0 }
 0x45a   : > { %v10244_v10 = vpack.c.bf16 %v10228_v25, %v10228_v25  ;;  %10356 = vrot.lane.b32.xlu2 %v10311_v17, %s13459_s30  ;;  %v9472_v22 = vadd.f32 %v9471_v40, %v9326_v7  ;;  %v9158_v25 = vshll.u32 %v8950_v59, 16 }
 0x45b   : > { %v9649_v23 = vpop.f32.mrf.mxu2 }
 0x45c   : > { %v10454_v19 = vshrl.u32 %v10244_v10, 16  ;;  %v10457_v5 = vshll.u32 %v10244_v10, 16  ;;  %v9683_v35 = vadd.f32 %v9649_v23, %v9472_v22  ;;  %v9478_v7 = vpop.f32.mrf.mxu1 }
 0x45e   : > { %v10456_v6 = vrot.slane %v10454_v19, 7  ;;  %v8640_v11 = vld [vmem:[#allocation3 + $0x78] sm:$0x7]  ;;  %v8577_v29 = vpop.permute.xlu1 %8576 }
 0x45f   : > { %v8641_v8 = vsel %vm16273_vm14, %v8577_v29, %v8640_v11  ;;  %v9160_v11 = vrot.slane %v9158_v25, 5 }
 0x460   : > { %v10459_v43 = vor.u32 %v10457_v5, %v10456_v6  ;;  %8642 = vst [vmem:[#allocation3 + $0x78] sm:$0x7] %v8641_v8 }
 0x461   : > { %v9328_v14 = vpop.f32.mrf.mxu0 }
 0x462   : > { %10414 = vrot.lane.b32.xlu2 %v10244_v10, %s13459_s30  ;;  %10504 = vrot.lane.b32.xlu0 %v10459_v43, %s13458_s14  ;;  %v8575_v52 = vpop.permute.xlu0 %8574  ;;  %v9474_v3 = vadd.f32 %v9473_v20, %v9328_v14  ;;  %v9164_v10 = vshll.u32 %v8982_v54, 16  ;;  %v9157_v43 = vrot.slane %v9155_v27, 4  ;;  %v533_v20 = vld [vmem:[#allocation3 + $0x7c] sm:$0x1] }
 0x463   : > { %v8638_v16 = vsel %vm16273_vm14, %v8575_v52, %v8637_v50  ;;  %v9651_v46 = vpop.f32.mrf.mxu2 }
 0x464   : > { %8639 = vst [vmem:[#allocation3 + $0x70] sm:$0x7] %v8638_v16  ;;  %v9684_v53 = vadd.f32 %v9651_v46, %v9474_v3  ;;  %v9161_v50 = vor.u32 %v9160_v11, %v9157_v43  ;;  %v9166_v40 = vrot.slane %v9164_v10, 5 }
 0x465   : > { %8724 = vst.msk [vmem:[#allocation3 + $0x70] sm:$0x3] %vm8711_vm6, %v8687_v47 }
 0x46a   : > { %v8689_v56 = vpop.permute.xlu0 %8688 }
 0x46b   : > { %8725 = vst.msk [vmem:[#allocation3 + $0x78] sm:$0x3] %vm8711_vm6, %v8689_v56 }
 0x46c   : > { %v8926_v21 = vld [vmem:[#allocation3 + $0x70] sm:$0x7] }
 0x46d   : > { %v8927_v60 = vsel %vm16354_vm4, %v8865_v41, %v8926_v21  ;;  %v8871_v41 = vpop.permute.xlu2 %8870 }
 0x46e   : > { %8928 = vst [vmem:[#allocation3 + $0x70] sm:$0x7] %v8927_v60  ;;  %v9331_v49 = vpop.f32.mrf.mxu0 }
 0x46f   : > { %v8402_v31 = vpop.permute.xlu1 %8401  ;;  %v9477_v29 = vadd.f32 %v9476_v39, %v9331_v49 }
 0x470   : > { %8435 = vst.msk [vmem:[#allocation3 + $0x80] sm:$0x3] %vm8419_vm10, %v8402_v31 }
 0x472   : > { %v8867_v57 = vpop.permute.xlu0 %8866  ;;  %v8929_v33 = vld [vmem:[#allocation3 + $0x78] sm:$0x7] }
 0x473   : > { %v8930_v42 = vsel %vm16354_vm4, %v8867_v57, %v8929_v33  ;;  %v8983_v57 = vld [vmem:[#allocation3 + $0x74] sm:$0x1]  ;;  %v534_v33 = vsel %vm15416_vm5, 0, %v533_v20 }
 0x474   : > { %8931 = vst [vmem:[#allocation3 + $0x78] sm:$0x7] %v8930_v42  ;;  %v9654_v51 = vpop.f32.mrf.mxu2  ;;  %v9178_v9 = vshll.u32 %v8983_v57, 16 }
 0x475   : > { %v10067_v26 = vpop.f32.mrf.mxu3  ;;  %v13199_v13 = vld [vmem:[#allocation3 + $0x6c] sm:$0xf0]  ;;  %v9685_v56 = vadd.f32 %v9654_v51, %v9477_v29  ;;  %535 = vst [vmem:[#allocation3 + $0x7c] sm:$0x1] %v534_v33 }
 0x476   : > { %v16742_v61 = vadd.f32 %v10067_v26, %v9683_v35  ;;  %v12640_v2 = vor.u32 %v13199_v13, %v12639_v48  ;;  %v12719_v38 = vld [vmem:[#allocation3 + $0x70] sm:$0xf]  ;;  %v9333_v5 = vpop.f32.mrf.mxu0 }
 0x477   : > { %v8643_v34 = vld [vmem:[#allocation3 + $0x80] sm:$0x7]  ;;  %v8579_v0 = vpop.permute.xlu1 %8578  ;;  %v8951_v28 = vld [vmem:[#allocation3 + $0x70] sm:$0xf]  ;;  %v9479_v31 = vadd.f32 %v9478_v7, %v9333_v5  ;;  %v10299_v5 = vshrl.u32 %v16707_v1, 16 }
 0x478   : > { %v8644_v36 = vsel %vm16273_vm14, %v8579_v0, %v8643_v34  ;;  %v10133_v55 = vmin.f32 %v16742_v61, 0.0  ;;  %9490 = vmatmul.bf16.gmra.mxu1 %v12640_v2  ;;  %v9169_v19 = vshrl.u32 %v8951_v28, 16  ;;  %v9172_v6 = vshll.u32 %v8951_v28, 16  ;;  %v9720_v2 = vld [vmem:[#allocation3 + $0x74] sm:$0x1] }
 0x479   : > { %8645 = vst [vmem:[#allocation3 + $0x80] sm:$0x7] %v8644_v36  ;;  %vm10117_vm10 = vcmp.gt.f32.partialorder %v16742_v61, 0.0  ;;  %v9162_v34 = vrot.slane %v9161_v50, 4  ;;  %v9719_v36 = vld [vmem:[#allocation3 + $0x70] sm:$0xf] }
 0x47a   : > { %8726 = vst.msk [vmem:[#allocation3 + $0x80] sm:$0x3] %vm8711_vm6, %v8691_v4  ;;  %v10153_v15 = vmul.f32 1.442695, %v10133_v55  ;;  %v8693_v58 = vpop.permute.xlu0 %8692  ;;  %v9171_v8 = vrot.slane %v9169_v19, 4  ;;  %v9174_v16 = vrot.slane %v9172_v6, 5 }
 0x47b   : > { %8727 = vst.msk [vmem:[#allocation3 + $0x88] sm:$0x3] %vm8711_vm6, %v8693_v58  ;;  %v13223_v62 = vld [vmem:[#allocation3 + $0x74] sm:$0xf0]  ;;  %v9896_v42 = vshrl.u32 %v9719_v36, 16  ;;  %v9167_v26 = vsel %vm13604_vm2, %v9162_v34, %v9166_v40  ;;  %v9899_v51 = vshll.u32 %v9719_v36, 16 }
 0x47c   : > { %13389 = vpow2.f32 %v10153_v15  ;;  %v12720_v45 = vor.u32 %v13223_v62, %v12719_v38  ;;  %v9656_v52 = vpop.f32.mrf.mxu2  ;;  %v9175_v0 = vor.u32 %v9174_v16, %v9171_v8  ;;  %v9721_v4 = vld [vmem:[#allocation3 + $0x78] sm:$0xf]  ;;  %v9180_v38 = vrot.slane %v9178_v9, 5  ;;  %v9722_v11 = vld [vmem:[#allocation3 + $0x7c] sm:$0x1] }
 0x47d   : > { %v10069_v12 = vpop.f32.mrf.mxu3  ;;  %v9686_v22 = vadd.f32 %v9656_v52, %v9479_v31  ;;  %v9898_v39 = vrot.slane %v9896_v42, 4  ;;  %v9905_v3 = vshll.u32 %v9720_v2, 16  ;;  %v9910_v15 = vshrl.u32 %v9721_v4, 16  ;;  %v12643_v27 = vld [vmem:[#allocation3 + $0x78] sm:$0xf] }
 0x47e   : > { %v16750_v17 = vadd.f32 %v10069_v12, %v9684_v53  ;;  %9668 = vmatmul.bf16.gmra.mxu2 %v12720_v45  ;;  %v9176_v48 = vrot.slane %v9175_v0, 4  ;;  %v9901_v24 = vrot.slane %v9899_v51, 5  ;;  %v9913_v45 = vshll.u32 %v9721_v4, 16  ;;  %v8984_v57 = vld [vmem:[#allocation3 + $0x7c] sm:$0x1] }
 0x47f   : > { %v8869_v63 = vpop.permute.xlu1 %8868  ;;  %v9907_v32 = vrot.slane %v9905_v3, 5  ;;  %v9912_v53 = vrot.slane %v9910_v15, 4  ;;  %v9919_v50 = vshll.u32 %v9722_v11, 16  ;;  %v10301_v42 = vrot.slane %v10299_v5, 7 }
 0x480   : > { %v10134_v47 = vmin.f32 %v16750_v17, 0.0  ;;  %vm10118_vm14 = vcmp.gt.f32.partialorder %v16750_v17, 0.0  ;;  %v9181_v62 = vsel %vm13604_vm2, %v9176_v48, %v9180_v38  ;;  %v9915_v10 = vrot.slane %v9913_v45, 5 }
 0x481   : > { %v8932_v18 = vld [vmem:[#allocation3 + $0x80] sm:$0x7]  ;;  %v9240_v54 = vunpack.c.l.b16 %v9181_v62  ;;  %v9192_v3 = vshll.u32 %v8984_v57, 16 }
 0x482   : > { %v8933_v30 = vsel %vm16354_vm4, %v8869_v63, %v8932_v18  ;;  %v13390_v23 = vpop.eup %13389  ;;  %v10155_v14 = vmul.f32 1.442695, %v10134_v47  ;;  %v8935_v21 = vld [vmem:[#allocation3 + $0x88] sm:$0x7]  ;;  %v9239_v63 = vunpack.c.l.b16 %v9167_v26  ;;  %v9916_v52 = vor.u32 %v9915_v10, %v9912_v53 }
 0x483   : > { %8934 = vst [vmem:[#allocation3 + $0x80] sm:$0x7] %v8933_v30  ;;  %v12809_v60 = vadd.f32 -1.0, %v13390_v23  ;;  %v8936_v46 = vsel %vm16354_vm4, %v8871_v41, %v8935_v21  ;;  %v9194_v53 = vrot.slane %v9192_v3, 5 }
 0x484   : > { %13391 = vpow2.f32 %v10155_v14  ;;  %8937 = vst [vmem:[#allocation3 + $0x88] sm:$0x7] %v8936_v46  ;;  %v9249_v43 = vpack.c.b16 %v9240_v54, %v9239_v63  ;;  %v537_v14 = vld [vmem:[#allocation3 + $0x84] sm:$0x1]  ;;  %v9917_v20 = vrot.slane %v9916_v52, 4 }
 0x485   : > { %v10197_v35 = vmul.f32 1.6732632, %v12809_v60  ;;  %v9921_v60 = vrot.slane %v9919_v50, 5  ;;  %v8952_v46 = vld [vmem:[#allocation3 + $0x78] sm:$0xf] }
 0x486   : > { %9345 = vmatmul.bf16.gmra.mxu0 %v9249_v43  ;;  %v9186_v38 = vshll.u32 %v8952_v46, 16 }
 0x487   : > { %v10213_v55 = vsel %vm10117_vm10, %v16742_v61, %v10197_v35  ;;  %v9902_v61 = vor.u32 %v9901_v24, %v9898_v39  ;;  %v9922_v33 = vsel %vm13604_vm2, %v9917_v20, %v9921_v60  ;;  %v10302_v35 = vshll.u32 %v16707_v1, 16 }
 0x488   : > { %v10229_v58 = vmul.f32 1.050701, %v10213_v55  ;;  %v9981_v2 = vunpack.c.l.b16 %v9922_v33  ;;  %v9183_v39 = vshrl.u32 %v8952_v46, 16 }
 0x489   : > { %v10072_v49 = vpop.f32.mrf.mxu3  ;;  %v9903_v29 = vrot.slane %v9902_v61, 4  ;;  %v10304_v55 = vor.u32 %v10302_v35, %v10301_v42  ;;  %v9481_v62 = vpop.f32.mrf.mxu1 }
 0x48a   : > { %v16761_v13 = vadd.f32 %v10072_v49, %v9685_v56  ;;  %v13200_v30 = vld [vmem:[#allocation3 + $0x7c] sm:$0xf0]  ;;  %v13392_v59 = vpop.eup %13391  ;;  %v10245_v28 = vpack.c.bf16 %v10229_v58, %v10229_v58  ;;  %v541_v49 = vld [vmem:[#allocation3 + $0x8c] sm:$0x1] }
 0x48b   : > { %v12810_v25 = vadd.f32 -1.0, %v13392_v59  ;;  %v12644_v19 = vor.u32 %v13200_v30, %v12643_v27  ;;  %v13224_v6 = vld [vmem:[#allocation3 + $0x84] sm:$0xf0]  ;;  %v12723_v16 = vld [vmem:[#allocation3 + $0x80] sm:$0xf]  ;;  %v9908_v41 = vsel %vm13604_vm2, %v9903_v29, %v9907_v32  ;;  %v9188_v32 = vrot.slane %v9186_v38, 5 }
 0x48c   : > { %v10135_v18 = vmin.f32 %v16761_v13, 0.0  ;;  %10269 = vrot.lane.b32.xlu1 %v10245_v28, %s13458_s14  ;;  %v10313_v47 = vshrl.u32 %v10245_v28, 16  ;;  %v10316_v40 = vshll.u32 %v10245_v28, 16  ;;  %vm10119_vm6 = vcmp.gt.f32.partialorder %v16761_v13, 0.0  ;;  %v8953_v34 = vld [vmem:[#allocation3 + $0x80] sm:$0xf] }
 0x48d   : > { %v10198_v8 = vmul.f32 1.6732632, %v12810_v25  ;;  %9495 = vmatmul.bf16.gmra.mxu1 %v12644_v19  ;;  %v12724_v56 = vor.u32 %v13224_v6, %v12723_v16  ;;  %v9980_v4 = vunpack.c.l.b16 %v9908_v41  ;;  %v9723_v58 = vld [vmem:[#allocation3 + $0x80] sm:$0xf]  ;;  %v9197_v63 = vshrl.u32 %v8953_v34, 16 }
 0x48e   : > { %v10157_v12 = vmul.f32 1.442695, %v10135_v18  ;;  %v10315_v31 = vrot.slane %v10313_v47, 7  ;;  %v9185_v18 = vrot.slane %v9183_v39, 4  ;;  %v9725_v24 = vld [vmem:[#allocation3 + $0x88] sm:$0xf] }
 0x48f   : > { %v10214_v21 = vsel %vm10118_vm14, %v16750_v17, %v10198_v8  ;;  %9673 = vmatmul.bf16.gmra.mxu2 %v12724_v56  ;;  %v538_v17 = vsel %vm15416_vm5, 0, %v537_v14  ;;  %v9990_v1 = vpack.c.b16 %v9981_v2, %v9980_v4  ;;  %v9200_v45 = vshll.u32 %v8953_v34, 16 }
 0x490   : > { %13393 = vpow2.f32 %v10157_v12  ;;  %v10230_v0 = vmul.f32 1.050701, %v10214_v21  ;;  %539 = vst [vmem:[#allocation3 + $0x84] sm:$0x1] %v538_v17  ;;  %v9199_v59 = vrot.slane %v9197_v63, 4  ;;  %v542_v12 = vsel %vm15416_vm5, 0, %v541_v49 }
 0x491   : > { %v10074_v7 = vpop.f32.mrf.mxu3  ;;  %10086 = vmatmul.bf16.gmra.mxu3 %v9990_v1  ;;  %v9924_v54 = vshrl.u32 %v9723_v58, 16  ;;  %v9189_v25 = vor.u32 %v9188_v32, %v9185_v18  ;;  %v9202_v10 = vrot.slane %v9200_v45, 5  ;;  %543 = vst [vmem:[#allocation3 + $0x8c] sm:$0x1] %v542_v12  ;;  %v9927_v19 = vshll.u32 %v9723_v58, 16 }
 0x492   : > { %v16772_v23 = vadd.f32 %v10074_v7, %v9686_v22  ;;  %v10318_v22 = vor.u32 %v10316_v40, %v10315_v31  ;;  %v16785_v48 = vpack.c.bf16 %v10230_v0, %v10230_v0  ;;  %v9938_v43 = vshrl.u32 %v9725_v24, 16 }
 0x493   : > { %v9926_v5 = vrot.slane %v9924_v54, 4  ;;  %v9941_v11 = vshll.u32 %v9725_v24, 16  ;;  %v9190_v47 = vrot.slane %v9189_v25, 4  ;;  %v9203_v8 = vor.u32 %v9202_v10, %v9199_v59 }
 0x494   : > { %v10136_v36 = vmin.f32 %v16772_v23, 0.0  ;;  %10358 = vrot.lane.b32.xlu0 %v10318_v22, %s13459_s30  ;;  %10354 = vrot.lane.b32.xlu1 %v10304_v55, %s13459_s30  ;;  %v9929_v52 = vrot.slane %v9927_v19, 5  ;;  %v9940_v31 = vrot.slane %v9938_v43, 4  ;;  %vm10120_vm4 = vcmp.gt.f32.partialorder %v16772_v23, 0.0 }
 0x495   : > { %v9336_v15 = vpop.f32.mrf.mxu0  ;;  %v9195_v14 = vsel %vm13604_vm2, %v9190_v47, %v9194_v53  ;;  %v9204_v21 = vrot.slane %v9203_v8, 4  ;;  %v9943_v46 = vrot.slane %v9941_v11, 5  ;;  %v10461_v35 = vshrl.u32 %v16785_v48, 16 }
 0x496   : > { %v13394_v26 = vpop.eup %13393  ;;  %v10159_v9 = vmul.f32 1.442695, %v10136_v36  ;;  %v9482_v28 = vadd.f32 %v9481_v62, %v9336_v15  ;;  %v9930_v20 = vor.u32 %v9929_v52, %v9926_v5  ;;  %v9241_v57 = vunpack.c.l.b16 %v9195_v14 }
 0x497   : > { %v12811_v51 = vadd.f32 -1.0, %v13394_v26  ;;  %v9659_v61 = vpop.f32.mrf.mxu2  ;;  %v8985_v29 = vld [vmem:[#allocation3 + $0x84] sm:$0x1]  ;;  %v9944_v42 = vor.u32 %v9943_v46, %v9940_v31  ;;  %v10464_v38 = vshll.u32 %v16785_v48, 16  ;;  %v10463_v1 = vrot.slane %v10461_v35, 7 }
 0x498   : > { %13395 = vpow2.f32 %v10159_v9  ;;  %v9724_v7 = vld [vmem:[#allocation3 + $0x84] sm:$0x1]  ;;  %v9687_v50 = vadd.f32 %v9659_v61, %v9482_v28  ;;  %v9931_v0 = vrot.slane %v9930_v20, 4  ;;  %v9726_v33 = vld [vmem:[#allocation3 + $0x8c] sm:$0x1]  ;;  %v9483_v61 = vpop.f32.mrf.mxu1 }
 0x499   : > { %v10199_v30 = vmul.f32 1.6732632, %v12811_v51  ;;  %v9933_v41 = vshll.u32 %v9724_v7, 16  ;;  %v9947_v26 = vshll.u32 %v9726_v33, 16  ;;  %v9945_v51 = vrot.slane %v9944_v42, 4  ;;  %v13250_v42 = vld [vmem:[%s17206_s4 + $0x28] sm:$0xff] }
 0x49b   : > { %v10215_v27 = vsel %vm10119_vm6, %v16761_v13, %v10199_v30  ;;  %v9206_v13 = vshll.u32 %v8985_v29, 16  ;;  %v9935_v36 = vrot.slane %v9933_v41, 5  ;;  %v9949_v58 = vrot.slane %v9947_v26, 5 }
 0x49c   : > { %v10231_v6 = vmul.f32 1.050701, %v10215_v27  ;;  %10416 = vrot.lane.b32.xlu0 %v16785_v48, %s13459_s30  ;;  %v10466_v30 = vor.u32 %v10464_v38, %v10463_v1  ;;  %v13249_v38 = vld [vmem:[%s17206_s4 + $0x20] sm:$0xff]  ;;  %v13271_v1 = vld [vmem:[%s17206_s4 + $0xb0] sm:$0xff] }
 0x49d   : > { %v9208_v60 = vrot.slane %v9206_v13, 5  ;;  %v9936_v15 = vsel %vm13604_vm2, %v9931_v0, %v9935_v36  ;;  %v9338_v54 = vpop.f32.mrf.mxu0 }
 0x49e   : > { %v13396_v40 = vpop.eup %13395  ;;  %v10247_v16 = vpack.c.bf16 %v10231_v6, %v10231_v6  ;;  %v9982_v62 = vunpack.c.l.b16 %v9936_v15  ;;  %v9484_v25 = vadd.f32 %v9483_v61, %v9338_v54  ;;  %v13279_v54 = vld [vmem:[%s17206_s4 + $0xf0] sm:$0xff] }
 0x49f   : > { %v12812_v56 = vadd.f32 -1.0, %v13396_v40  ;;  %v9209_v22 = vsel %vm13604_vm2, %v9204_v21, %v9208_v60  ;;  %v9661_v27 = vpop.f32.mrf.mxu2  ;;  %v13252_v40 = vld [vmem:[%s17206_s4 + $0x38] sm:$0xff]  ;;  %v13251_v21 = vld [vmem:[%s17206_s4 + $0x30] sm:$0xff] }
 0x4a0   : > { %10271 = vrot.lane.b32.xlu1 %v10247_v16, %s13458_s14  ;;  %v10320_v4 = vshrl.u32 %v10247_v16, 16  ;;  %v9242_v49 = vunpack.c.l.b16 %v9209_v22  ;;  %v10323_v9 = vshll.u32 %v10247_v16, 16  ;;  %v9688_v19 = vadd.f32 %v9661_v27, %v9484_v25  ;;  %10878 = vmatpush.bf16.msrb.mxu1 %v13252_v40 }
 0x4a1   : > { %v10200_v34 = vmul.f32 1.6732632, %v12812_v56 }
 0x4a2   : > { %v10322_v55 = vrot.slane %v10320_v4, 7  ;;  %v9250_v3 = vpack.c.b16 %v9242_v49, %v9241_v57 }
 0x4a3   : > { %v10216_v17 = vsel %vm10120_vm4, %v16772_v23, %v10200_v34  ;;  %v10077_v2 = vpop.f32.mrf.mxu3  ;;  %v9950_v23 = vsel %vm13604_vm2, %v9945_v51, %v9949_v58  ;;  %v13272_v51 = vld [vmem:[%s17206_s4 + $0xb8] sm:$0xff] }
 0x4a4   : > { %v10232_v39 = vmul.f32 1.050701, %v10216_v17  ;;  %v10325_v63 = vor.u32 %v10323_v9, %v10322_v55  ;;  %v16807_v24 = vadd.f32 %v10077_v2, %v9687_v50  ;;  %9350 = vmatmul.bf16.gmra.mxu0 %v9250_v3  ;;  %v9983_v32 = vunpack.c.l.b16 %v9950_v23  ;;  %10879 = vmatpush.bf16.msrb.mxu1 %v13251_v21  ;;  %v13260_v55 = vld [vmem:[%s17206_s4 + $0x78] sm:$0xff] }
 0x4a5   : > { %v10503_v6 = vpop.permute.xlu2 %10502  ;;  %11004 = vmatpush.bf16.msrb.mxu2 %v13272_v51  ;;  %10777 = vmatpush.bf16.msrb.mxu0 %v13260_v55 }
 0x4a6   : > { %v10248_v18 = vpack.c.bf16 %v10232_v39, %v10232_v39  ;;  %10360 = vrot.lane.b32.xlu2 %v10325_v63, %s13459_s30  ;;  %v9991_v53 = vpack.c.b16 %v9983_v32, %v9982_v62  ;;  %v13248_v63 = vld [vmem:[%s17206_s4 + $0x18] sm:$0xff]  ;;  %v13270_v62 = vld [vmem:[%s17206_s4 + $0xa8] sm:$0xff]  ;;  %vm10121_vm15 = vcmp.gt.f32.partialorder %v16807_v24, 0.0 }
 0x4a7   : > { %v13258_v32 = vld [vmem:[%s17206_s4 + $0x68] sm:$0xff] }
 0x4a8   : > { %v10468_v48 = vshrl.u32 %v10248_v18, 16  ;;  %10506 = vrot.lane.b32.xlu1 %v10466_v30, %s13458_s14  ;;  %v10471_v59 = vshll.u32 %v10248_v18, 16  ;;  %10091 = vmatmul.bf16.gmra.mxu3 %v9991_v53  ;;  %v13280_v53 = vld [vmem:[%s17206_s4 + $0xf8] sm:$0xff] }
 0x4a9   : > { %10880 = vmatpush.bf16.msrb.mxu1 %v13250_v42  ;;  %11005 = vmatpush.bf16.msrb.mxu2 %v13271_v1  ;;  %v13277_v42 = vld [vmem:[%s17206_s4 + $0xe0] sm:$0xff] }
 0x4aa   : > { %v10470_v45 = vrot.slane %v10468_v48, 7  ;;  %v13247_v48 = vld [vmem:[%s17206_s4 + $0x10] sm:$0xff]  ;;  %11250 = vmatpush.bf16.msrb.mxu3 %v13280_v53  ;;  %v13265_v1 = vld [vmem:[%s17206_s4 + $0x80] sm:$0xff] }
 0x4ab   : > { %v10079_v10 = vpop.f32.mrf.mxu3  ;;  %v545_v53 = vld [vmem:[#allocation4 + $0x4] sm:$0x1] }
 0x4ac   : > { %v10473_v28 = vor.u32 %v10471_v59, %v10470_v45  ;;  %v10106_v11 = vadd.f32 %v10079_v10, %v9688_v19  ;;  %v13269_v59 = vld [vmem:[%s17206_s4 + $0xa0] sm:$0xff]  ;;  %v13268_v10 = vld [vmem:[%s17206_s4 + $0x98] sm:$0xff] }
 0x4ad   : > { %10881 = vmatpush.bf16.msrb.mxu1 %v13249_v38  ;;  %11006 = vmatpush.bf16.msrb.mxu2 %v13270_v62  ;;  %v13256_v19 = vld [vmem:[%s17206_s4 + $0x58] sm:$0xff] }
 0x4ae   : > { %v10266_v12 = vpop.permute.xlu0 %10265  ;;  %10508 = vrot.lane.b32.xlu2 %v10473_v28, %s13458_s14  ;;  %v10138_v7 = vmin.f32 %v10106_v11, 0.0  ;;  %vm10122_vm7 = vcmp.gt.f32.partialorder %v10106_v11, 0.0  ;;  %v13257_v28 = vld [vmem:[%s17206_s4 + $0x60] sm:$0xff]  ;;  %11251 = vmatpush.bf16.msrb.mxu3 %v13279_v54  ;;  %v546_v54 = vsel %vm15416_vm5, 0, %v545_v53 }
 0x4af   : > { %10290 = vst.msk [vmem:[#allocation4] sm:$0x3] %vm10289_vm3, %v10266_v12  ;;  %v13246_v12 = vld [vmem:[%s17206_s4 + $0x8] sm:$0xff] }
 0x4b0   : > { %10418 = vrot.lane.b32.xlu1 %v10248_v18, %s13459_s30  ;;  %v10163_v31 = vmul.f32 1.442695, %v10138_v7  ;;  %v13259_v18 = vld [vmem:[%s17206_s4 + $0x70] sm:$0xff]  ;;  %v10137_v7 = vmin.f32 %v16807_v24, 0.0  ;;  %547 = vst [vmem:[#allocation4 + $0x4] sm:$0x1] %v546_v54 }
 0x4b1   : > { %10778 = vmatpush.bf16.msrb.mxu0 %v13259_v18  ;;  %10882 = vmatpush.bf16.msrb.mxu1 %v13248_v63  ;;  %v13253_v18 = vld [vmem:[%s17206_s4 + $0x40] sm:$0xff] }
 0x4b2   : > { %13397 = vpow2.f32 %v10163_v31  ;;  %11007 = vmatpush.bf16.msrb.mxu2 %v13269_v59  ;;  %v10161_v40 = vmul.f32 1.442695, %v10137_v7 }
 0x4b4   : > { %v10357_v16 = vpop.permute.xlu2 %10356 }
 0x4b5   : > { %10779 = vmatpush.bf16.msrb.mxu0 %v13258_v32  ;;  %10883 = vmatpush.bf16.msrb.mxu1 %v13247_v48  ;;  %v13275_v48 = vld [vmem:[%s17206_s4 + $0xd0] sm:$0xff] }
 0x4b6   : > { %11008 = vmatpush.bf16.msrb.mxu2 %v13268_v10 }
 0x4b7   : > { %v10413_v20 = vpop.permute.xlu1 %10412 }
 0x4b8   : > { %v13398_v36 = vpop.eup %13397 }
 0x4b9   : > { %v9486_v29 = vpop.f32.mrf.mxu1  ;;  %v12814_v57 = vadd.f32 -1.0, %v13398_v36  ;;  %10780 = vmatpush.bf16.msrb.mxu0 %v13257_v28  ;;  %10884 = vmatpush.bf16.msrb.mxu1 %v13246_v12  ;;  %v13267_v36 = vld [vmem:[%s17206_s4 + $0x90] sm:$0xff] }
 0x4ba   : > { %11009 = vmatpush.bf16.msrb.mxu2 %v13267_v36 }
 0x4bb   : > { %v10202_v17 = vmul.f32 1.6732632, %v12814_v57 }
 0x4bc   : > { %v10415_v21 = vpop.permute.xlu2 %10414 }
 0x4bd   : > { %v10218_v2 = vsel %vm10122_vm7, %v10106_v11, %v10202_v17  ;;  %10781 = vmatpush.bf16.msrb.mxu0 %v13256_v19 }
 0x4be   : > { %v10234_v3 = vmul.f32 1.050701, %v10218_v2  ;;  %v13254_v2 = vld [vmem:[%s17206_s4 + $0x48] sm:$0xff] }
 0x4c0   : > { %v16860_v30 = vpack.c.bf16 %v10234_v3, %v10234_v3 }
 0x4c1   : > { %v9664_v8 = vpop.f32.mrf.mxu2  ;;  %v9488_v61 = vpop.f32.mrf.mxu1 }
 0x4c6   : > { %v9341_v5 = vpop.f32.mrf.mxu0  ;;  %v10268_v43 = vpop.permute.xlu0 %10267 }
 0x4c7   : > { %10291 = vst.msk [vmem:[#allocation4 + $0x8] sm:$0x3] %vm10289_vm3, %v10268_v43  ;;  %v9487_v47 = vadd.f32 %v9486_v29, %v9341_v5  ;;  %v13245_v5 = vld [vmem:[%s17206_s4] sm:$0xff]  ;;  %v13278_v43 = vld [vmem:[%s17206_s4 + $0xe8] sm:$0xff] }
 0x4c8   : > { %10885 = vmatpush.bf16.msrb.mxu1 %v13245_v5  ;;  %11252 = vmatpush.bf16.msrb.mxu3 %v13278_v43 }
 0x4c9   : > { %v9689_v50 = vadd.f32 %v9664_v8, %v9487_v47  ;;  %v9666_v25 = vpop.f32.mrf.mxu2 }
 0x4cc   : > { %11253 = vmatpush.bf16.msrb.mxu3 %v13277_v42  ;;  %v13273_v42 = vld [vmem:[%s17206_s4 + $0xc0] sm:$0xff] }
 0x4cd   : > { %v10082_v41 = vpop.f32.mrf.mxu3 }
 0x4ce   : > { %v10383_v13 = vld [vmem:[#allocation4 + $0x8] sm:$0x7]  ;;  %v10107_v14 = vadd.f32 %v10082_v41, %v9689_v50  ;;  %v9343_v45 = vpop.f32.mrf.mxu0 }
 0x4cf   : > { %v10384_v56 = vsel %vm16818_vm9, %v10357_v16, %v10383_v13  ;;  %v9489_v27 = vadd.f32 %v9488_v61, %v9343_v45  ;;  %v549_v61 = vld [vmem:[#allocation4 + $0xc] sm:$0x1] }
 0x4d0   : > { %10385 = vst [vmem:[#allocation4 + $0x8] sm:$0x7] %v10384_v56  ;;  %v10139_v60 = vmin.f32 %v10107_v14, 0.0  ;;  %vm10123_vm12 = vcmp.gt.f32.partialorder %v10107_v14, 0.0  ;;  %v10380_v56 = vld [vmem:[#allocation4] sm:$0x7] }
 0x4d1   : > { %10438 = vst.msk [vmem:[#allocation4 + $0x8] sm:$0x3] %vm10437_vm13, %v10413_v20  ;;  %v9690_v11 = vadd.f32 %v9666_v25, %v9489_v27  ;;  %v13274_v25 = vld [vmem:[%s17206_s4 + $0xc8] sm:$0xff]  ;;  %v550_v5 = vsel %vm15416_vm5, 0, %v549_v61 }
 0x4d2   : > { %v10165_v46 = vmul.f32 1.442695, %v10139_v60  ;;  %551 = vst [vmem:[#allocation4 + $0xc] sm:$0x1] %v550_v5 }
 0x4d4   : > { %13399 = vpow2.f32 %v10165_v46  ;;  %v10505_v47 = vpop.permute.xlu0 %10504 }
 0x4d5   : > { %13401 = vpow2.f32 %v10161_v40 }
 0x4d8   : > { %v10528_v0 = vld [vmem:[#allocation4 + $0x8] sm:$0x7] }
 0x4d9   : > { %v10529_v4 = vsel %vm16832_vm11, %v10503_v6, %v10528_v0  ;;  %v10084_v6 = vpop.f32.mrf.mxu3 }
 0x4da   : > { %10530 = vst [vmem:[#allocation4 + $0x8] sm:$0x7] %v10529_v4  ;;  %v13400_v22 = vpop.eup %13399  ;;  %v16901_v29 = vadd.f32 %v10084_v6, %v9690_v11  ;;  %v13255_v4 = vld [vmem:[%s17206_s4 + $0x50] sm:$0xff] }
 0x4db   : > { %v12815_v33 = vadd.f32 -1.0, %v13400_v22  ;;  %v13402_v60 = vpop.eup %13401  ;;  %10782 = vmatpush.bf16.msrb.mxu0 %v13255_v4 }
 0x4dc   : > { %v10140_v50 = vmin.f32 %v16901_v29, 0.0  ;;  %v12813_v51 = vadd.f32 -1.0, %v13402_v60  ;;  %vm10124_vm0 = vcmp.gt.f32.partialorder %v16901_v29, 0.0 }
 0x4dd   : > { %v10203_v35 = vmul.f32 1.6732632, %v12815_v33 }
 0x4de   : > { %v10167_v16 = vmul.f32 1.442695, %v10140_v50 }
 0x4df   : > { %v10219_v49 = vsel %vm10123_vm12, %v10107_v14, %v10203_v35  ;;  %10783 = vmatpush.bf16.msrb.mxu0 %v13254_v2 }
 0x4e0   : > { %v10235_v26 = vmul.f32 1.050701, %v10219_v49  ;;  %13403 = vpow2.f32 %v10167_v16  ;;  %v13266_v49 = vld [vmem:[%s17206_s4 + $0x88] sm:$0xff] }
 0x4e1   : > { %v13241_v33 = vld [vmem:[#allocation4 + $0x4] sm:$0xf0]  ;;  %11010 = vmatpush.bf16.msrb.mxu2 %v13266_v49 }
 0x4e2   : > { %v10251_v9 = vpack.c.bf16 %v10235_v26, %v10235_v26  ;;  %v12935_v32 = vld [vmem:[#allocation4 + $0x8] sm:$0xf] }
 0x4e3   : > { %10784 = vmatpush.bf16.msrb.mxu0 %v13253_v18  ;;  %v10553_v50 = vld [vmem:[#allocation4 + $0x8] sm:$0xf] }
 0x4e4   : > { %10275 = vrot.lane.b32.xlu2 %v10251_v9, %s13458_s14  ;;  %v10334_v39 = vshrl.u32 %v10251_v9, 16  ;;  %v10337_v58 = vshll.u32 %v10251_v9, 16  ;;  %v11041_v2 = vld [vmem:[#allocation4 + $0x8] sm:$0xf] }
 0x4e5   : > { %11011 = vmatpush.bf16.msrb.mxu2 %v13265_v1  ;;  %v11058_v1 = vshrl.u32 %v11041_v2, 16  ;;  %v11061_v53 = vshll.u32 %v11041_v2, 16 }
 0x4e6   : > { %v10336_v15 = vrot.slane %v10334_v39, 7  ;;  %v13404_v22 = vpop.eup %13403  ;;  %v13276_v39 = vld [vmem:[%s17206_s4 + $0xd8] sm:$0xff] }
 0x4e7   : > { %v12816_v55 = vadd.f32 -1.0, %v13404_v22  ;;  %11254 = vmatpush.bf16.msrb.mxu3 %v13276_v39 }
 0x4e8   : > { %v10339_v23 = vor.u32 %v10337_v58, %v10336_v15  ;;  %v10201_v15 = vmul.f32 1.6732632, %v12813_v51 }
 0x4e9   : > { %v10204_v58 = vmul.f32 1.6732632, %v12816_v55  ;;  %v10576_v55 = vld [vmem:[#allocation4 + $0x4] sm:$0x1] }
 0x4ea   : > { %10364 = vrot.lane.b32.xlu0 %v10339_v23, %s13459_s30  ;;  %v10217_v11 = vsel %vm10121_vm15, %v16807_v24, %v10201_v15  ;;  %v10577_v15 = vld [vmem:[#allocation4 + $0xc] sm:$0x1] }
 0x4eb   : > { %11255 = vmatpush.bf16.msrb.mxu3 %v13275_v48  ;;  %v11042_v48 = vld [vmem:[#allocation4 + $0xc] sm:$0x1] }
 0x4ec   : > { %10420 = vrot.lane.b32.xlu2 %v16860_v30, %s13459_s30 }
 0x4ef   : > { %11256 = vmatpush.bf16.msrb.mxu3 %v13274_v25 }
 0x4f3   : > { %11257 = vmatpush.bf16.msrb.mxu3 %v13273_v42 }
 0x4f5   : > { %v9491_v46 = vpop.f32.mrf.mxu1 }
 0x4fd   : > { %v9493_v45 = vpop.f32.mrf.mxu1 }
 0x4fe   : > { %v10270_v8 = vpop.permute.xlu1 %10269 }
 0x4ff   : > { %10292 = vst.msk [vmem:[#allocation4 + $0x10] sm:$0x3] %vm10289_vm3, %v10270_v8 }
 0x500   : > { %v10361_v63 = vpop.permute.xlu2 %10360 }
 0x501   : > { %v9669_v17 = vpop.f32.mrf.mxu2 }
 0x503   : > { %v9346_v0 = vpop.f32.mrf.mxu0 }
 0x504   : > { %v9492_v3 = vadd.f32 %v9491_v46, %v9346_v0  ;;  %v16962_v0 = vmul.f32 1.050701, %v10217_v11 }
 0x506   : > { %v10359_v13 = vpop.permute.xlu0 %10358  ;;  %v10386_v41 = vld [vmem:[#allocation4 + $0x10] sm:$0x7]  ;;  %v10355_v14 = vpop.permute.xlu1 %10354  ;;  %v9691_v59 = vadd.f32 %v9669_v17, %v9492_v3 }
 0x507   : > { %v10387_v31 = vsel %vm16818_vm9, %v10359_v13, %v10386_v41  ;;  %v10381_v20 = vsel %vm16818_vm9, %v10355_v14, %v10380_v56  ;;  %v10599_v13 = vshrl.u32 %v10553_v50, 16  ;;  %v10602_v41 = vshll.u32 %v10553_v50, 16 }
 0x508   : > { %10388 = vst [vmem:[#allocation4 + $0x10] sm:$0x7] %v10387_v31  ;;  %v10220_v31 = vsel %vm10124_vm0, %v16901_v29, %v10204_v58  ;;  %v10594_v58 = vshll.u32 %v10576_v55, 16 }
 0x509   : > { %10439 = vst.msk [vmem:[#allocation4 + $0x10] sm:$0x3] %vm10437_vm13, %v10415_v21  ;;  %v10601_v21 = vrot.slane %v10599_v13, 4  ;;  %v16964_v36 = vmul.f32 1.050701, %v10220_v31 }
 0x50a   : > { %10382 = vst [vmem:[#allocation4] sm:$0x7] %v10381_v20  ;;  %v10604_v20 = vrot.slane %v10602_v41, 5  ;;  %v9496_v22 = vpop.f32.mrf.mxu1 }
 0x50b   : > { %v9348_v28 = vpop.f32.mrf.mxu0 }
 0x50c   : > { %v9494_v56 = vadd.f32 %v9493_v45, %v9348_v28  ;;  %v10596_v45 = vrot.slane %v10594_v58, 5 }
 0x50e   : > { %v10417_v10 = vpop.permute.xlu0 %10416 }
 0x510   : > { %v10531_v35 = vld [vmem:[#allocation4 + $0x10] sm:$0x7] }
 0x511   : > { %v10532_v26 = vsel %vm16832_vm11, %v10505_v47, %v10531_v35  ;;  %v12871_v9 = vld [vmem:[#allocation4] sm:$0xf]  ;;  %v9671_v47 = vpop.f32.mrf.mxu2  ;;  %v553_v35 = vld [vmem:[#allocation4 + $0x14] sm:$0x1] }
 0x512   : > { %v10272_v57 = vpop.permute.xlu1 %10271  ;;  %10533 = vst [vmem:[#allocation4 + $0x10] sm:$0x7] %v10532_v26  ;;  %v12872_v38 = vor.u32 %v13241_v33, %v12871_v9  ;;  %v10552_v27 = vld [vmem:[#allocation4] sm:$0xf]  ;;  %v10605_v33 = vor.u32 %v10604_v20, %v10601_v21  ;;  %v554_v9 = vsel %vm15416_vm5, 0, %v553_v35 }
 0x513   : > { %10293 = vst.msk [vmem:[#allocation4 + $0x18] sm:$0x3] %vm10289_vm3, %v10272_v57  ;;  %v10585_v43 = vshrl.u32 %v10552_v27, 16  ;;  %v10588_v40 = vshll.u32 %v10552_v27, 16  ;;  %v9692_v57 = vadd.f32 %v9671_v47, %v9494_v56  ;;  %v11063_v27 = vrot.slane %v11061_v53, 5 }
 0x514   : > { %10886 = vmatmul.bf16.vlgmr.msrb.gmra.mxu1 %v12872_v38  ;;  %v10087_v19 = vpop.f32.mrf.mxu3  ;;  %555 = vst [vmem:[#allocation4 + $0x14] sm:$0x1] %v554_v9 }
 0x515   : > { %v16957_v8 = vadd.f32 %v10087_v19, %v9691_v59  ;;  %v10587_v16 = vrot.slane %v10585_v43, 4  ;;  %v10590_v24 = vrot.slane %v10588_v40, 5  ;;  %v11067_v59 = vshll.u32 %v11042_v48, 16 }
 0x517   : > { %v10141_v14 = vmin.f32 %v16957_v8, 0.0  ;;  %v10591_v46 = vor.u32 %v10590_v24, %v10587_v16  ;;  %vm10125_vm10 = vcmp.gt.f32.partialorder %v16957_v8, 0.0  ;;  %v11069_v43 = vrot.slane %v11067_v59, 5  ;;  %v557_v16 = vld [vmem:[#allocation4 + $0x1c] sm:$0x1] }
 0x519   : > { %v13261_v6 = vld [vmem:[#allocation4 + $0xc] sm:$0xf0]  ;;  %v10169_v60 = vmul.f32 1.442695, %v10141_v14  ;;  %v10592_v26 = vrot.slane %v10591_v46, 4  ;;  %v9674_v18 = vpop.f32.mrf.mxu2  ;;  %v9498_v14 = vpop.f32.mrf.mxu1 }
 0x51a   : > { %v10389_v23 = vld [vmem:[#allocation4 + $0x18] sm:$0x7]  ;;  %v16939_v62 = vpop.permute.xlu1 %10506  ;;  %v12936_v7 = vor.u32 %v13261_v6, %v12935_v32  ;;  %v11043_v38 = vld [vmem:[#allocation4 + $0x10] sm:$0xf]  ;;  %v10608_v32 = vshll.u32 %v10577_v15, 16 }
 0x51b   : > { %v10390_v12 = vsel %vm16818_vm9, %v10361_v63, %v10389_v23  ;;  %13405 = vpow2.f32 %v10169_v60  ;;  %v10606_v23 = vrot.slane %v10605_v33, 4  ;;  %v11072_v28 = vshrl.u32 %v11043_v38, 16  ;;  %v11044_v31 = vld [vmem:[#allocation4 + $0x14] sm:$0x1]  ;;  %v10554_v46 = vld [vmem:[#allocation4 + $0x10] sm:$0xf] }
 0x51c   : > { %10391 = vst [vmem:[#allocation4 + $0x18] sm:$0x7] %v10390_v12  ;;  %11012 = vmatmul.bf16.vlgmr.msrb.gmra.mxu2 %v12936_v7  ;;  %v10089_v49 = vpop.f32.mrf.mxu3  ;;  %v10610_v61 = vrot.slane %v10608_v32, 5  ;;  %v11075_v25 = vshll.u32 %v11043_v38, 16  ;;  %v10597_v6 = vsel %vm13604_vm2, %v10592_v26, %v10596_v45  ;;  %v11081_v20 = vshll.u32 %v11044_v31, 16 }
 0x51d   : > { %10440 = vst.msk [vmem:[#allocation4 + $0x18] sm:$0x3] %vm10437_vm13, %v10417_v10  ;;  %v16976_v51 = vadd.f32 %v10089_v49, %v9692_v57  ;;  %v10509_v10 = vpop.permute.xlu2 %10508  ;;  %v11074_v11 = vrot.slane %v11072_v28, 4  ;;  %v10713_v7 = vunpack.c.l.b16 %v10597_v6  ;;  %v12875_v26 = vld [vmem:[#allocation4 + $0x10] sm:$0xf]  ;;  %v10613_v55 = vshrl.u32 %v10554_v46, 16 }
 0x51e   : > { %v10611_v47 = vsel %vm13604_vm2, %v10606_v23, %v10610_v61  ;;  %v11077_v21 = vrot.slane %v11075_v25, 5  ;;  %v11083_v49 = vrot.slane %v11081_v20, 5  ;;  %v10578_v32 = vld [vmem:[#allocation4 + $0x14] sm:$0x1]  ;;  %v10616_v53 = vshll.u32 %v10554_v46, 16 }
 0x51f   : > { %v10142_v63 = vmin.f32 %v16976_v51, 0.0  ;;  %v10714_v41 = vunpack.c.l.b16 %v10611_v47  ;;  %v10615_v48 = vrot.slane %v10613_v55, 4  ;;  %v17007_v20 = vpack.c.bf16 %v16964_v36, %v16964_v36 }
 0x520   : > { %v10618_v25 = vrot.slane %v10616_v53, 5  ;;  %vm10126_vm14 = vcmp.gt.f32.partialorder %v16976_v51, 0.0 }
 0x521   : > { %v9351_v29 = vpop.f32.mrf.mxu0  ;;  %v13406_v12 = vpop.eup %13405  ;;  %v10171_v54 = vmul.f32 1.442695, %v10142_v63 }
 0x522   : > { %v10419_v4 = vpop.permute.xlu1 %10418  ;;  %v9497_v3 = vadd.f32 %v9496_v22, %v9351_v29  ;;  %v12817_v19 = vadd.f32 -1.0, %v13406_v12  ;;  %v10721_v22 = vpack.c.b16 %v10714_v41, %v10713_v7  ;;  %v10619_v47 = vor.u32 %v10618_v25, %v10615_v48  ;;  %v561_v41 = vld [vmem:[#allocation4 + $0x24] sm:$0x1] }
 0x523   : > { %10441 = vst.msk [vmem:[#allocation4 + $0x20] sm:$0x3] %vm10437_vm13, %v10419_v4  ;;  %13407 = vpow2.f32 %v10171_v54 }
 0x524   : > { %v10534_v17 = vld [vmem:[#allocation4 + $0x18] sm:$0x7]  ;;  %v10205_v13 = vmul.f32 1.6732632, %v12817_v19  ;;  %v9693_v24 = vadd.f32 %v9674_v18, %v9497_v3  ;;  %10785 = vmatmul.bf16.vlgmr.msrb.gmra.mxu0 %v10721_v22  ;;  %v9676_v3 = vpop.f32.mrf.mxu2  ;;  %v10622_v19 = vshll.u32 %v10578_v32, 16 }
 0x525   : > { %v10535_v39 = vsel %vm16832_vm11, %v16939_v62, %v10534_v17  ;;  %v11060_v62 = vrot.slane %v11058_v1, 4  ;;  %v11078_v17 = vor.u32 %v11077_v21, %v11074_v11  ;;  %v10475_v21 = vshrl.u32 %v16860_v30, 16 }
 0x526   : > { %10536 = vst [vmem:[#allocation4 + $0x18] sm:$0x7] %v10535_v39  ;;  %v10221_v4 = vsel %vm10125_vm10, %v16957_v8, %v10205_v13  ;;  %v558_v39 = vsel %vm15416_vm5, 0, %v557_v16  ;;  %v10624_v13 = vrot.slane %v10622_v19, 5 }
 0x527   : > { %v11064_v56 = vor.u32 %v11063_v27, %v11060_v62  ;;  %v10237_v42 = vmul.f32 1.050701, %v10221_v4  ;;  %v11079_v58 = vrot.slane %v11078_v17, 4  ;;  %559 = vst [vmem:[#allocation4 + $0x1c] sm:$0x1] %v558_v39  ;;  %v10478_v39 = vshll.u32 %v16860_v30, 16 }
 0x529   : > { %v9353_v40 = vpop.f32.mrf.mxu0  ;;  %v11065_v33 = vrot.slane %v11064_v56, 4  ;;  %v13408_v8 = vpop.eup %13407  ;;  %v10253_v38 = vpack.c.bf16 %v10237_v42, %v10237_v42  ;;  %v11084_v62 = vsel %vm13604_vm2, %v11079_v58, %v11083_v49  ;;  %v10620_v56 = vrot.slane %v10619_v47, 4 }
 0x52a   : > { %v10537_v5 = vld [vmem:[#allocation4 + $0x20] sm:$0x7]  ;;  %v9499_v57 = vadd.f32 %v9498_v14, %v9353_v40  ;;  %v12818_v63 = vadd.f32 -1.0, %v13408_v8  ;;  %v11187_v54 = vunpack.c.l.b16 %v11084_v62  ;;  %v10477_v49 = vrot.slane %v10475_v21, 7 }
 0x52b   : > { %v10538_v50 = vsel %vm16832_vm11, %v10509_v10, %v10537_v5  ;;  %v10092_v29 = vpop.f32.mrf.mxu3  ;;  %v11070_v9 = vsel %vm13604_vm2, %v11065_v33, %v11069_v43  ;;  %10277 = vrot.lane.b32.xlu0 %v10253_v38, %s13458_s14  ;;  %v10341_v28 = vshrl.u32 %v10253_v38, 16  ;;  %v10344_v61 = vshll.u32 %v10253_v38, 16 }
 0x52c   : > { %10539 = vst [vmem:[#allocation4 + $0x20] sm:$0x7] %v10538_v50  ;;  %v16988_v35 = vadd.f32 %v10092_v29, %v9693_v24  ;;  %v9694_v23 = vadd.f32 %v9676_v3, %v9499_v57  ;;  %v11186_v59 = vunpack.c.l.b16 %v11070_v9  ;;  %v10206_v5 = vmul.f32 1.6732632, %v12818_v63 }
 0x52d   : > { %v13242_v60 = vld [vmem:[#allocation4 + $0x14] sm:$0xf0]  ;;  %v10343_v10 = vrot.slane %v10341_v28, 7  ;;  %v17000_v50 = vpack.c.bf16 %v16962_v0, %v16962_v0  ;;  %v10625_v22 = vsel %vm13604_vm2, %v10620_v56, %v10624_v13  ;;  %v10482_v62 = vshrl.u32 %v17007_v20, 16 }
 0x52e   : > { %v12876_v2 = vor.u32 %v13242_v60, %v12875_v26  ;;  %v10143_v15 = vmin.f32 %v16988_v35, 0.0  ;;  %v12939_v1 = vld [vmem:[#allocation4 + $0x18] sm:$0xf]  ;;  %v11194_v43 = vpack.c.b16 %v11187_v54, %v11186_v59  ;;  %v10579_v31 = vld [vmem:[#allocation4 + $0x1c] sm:$0x1]  ;;  %v10222_v4 = vsel %vm10126_vm14, %v16976_v51, %v10206_v5 }
 0x52f   : > { %v10555_v18 = vld [vmem:[#allocation4 + $0x18] sm:$0xf]  ;;  %v10346_v16 = vor.u32 %v10344_v61, %v10343_v10  ;;  %v10636_v60 = vshll.u32 %v10579_v31, 16  ;;  %vm10127_vm6 = vcmp.gt.f32.partialorder %v16988_v35, 0.0  ;;  %v11046_v29 = vld [vmem:[#allocation4 + $0x1c] sm:$0x1]  ;;  %v10715_v63 = vunpack.c.l.b16 %v10625_v22 }
 0x530   : > { %10891 = vmatmul.bf16.gmra.mxu1 %v12876_v2  ;;  %v10173_v45 = vmul.f32 1.442695, %v10143_v15  ;;  %v10627_v6 = vshrl.u32 %v10555_v18, 16  ;;  %v10630_v7 = vshll.u32 %v10555_v18, 16  ;;  %11258 = vmatmul.bf16.vlgmr.msrb.gmra.mxu3 %v11194_v43  ;;  %v11045_v46 = vld [vmem:[#allocation4 + $0x18] sm:$0xf] }
 0x531   : > { %10366 = vrot.lane.b32.xlu1 %v10346_v16, %s13459_s30  ;;  %v10638_v17 = vrot.slane %v10636_v60, 5  ;;  %v562_v26 = vsel %vm15416_vm5, 0, %v561_v41  ;;  %v11086_v55 = vshrl.u32 %v11045_v46, 16  ;;  %v11089_v8 = vshll.u32 %v11045_v46, 16 }
 0x532   : > { %13409 = vpow2.f32 %v10173_v45  ;;  %v10629_v14 = vrot.slane %v10627_v6, 4  ;;  %v10632_v24 = vrot.slane %v10630_v7, 5  ;;  %563 = vst [vmem:[#allocation4 + $0x24] sm:$0x1] %v562_v26  ;;  %v11095_v38 = vshll.u32 %v11046_v29, 16 }
 0x533   : > { %v13262_v12 = vld [vmem:[#allocation4 + $0x1c] sm:$0xf0]  ;;  %v10094_v11 = vpop.f32.mrf.mxu3  ;;  %10422 = vrot.lane.b32.xlu0 %v17007_v20, %s13459_s30  ;;  %v11091_v32 = vrot.slane %v11089_v8, 5  ;;  %v10238_v53 = vmul.f32 1.050701, %v10222_v4  ;;  %v10327_v5 = vshrl.u32 %v17000_v50, 16 }
 0x534   : > { %v12940_v27 = vor.u32 %v13262_v12, %v12939_v1  ;;  %v17002_v40 = vadd.f32 %v10094_v11, %v9694_v23  ;;  %v10633_v57 = vor.u32 %v10632_v24, %v10629_v14  ;;  %v11047_v33 = vld [vmem:[#allocation4 + $0x20] sm:$0xf]  ;;  %v11088_v1 = vrot.slane %v11086_v55, 4 }
 0x535   : > { %v11100_v3 = vshrl.u32 %v11047_v33, 16  ;;  %v11103_v18 = vshll.u32 %v11047_v33, 16  ;;  %v10480_v12 = vor.u32 %v10478_v39, %v10477_v49  ;;  %v11097_v61 = vrot.slane %v11095_v38, 5 }
 0x536   : > { %11017 = vmatmul.bf16.gmra.mxu2 %v12940_v27  ;;  %v10144_v0 = vmin.f32 %v17002_v40, 0.0  ;;  %v10634_v2 = vrot.slane %v10633_v57, 4  ;;  %v11092_v54 = vor.u32 %v11091_v32, %v11088_v1  ;;  %v10254_v43 = vpack.c.bf16 %v10238_v53, %v10238_v53 }
 0x537   : > { %v11102_v48 = vrot.slane %v11100_v3, 4  ;;  %v11105_v45 = vrot.slane %v11103_v18, 5  ;;  %v10485_v16 = vshll.u32 %v17007_v20, 16  ;;  %vm10128_vm4 = vcmp.gt.f32.partialorder %v17002_v40, 0.0 }
 0x538   : > { %v13410_v36 = vpop.eup %13409  ;;  %v10175_v42 = vmul.f32 1.442695, %v10144_v0  ;;  %v10639_v58 = vsel %vm13604_vm2, %v10634_v2, %v10638_v17  ;;  %v11093_v6 = vrot.slane %v11092_v54, 4  ;;  %v10329_v24 = vrot.slane %v10327_v5, 7 }
 0x539   : > { %v12819_v51 = vadd.f32 -1.0, %v13410_v36  ;;  %v10716_v23 = vunpack.c.l.b16 %v10639_v58  ;;  %10273 = vrot.lane.b32.xlu1 %v17000_v50, %s13458_s14  ;;  %v11106_v27 = vor.u32 %v11105_v45, %v11102_v48  ;;  %v11048_v19 = vld [vmem:[#allocation4 + $0x24] sm:$0x1]  ;;  %v10330_v4 = vshll.u32 %v17000_v50, 16 }
 0x53a   : > { %13411 = vpow2.f32 %v10175_v42  ;;  %v11109_v7 = vshll.u32 %v11048_v19, 16  ;;  %v11098_v31 = vsel %vm13604_vm2, %v11093_v6, %v11097_v61  ;;  %v10489_v20 = vshrl.u32 %v10254_v43, 16 }
 0x53b   : > { %v10207_v15 = vmul.f32 1.6732632, %v12819_v51  ;;  %v10722_v28 = vpack.c.b16 %v10716_v23, %v10715_v63  ;;  %10510 = vrot.lane.b32.xlu0 %v10480_v12, %s13458_s14  ;;  %v11107_v47 = vrot.slane %v11106_v27, 4  ;;  %v11188_v57 = vunpack.c.l.b16 %v11098_v31 }
 0x53c   : > { %v11111_v56 = vrot.slane %v11109_v7, 5  ;;  %v10332_v17 = vor.u32 %v10330_v4, %v10329_v24  ;;  %v10492_v49 = vshll.u32 %v10254_v43, 16 }
 0x53d   : > { %v10223_v30 = vsel %vm10127_vm6, %v16988_v35, %v10207_v15  ;;  %10790 = vmatmul.bf16.gmra.mxu0 %v10722_v28  ;;  %v10484_v35 = vrot.slane %v10482_v62, 7 }
 0x53e   : > { %v10276_v9 = vpop.permute.xlu2 %10275  ;;  %v10239_v59 = vmul.f32 1.050701, %v10223_v30  ;;  %v11112_v46 = vsel %vm13604_vm2, %v11107_v47, %v11111_v56 }
 0x53f   : > { %10295 = vst.msk [vmem:[#allocation4 + $0x30] sm:$0x3] %vm10289_vm3, %v10276_v9  ;;  %v10487_v14 = vor.u32 %v10485_v16, %v10484_v35  ;;  %v11189_v29 = vunpack.c.l.b16 %v11112_v46 }
 0x540   : > { %v13412_v25 = vpop.eup %13411  ;;  %v10255_v10 = vpack.c.bf16 %v10239_v59, %v10239_v59 }
 0x541   : > { %v12820_v11 = vadd.f32 -1.0, %v13412_v25  ;;  %10512 = vrot.lane.b32.xlu1 %v10487_v14, %s13458_s14  ;;  %v11195_v42 = vpack.c.b16 %v11189_v29, %v11188_v57 }
 0x542   : > { %10279 = vrot.lane.b32.xlu2 %v10255_v10, %s13458_s14  ;;  %v10348_v13 = vshrl.u32 %v10255_v10, 16  ;;  %v10351_v0 = vshll.u32 %v10255_v10, 16 }
 0x543   : > { %v10208_v41 = vmul.f32 1.6732632, %v12820_v11  ;;  %11263 = vmatmul.bf16.gmra.mxu3 %v11195_v42  ;;  %v569_v42 = vld [vmem:[#allocation4 + $0x34] sm:$0x1] }
 0x544   : > { %v10350_v21 = vrot.slane %v10348_v13, 7 }
 0x545   : > { %v10224_v60 = vsel %vm10128_vm4, %v17002_v40, %v10208_v41  ;;  %v10491_v40 = vrot.slane %v10489_v20, 7 }
 0x546   : > { %v10240_v22 = vmul.f32 1.050701, %v10224_v60  ;;  %v10353_v33 = vor.u32 %v10351_v0, %v10350_v21  ;;  %v10395_v39 = vld [vmem:[#allocation4 + $0x30] sm:$0x7]  ;;  %v10421_v38 = vpop.permute.xlu2 %10420 }
 0x547   : > { %v10494_v50 = vor.u32 %v10492_v49, %v10491_v40  ;;  %v570_v40 = vsel %vm15416_vm5, 0, %v569_v42 }
 0x548   : > { %v10256_v36 = vpack.c.bf16 %v10240_v22, %v10240_v22  ;;  %10368 = vrot.lane.b32.xlu0 %v10353_v33, %s13459_s30  ;;  %571 = vst [vmem:[#allocation4 + $0x34] sm:$0x1] %v570_v40 }
 0x549   : > { %10424 = vrot.lane.b32.xlu1 %v10254_v43, %s13459_s30 }
 0x54a   : > { %10362 = vrot.lane.b32.xlu2 %v10332_v17, %s13459_s30  ;;  %v10496_v26 = vshrl.u32 %v10256_v36, 16  ;;  %v10499_v51 = vshll.u32 %v10256_v36, 16 }
 0x54c   : > { %v10498_v9 = vrot.slane %v10496_v26, 7 }
 0x54e   : > { %v10501_v2 = vor.u32 %v10499_v51, %v10498_v9 }
 0x550   : > { %10514 = vrot.lane.b32.xlu0 %v10494_v50, %s13458_s14 }
 0x551   : > { %10516 = vrot.lane.b32.xlu1 %v10501_v2, %s13458_s14  ;;  %s13040_s14 = sshll.u32 %s17231_s11, 5 }
 0x552   : > { %10426 = vrot.lane.b32.xlu2 %v10256_v36, %s13459_s30  ;;  %v565_v36 = vld [vmem:[#allocation4 + $0x2c] sm:$0x1]  ;;  %s17091_s10 = scalar_lea.vmem %s17209_s7, %s13040_s14 }
 0x553   : > { %v566_v17 = vsel %vm15416_vm5, 0, %v565_v36 }
 0x554   : > { %567 = vst [vmem:[#allocation4 + $0x2c] sm:$0x1] %v566_v17 }
 0x55c   : > { %v10365_v55 = vpop.permute.xlu0 %10364 }
 0x55d   : > { %v10396_v8 = vsel %vm16818_vm9, %v10365_v55, %v10395_v39 }
 0x55e   : > { %10397 = vst [vmem:[#allocation4 + $0x30] sm:$0x7] %v10396_v8 }
 0x55f   : > { %10442 = vst.msk [vmem:[#allocation4 + $0x30] sm:$0x3] %vm10437_vm13, %v10421_v38 }
 0x566   : > { %v10540_v62 = vld [vmem:[#allocation4 + $0x30] sm:$0x7] }
 0x591   : > { %v10887_v53 = vpop.f32.mrf.mxu1 }
 0x599   : > { %v10889_v6 = vpop.f32.mrf.mxu1 }
 0x59c   : > { %v10280_v3 = vpop.permute.xlu2 %10279 }
 0x59d   : > { %10297 = vst.msk [vmem:[#allocation4 + $0x40] sm:$0x3] %vm10289_vm3, %v10280_v3  ;;  %v10278_v15 = vpop.permute.xlu0 %10277 }
 0x59e   : > { %10296 = vst.msk [vmem:[#allocation4 + $0x38] sm:$0x3] %vm10289_vm3, %v10278_v15 }
 0x59f   : > { %v11013_v45 = vpop.f32.mrf.mxu2 }
 0x5a1   : > { %v10786_v48 = vpop.f32.mrf.mxu0 }
 0x5a2   : > { %v10888_v12 = vadd.f32 %v10887_v53, %v10786_v48 }
 0x5a3   : > { %v10367_v1 = vpop.permute.xlu1 %10366 }
 0x5a4   : > { %v10363_v58 = vpop.permute.xlu2 %10362  ;;  %v11033_v54 = vadd.f32 %v11013_v45, %v10888_v12  ;;  %v10401_v11 = vld [vmem:[#allocation4 + $0x40] sm:$0x7] }
 0x5a5   : > { %v10398_v18 = vld [vmem:[#allocation4 + $0x38] sm:$0x7]  ;;  %v10423_v63 = vpop.permute.xlu0 %10422 }
 0x5a6   : > { %v10399_v23 = vsel %vm16818_vm9, %v10367_v1, %v10398_v18 }
 0x5a7   : > { %10400 = vst [vmem:[#allocation4 + $0x38] sm:$0x7] %v10399_v23  ;;  %v11015_v7 = vpop.f32.mrf.mxu2 }
 0x5a8   : > { %10443 = vst.msk [vmem:[#allocation4 + $0x38] sm:$0x3] %vm10437_vm13, %v10423_v63 }
 0x5a9   : > { %v10788_v61 = vpop.f32.mrf.mxu0 }
 0x5aa   : > { %v10890_v41 = vadd.f32 %v10889_v6, %v10788_v61 }
 0x5ab   : > { %v10274_v30 = vpop.permute.xlu1 %10273 }
 0x5ac   : > { %v10427_v32 = vpop.permute.xlu2 %10426  ;;  %10294 = vst.msk [vmem:[#allocation4 + $0x28] sm:$0x3] %vm10289_vm3, %v10274_v30  ;;  %v11034_v56 = vadd.f32 %v11015_v7, %v10890_v41  ;;  %vm11351_vm3 = vcmask 523264  }
 0x5ad   : > { %10445 = vst.msk [vmem:[#allocation4 + $0x48] sm:$0x3] %vm10437_vm13, %v10427_v32  ;;  %v10511_v59 = vpop.permute.xlu0 %10510  ;;  %v10892_v0 = vpop.f32.mrf.mxu1 }
 0x5ae   : > { %v10541_v28 = vsel %vm16832_vm11, %v10511_v59, %v10540_v62 }
 0x5af   : > { %10542 = vst [vmem:[#allocation4 + $0x30] sm:$0x7] %v10541_v28  ;;  %v10543_v10 = vld [vmem:[#allocation4 + $0x38] sm:$0x7] }
 0x5b3   : > { %v10392_v27 = vld [vmem:[#allocation4 + $0x28] sm:$0x7]  ;;  %v11259_v25 = vpop.f32.mrf.mxu3  ;;  %v10513_v19 = vpop.permute.xlu1 %10512 }
 0x5b4   : > { %v10393_v35 = vsel %vm16818_vm9, %v10363_v58, %v10392_v27  ;;  %v17062_v5 = vadd.f32 %v11259_v25, %v11033_v54  ;;  %v10544_v43 = vsel %vm16832_vm11, %v10513_v19, %v10543_v10  ;;  %v10549_v55 = vld [vmem:[#allocation4 + $0x48] sm:$0x7]  ;;  %v573_v58 = vld [vmem:[#allocation4 + $0x3c] sm:$0x1] }
 0x5b5   : > { %10394 = vst [vmem:[#allocation4 + $0x28] sm:$0x7] %v10393_v35  ;;  %v574_v12 = vsel %vm15416_vm5, 0, %v573_v58  ;;  %v10894_v19 = vpop.f32.mrf.mxu1 }
 0x5b6   : > { %v11295_v16 = vmin.f32 %v17062_v5, 0.0  ;;  %10545 = vst [vmem:[#allocation4 + $0x38] sm:$0x7] %v10544_v43  ;;  %v13243_v4 = vld [vmem:[#allocation4 + $0x2c] sm:$0xf0]  ;;  %vm11287_vm8 = vcmp.gt.f32.partialorder %v17062_v5, 0.0 }
 0x5b7   : > { %v12943_v22 = vld [vmem:[#allocation4 + $0x30] sm:$0xf]  ;;  %575 = vst [vmem:[#allocation4 + $0x3c] sm:$0x1] %v574_v12 }
 0x5b8   : > { %v11303_v31 = vmul.f32 1.442695, %v11295_v16  ;;  %v10557_v26 = vld [vmem:[#allocation4 + $0x30] sm:$0xf] }
 0x5b9   : > { %v11018_v29 = vpop.f32.mrf.mxu2  ;;  %v10655_v8 = vshrl.u32 %v10557_v26, 16  ;;  %v10658_v38 = vshll.u32 %v10557_v26, 16  ;;  %v11049_v1 = vld [vmem:[#allocation4 + $0x30] sm:$0xf] }
 0x5ba   : > { %v10369_v47 = vpop.permute.xlu0 %10368  ;;  %13413 = vpow2.f32 %v11303_v31  ;;  %v10791_v14 = vpop.f32.mrf.mxu0  ;;  %v11114_v34 = vshrl.u32 %v11049_v1, 16  ;;  %v11117_v25 = vshll.u32 %v11049_v1, 16  ;;  %v10581_v31 = vld [vmem:[#allocation4 + $0x34] sm:$0x1] }
 0x5bb   : > { %v10402_v13 = vsel %vm16818_vm9, %v10369_v47, %v10401_v11  ;;  %v11261_v24 = vpop.f32.mrf.mxu3  ;;  %v10425_v21 = vpop.permute.xlu1 %10424  ;;  %v10893_v63 = vadd.f32 %v10892_v0, %v10791_v14  ;;  %v10657_v53 = vrot.slane %v10655_v8, 4  ;;  %v10660_v30 = vrot.slane %v10658_v38, 5  ;;  %v10580_v47 = vld [vmem:[#allocation4 + $0x2c] sm:$0x1]  ;;  %v11050_v14 = vld [vmem:[#allocation4 + $0x34] sm:$0x1] }
 0x5bc   : > { %10403 = vst [vmem:[#allocation4 + $0x40] sm:$0x7] %v10402_v13  ;;  %v17069_v60 = vadd.f32 %v11261_v24, %v11034_v56  ;;  %v12879_v46 = vld [vmem:[#allocation4 + $0x28] sm:$0xf]  ;;  %v11116_v16 = vrot.slane %v11114_v34, 4  ;;  %v10650_v56 = vshll.u32 %v10580_v47, 16 }
 0x5bd   : > { %10444 = vst.msk [vmem:[#allocation4 + $0x40] sm:$0x3] %vm10437_vm13, %v10425_v21  ;;  %v12880_v20 = vor.u32 %v13243_v4, %v12879_v46  ;;  %v13263_v52 = vld [vmem:[#allocation4 + $0x34] sm:$0xf0]  ;;  %v10556_v49 = vld [vmem:[#allocation4 + $0x28] sm:$0xf]  ;;  %v10661_v27 = vor.u32 %v10660_v30, %v10657_v53  ;;  %v11035_v43 = vadd.f32 %v11018_v29, %v10893_v63 }
 0x5be   : > { %v11296_v57 = vmin.f32 %v17069_v60, 0.0  ;;  %v12944_v33 = vor.u32 %v13263_v52, %v12943_v22  ;;  %v10641_v51 = vshrl.u32 %v10556_v49, 16  ;;  %v10644_v2 = vshll.u32 %v10556_v49, 16  ;;  %v11051_v54 = vld [vmem:[#allocation4 + $0x38] sm:$0xf] }
 0x5bf   : > { %10896 = vmatmul.bf16.gmra.mxu1 %v12880_v20  ;;  %vm11288_vm9 = vcmp.gt.f32.partialorder %v17069_v60, 0.0  ;;  %v11128_v35 = vshrl.u32 %v11051_v54, 16  ;;  %v10662_v7 = vrot.slane %v10661_v27, 4  ;;  %v10664_v0 = vshll.u32 %v10581_v31, 16  ;;  %v12883_v26 = vld [vmem:[#allocation4 + $0x38] sm:$0xf] }
 0x5c0   : > { %v13414_v50 = vpop.eup %13413  ;;  %v11305_v9 = vmul.f32 1.442695, %v11296_v57  ;;  %11022 = vmatmul.bf16.gmra.mxu2 %v12944_v33  ;;  %v10643_v3 = vrot.slane %v10641_v51, 4  ;;  %v10646_v15 = vrot.slane %v10644_v2, 5  ;;  %v11119_v46 = vrot.slane %v11117_v25, 5 }
 0x5c1   : > { %v13029_v39 = vadd.f32 -1.0, %v13414_v50  ;;  %v10652_v4 = vrot.slane %v10650_v56, 5  ;;  %v11123_v20 = vshll.u32 %v11050_v14, 16  ;;  %v11130_v22 = vrot.slane %v11128_v35, 4  ;;  %v577_v51 = vld [vmem:[#allocation4 + $0x44] sm:$0x1] }
 0x5c2   : > { %13415 = vpow2.f32 %v11305_v9  ;;  %v10515_v23 = vpop.permute.xlu0 %10514  ;;  %v10793_v62 = vpop.f32.mrf.mxu0  ;;  %v10647_v28 = vor.u32 %v10646_v15, %v10643_v3  ;;  %v11131_v52 = vshll.u32 %v11051_v54, 16  ;;  %v10666_v36 = vrot.slane %v10664_v0, 5  ;;  %v10558_v3 = vld [vmem:[#allocation4 + $0x38] sm:$0xf]  ;;  %v11052_v1 = vld [vmem:[#allocation4 + $0x3c] sm:$0x1] }
 0x5c3   : > { %v11327_v18 = vmul.f32 1.6732632, %v13029_v39  ;;  %v10517_v48 = vpop.permute.xlu1 %10516  ;;  %v10895_v11 = vadd.f32 %v10894_v19, %v10793_v62  ;;  %v11120_v17 = vor.u32 %v11119_v46, %v11116_v16  ;;  %v11125_v40 = vrot.slane %v11123_v20, 5 }
 0x5c4   : > { %v10546_v32 = vld [vmem:[#allocation4 + $0x40] sm:$0x7]  ;;  %v10550_v59 = vsel %vm16832_vm11, %v10517_v48, %v10549_v55  ;;  %v10648_v6 = vrot.slane %v10647_v28, 4  ;;  %v11133_v49 = vrot.slane %v11131_v52, 5  ;;  %v10667_v55 = vsel %vm13604_vm2, %v10662_v7, %v10666_v36 }
 0x5c5   : > { %v10547_v45 = vsel %vm16832_vm11, %v10515_v23, %v10546_v32  ;;  %v11335_v61 = vsel %vm11287_vm8, %v17062_v5, %v11327_v18  ;;  %10551 = vst [vmem:[#allocation4 + $0x48] sm:$0x7] %v10550_v59  ;;  %v11020_v5 = vpop.f32.mrf.mxu2  ;;  %v10718_v58 = vunpack.c.l.b16 %v10667_v55  ;;  %v11121_v18 = vrot.slane %v11120_v17, 4 }
 0x5c6   : > { %10548 = vst [vmem:[#allocation4 + $0x40] sm:$0x7] %v10547_v45  ;;  %v17096_v10 = vmul.f32 1.050701, %v11335_v61  ;;  %v11264_v41 = vpop.f32.mrf.mxu3  ;;  %v11036_v29 = vadd.f32 %v11020_v5, %v10895_v11  ;;  %v10653_v42 = vsel %vm13604_vm2, %v10648_v6, %v10652_v4  ;;  %v11134_v63 = vor.u32 %v11133_v49, %v11130_v22  ;;  %v581_v61 = vld [vmem:[#allocation4 + $0x4c] sm:$0x1] }
 0x5c7   : > { %v17101_v21 = vadd.f32 %v11264_v41, %v11035_v43  ;;  %v10717_v8 = vunpack.c.l.b16 %v10653_v42  ;;  %v11137_v23 = vshll.u32 %v11052_v1, 16  ;;  %v11126_v45 = vsel %vm13604_vm2, %v11121_v18, %v11125_v40 }
 0x5c8   : > { %v13416_v13 = vpop.eup %13415  ;;  %11352 = vst.msk [vmem:[%s17091_s10] sm:$0xff] %vm11351_vm3, %v17096_v10  ;;  %v11135_v62 = vrot.slane %v11134_v63, 4  ;;  %v578_v54 = vsel %vm15416_vm5, 0, %v577_v51  ;;  %v10669_v27 = vshrl.u32 %v10558_v3, 16  ;;  %v10672_v34 = vshll.u32 %v10558_v3, 16  ;;  %v17142_v3 = vld [vmem:[%s17207_s5 + $0x10] sm:$0xff] }
 0x5c9   : > { %v13030_v24 = vadd.f32 -1.0, %v13416_v13  ;;  %v11297_v33 = vmin.f32 %v17101_v21, 0.0  ;;  %v10723_v30 = vpack.c.b16 %v10718_v58, %v10717_v8  ;;  %v11139_v28 = vrot.slane %v11137_v23, 5  ;;  %579 = vst [vmem:[#allocation4 + $0x44] sm:$0x1] %v578_v54 }
 0x5ca   : > { %v11190_v35 = vunpack.c.l.b16 %v11126_v45  ;;  %v10671_v16 = vrot.slane %v10669_v27, 4  ;;  %v10674_v13 = vrot.slane %v10672_v34, 5  ;;  %v582_v0 = vsel %vm15416_vm5, 0, %v581_v61 }
 0x5cb   : > { %v11328_v57 = vmul.f32 1.6732632, %v13030_v24  ;;  %v11307_v39 = vmul.f32 1.442695, %v11297_v33  ;;  %10795 = vmatmul.bf16.gmra.mxu0 %v10723_v30  ;;  %v11140_v6 = vsel %vm13604_vm2, %v11135_v62, %v11139_v28  ;;  %583 = vst [vmem:[#allocation4 + $0x4c] sm:$0x1] %v582_v0 }
 0x5cc   : > { %v13264_v38 = vld [vmem:[#allocation4 + $0x44] sm:$0xf0]  ;;  %v11191_v7 = vunpack.c.l.b16 %v11140_v6  ;;  %v10675_v20 = vor.u32 %v10674_v13, %v10671_v16  ;;  %vm11289_vm13 = vcmp.gt.f32.partialorder %v17101_v21, 0.0 }
 0x5cd   : > { %v13244_v50 = vld [vmem:[#allocation4 + $0x3c] sm:$0xf0]  ;;  %v11336_v2 = vsel %vm11288_vm9, %v17069_v60, %v11328_v57  ;;  %13417 = vpow2.f32 %v11307_v39  ;;  %v10582_v60 = vld [vmem:[#allocation4 + $0x3c] sm:$0x1]  ;;  %v11055_v41 = vld [vmem:[#allocation4 + $0x48] sm:$0xf] }
 0x5ce   : > { %v12947_v9 = vld [vmem:[#allocation4 + $0x40] sm:$0xf]  ;;  %v17111_v15 = vmul.f32 1.050701, %v11336_v2  ;;  %v12884_v32 = vor.u32 %v13244_v50, %v12883_v26  ;;  %v11266_v59 = vpop.f32.mrf.mxu3  ;;  %v10678_v25 = vshll.u32 %v10582_v60, 16  ;;  %v11196_v4 = vpack.c.b16 %v11191_v7, %v11190_v35  ;;  %v17136_v50 = vld [vmem:[%s17207_s5 + $0x8] sm:$0xff] }
 0x5cf   : > { %v12948_v48 = vor.u32 %v13264_v38, %v12947_v9  ;;  %v10559_v53 = vld [vmem:[#allocation4 + $0x40] sm:$0xf]  ;;  %v17118_v12 = vadd.f32 %v11266_v59, %v11036_v29  ;;  %v11156_v29 = vshrl.u32 %v11055_v41, 16  ;;  %v10676_v36 = vrot.slane %v10675_v20, 4 }
 0x5d0   : > { %11353 = vst.msk [vmem:[%s17091_s10 + $0x8] sm:$0xff] %vm11351_vm3, %v17111_v15  ;;  %10901 = vmatmul.bf16.gmra.mxu1 %v12884_v32  ;;  %v10683_v19 = vshrl.u32 %v10559_v53, 16  ;;  %v10686_v11 = vshll.u32 %v10559_v53, 16  ;;  %v11053_v47 = vld [vmem:[#allocation4 + $0x40] sm:$0xf]  ;;  %v10680_v5 = vrot.slane %v10678_v25, 5  ;;  %11268 = vmatmul.bf16.gmra.mxu3 %v11196_v4  ;;  %v11365_v32 = vmul.f32 %v17136_v50, %v17111_v15 }
 0x5d1   : > { %11027 = vmatmul.bf16.gmra.mxu2 %v12948_v48  ;;  %v11298_v43 = vmin.f32 %v17118_v12, 0.0  ;;  %v11142_v22 = vshrl.u32 %v11053_v47, 16  ;;  %v11145_v57 = vshll.u32 %v11053_v47, 16  ;;  %v11159_v17 = vshll.u32 %v11055_v41, 16  ;;  %v10583_v40 = vld [vmem:[#allocation4 + $0x44] sm:$0x1] }
 0x5d2   : > { %v10685_v14 = vrot.slane %v10683_v19, 4  ;;  %v10688_v24 = vrot.slane %v10686_v11, 5  ;;  %v11054_v49 = vld [vmem:[#allocation4 + $0x44] sm:$0x1]  ;;  %v10692_v2 = vshll.u32 %v10583_v40, 16  ;;  %v11158_v38 = vrot.slane %v11156_v29, 4 }
 0x5d3   : > { %v13418_v31 = vpop.eup %13417  ;;  %v11309_v56 = vmul.f32 1.442695, %v11298_v43  ;;  %v11144_v42 = vrot.slane %v11142_v22, 4  ;;  %v11147_v37 = vrot.slane %v11145_v57, 5  ;;  %v17131_v26 = vld [vmem:[%s17207_s5] sm:$0xff]  ;;  %v11151_v39 = vshll.u32 %v11054_v49, 16 }
 0x5d4   : > { %v13031_v46 = vadd.f32 -1.0, %v13418_v31  ;;  %v10689_v52 = vor.u32 %v10688_v24, %v10685_v14  ;;  %v10681_v58 = vsel %vm13604_vm2, %v10676_v36, %v10680_v5  ;;  %v10694_v1 = vrot.slane %v10692_v2, 5  ;;  %v11056_v48 = vld [vmem:[#allocation4 + $0x4c] sm:$0x1]  ;;  %v17165_v43 = vld [vmem:[%s17207_s5 + $0x18] sm:$0xff] }
 0x5d5   : > { %13419 = vpow2.f32 %v11309_v56  ;;  %v11148_v8 = vor.u32 %v11147_v37, %v11144_v42  ;;  %v11153_v18 = vrot.slane %v11151_v39, 5  ;;  %v11161_v63 = vrot.slane %v11159_v17, 5 }
 0x5d6   : > { %v11329_v33 = vmul.f32 1.6732632, %v13031_v46  ;;  %v10690_v51 = vrot.slane %v10689_v52, 4  ;;  %v11165_v62 = vshll.u32 %v11056_v48, 16  ;;  %v10719_v28 = vunpack.c.l.b16 %v10681_v58 }
 0x5d7   : > { %v11149_v53 = vrot.slane %v11148_v8, 4  ;;  %v11162_v45 = vor.u32 %v11161_v63, %v11158_v38  ;;  %vm11290_vm5 = vcmp.gt.f32.partialorder %v17118_v12, 0.0  ;;  %v11373_v19 = vsel %vm11351_vm3, %v11365_v32, 0.0 }
 0x5d8   : > { %v11337_v9 = vsel %vm11289_vm13, %v17101_v21, %v11329_v33  ;;  %v11364_v21 = vmul.f32 %v17131_v26, %v17096_v10  ;;  %v10695_v30 = vsel %vm13604_vm2, %v10690_v51, %v10694_v1  ;;  %v11167_v27 = vrot.slane %v11165_v62, 5 }
 0x5d9   : > { %v11345_v55 = vmul.f32 1.050701, %v11337_v9  ;;  %v10720_v54 = vunpack.c.l.b16 %v10695_v30  ;;  %v11154_v10 = vsel %vm13604_vm2, %v11149_v53, %v11153_v18  ;;  %v11163_v15 = vrot.slane %v11162_v45, 4 }
 0x5da   : > { %v11192_v25 = vunpack.c.l.b16 %v11154_v10  ;;  %v11372_v7 = vsel %vm11351_vm3, %v11364_v21, 0.0 }
 0x5db   : > { %v13420_v23 = vpop.eup %13419  ;;  %11354 = vst.msk [vmem:[%s17091_s10 + $0x10] sm:$0xff] %vm11351_vm3, %v11345_v55  ;;  %v11366_v59 = vmul.f32 %v17142_v3, %v11345_v55  ;;  %v10724_v34 = vpack.c.b16 %v10720_v54, %v10719_v28  ;;  %v11168_v35 = vsel %vm13604_vm2, %v11163_v15, %v11167_v27  ;;  %v11374_v13 = vadd.f32 %v11373_v19, %v11372_v7 }
 0x5dc   : > { %v13032_v60 = vadd.f32 -1.0, %v13420_v23  ;;  %v11193_v47 = vunpack.c.l.b16 %v11168_v35 }
 0x5dd   : > { %10800 = vmatmul.bf16.gmra.mxu0 %v10724_v34  ;;  %v11375_v16 = vsel %vm11351_vm3, %v11366_v59, 0.0 }
 0x5de   : > { %v11330_v61 = vmul.f32 1.6732632, %v13032_v60  ;;  %v11197_v5 = vpack.c.b16 %v11193_v47, %v11192_v25  ;;  %v11376_v44 = vadd.f32 %v11375_v16, %v11374_v13 }
 0x5e0   : > { %v11338_v6 = vsel %vm11290_vm5, %v17118_v12, %v11330_v61  ;;  %11273 = vmatmul.bf16.gmra.mxu3 %v11197_v5 }
 0x5e1   : > { %v11346_v11 = vmul.f32 1.050701, %v11338_v6 }
 0x5e3   : > { %11355 = vst.msk [vmem:[%s17091_s10 + $0x18] sm:$0xff] %vm11351_vm3, %v11346_v11  ;;  %v11367_v12 = vmul.f32 %v17165_v43, %v11346_v11 }
 0x5e5   : > { %v11377_v41 = vsel %vm11351_vm3, %v11367_v12, 0.0 }
 0x5e6   : > { %v11378_v31 = vadd.f32 %v11377_v41, %v11376_v44 }
 0x5e8   : > { %11379 = vadd.xlane.f32.xlu2 %v11378_v31 }
 0x63c   : > { %v10897_v56 = vpop.f32.mrf.mxu1 }
 0x643   : > { %v11023_v24 = vpop.f32.mrf.mxu2 }
 0x644   : > { %v10899_v4 = vpop.f32.mrf.mxu1 }
 0x648   : > { %v10796_v14 = vpop.f32.mrf.mxu0 }
 0x649   : > { %v10898_v0 = vadd.f32 %v10897_v56, %v10796_v14 }
 0x64b   : > { %v11037_v20 = vadd.f32 %v11023_v24, %v10898_v0  ;;  %v11025_v57 = vpop.f32.mrf.mxu2 }
 0x64d   : > { %v10902_v9 = vpop.f32.mrf.mxu1 }
 0x650   : > { %v10798_v46 = vpop.f32.mrf.mxu0 }
 0x651   : > { %v10900_v36 = vadd.f32 %v10899_v4, %v10798_v46 }
 0x653   : > { %v11269_v22 = vpop.f32.mrf.mxu3  ;;  %v11038_v37 = vadd.f32 %v11025_v57, %v10900_v36 }
 0x654   : > { %v11283_v52 = vadd.f32 %v11269_v22, %v11037_v20  ;;  %v11028_v38 = vpop.f32.mrf.mxu2 }
 0x655   : > { %v10904_v62 = vpop.f32.mrf.mxu1 }
 0x656   : > { %v11299_v33 = vmin.f32 %v11283_v52, 0.0  ;;  %vm11291_vm2 = vcmp.gt.f32.partialorder %v11283_v52, 0.0 }
 0x658   : > { %v11311_v17 = vmul.f32 1.442695, %v11299_v33 }
 0x65a   : > { %v10801_v49 = vpop.f32.mrf.mxu0  ;;  %13421 = vpow2.f32 %v11311_v17 }
 0x65b   : > { %v11380_v29 = vpop.xlane.xlu2 %11379  ;;  %v11271_v51 = vpop.f32.mrf.mxu3  ;;  %v10903_v8 = vadd.f32 %v10902_v9, %v10801_v49 }
 0x65c   : > { %v11381_v42 = vrot.slane %v11380_v29, 4  ;;  %v11284_v2 = vadd.f32 %v11271_v51, %v11038_v37  ;;  %v11030_v27 = vpop.f32.mrf.mxu2 }
 0x65d   : > { %v11039_v23 = vadd.f32 %v11028_v38, %v10903_v8 }
 0x65e   : > { %v11382_v40 = vadd.f32 %v11381_v42, %v11380_v29  ;;  %v11300_v55 = vmin.f32 %v11284_v2, 0.0  ;;  %vm11292_vm1 = vcmp.gt.f32.partialorder %v11284_v2, 0.0 }
 0x660   : > { %v11383_v39 = vrot.slane %v11382_v40, 2  ;;  %v13422_v58 = vpop.eup %13421  ;;  %v11313_v1 = vmul.f32 1.442695, %v11300_v55 }
 0x661   : > { %v13033_v63 = vadd.f32 -1.0, %v13422_v58 }
 0x662   : > { %v11384_v18 = vadd.f32 %v11383_v39, %v11382_v40  ;;  %13423 = vpow2.f32 %v11313_v1  ;;  %v10803_v53 = vpop.f32.mrf.mxu0 }
 0x663   : > { %v11331_v32 = vmul.f32 1.6732632, %v13033_v63  ;;  %v11274_v48 = vpop.f32.mrf.mxu3  ;;  %v10905_v54 = vadd.f32 %v10904_v62, %v10803_v53 }
 0x664   : > { %v11385_v21 = vrot.slane %v11384_v18, 1  ;;  %v11285_v60 = vadd.f32 %v11274_v48, %v11039_v23 }
 0x665   : > { %v11339_v45 = vsel %vm11291_vm2, %v11283_v52, %v11331_v32  ;;  %v11040_v34 = vadd.f32 %v11030_v27, %v10905_v54 }
 0x666   : > { %v11386_v30 = vadd.f32 %v11385_v21, %v11384_v18  ;;  %v11347_v59 = vmul.f32 1.050701, %v11339_v45  ;;  %v11301_v28 = vmin.f32 %v11285_v60, 0.0  ;;  %vm11293_vm11 = vcmp.gt.f32.partialorder %v11285_v60, 0.0 }
 0x668   : > { %13282 = vpush %v11386_v30  ;;  %v13424_v10 = vpop.eup %13423  ;;  %v11315_v61 = vmul.f32 1.442695, %v11301_v28  ;;  %v11368_v14 = vmul.f32 %v17131_v26, %v11347_v59 }
 0x669   : > { %11356 = vst.msk [vmem:[%s17091_s10 + $0x20] sm:$0xff] %vm11351_vm3, %v11347_v59  ;;  %v13034_v15 = vadd.f32 -1.0, %v13424_v10 }
 0x66a   : > { %13425 = vpow2.f32 %v11315_v61  ;;  %v11390_v22 = vsel %vm11351_vm3, %v11368_v14, 0.0 }
 0x66b   : > { %v11332_v25 = vmul.f32 1.6732632, %v13034_v15  ;;  %v11276_v19 = vpop.f32.mrf.mxu3 }
 0x66c   : > { %v11286_v6 = vadd.f32 %v11276_v19, %v11040_v34 }
 0x66d   : > { %v11340_v35 = vsel %vm11292_vm1, %v11284_v2, %v11332_v25 }
 0x66e   : > { %v11348_v11 = vmul.f32 1.050701, %v11340_v35  ;;  %v11302_v47 = vmin.f32 %v11286_v6, 0.0  ;;  %vm11294_vm12 = vcmp.gt.f32.partialorder %v11286_v6, 0.0 }
 0x670   : > { %v13426_v7 = vpop.eup %13425  ;;  %11357 = vst.msk [vmem:[%s17091_s10 + $0x28] sm:$0xff] %vm11351_vm3, %v11348_v11  ;;  %v11317_v16 = vmul.f32 1.442695, %v11302_v47  ;;  %v11369_v31 = vmul.f32 %v17136_v50, %v11348_v11 }
 0x671   : > { %v13035_v13 = vadd.f32 -1.0, %v13426_v7 }
 0x672   : > { %13427 = vpow2.f32 %v11317_v16  ;;  %v11391_v46 = vsel %vm11351_vm3, %v11369_v31, 0.0 }
 0x673   : > { %v11333_v5 = vmul.f32 1.6732632, %v13035_v13  ;;  %v11392_v57 = vadd.f32 %v11391_v46, %v11390_v22 }
 0x675   : > { %v11341_v12 = vsel %vm11293_vm11, %v11285_v60, %v11333_v5 }
 0x676   : > { %v11349_v44 = vmul.f32 1.050701, %v11341_v12 }
 0x678   : > { %v13428_v41 = vpop.eup %13427  ;;  %11358 = vst.msk [vmem:[%s17091_s10 + $0x30] sm:$0xff] %vm11351_vm3, %v11349_v44  ;;  %v11370_v24 = vmul.f32 %v17142_v3, %v11349_v44 }
 0x679   : > { %v13036_v56 = vadd.f32 -1.0, %v13428_v41 }
 0x67a   : > { %v11393_v52 = vsel %vm11351_vm3, %v11370_v24, 0.0 }
 0x67b   : > { %v11334_v0 = vmul.f32 1.6732632, %v13036_v56  ;;  %v11394_v29 = vadd.f32 %v11393_v52, %v11392_v57 }
 0x67d   : > { %v11342_v4 = vsel %vm11294_vm12, %v11286_v6, %v11334_v0 }
 0x67e   : > { %v11350_v20 = vmul.f32 1.050701, %v11342_v4 }
 0x680   : > { %11359 = vst.msk [vmem:[%s17091_s10 + $0x38] sm:$0xff] %vm11351_vm3, %v11350_v20  ;;  %v11371_v50 = vmul.f32 %v17165_v43, %v11350_v20 }
 0x682   : > { %v11395_v26 = vsel %vm11351_vm3, %v11371_v50, 0.0 }
 0x683   : > { %v11396_v33 = vadd.f32 %v11395_v26, %v11394_v29 }
 0x685   : > { %11397 = vadd.xlane.f32.xlu0 %v11396_v33 }
 0x699   : > { %s13283_s23 = spop %13282 }
 0x69a   : > { %v11388_v3 = vstv %s13283_s23 }
 0x69b   : > { %11389 = vst [vmem:[%s316_s22] sm:$0x1] %v11388_v3 }
 0x6f8   : > { %v11398_v36 = vpop.xlane.xlu0 %11397 }
 0x6f9   : > { %v11399_v42 = vrot.slane %v11398_v36, 4 }
 0x6fb   : > { %v11400_v17 = vadd.f32 %v11399_v42, %v11398_v36 }
 0x6fd   : > { %v11401_v40 = vrot.slane %v11400_v17, 2 }
 0x6ff   : > { %v11402_v49 = vadd.f32 %v11401_v40, %v11400_v17 }
 0x701   : > { %v11403_v37 = vrot.slane %v11402_v49, 1 }
 0x703   : > { %v11404_v9 = vadd.f32 %v11403_v37, %v11402_v49 }
 0x705   : > { %13284 = vpush %v11404_v9 }
 0x736   : > { %s13285_s24 = spop %13284 }
 0x737   : > { %v11406_v43 = vstv %s13285_s24 }
 0x738   : > { %13037 = vst [vmem:[%s316_s22 + $0x1] sm:$0x1] %v11406_v43 }
 0x739 PF: > { %s18_s26 = sadd.s32 1, %s13451_s26   ;;  %s17226_s24 = smov %s13447_s25 }
 0x73a   : > { %p15_p5 = scmp.ge.s32.totalorder %s18_s26, 4   ;;  %s17227_s25 = smov %s17229_s27 }
 0x73c   :  { %17 = sbr.rel (!%p15_p5) target bundleno = 2 (0x2), region = 107 }

</bundles_post_ra>
